<compile_context>
chip_gen: v6e
topology: v6e:2x2x1
jax: 0.10.0
libtpu: 0.0.40
codegen_flags: <defaults>
</compile_context>

<pallas_src>
import jax
import jax.numpy as jnp
from jax.experimental import pallas as pl
from jax.experimental.pallas import tpu as pltpu


def make_cc_kernel(BB, C, H, W, C8P, recurrence):
    """Fused criss-cross kernel for a block of BB images.

    Refs:
      x_ref    : (BB, C, H*W)   NCHW input block (lane-dense, 256 lanes)
      wq_ref   : (C, C8P)       padded q projection (x @ wq form)
      wk_ref   : (C, C8P)       padded k projection
      wv_ref   : (C, C)         v projection
      bq_ref   : (1, C8P)       padded q bias
      bk_ref   : (1, C8P)       padded k bias
      bv_ref   : (1, C)         v bias
      mask_ref : (2, HW, HW)    additive masks; [0]=height pass, [1]=width pass
      gamma_ref: (1, 1) in SMEM
      o_ref    : (BB, C, H*W)   NCHW output block
    """
    HW = H * W

    def kernel(x_ref, wq_ref, wk_ref, wv_ref, bq_ref, bk_ref, bv_ref,
               mask_ref, gamma_ref, o_ref):
        gamma = gamma_ref[0, 0]
        wq = wq_ref[...]
        wk = wk_ref[...]
        wv = wv_ref[...]
        bq = bq_ref[...]
        bk = bk_ref[...]
        bv = bv_ref[...]
        # Hoisted static masks (built host side, loaded once per grid step).
        mask_h = mask_ref[0]
        mask_w = mask_ref[1]

        for b in range(BB):                        # static unroll over images
            x_cm = x_ref[b].astype(jnp.float32)    # (C, HW) channel-major
            xf = x_cm.T                            # (HW, C) pixel-major; once per image

            for r in range(recurrence):            # static unroll (recurrence == 2)
                mask = mask_h if (r % 2 == 0) else mask_w

                # 1x1-conv projections as aligned MXU matmuls (q/k zero-padded to 8).
                q = jnp.dot(xf, wq, preferred_element_type=jnp.float32) + bq   # (HW, 8)
                k = jnp.dot(xf, wk, preferred_element_type=jnp.float32) + bk   # (HW, 8)
                v = jnp.dot(xf, wv, preferred_element_type=jnp.float32) + bv   # (HW, C)

                # Full-pixel energy on the MXU; criss-cross orientation via mask.
                energy = jax.lax.dot_general(
                    q, k, (((1,), (1,)), ((), ())),
                    preferred_element_type=jnp.float32)                        # (HW, HW)
                energy = energy + mask

                # Softmax over the lane-dense key axis; masked entries exp to 0.
                m = jnp.max(energy, axis=-1, keepdims=True)
                p = jnp.exp(energy - m)
                denom = jnp.sum(p, axis=-1, keepdims=True)
                inv = pl.reciprocal(denom, approx=True)     # EUP slot
                inv = inv * (2.0 - denom * inv)             # one Newton step: near-exact
                att = p * inv

                out = jnp.dot(att, v, preferred_element_type=jnp.float32)      # (HW, C)
                xf = gamma * out + xf

            # Back to (C, HW) once, for a lane-dense NCHW store.
            o_ref[b] = xf.T.astype(o_ref.dtype)

    return kernel


def _multi_tensorcore_chip():
    """Best-effort detection of chips with >1 TensorCore per chip (v7x-class)."""
    try:
        kind = jax.devices()[0].device_kind.lower()
    except Exception:
        return False
    return "v7" in kind


def efficient_cc_wrapper(x_nchw, params, recurrence=2, batch_block=None):
    """Pallas implementation of EfficientCC_Wrapper.forward (NCHW in / NCHW out)."""
    assert recurrence % 2 == 0
    wq, bq, wk, bk, wv, bv, gamma = params        # torch conv layout: (Cout, Cin), (Cout,)
    B, C, H, W = x_nchw.shape
    HW = H * W
    C8 = wq.shape[0]
    C8P = ((C8 + 7) // 8) * 8                     # pad q/k channels to a sublane tile

    f32 = jnp.float32
    wq_p = jnp.pad(wq.T.astype(f32), ((0, 0), (0, C8P - C8)))   # (C, C8P)
    wk_p = jnp.pad(wk.T.astype(f32), ((0, 0), (0, C8P - C8)))   # (C, C8P)
    wv_t = wv.T.astype(f32)                                     # (C, C)
    bq_p = jnp.pad(bq.astype(f32), (0, C8P - C8))[None, :]      # (1, C8P)
    bk_p = jnp.pad(bk.astype(f32), (0, C8P - C8))[None, :]      # (1, C8P)
    bv_r = bv.astype(f32)[None, :]                              # (1, C)
    g2 = gamma.reshape(1, 1).astype(f32)

    # Static criss-cross masks over the row-major H*W flattening.
    pix = jnp.arange(HW)
    row = pix // W
    col = pix % W
    neg = jnp.float32(-1e30)
    same_col_offdiag = (col[:, None] == col[None, :]) & (pix[:, None] != pix[None, :])
    same_row = row[:, None] == row[None, :]
    mask_h = jnp.where(same_col_offdiag, 0.0, neg).astype(f32)  # even pass: height attn
    mask_w = jnp.where(same_row, 0.0, neg).astype(f32)          # odd pass: width attn
    masks = jnp.stack([mask_h, mask_w])                          # (2, HW, HW)

    # One image per grid step (parallel) on multi-TC chips; fold the batch into
    # a single step on single-TC chips to remove per-step pipeline overhead.
    if batch_block is None:
        batch_block = 1 if (_multi_tensorcore_chip() and B > 1) else B
    assert B % batch_block == 0
    grid = (B // batch_block,)

    # NCHW block is already (C, H*W)-major: only free contiguous reshapes here.
    x3 = x_nchw.reshape(B, C, HW)

    kernel = make_cc_kernel(batch_block, C, H, W, C8P, recurrence)
    y3 = pl.pallas_call(
        kernel,
        out_shape=jax.ShapeDtypeStruct((B, C, HW), x_nchw.dtype),
        grid=grid,
        in_specs=[
            pl.BlockSpec((batch_block, C, HW), lambda b: (b, 0, 0)),
            pl.BlockSpec((C, C8P), lambda b: (0, 0)),
            pl.BlockSpec((C, C8P), lambda b: (0, 0)),
            pl.BlockSpec((C, C), lambda b: (0, 0)),
            pl.BlockSpec((1, C8P), lambda b: (0, 0)),
            pl.BlockSpec((1, C8P), lambda b: (0, 0)),
            pl.BlockSpec((1, C), lambda b: (0, 0)),
            pl.BlockSpec((2, HW, HW), lambda b: (0, 0, 0)),
            pl.BlockSpec(memory_space=pltpu.MemorySpace.SMEM),
        ],
        out_specs=pl.BlockSpec((batch_block, C, HW), lambda b: (b, 0, 0)),
        compiler_params=pltpu.CompilerParams(
            dimension_semantics=("parallel",)),
    )(x3, wq_p, wk_p, wv_t, bq_p, bk_p, bv_r, masks, g2)

    return y3.reshape(B, C, H, W)


def reference(x, params, recurrence=2):
    """Pure-JAX replica of the PyTorch forward (NCHW), for correctness checking."""
    wq, bq, wk, bk, wv, bv, gamma = params
    g = gamma[0]

    def conv1x1(t, w, b):
        return jnp.einsum('oc,bchw->bohw', w, t) + b[None, :, None, None]

    for i in range(recurrence):
        q = conv1x1(x, wq, bq)
        k = conv1x1(x, wk, bk)
        v = conv1x1(x, wv, bv)
        if i % 2 == 1:
            energy = jnp.einsum('bchi,bchj->bhij', q, k)
            att = jax.nn.softmax(energy, axis=-1)
            out = jnp.einsum('bchj,bhij->bchi', v, att)
        else:
            energy = jnp.einsum('bciw,bcjw->bwij', q, k)
            H = x.shape[2]
            eye = jnp.eye(H, dtype=bool)[None, None]
            energy = jnp.where(eye, -jnp.inf, energy)
            att = jax.nn.softmax(energy, axis=-1)
            out = jnp.einsum('bcjw,bwij->bciw', v, att)
        x = g * out + x
    return x


if __name__ == "__main__":
    B, C, H, W = 2, 16, 16, 16          # channels must be divisible by 8 (C // 8 heads dim)
    C8 = C // 8

    key = jax.random.PRNGKey(0)
    kx, kp = jax.random.split(key)
    x = jax.random.normal(kx, (B, C, H, W), jnp.float32)

    keys = jax.random.split(kp, 6)
    wq = 0.2 * jax.random.normal(keys[0], (C8, C), jnp.float32)
    bq = 0.1 * jax.random.normal(keys[1], (C8,), jnp.float32)
    wk = 0.2 * jax.random.normal(keys[2], (C8, C), jnp.float32)
    bk = 0.1 * jax.random.normal(keys[3], (C8,), jnp.float32)
    wv = 0.2 * jax.random.normal(keys[4], (C, C), jnp.float32)
    bv = 0.1 * jax.random.normal(keys[5], (C,), jnp.float32)
    gamma = jnp.array([0.5], jnp.float32)   # deterministic nonzero (torch inits 0)

    params = (wq, bq, wk, bk, wv, bv, gamma)

    out = efficient_cc_wrapper(x, params, recurrence=2)
    out = jax.block_until_ready(out)

    ref = reference(x, params, recurrence=2)
    err = float(jnp.max(jnp.abs(out - ref)))
    assert jnp.allclose(out, ref, atol=1e-3, rtol=1e-3), f"max abs err = {err}"

    print("KERNEL_OK")
</pallas_src>

<mosaic_0001>
module attributes {stable_mosaic.version = 11 : i64} {
  func.func @kernel(%arg0: i32, %arg1: memref<2x16x256xf32, #tpu.memory_space<vmem>>, %arg2: memref<16x8xf32, #tpu.memory_space<vmem>>, %arg3: memref<16x8xf32, #tpu.memory_space<vmem>>, %arg4: memref<16x16xf32, #tpu.memory_space<vmem>>, %arg5: memref<1x8xf32, #tpu.memory_space<vmem>>, %arg6: memref<1x8xf32, #tpu.memory_space<vmem>>, %arg7: memref<1x16xf32, #tpu.memory_space<vmem>>, %arg8: memref<2x256x256xf32, #tpu.memory_space<vmem>>, %arg9: memref<1x1xf32, #tpu.memory_space<smem>>, %arg10: memref<2x16x256xf32, #tpu.memory_space<vmem>>) attributes {dimension_semantics = [#tpu.dimension_semantics<parallel>], iteration_bounds = array<i64: 1>, scalar_prefetch = 0 : i64, scratch_operands = 0 : i64, tpu.core_type = #tpu.core_type<tc>, window_params = [{transform_indices = @transform_0, window_bounds = array<i64: 2, 16, 256>}, {pipeline_mode = #tpu.pipeline_mode<synchronous>, transform_indices = @transform_1, window_bounds = array<i64: 16, 8>}, {pipeline_mode = #tpu.pipeline_mode<synchronous>, transform_indices = @transform_2, window_bounds = array<i64: 16, 8>}, {pipeline_mode = #tpu.pipeline_mode<synchronous>, transform_indices = @transform_3, window_bounds = array<i64: 16, 16>}, {pipeline_mode = #tpu.pipeline_mode<synchronous>, transform_indices = @transform_4, window_bounds = array<i64: 1, 8>}, {pipeline_mode = #tpu.pipeline_mode<synchronous>, transform_indices = @transform_5, window_bounds = array<i64: 1, 8>}, {pipeline_mode = #tpu.pipeline_mode<synchronous>, transform_indices = @transform_6, window_bounds = array<i64: 1, 16>}, {pipeline_mode = #tpu.pipeline_mode<synchronous>, transform_indices = @transform_7, window_bounds = array<i64: 2, 256, 256>}, {transform_indices = @transform_8, window_bounds = array<i64: 1, 1>}, {transform_indices = @transform_9, window_bounds = array<i64: 2, 16, 256>}]} {
    %c0 = arith.constant 0 : index
    %c0_0 = arith.constant 0 : index
    %0 = memref.load %arg9[%c0, %c0_0] : memref<1x1xf32, #tpu.memory_space<smem>>
    %c0_1 = arith.constant 0 : index
    %c0_2 = arith.constant 0 : index
    %1 = vector.load %arg2[%c0_1, %c0_2] : memref<16x8xf32, #tpu.memory_space<vmem>>, vector<16x8xf32>
    %c0_3 = arith.constant 0 : index
    %c0_4 = arith.constant 0 : index
    %2 = vector.load %arg3[%c0_3, %c0_4] : memref<16x8xf32, #tpu.memory_space<vmem>>, vector<16x8xf32>
    %c0_5 = arith.constant 0 : index
    %c0_6 = arith.constant 0 : index
    %3 = vector.load %arg4[%c0_5, %c0_6] : memref<16x16xf32, #tpu.memory_space<vmem>>, vector<16x16xf32>
    %c0_7 = arith.constant 0 : index
    %c0_8 = arith.constant 0 : index
    %4 = vector.load %arg5[%c0_7, %c0_8] : memref<1x8xf32, #tpu.memory_space<vmem>>, vector<1x8xf32>
    %c0_9 = arith.constant 0 : index
    %c0_10 = arith.constant 0 : index
    %5 = vector.load %arg6[%c0_9, %c0_10] : memref<1x8xf32, #tpu.memory_space<vmem>>, vector<1x8xf32>
    %c0_11 = arith.constant 0 : index
    %c0_12 = arith.constant 0 : index
    %6 = vector.load %arg7[%c0_11, %c0_12] : memref<1x16xf32, #tpu.memory_space<vmem>>, vector<1x16xf32>
    %c0_13 = arith.constant 0 : index
    %c0_14 = arith.constant 0 : index
    %c0_15 = arith.constant 0 : index
    %7 = vector.load %arg8[%c0_13, %c0_14, %c0_15] : memref<2x256x256xf32, #tpu.memory_space<vmem>>, vector<1x256x256xf32>
    %8 = vector.shape_cast %7 : vector<1x256x256xf32> to vector<256x256xf32>
    %c1 = arith.constant 1 : index
    %c0_16 = arith.constant 0 : index
    %c0_17 = arith.constant 0 : index
    %9 = vector.load %arg8[%c1, %c0_16, %c0_17] : memref<2x256x256xf32, #tpu.memory_space<vmem>>, vector<1x256x256xf32>
    %10 = vector.shape_cast %9 : vector<1x256x256xf32> to vector<256x256xf32>
    %c0_18 = arith.constant 0 : index
    %c0_19 = arith.constant 0 : index
    %c0_20 = arith.constant 0 : index
    %11 = vector.load %arg1[%c0_18, %c0_19, %c0_20] : memref<2x16x256xf32, #tpu.memory_space<vmem>>, vector<1x16x256xf32>
    %12 = vector.shape_cast %11 : vector<1x16x256xf32> to vector<16x256xf32>
    %13 = tpu.transpose %12, [1, 0] : vector<16x256xf32> -> vector<256x16xf32>
    %cst = arith.constant dense<0.000000e+00> : vector<256x8xf32>
    %14 = tpu.matmul %13, %1, %cst {dimension_numbers = #tpu.dot_dimension_numbers<[1], [0], [0], [1], [0, 0, 1, 1], [], []>} : vector<256x16xf32>, vector<16x8xf32>, vector<256x8xf32> -> vector<256x8xf32>
    %15 = vector.broadcast %4 : vector<1x8xf32> to vector<256x8xf32>
    %16 = arith.addf %14, %15 : vector<256x8xf32>
    %cst_21 = arith.constant dense<0.000000e+00> : vector<256x8xf32>
    %17 = tpu.matmul %13, %2, %cst_21 {dimension_numbers = #tpu.dot_dimension_numbers<[1], [0], [0], [1], [0, 0, 1, 1], [], []>} : vector<256x16xf32>, vector<16x8xf32>, vector<256x8xf32> -> vector<256x8xf32>
    %18 = vector.broadcast %5 : vector<1x8xf32> to vector<256x8xf32>
    %19 = arith.addf %17, %18 : vector<256x8xf32>
    %cst_22 = arith.constant dense<0.000000e+00> : vector<256x16xf32>
    %20 = tpu.matmul %13, %3, %cst_22 {dimension_numbers = #tpu.dot_dimension_numbers<[1], [0], [0], [1], [0, 0, 1, 1], [], []>} : vector<256x16xf32>, vector<16x16xf32>, vector<256x16xf32> -> vector<256x16xf32>
    %21 = vector.broadcast %6 : vector<1x16xf32> to vector<256x16xf32>
    %22 = arith.addf %20, %21 : vector<256x16xf32>
    %cst_23 = arith.constant dense<0.000000e+00> : vector<256x256xf32>
    %23 = tpu.matmul %16, %19, %cst_23 {dimension_numbers = #tpu.dot_dimension_numbers<[1], [1], [0], [0], [0, 0, 1, 0], [], []>} : vector<256x8xf32>, vector<256x8xf32>, vector<256x256xf32> -> vector<256x256xf32>
    %24 = arith.addf %23, %8 : vector<256x256xf32>
    %cst_24 = arith.constant dense<0xFF800000> : vector<256xf32>
    %25 = vector.multi_reduction <maximumf>, %24, %cst_24 [1] : vector<256x256xf32> to vector<256xf32>
    %26 = vector.shape_cast %25 : vector<256xf32> to vector<256x1xf32>
    %27 = vector.broadcast %26 : vector<256x1xf32> to vector<256x256xf32>
    %28 = arith.subf %24, %27 : vector<256x256xf32>
    %29 = math.exp %28 : vector<256x256xf32>
    %cst_25 = arith.constant dense<0.000000e+00> : vector<256xf32>
    %30 = vector.multi_reduction <add>, %29, %cst_25 [1] : vector<256x256xf32> to vector<256xf32>
    %31 = vector.shape_cast %30 : vector<256xf32> to vector<256x1xf32>
    %32 = tpu.reciprocal %31 {approx = true} : vector<256x1xf32> -> vector<256x1xf32>
    %33 = arith.mulf %31, %32 : vector<256x1xf32>
    %cst_26 = arith.constant 2.000000e+00 : f32
    %34 = vector.broadcast %cst_26 : f32 to vector<256x1xf32>
    %35 = arith.subf %34, %33 : vector<256x1xf32>
    %36 = arith.mulf %32, %35 : vector<256x1xf32>
    %37 = vector.broadcast %36 : vector<256x1xf32> to vector<256x256xf32>
    %38 = arith.mulf %29, %37 : vector<256x256xf32>
    %cst_27 = arith.constant dense<0.000000e+00> : vector<256x16xf32>
    %39 = tpu.matmul %38, %22, %cst_27 {dimension_numbers = #tpu.dot_dimension_numbers<[1], [0], [0], [1], [0, 0, 1, 1], [], []>} : vector<256x256xf32>, vector<256x16xf32>, vector<256x16xf32> -> vector<256x16xf32>
    %40 = vector.broadcast %0 : f32 to vector<256x16xf32>
    %41 = arith.mulf %40, %39 : vector<256x16xf32>
    %42 = arith.addf %41, %13 : vector<256x16xf32>
    %cst_28 = arith.constant dense<0.000000e+00> : vector<256x8xf32>
    %43 = tpu.matmul %42, %1, %cst_28 {dimension_numbers = #tpu.dot_dimension_numbers<[1], [0], [0], [1], [0, 0, 1, 1], [], []>} : vector<256x16xf32>, vector<16x8xf32>, vector<256x8xf32> -> vector<256x8xf32>
    %44 = vector.broadcast %4 : vector<1x8xf32> to vector<256x8xf32>
    %45 = arith.addf %43, %44 : vector<256x8xf32>
    %cst_29 = arith.constant dense<0.000000e+00> : vector<256x8xf32>
    %46 = tpu.matmul %42, %2, %cst_29 {dimension_numbers = #tpu.dot_dimension_numbers<[1], [0], [0], [1], [0, 0, 1, 1], [], []>} : vector<256x16xf32>, vector<16x8xf32>, vector<256x8xf32> -> vector<256x8xf32>
    %47 = vector.broadcast %5 : vector<1x8xf32> to vector<256x8xf32>
    %48 = arith.addf %46, %47 : vector<256x8xf32>
    %cst_30 = arith.constant dense<0.000000e+00> : vector<256x16xf32>
    %49 = tpu.matmul %42, %3, %cst_30 {dimension_numbers = #tpu.dot_dimension_numbers<[1], [0], [0], [1], [0, 0, 1, 1], [], []>} : vector<256x16xf32>, vector<16x16xf32>, vector<256x16xf32> -> vector<256x16xf32>
    %50 = vector.broadcast %6 : vector<1x16xf32> to vector<256x16xf32>
    %51 = arith.addf %49, %50 : vector<256x16xf32>
    %cst_31 = arith.constant dense<0.000000e+00> : vector<256x256xf32>
    %52 = tpu.matmul %45, %48, %cst_31 {dimension_numbers = #tpu.dot_dimension_numbers<[1], [1], [0], [0], [0, 0, 1, 0], [], []>} : vector<256x8xf32>, vector<256x8xf32>, vector<256x256xf32> -> vector<256x256xf32>
    %53 = arith.addf %52, %10 : vector<256x256xf32>
    %cst_32 = arith.constant dense<0xFF800000> : vector<256xf32>
    %54 = vector.multi_reduction <maximumf>, %53, %cst_32 [1] : vector<256x256xf32> to vector<256xf32>
    %55 = vector.shape_cast %54 : vector<256xf32> to vector<256x1xf32>
    %56 = vector.broadcast %55 : vector<256x1xf32> to vector<256x256xf32>
    %57 = arith.subf %53, %56 : vector<256x256xf32>
    %58 = math.exp %57 : vector<256x256xf32>
    %cst_33 = arith.constant dense<0.000000e+00> : vector<256xf32>
    %59 = vector.multi_reduction <add>, %58, %cst_33 [1] : vector<256x256xf32> to vector<256xf32>
    %60 = vector.shape_cast %59 : vector<256xf32> to vector<256x1xf32>
    %61 = tpu.reciprocal %60 {approx = true} : vector<256x1xf32> -> vector<256x1xf32>
    %62 = arith.mulf %60, %61 : vector<256x1xf32>
    %cst_34 = arith.constant 2.000000e+00 : f32
    %63 = vector.broadcast %cst_34 : f32 to vector<256x1xf32>
    %64 = arith.subf %63, %62 : vector<256x1xf32>
    %65 = arith.mulf %61, %64 : vector<256x1xf32>
    %66 = vector.broadcast %65 : vector<256x1xf32> to vector<256x256xf32>
    %67 = arith.mulf %58, %66 : vector<256x256xf32>
    %cst_35 = arith.constant dense<0.000000e+00> : vector<256x16xf32>
    %68 = tpu.matmul %67, %51, %cst_35 {dimension_numbers = #tpu.dot_dimension_numbers<[1], [0], [0], [1], [0, 0, 1, 1], [], []>} : vector<256x256xf32>, vector<256x16xf32>, vector<256x16xf32> -> vector<256x16xf32>
    %69 = vector.broadcast %0 : f32 to vector<256x16xf32>
    %70 = arith.mulf %69, %68 : vector<256x16xf32>
    %71 = arith.addf %70, %42 : vector<256x16xf32>
    %72 = tpu.transpose %71, [1, 0] : vector<256x16xf32> -> vector<16x256xf32>
    %c0_36 = arith.constant 0 : index
    %c0_37 = arith.constant 0 : index
    %c0_38 = arith.constant 0 : index
    %73 = vector.load %arg10[%c0_36, %c0_37, %c0_38] : memref<2x16x256xf32, #tpu.memory_space<vmem>>, vector<1x16x256xf32>
    %74 = vector.shape_cast %73 : vector<1x16x256xf32> to vector<16x256xf32>
    %75 = vector.shape_cast %72 : vector<16x256xf32> to vector<1x16x256xf32>
    tpu.vector_store %arg10[%c0_36, %c0_37, %c0_38], %75 {strides = array<i32>} : memref<2x16x256xf32, #tpu.memory_space<vmem>>, vector<1x16x256xf32>,
    %c1_39 = arith.constant 1 : index
    %c0_40 = arith.constant 0 : index
    %c0_41 = arith.constant 0 : index
    %76 = vector.load %arg1[%c1_39, %c0_40, %c0_41] : memref<2x16x256xf32, #tpu.memory_space<vmem>>, vector<1x16x256xf32>
    %77 = vector.shape_cast %76 : vector<1x16x256xf32> to vector<16x256xf32>
    %78 = tpu.transpose %77, [1, 0] : vector<16x256xf32> -> vector<256x16xf32>
    %cst_42 = arith.constant dense<0.000000e+00> : vector<256x8xf32>
    %79 = tpu.matmul %78, %1, %cst_42 {dimension_numbers = #tpu.dot_dimension_numbers<[1], [0], [0], [1], [0, 0, 1, 1], [], []>} : vector<256x16xf32>, vector<16x8xf32>, vector<256x8xf32> -> vector<256x8xf32>
    %80 = vector.broadcast %4 : vector<1x8xf32> to vector<256x8xf32>
    %81 = arith.addf %79, %80 : vector<256x8xf32>
    %cst_43 = arith.constant dense<0.000000e+00> : vector<256x8xf32>
    %82 = tpu.matmul %78, %2, %cst_43 {dimension_numbers = #tpu.dot_dimension_numbers<[1], [0], [0], [1], [0, 0, 1, 1], [], []>} : vector<256x16xf32>, vector<16x8xf32>, vector<256x8xf32> -> vector<256x8xf32>
    %83 = vector.broadcast %5 : vector<1x8xf32> to vector<256x8xf32>
    %84 = arith.addf %82, %83 : vector<256x8xf32>
    %cst_44 = arith.constant dense<0.000000e+00> : vector<256x16xf32>
    %85 = tpu.matmul %78, %3, %cst_44 {dimension_numbers = #tpu.dot_dimension_numbers<[1], [0], [0], [1], [0, 0, 1, 1], [], []>} : vector<256x16xf32>, vector<16x16xf32>, vector<256x16xf32> -> vector<256x16xf32>
    %86 = vector.broadcast %6 : vector<1x16xf32> to vector<256x16xf32>
    %87 = arith.addf %85, %86 : vector<256x16xf32>
    %cst_45 = arith.constant dense<0.000000e+00> : vector<256x256xf32>
    %88 = tpu.matmul %81, %84, %cst_45 {dimension_numbers = #tpu.dot_dimension_numbers<[1], [1], [0], [0], [0, 0, 1, 0], [], []>} : vector<256x8xf32>, vector<256x8xf32>, vector<256x256xf32> -> vector<256x256xf32>
    %89 = arith.addf %88, %8 : vector<256x256xf32>
    %cst_46 = arith.constant dense<0xFF800000> : vector<256xf32>
    %90 = vector.multi_reduction <maximumf>, %89, %cst_46 [1] : vector<256x256xf32> to vector<256xf32>
    %91 = vector.shape_cast %90 : vector<256xf32> to vector<256x1xf32>
    %92 = vector.broadcast %91 : vector<256x1xf32> to vector<256x256xf32>
    %93 = arith.subf %89, %92 : vector<256x256xf32>
    %94 = math.exp %93 : vector<256x256xf32>
    %cst_47 = arith.constant dense<0.000000e+00> : vector<256xf32>
    %95 = vector.multi_reduction <add>, %94, %cst_47 [1] : vector<256x256xf32> to vector<256xf32>
    %96 = vector.shape_cast %95 : vector<256xf32> to vector<256x1xf32>
    %97 = tpu.reciprocal %96 {approx = true} : vector<256x1xf32> -> vector<256x1xf32>
    %98 = arith.mulf %96, %97 : vector<256x1xf32>
    %cst_48 = arith.constant 2.000000e+00 : f32
    %99 = vector.broadcast %cst_48 : f32 to vector<256x1xf32>
    %100 = arith.subf %99, %98 : vector<256x1xf32>
    %101 = arith.mulf %97, %100 : vector<256x1xf32>
    %102 = vector.broadcast %101 : vector<256x1xf32> to vector<256x256xf32>
    %103 = arith.mulf %94, %102 : vector<256x256xf32>
    %cst_49 = arith.constant dense<0.000000e+00> : vector<256x16xf32>
    %104 = tpu.matmul %103, %87, %cst_49 {dimension_numbers = #tpu.dot_dimension_numbers<[1], [0], [0], [1], [0, 0, 1, 1], [], []>} : vector<256x256xf32>, vector<256x16xf32>, vector<256x16xf32> -> vector<256x16xf32>
    %105 = vector.broadcast %0 : f32 to vector<256x16xf32>
    %106 = arith.mulf %105, %104 : vector<256x16xf32>
    %107 = arith.addf %106, %78 : vector<256x16xf32>
    %cst_50 = arith.constant dense<0.000000e+00> : vector<256x8xf32>
    %108 = tpu.matmul %107, %1, %cst_50 {dimension_numbers = #tpu.dot_dimension_numbers<[1], [0], [0], [1], [0, 0, 1, 1], [], []>} : vector<256x16xf32>, vector<16x8xf32>, vector<256x8xf32> -> vector<256x8xf32>
    %109 = vector.broadcast %4 : vector<1x8xf32> to vector<256x8xf32>
    %110 = arith.addf %108, %109 : vector<256x8xf32>
    %cst_51 = arith.constant dense<0.000000e+00> : vector<256x8xf32>
    %111 = tpu.matmul %107, %2, %cst_51 {dimension_numbers = #tpu.dot_dimension_numbers<[1], [0], [0], [1], [0, 0, 1, 1], [], []>} : vector<256x16xf32>, vector<16x8xf32>, vector<256x8xf32> -> vector<256x8xf32>
    %112 = vector.broadcast %5 : vector<1x8xf32> to vector<256x8xf32>
    %113 = arith.addf %111, %112 : vector<256x8xf32>
    %cst_52 = arith.constant dense<0.000000e+00> : vector<256x16xf32>
    %114 = tpu.matmul %107, %3, %cst_52 {dimension_numbers = #tpu.dot_dimension_numbers<[1], [0], [0], [1], [0, 0, 1, 1], [], []>} : vector<256x16xf32>, vector<16x16xf32>, vector<256x16xf32> -> vector<256x16xf32>
    %115 = vector.broadcast %6 : vector<1x16xf32> to vector<256x16xf32>
    %116 = arith.addf %114, %115 : vector<256x16xf32>
    %cst_53 = arith.constant dense<0.000000e+00> : vector<256x256xf32>
    %117 = tpu.matmul %110, %113, %cst_53 {dimension_numbers = #tpu.dot_dimension_numbers<[1], [1], [0], [0], [0, 0, 1, 0], [], []>} : vector<256x8xf32>, vector<256x8xf32>, vector<256x256xf32> -> vector<256x256xf32>
    %118 = arith.addf %117, %10 : vector<256x256xf32>
    %cst_54 = arith.constant dense<0xFF800000> : vector<256xf32>
    %119 = vector.multi_reduction <maximumf>, %118, %cst_54 [1] : vector<256x256xf32> to vector<256xf32>
    %120 = vector.shape_cast %119 : vector<256xf32> to vector<256x1xf32>
    %121 = vector.broadcast %120 : vector<256x1xf32> to vector<256x256xf32>
    %122 = arith.subf %118, %121 : vector<256x256xf32>
    %123 = math.exp %122 : vector<256x256xf32>
    %cst_55 = arith.constant dense<0.000000e+00> : vector<256xf32>
    %124 = vector.multi_reduction <add>, %123, %cst_55 [1] : vector<256x256xf32> to vector<256xf32>
    %125 = vector.shape_cast %124 : vector<256xf32> to vector<256x1xf32>
    %126 = tpu.reciprocal %125 {approx = true} : vector<256x1xf32> -> vector<256x1xf32>
    %127 = arith.mulf %125, %126 : vector<256x1xf32>
    %cst_56 = arith.constant 2.000000e+00 : f32
    %128 = vector.broadcast %cst_56 : f32 to vector<256x1xf32>
    %129 = arith.subf %128, %127 : vector<256x1xf32>
    %130 = arith.mulf %126, %129 : vector<256x1xf32>
    %131 = vector.broadcast %130 : vector<256x1xf32> to vector<256x256xf32>
    %132 = arith.mulf %123, %131 : vector<256x256xf32>
    %cst_57 = arith.constant dense<0.000000e+00> : vector<256x16xf32>
    %133 = tpu.matmul %132, %116, %cst_57 {dimension_numbers = #tpu.dot_dimension_numbers<[1], [0], [0], [1], [0, 0, 1, 1], [], []>} : vector<256x256xf32>, vector<256x16xf32>, vector<256x16xf32> -> vector<256x16xf32>
    %134 = vector.broadcast %0 : f32 to vector<256x16xf32>
    %135 = arith.mulf %134, %133 : vector<256x16xf32>
    %136 = arith.addf %135, %107 : vector<256x16xf32>
    %137 = tpu.transpose %136, [1, 0] : vector<256x16xf32> -> vector<16x256xf32>
    %c1_58 = arith.constant 1 : index
    %c0_59 = arith.constant 0 : index
    %c0_60 = arith.constant 0 : index
    %138 = vector.load %arg10[%c1_58, %c0_59, %c0_60] : memref<2x16x256xf32, #tpu.memory_space<vmem>>, vector<1x16x256xf32>
    %139 = vector.shape_cast %138 : vector<1x16x256xf32> to vector<16x256xf32>
    %140 = vector.shape_cast %137 : vector<16x256xf32> to vector<1x16x256xf32>
    tpu.vector_store %arg10[%c1_58, %c0_59, %c0_60], %140 {strides = array<i32>} : memref<2x16x256xf32, #tpu.memory_space<vmem>>, vector<1x16x256xf32>,
    return
  }
  func.func @transform_0(%arg0: i32) -> (i32, i32, i32) {
    %c0_i32 = arith.constant 0 : i32
    %c0_i32_0 = arith.constant 0 : i32
    %c0_i32_1 = arith.constant 0 : i32
    return %arg0, %c0_i32, %c0_i32_0 : i32, i32, i32
  }
  func.func @transform_1(%arg0: i32) -> (i32, i32) {
    %c0_i32 = arith.constant 0 : i32
    %c0_i32_0 = arith.constant 0 : i32
    %c0_i32_1 = arith.constant 0 : i32
    return %c0_i32, %c0_i32_0 : i32, i32
  }
  func.func @transform_2(%arg0: i32) -> (i32, i32) {
    %c0_i32 = arith.constant 0 : i32
    %c0_i32_0 = arith.constant 0 : i32
    %c0_i32_1 = arith.constant 0 : i32
    return %c0_i32, %c0_i32_0 : i32, i32
  }
  func.func @transform_3(%arg0: i32) -> (i32, i32) {
    %c0_i32 = arith.constant 0 : i32
    %c0_i32_0 = arith.constant 0 : i32
    %c0_i32_1 = arith.constant 0 : i32
    return %c0_i32, %c0_i32_0 : i32, i32
  }
  func.func @transform_4(%arg0: i32) -> (i32, i32) {
    %c0_i32 = arith.constant 0 : i32
    %c0_i32_0 = arith.constant 0 : i32
    %c0_i32_1 = arith.constant 0 : i32
    return %c0_i32, %c0_i32_0 : i32, i32
  }
  func.func @transform_5(%arg0: i32) -> (i32, i32) {
    %c0_i32 = arith.constant 0 : i32
    %c0_i32_0 = arith.constant 0 : i32
    %c0_i32_1 = arith.constant 0 : i32
    return %c0_i32, %c0_i32_0 : i32, i32
  }
  func.func @transform_6(%arg0: i32) -> (i32, i32) {
    %c0_i32 = arith.constant 0 : i32
    %c0_i32_0 = arith.constant 0 : i32
    %c0_i32_1 = arith.constant 0 : i32
    return %c0_i32, %c0_i32_0 : i32, i32
  }
  func.func @transform_7(%arg0: i32) -> (i32, i32, i32) {
    %c0_i32 = arith.constant 0 : i32
    %c0_i32_0 = arith.constant 0 : i32
    %c0_i32_1 = arith.constant 0 : i32
    %c0_i32_2 = arith.constant 0 : i32
    return %c0_i32, %c0_i32_0, %c0_i32_1 : i32, i32, i32
  }
  func.func @transform_8(%arg0: i32) -> (i32, i32) {
    %c0_i32 = arith.constant 0 : i32
    %c0_i32_0 = arith.constant 0 : i32
    %c0_i32_1 = arith.constant 0 : i32
    return %c0_i32, %c0_i32_0 : i32, i32
  }
  func.func @transform_9(%arg0: i32) -> (i32, i32, i32) {
    %c0_i32 = arith.constant 0 : i32
    %c0_i32_0 = arith.constant 0 : i32
    %c0_i32_1 = arith.constant 0 : i32
    return %arg0, %c0_i32, %c0_i32_0 : i32, i32, i32
  }
}

</mosaic_0001>

<bundles_post_ra>
// kernel: tpu_custom_call.1
= control target key start
LH: loop header
LB: loop body
LE: loop exit
PB: predicated region body
PF: predicated region fallthrough
CT: control target
= control target key end

     0   :  { %15 = vsyncpa [#allocation4], 0  ;;  %s17313_s0 = inlined_call_operand.hbm [shape: f32[2,16,256], index: 0, kind: input, shape index: {}]   ;;  %s17314_s1 = inlined_call_operand.vmem [shape: f32[16,8], index: 1, kind: input, shape index: {}]   ;;  %s17315_s2 = inlined_call_operand.vmem [shape: f32[16,8], index: 2, kind: input, shape index: {}]   ;;  %s17316_s3 = inlined_call_operand.vmem [shape: f32[16,16], index: 3, kind: input, shape index: {}]   ;;  %s17317_s4 = inlined_call_operand.vmem [shape: f32[1,8], index: 4, kind: input, shape index: {}]   ;;  %s17318_s5 = inlined_call_operand.vmem [shape: f32[1,8], index: 5, kind: input, shape index: {}]   ;;  %s17319_s6 = inlined_call_operand.vmem [shape: f32[1,16], index: 6, kind: input, shape index: {}]   ;;  %s17320_s7 = inlined_call_operand.hbm [shape: f32[2,256,256], index: 7, kind: input, shape index: {}]   ;;  %s17321_s8 = inlined_call_operand.<no memory space> [shape: f32[1,1], index: 8, kind: input, shape index: {}]   ;;  %s17322_s9 = inlined_call_operand.hbm [shape: f32[2,16,256], index: 9, kind: output, shape index: {}]  }
   0x1   :  { %16 = vsyncpa [#allocation7], 0 }
   0x2   :  { %17 = vsyncpa [#allocation5], 0  ;;  %s11908_s30 = smov [#allocation3]  }
   0x3   :  { %s23_s10 = sshll.u32 %s11908_s30, 4  ;;  %s24_s10 = int_to_ptr.vmem [resolvable:$true] %s23_s10 }
   0x4   :  { %s11850_s11 = scalar_lea.vmem %s24_s10, 1024  ;;  %p11855_p1 = scmp.lt.s32.totalorder %s24_s10, %s24_s10 }
   0x5   :  { %p11851_p0 = scmp.ne.s32.totalorder %s24_s10, %s11850_s11  ;;  %p11856_p2 = scmp.lt.s32.totalorder %s11850_s11, %s11850_s11 }
   0x7   :  { %p11857_p3 = por %p11856_p2, %p11855_p1 }
   0x9   :  { %p11858_p4 = pnand %p11857_p3, %p11851_p0 }
   0xb   :  { %11861 = shalt.err (!%p11858_p4)
}
   0xc   :  { %s11909_s12 = smov 256   ;;  %s11910_s13 = smov 16  }
   0xd   :  { %29 = dma.hbm_to_vmem [thread:$0]  %s17313_s0, 1024, %s24_s10, [#allocation4], %s11909_s12, %s11909_s12, %s11910_s13  }
   0xe   :  { %s11911_s16 = smov [#allocation6]  }
   0xf   :  { %s47_s17 = sshll.u32 %s11911_s16, 4  ;;  %s48_s17 = int_to_ptr.vmem [resolvable:$true] %s47_s17 }
  0x10   :  { %s11870_s18 = scalar_lea.vmem %s48_s17, 16384  ;;  %p11875_p6 = scmp.lt.s32.totalorder %s48_s17, %s48_s17 }
  0x11   :  { %p11871_p5 = scmp.ne.s32.totalorder %s48_s17, %s11870_s18  ;;  %p11876_p7 = scmp.lt.s32.totalorder %s11870_s18, %s11870_s18 }
  0x13   :  { %p11877_p8 = por %p11876_p7, %p11875_p6 }
  0x15   :  { %p11878_p9 = pnand %p11877_p8, %p11871_p5 }
  0x17   :  { %11881 = shalt.err (!%p11878_p9)
}
  0x18   :  { %53 = dma.hbm_to_vmem [thread:$0]  %s17320_s7, 16384, %s48_s17, [#allocation7], %s11909_s12, %s11909_s12, %s11910_s13  }
  0x19   :  { %11902 = dma.done.wait [#allocation4], 1024  }
  0x1a   :  { %11903 = vsyncadd [#allocation4], 4294966272 }
  0x1b   :  { %11904 = dma.done.wait [#allocation7], 16384  }
  0x1c   :  { %11905 = vsyncadd [#allocation7], 4294950912  ;;  %v201_v0 = vld [vmem:[#allocation3] sm:$0xff]  ;;  %v202_v1 = vld [vmem:[#allocation3 + $0x8] sm:$0xff]  ;;  %vm275_vm0 = vcmask 130048   ;;  %v17323_v42 = vmov 0.0  }
  0x1d   :  { %205 = vxpose.xlu0.b32.start [1/2] (short) %v201_v0, 128  ;;  %v203_v2 = vld [vmem:[#allocation3 + $0x10] sm:$0xff]  ;;  %237 = vxpose.xlu1.b32.start [1/2] (short) %v202_v1, 128  ;;  %v11979_v3 = vld [vmem:[%s17314_s1 + $0x8] sm:$0xff]  ;;  %v204_v5 = vld [vmem:[#allocation3 + $0x18] sm:$0xff]  ;;  %vm1059_vm1 = vcmask 64512  }
  0x1e   :  { %v11984_v4 = vld [vmem:[%s17315_s2 + $0x8] sm:$0xff]  ;;  %10289 = vmatprep.subr.mxu0 %v11979_v3  ;;  %v11991_v6 = vld [vmem:[%s17314_s1] sm:$0xff] }
  0x1f   :  { %10341 = vmatprep.subr.mxu1 %v11984_v4  ;;  %v65_v7 = vld [vmem:[%s17315_s2] sm:$0xff]  ;;  %10290 = vmatpush3.msra.mxu0 %v11979_v3  ;;  %v12003_v8 = vld [vmem:[%s17316_s3 + $0x8] sm:$0xff] }
  0x20   :  { %10342 = vmatpush3.msra.mxu1 %v11984_v4  ;;  %10291 = vmatprep.subr.mxu0 %v11991_v6  ;;  %v67_v12 = vld [vmem:[%s17316_s3] sm:$0xff] }
  0x21   :  { %10343 = vmatprep.subr.mxu1 %v65_v7  ;;  %206 = vxpose.xlu0.b32.end [2/2] (short) %v203_v2, 128  ;;  %v12272_v44 = vld [vmem:[%s17317_s4] ss:$0 sm:$0xff] }
  0x22   :  { %238 = vxpose.xlu1.b32.end [2/2] (short) %v204_v5, 128  ;;  %10292 = vmatpush3.msra.mxu0 %v11991_v6 }
  0x23   :  { %10344 = vmatpush3.msra.mxu1 %v65_v7  ;;  %10393 = vmatprep.subr.mxu0 %v12003_v8 }
  0x99   :  { %v12006_v9 = vpop.trf.xlu0 }
  0x9a   :  { %17591 = vst [vmem:[#allocation12_spill] sm:$0xff] %v12006_v9  ;;  %v12008_v10 = vpop.trf.xlu1  ;;  %10293 = vmatprep.mubr.msk.f32.mxu0 %vm275_vm0, %v12006_v9  ;;  %10345 = vmatprep.mubr.msk.f32.mxu1 %vm275_vm0, %v12006_v9 }
  0x9b   :  { %17592 = vst [vmem:[#allocation13_spill] sm:$0xff] %v12008_v10 }
  0x9d   :  { %v12014_v11 = vpop.trf.xlu0 }
  0x9e   :  { %17593 = vst [vmem:[#allocation14_spill] sm:$0xff] %v12014_v11  ;;  %10294 = vmatmul.mubr.msk.f32.vlgmr.msra.gmra.mxu0 %vm275_vm0, %v12014_v11  ;;  %10346 = vmatmul.mubr.msk.f32.vlgmr.msra.gmra.mxu1 %vm275_vm0, %v12014_v11  ;;  %v12023_v13 = vpop.trf.xlu1 }
  0x9f   :  { %17594 = vst [vmem:[#allocation15_spill] sm:$0xff] %v12023_v13  ;;  %10394 = vmatpush3.msra.mxu0 %v12003_v8 }
  0xa0   :  { %10395 = vmatprep.subr.mxu0 %v67_v12 }
  0xa1   :  { %v12026_v14 = vpop.trf.xlu0  ;;  %10396 = vmatpush3.msra.mxu0 %v67_v12 }
  0xa2   :  { %17595 = vst [vmem:[#allocation16_spill] sm:$0xff] %v12026_v14  ;;  %10296 = vmatprep.mubr.msk.f32.mxu0 %vm275_vm0, %v12026_v14  ;;  %10348 = vmatprep.mubr.msk.f32.mxu1 %vm275_vm0, %v12026_v14  ;;  %v12034_v16 = vpop.trf.xlu1 }
  0xa3   :  { %17597 = vst [vmem:[#allocation18_spill] sm:$0xff] %v12034_v16  ;;  %2085 = vmatprep.subr.mxu0 %v17323_v42 }
  0xa5   :  { %v12032_v15 = vpop.trf.xlu0 }
  0xa6   :  { %17596 = vst [vmem:[#allocation17_spill] sm:$0xff] %v12032_v15  ;;  %10297 = vmatmul.mubr.msk.f32.gmra.mxu0 %vm275_vm0, %v12032_v15  ;;  %10349 = vmatmul.mubr.msk.f32.gmra.mxu1 %vm275_vm0, %v12032_v15  ;;  %v12046_v18 = vpop.trf.xlu1 }
  0xa7   :  { %17599 = vst [vmem:[#allocation20_spill] sm:$0xff] %v12046_v18 }
  0xa9   :  { %v12040_v17 = vpop.trf.xlu0 }
  0xaa   :  { %17598 = vst [vmem:[#allocation19_spill] sm:$0xff] %v12040_v17  ;;  %10299 = vmatprep.mubr.msk.f32.mxu0 %vm275_vm0, %v12040_v17  ;;  %10351 = vmatprep.mubr.msk.f32.mxu1 %vm275_vm0, %v12040_v17  ;;  %v12056_v21 = vpop.trf.xlu1 }
  0xab   :  { %17602 = vst [vmem:[#allocation23_spill] sm:$0xff] %v12056_v21 }
  0xad   :  { %v12048_v19 = vpop.trf.xlu0 }
  0xae   :  { %17600 = vst [vmem:[#allocation21_spill] sm:$0xff] %v12048_v19  ;;  %10300 = vmatmul.mubr.msk.f32.gmra.mxu0 %vm275_vm0, %v12048_v19  ;;  %10352 = vmatmul.mubr.msk.f32.gmra.mxu1 %vm275_vm0, %v12048_v19  ;;  %v12068_v23 = vpop.trf.xlu1 }
  0xaf   :  { %17604 = vst [vmem:[#allocation25_spill] sm:$0xff] %v12068_v23 }
  0xb1   :  { %v12054_v20 = vpop.trf.xlu0 }
  0xb2   :  { %17601 = vst [vmem:[#allocation22_spill] sm:$0xff] %v12054_v20  ;;  %10302 = vmatprep.mubr.msk.f32.mxu0 %vm275_vm0, %v12054_v20  ;;  %10354 = vmatprep.mubr.msk.f32.mxu1 %vm275_vm0, %v12054_v20  ;;  %v12078_v26 = vpop.trf.xlu1 }
  0xb3   :  { %17607 = vst [vmem:[#allocation28_spill] sm:$0xff] %v12078_v26 }
  0xb5   :  { %v12062_v22 = vpop.trf.xlu0 }
  0xb6   :  { %17603 = vst [vmem:[#allocation24_spill] sm:$0xff] %v12062_v22  ;;  %10303 = vmatmul.mubr.msk.f32.gmra.mxu0 %vm275_vm0, %v12062_v22  ;;  %10355 = vmatmul.mubr.msk.f32.gmra.mxu1 %vm275_vm0, %v12062_v22  ;;  %v12090_v28 = vpop.trf.xlu1 }
  0xb7   :  { %17609 = vst [vmem:[#allocation30_spill] sm:$0xff] %v12090_v28 }
  0xb9   :  { %v12070_v24 = vpop.trf.xlu0 }
  0xba   :  { %17605 = vst [vmem:[#allocation26_spill] sm:$0xff] %v12070_v24  ;;  %10305 = vmatprep.mubr.msk.f32.mxu0 %vm275_vm0, %v12070_v24  ;;  %10357 = vmatprep.mubr.msk.f32.mxu1 %vm275_vm0, %v12070_v24  ;;  %v12100_v31 = vpop.trf.xlu1 }
  0xbb   :  { %17612 = vst [vmem:[#allocation33_spill] sm:$0xff] %v12100_v31 }
  0xbd   :  { %v12076_v25 = vpop.trf.xlu0 }
  0xbe   :  { %17606 = vst [vmem:[#allocation27_spill] sm:$0xff] %v12076_v25  ;;  %10306 = vmatmul.mubr.msk.f32.gmra.mxu0 %vm275_vm0, %v12076_v25  ;;  %10358 = vmatmul.mubr.msk.f32.gmra.mxu1 %vm275_vm0, %v12076_v25  ;;  %v12112_v33 = vpop.trf.xlu1 }
  0xbf   :  { %17614 = vst [vmem:[#allocation35_spill] sm:$0xff] %v12112_v33 }
  0xc1   :  { %v12084_v27 = vpop.trf.xlu0 }
  0xc2   :  { %17608 = vst [vmem:[#allocation29_spill] sm:$0xff] %v12084_v27  ;;  %10308 = vmatprep.mubr.msk.f32.mxu0 %vm275_vm0, %v12084_v27  ;;  %10360 = vmatprep.mubr.msk.f32.mxu1 %vm275_vm0, %v12084_v27  ;;  %v12122_v36 = vpop.trf.xlu1 }
  0xc3   :  { %17617 = vst [vmem:[#allocation38_spill] sm:$0xff] %v12122_v36 }
  0xc5   :  { %v12092_v29 = vpop.trf.xlu0 }
  0xc6   :  { %17610 = vst [vmem:[#allocation31_spill] sm:$0xff] %v12092_v29  ;;  %10309 = vmatmul.mubr.msk.f32.gmra.mxu0 %vm275_vm0, %v12092_v29  ;;  %10361 = vmatmul.mubr.msk.f32.gmra.mxu1 %vm275_vm0, %v12092_v29  ;;  %v12140_v37 = vpop.trf.xlu1 }
  0xc7   :  { %17618 = vst [vmem:[#allocation39_spill] sm:$0xff] %v12140_v37 }
  0xc9   :  { %v12098_v30 = vpop.trf.xlu0 }
  0xca   :  { %17611 = vst [vmem:[#allocation32_spill] sm:$0xff] %v12098_v30  ;;  %10311 = vmatprep.mubr.msk.f32.mxu0 %vm275_vm0, %v12098_v30  ;;  %10363 = vmatprep.mubr.msk.f32.mxu1 %vm275_vm0, %v12098_v30  ;;  %v12150_v38 = vpop.trf.xlu1 }
  0xcb   :  { %17619 = vst [vmem:[#allocation40_spill] sm:$0xff] %v12150_v38 }
  0xcd   :  { %v12106_v32 = vpop.trf.xlu0 }
  0xce   :  { %17613 = vst [vmem:[#allocation34_spill] sm:$0xff] %v12106_v32  ;;  %10312 = vmatmul.mubr.msk.f32.gmra.mxu0 %vm275_vm0, %v12106_v32  ;;  %10364 = vmatmul.mubr.msk.f32.gmra.mxu1 %vm275_vm0, %v12106_v32  ;;  %v12168_v39 = vpop.trf.xlu1 }
  0xcf   :  { %17620 = vst [vmem:[#allocation41_spill] sm:$0xff] %v12168_v39 }
  0xd1   :  { %v12114_v34 = vpop.trf.xlu0 }
  0xd2   :  { %17615 = vst [vmem:[#allocation36_spill] sm:$0xff] %v12114_v34  ;;  %10314 = vmatprep.mubr.msk.f32.mxu0 %vm275_vm0, %v12114_v34  ;;  %10366 = vmatprep.mubr.msk.f32.mxu1 %vm275_vm0, %v12114_v34  ;;  %v12178_v40 = vpop.trf.xlu1 }
  0xd3   :  { %17621 = vst [vmem:[#allocation42_spill] sm:$0xff] %v12178_v40 }
  0xd5   :  { %v12120_v35 = vpop.trf.xlu0 }
  0xd6   :  { %17616 = vst [vmem:[#allocation37_spill] sm:$0xff] %v12120_v35  ;;  %10315 = vmatmul.mubr.msk.f32.gmra.mxu0 %vm275_vm0, %v12120_v35  ;;  %10367 = vmatmul.mubr.msk.f32.gmra.mxu1 %vm275_vm0, %v12120_v35  ;;  %v12196_v41 = vpop.trf.xlu1 }
  0xd7   :  { %10317 = vmatprep.mubr.msk.f32.mxu0 %vm275_vm0, %v12008_v10  ;;  %10369 = vmatprep.mubr.msk.f32.mxu1 %vm275_vm0, %v12008_v10  ;;  %17622 = vst [vmem:[#allocation43_spill] sm:$0xff] %v12196_v41 }
  0xda   :  { %10318 = vmatmul.mubr.msk.f32.gmra.mxu0 %vm275_vm0, %v12023_v13  ;;  %10370 = vmatmul.mubr.msk.f32.gmra.mxu1 %vm275_vm0, %v12023_v13 }
  0xdb   :  { %10320 = vmatprep.mubr.msk.f32.mxu0 %vm275_vm0, %v12034_v16  ;;  %10372 = vmatprep.mubr.msk.f32.mxu1 %vm275_vm0, %v12034_v16 }
  0xde   :  { %10321 = vmatmul.mubr.msk.f32.gmra.mxu0 %vm275_vm0, %v12046_v18  ;;  %10373 = vmatmul.mubr.msk.f32.gmra.mxu1 %vm275_vm0, %v12046_v18 }
  0xdf   :  { %10323 = vmatprep.mubr.msk.f32.mxu0 %vm275_vm0, %v12056_v21  ;;  %10375 = vmatprep.mubr.msk.f32.mxu1 %vm275_vm0, %v12056_v21 }
  0xe2   :  { %10324 = vmatmul.mubr.msk.f32.gmra.mxu0 %vm275_vm0, %v12068_v23  ;;  %10376 = vmatmul.mubr.msk.f32.gmra.mxu1 %vm275_vm0, %v12068_v23 }
  0xe3   :  { %10326 = vmatprep.mubr.msk.f32.mxu0 %vm275_vm0, %v12078_v26  ;;  %10378 = vmatprep.mubr.msk.f32.mxu1 %vm275_vm0, %v12078_v26 }
  0xe6   :  { %10327 = vmatmul.mubr.msk.f32.gmra.mxu0 %vm275_vm0, %v12090_v28  ;;  %10379 = vmatmul.mubr.msk.f32.gmra.mxu1 %vm275_vm0, %v12090_v28 }
  0xe7   :  { %10329 = vmatprep.mubr.msk.f32.mxu0 %vm275_vm0, %v12100_v31  ;;  %10381 = vmatprep.mubr.msk.f32.mxu1 %vm275_vm0, %v12100_v31 }
  0xea   :  { %10330 = vmatmul.mubr.msk.f32.gmra.mxu0 %vm275_vm0, %v12112_v33  ;;  %10382 = vmatmul.mubr.msk.f32.gmra.mxu1 %vm275_vm0, %v12112_v33 }
  0xeb   :  { %10332 = vmatprep.mubr.msk.f32.mxu0 %vm275_vm0, %v12122_v36  ;;  %10384 = vmatprep.mubr.msk.f32.mxu1 %vm275_vm0, %v12122_v36 }
  0xee   :  { %10333 = vmatmul.mubr.msk.f32.gmra.mxu0 %vm275_vm0, %v12140_v37  ;;  %10385 = vmatmul.mubr.msk.f32.gmra.mxu1 %vm275_vm0, %v12140_v37 }
  0xef   :  { %10335 = vmatprep.mubr.msk.f32.mxu0 %vm275_vm0, %v12150_v38  ;;  %10387 = vmatprep.mubr.msk.f32.mxu1 %vm275_vm0, %v12150_v38 }
  0xf2   :  { %10336 = vmatmul.mubr.msk.f32.gmra.mxu0 %vm275_vm0, %v12168_v39  ;;  %10388 = vmatmul.mubr.msk.f32.gmra.mxu1 %vm275_vm0, %v12168_v39 }
  0xf3   :  { %10338 = vmatprep.mubr.msk.f32.mxu0 %vm275_vm0, %v12178_v40  ;;  %10390 = vmatprep.mubr.msk.f32.mxu1 %vm275_vm0, %v12178_v40 }
  0xf6   :  { %10339 = vmatmul.mubr.msk.f32.gmra.mxu0 %vm275_vm0, %v12196_v41  ;;  %10391 = vmatmul.mubr.msk.f32.gmra.mxu1 %vm275_vm0, %v12196_v41 }
  0xf7   :  { %10397 = vmatprep.mubr.msk.f32.mxu0 %vm275_vm0, %v12006_v9 }
  0xfa   :  { %10398 = vmatmul.mubr.msk.f32.vlgmr.msra.gmra.mxu0 %vm275_vm0, %v12014_v11 }
  0xfb   :  { %10400 = vmatprep.mubr.msk.f32.mxu0 %vm275_vm0, %v12026_v14 }
  0xfe   :  { %10401 = vmatmul.mubr.msk.f32.gmra.mxu0 %vm275_vm0, %v12032_v15 }
  0xff   :  { %10403 = vmatprep.mubr.msk.f32.mxu0 %vm275_vm0, %v12040_v17 }
 0x102   :  { %10404 = vmatmul.mubr.msk.f32.gmra.mxu0 %vm275_vm0, %v12048_v19 }
 0x103   :  { %10406 = vmatprep.mubr.msk.f32.mxu0 %vm275_vm0, %v12054_v20 }
 0x106   :  { %10407 = vmatmul.mubr.msk.f32.gmra.mxu0 %vm275_vm0, %v12062_v22 }
 0x107   :  { %10409 = vmatprep.mubr.msk.f32.mxu0 %vm275_vm0, %v12070_v24 }
 0x10a   :  { %10410 = vmatmul.mubr.msk.f32.gmra.mxu0 %vm275_vm0, %v12076_v25 }
 0x10b   :  { %10412 = vmatprep.mubr.msk.f32.mxu0 %vm275_vm0, %v12084_v27 }
 0x10e   :  { %10413 = vmatmul.mubr.msk.f32.gmra.mxu0 %vm275_vm0, %v12092_v29 }
 0x10f   :  { %10415 = vmatprep.mubr.msk.f32.mxu0 %vm275_vm0, %v12098_v30 }
 0x112   :  { %10416 = vmatmul.mubr.msk.f32.gmra.mxu0 %vm275_vm0, %v12106_v32 }
 0x113   :  { %10418 = vmatprep.mubr.msk.f32.mxu0 %vm275_vm0, %v12114_v34 }
 0x116   :  { %10419 = vmatmul.mubr.msk.f32.gmra.mxu0 %vm275_vm0, %v12120_v35 }
 0x117   :  { %10421 = vmatprep.mubr.msk.f32.mxu0 %vm275_vm0, %v12008_v10 }
 0x11a   :  { %10422 = vmatmul.mubr.msk.f32.gmra.mxu0 %vm275_vm0, %v12023_v13 }
 0x11b   :  { %10424 = vmatprep.mubr.msk.f32.mxu0 %vm275_vm0, %v12034_v16 }
 0x11e   :  { %10425 = vmatmul.mubr.msk.f32.gmra.mxu0 %vm275_vm0, %v12046_v18 }
 0x11f   :  { %10427 = vmatprep.mubr.msk.f32.mxu0 %vm275_vm0, %v12056_v21 }
 0x122   :  { %10428 = vmatmul.mubr.msk.f32.gmra.mxu0 %vm275_vm0, %v12068_v23 }
 0x123   :  { %10430 = vmatprep.mubr.msk.f32.mxu0 %vm275_vm0, %v12078_v26 }
 0x126   :  { %10431 = vmatmul.mubr.msk.f32.gmra.mxu0 %vm275_vm0, %v12090_v28 }
 0x127   :  { %10433 = vmatprep.mubr.msk.f32.mxu0 %vm275_vm0, %v12100_v31 }
 0x12a   :  { %10434 = vmatmul.mubr.msk.f32.gmra.mxu0 %vm275_vm0, %v12112_v33 }
 0x12b   :  { %10436 = vmatprep.mubr.msk.f32.mxu0 %vm275_vm0, %v12122_v36 }
 0x12e   :  { %10437 = vmatmul.mubr.msk.f32.gmra.mxu0 %vm275_vm0, %v12140_v37 }
 0x12f   :  { %10439 = vmatprep.mubr.msk.f32.mxu0 %vm275_vm0, %v12150_v38 }
 0x132   :  { %10440 = vmatmul.mubr.msk.f32.gmra.mxu0 %vm275_vm0, %v12168_v39 }
 0x133   :  { %10442 = vmatprep.mubr.msk.f32.mxu0 %vm275_vm0, %v12178_v40 }
 0x136   :  { %10443 = vmatmul.mubr.msk.f32.gmra.mxu0 %vm275_vm0, %v12196_v41 }
 0x15e   :  { %v12267_v43 = vpop.f32.mrf.mxu0  ;;  %v12279_v47 = vpop.f32.mrf.mxu1 }
 0x160   :  { %v438_v45 = vpop.f32.mrf.mxu0  ;;  %v12281_v48 = vpop.f32.mrf.mxu1 }
 0x161   :  { %v12275_v46 = vadd.f32 %v12272_v44, %v438_v45 }
 0x163   :  { %9631 = vmatprep.mubr.msk.f32.mxu1 %vm1059_vm1, %v12275_v46 }
 0x166   :  { %v12283_v49 = vpop.f32.mrf.mxu0  ;;  %v12285_v50 = vpop.f32.mrf.mxu1 }
 0x168   :  { %v12287_v51 = vpop.f32.mrf.mxu0  ;;  %v12289_v52 = vpop.f32.mrf.mxu1 }
 0x16e   :  { %v12291_v53 = vpop.f32.mrf.mxu0  ;;  %v12293_v54 = vpop.f32.mrf.mxu1 }
 0x170   :  { %v12295_v55 = vpop.f32.mrf.mxu0  ;;  %v12297_v56 = vpop.f32.mrf.mxu1 }
 0x176   :  { %v12299_v57 = vpop.f32.mrf.mxu0  ;;  %v12301_v58 = vpop.f32.mrf.mxu1 }
 0x178   :  { %v12303_v59 = vpop.f32.mrf.mxu0  ;;  %v12305_v60 = vpop.f32.mrf.mxu1 }
 0x17e   :  { %v12307_v61 = vpop.f32.mrf.mxu0  ;;  %v12309_v62 = vpop.f32.mrf.mxu1 }
 0x180   :  { %v12311_v63 = vpop.f32.mrf.mxu0  ;;  %v12313_v0 = vpop.f32.mrf.mxu1 }
 0x186   :  { %v12315_v1 = vpop.f32.mrf.mxu0  ;;  %v12317_v2 = vpop.f32.mrf.mxu1 }
 0x188   :  { %v12319_v5 = vpop.f32.mrf.mxu0  ;;  %v12321_v7 = vpop.f32.mrf.mxu1 }
 0x18e   :  { %v12323_v12 = vpop.f32.mrf.mxu0  ;;  %v10365_v45 = vpop.f32.mrf.mxu1 }
 0x190   :  { %v12325_v42 = vpop.f32.mrf.mxu0  ;;  %v729_v41 = vpop.f32.mrf.mxu1 }
 0x196   :  { %v12327_v40 = vpop.f32.mrf.mxu0  ;;  %v10368_v39 = vpop.f32.mrf.mxu1 }
 0x198   :  { %v12329_v38 = vpop.f32.mrf.mxu0  ;;  %v739_v37 = vpop.f32.mrf.mxu1 }
 0x19a   :  { %v12331_v36 = vpop.f32.mrf.mxu0  ;;  %v12333_v33 = vpop.f32.mrf.mxu1 }
 0x19c   :  { %v12335_v31 = vpop.f32.mrf.mxu0  ;;  %v12337_v28 = vpop.f32.mrf.mxu1 }
 0x19e   :  { %v12339_v26 = vpop.f32.mrf.mxu0  ;;  %v12341_v23 = vpop.f32.mrf.mxu1 }
 0x19f   :  { %17623 = vst [vmem:[#allocation44_spill] sm:$0xff] %v12339_v26 }
 0x1a0   :  { %v12343_v21 = vpop.f32.mrf.mxu0  ;;  %v12345_v18 = vpop.f32.mrf.mxu1 }
 0x1a1   :  { %17624 = vst [vmem:[#allocation45_spill] sm:$0xff] %v12343_v21  ;;  %v17637_v21 = vmov 0.0  }
 0x1a2   :  { %v12347_v16 = vpop.f32.mrf.mxu0  ;;  %v12349_v13 = vpop.f32.mrf.mxu1 }
 0x1a3   :  { %17625 = vst [vmem:[#allocation46_spill] sm:$0xff] %v12347_v16 }
 0x1a4   :  { %v12351_v10 = vpop.f32.mrf.mxu0  ;;  %v12353_v35 = vpop.f32.mrf.mxu1 }
 0x1a5   :  { %17626 = vst [vmem:[#allocation47_spill] sm:$0xff] %v12351_v10 }
 0x1a6   :  { %v12355_v34 = vpop.f32.mrf.mxu0  ;;  %v12357_v32 = vpop.f32.mrf.mxu1 }
 0x1a7   :  { %17627 = vst [vmem:[#allocation48_spill] sm:$0xff] %v12355_v34 }
 0x1a8   :  { %v12359_v30 = vpop.f32.mrf.mxu0  ;;  %v12361_v29 = vpop.f32.mrf.mxu1 }
 0x1a9   :  { %17628 = vst [vmem:[#allocation49_spill] sm:$0xff] %v12359_v30 }
 0x1aa   :  { %v12363_v27 = vpop.f32.mrf.mxu0  ;;  %v10383_v25 = vpop.f32.mrf.mxu1 }
 0x1ab   :  { %17629 = vst [vmem:[#allocation50_spill] sm:$0xff] %v12363_v27  ;;  %v12378_v27 = vld [vmem:[%s17318_s5] ss:$0 sm:$0xff] }
 0x1ac   :  { %v12365_v24 = vpop.f32.mrf.mxu0  ;;  %v789_v22 = vpop.f32.mrf.mxu1  ;;  %v745_v16 = vadd.f32 %v10368_v39, %v12378_v27 }
 0x1ad   :  { %17630 = vst [vmem:[#allocation51_spill] sm:$0xff] %v12365_v24 }
 0x1ae   :  { %v12367_v20 = vpop.f32.mrf.mxu0  ;;  %v10386_v19 = vpop.f32.mrf.mxu1 }
 0x1af   :  { %17631 = vst [vmem:[#allocation52_spill] sm:$0xff] %v12367_v20 }
 0x1b0   :  { %v12369_v17 = vpop.f32.mrf.mxu0  ;;  %v799_v15 = vpop.f32.mrf.mxu1 }
 0x1b1   :  { %17632 = vst [vmem:[#allocation53_spill] sm:$0xff] %v12369_v17 }
 0x1b2   :  { %v12371_v14 = vpop.f32.mrf.mxu0  ;;  %v10389_v11 = vpop.f32.mrf.mxu1 }
 0x1b3   :  { %17633 = vst [vmem:[#allocation54_spill] sm:$0xff] %v12371_v14 }
 0x1b4   :  { %v12373_v9 = vpop.f32.mrf.mxu0  ;;  %v809_v34 = vpop.f32.mrf.mxu1 }
 0x1b5   :  { %17634 = vst [vmem:[#allocation55_spill] sm:$0xff] %v12373_v9 }
 0x1b6   :  { %v12380_v30 = vpop.f32.mrf.mxu0  ;;  %v10392_v24 = vpop.f32.mrf.mxu1 }
 0x1b7   :  { %17635 = vst [vmem:[#allocation56_spill] sm:$0xff] %v12380_v30  ;;  %v825_v20 = vadd.f32 %v10392_v24, %v12378_v27  ;;  %v740_v30 = vadd.f32 %v12378_v27, %v739_v37  ;;  %v815_v24 = vadd.f32 %v10389_v11, %v12378_v27  ;;  %v730_v11 = vadd.f32 %v12378_v27, %v729_v41 }
 0x1b8   :  { %v12384_v17 = vpop.f32.mrf.mxu0  ;;  %v819_v10 = vpop.f32.mrf.mxu1 }
 0x1b9   :  { %17636 = vst [vmem:[#allocation57_spill] sm:$0xff] %v12384_v17  ;;  %v820_v14 = vadd.f32 %v12378_v27, %v819_v10  ;;  %9599 = vmatprep.subr.msk.mxu1 %vm1059_vm1, %v825_v20  ;;  %v735_v10 = vadd.f32 %v10365_v45, %v12378_v27 }
 0x1ba   :  { %v12388_v9 = vpop.f32.mrf.mxu0  ;;  %9600 = vmatpush3.xpose.msk.msra.mxu1 %vm1059_vm1, %v745_v16  ;;  %v810_v16 = vadd.f32 %v12378_v27, %v809_v34  ;;  %v725_v34 = vadd.f32 %v12317_v2, %v12378_v27  ;;  %v715_v2 = vadd.f32 %v12309_v62, %v12378_v27 }
 0x1bb   :  { %9601 = vmatprep.subr.msk.mxu1 %vm1059_vm1, %v820_v14 }
 0x1bc   :  { %v12393_v26 = vpop.f32.mrf.mxu0 }
 0x1be   :  { %v12396_v39 = vpop.f32.mrf.mxu0  ;;  %9602 = vmatpush3.xpose.msk.msra.mxu1 %vm1059_vm1, %v740_v30  ;;  %v805_v30 = vadd.f32 %v10386_v19, %v12378_v27  ;;  %v720_v19 = vadd.f32 %v12378_v27, %v12321_v7  ;;  %v710_v7 = vadd.f32 %v12378_v27, %v12313_v0 }
 0x1bf   :  { %9603 = vmatprep.subr.msk.mxu1 %vm1059_vm1, %v815_v24  ;;  %v800_v24 = vadd.f32 %v12378_v27, %v799_v15 }
 0x1c0   :  { %v12401_v20 = vpop.f32.mrf.mxu0 }
 0x1c2   :  { %v12404_v17 = vpop.f32.mrf.mxu0  ;;  %9604 = vmatpush3.xpose.msk.msra.mxu1 %vm1059_vm1, %v735_v10 }
 0x1c3   :  { %9605 = vmatprep.subr.msk.mxu1 %vm1059_vm1, %v810_v16  ;;  %v795_v16 = vadd.f32 %v10383_v25, %v12378_v27 }
 0x1c4   :  { %v12409_v14 = vpop.f32.mrf.mxu0 }
 0x1c6   :  { %v12412_v37 = vpop.f32.mrf.mxu0  ;;  %9606 = vmatpush3.xpose.msk.msra.mxu1 %vm1059_vm1, %v730_v11 }
 0x1c7   :  { %9607 = vmatprep.subr.msk.mxu1 %vm1059_vm1, %v805_v30  ;;  %v790_v30 = vadd.f32 %v12378_v27, %v789_v22 }
 0x1c8   :  { %v12418_v45 = vpop.f32.mrf.mxu0 }
 0x1ca   :  { %v10411_v10 = vpop.f32.mrf.mxu0  ;;  %9608 = vmatpush3.xpose.msk.msra.mxu1 %vm1059_vm1, %v725_v34 }
 0x1cb   :  { %9609 = vmatprep.subr.msk.mxu1 %vm1059_vm1, %v800_v24  ;;  %v785_v24 = vadd.f32 %v12357_v32, %v12378_v27 }
 0x1cc   :  { %v940_v41 = vpop.f32.mrf.mxu0 }
 0x1ce   :  { %v10414_v11 = vpop.f32.mrf.mxu0  ;;  %9610 = vmatpush3.xpose.msk.msra.mxu1 %vm1059_vm1, %v720_v19  ;;  %v12440_v19 = vld [vmem:[%s17319_s6] ss:$0 sm:$0xff] }
 0x1cf   :  { %9611 = vmatprep.subr.msk.mxu1 %vm1059_vm1, %v795_v16  ;;  %v705_v16 = vadd.f32 %v12301_v58, %v12378_v27  ;;  %v700_v58 = vadd.f32 %v12378_v27, %v12305_v60  ;;  %v695_v60 = vadd.f32 %v12293_v54, %v12378_v27  ;;  %v690_v54 = vadd.f32 %v12378_v27, %v12297_v56 }
 0x1d0   :  { %v950_v15 = vpop.f32.mrf.mxu0  ;;  %v685_v56 = vadd.f32 %v12285_v50, %v12378_v27  ;;  %v926_v50 = vadd.f32 %v12404_v17, %v12440_v19  ;;  %v916_v17 = vadd.f32 %v12396_v39, %v12440_v19  ;;  %v906_v39 = vadd.f32 %v12388_v9, %v12440_v19 }
 0x1d2   :  { %v10417_v34 = vpop.f32.mrf.mxu0  ;;  %9612 = vmatpush3.xpose.msk.msra.mxu1 %vm1059_vm1, %v715_v2  ;;  %v780_v2 = vadd.f32 %v12378_v27, %v12361_v29  ;;  %v775_v29 = vadd.f32 %v12349_v13, %v12378_v27  ;;  %v770_v13 = vadd.f32 %v12378_v27, %v12353_v35  ;;  %v765_v35 = vadd.f32 %v12341_v23, %v12378_v27 }
 0x1d3   :  { %9613 = vmatprep.subr.msk.mxu1 %vm1059_vm1, %v790_v30  ;;  %v760_v23 = vadd.f32 %v12378_v27, %v12345_v18 }
 0x1d4   :  { %v960_v25 = vpop.f32.mrf.mxu0 }
 0x1d6   :  { %v10420_v62 = vpop.f32.mrf.mxu0  ;;  %9614 = vmatpush3.xpose.msk.msra.mxu1 %vm1059_vm1, %v710_v7  ;;  %v966_v7 = vadd.f32 %v10417_v34, %v12440_v19  ;;  %v956_v34 = vadd.f32 %v10414_v11, %v12440_v19  ;;  %v946_v11 = vadd.f32 %v10411_v10, %v12440_v19  ;;  %v936_v10 = vadd.f32 %v12412_v37, %v12440_v19 }
 0x1d7   :  { %v976_v22 = vadd.f32 %v10420_v62, %v12440_v19  ;;  %9615 = vmatprep.subr.msk.mxu1 %vm1059_vm1, %v785_v24  ;;  %v961_v62 = vadd.f32 %v12440_v19, %v960_v25  ;;  %v951_v25 = vadd.f32 %v12440_v19, %v950_v15  ;;  %v941_v15 = vadd.f32 %v12440_v19, %v940_v41 }
 0x1d8   :  { %v970_v0 = vpop.f32.mrf.mxu0  ;;  %v931_v41 = vadd.f32 %v12440_v19, %v12418_v45  ;;  %v680_v37 = vadd.f32 %v12378_v27, %v12289_v52  ;;  %v755_v45 = vadd.f32 %v12333_v33, %v12378_v27  ;;  %v675_v52 = vadd.f32 %v12279_v47, %v12378_v27 }
 0x1d9   :  { %v971_v32 = vadd.f32 %v12440_v19, %v970_v0  ;;  %2086 = vmatpush1.msra.mxu0 %v976_v22  ;;  %v750_v33 = vadd.f32 %v12378_v27, %v12337_v28  ;;  %v670_v47 = vadd.f32 %v12378_v27, %v12281_v48  ;;  %v901_v28 = vadd.f32 %v12440_v19, %v12393_v26 }
 0x1da   :  { %v12450_v30 = vpop.f32.mrf.mxu0  ;;  %9616 = vmatpush3.xpose.msk.msra.mxu1 %vm1059_vm1, %v705_v16  ;;  %2087 = vmatprep.subr.mxu0 %v17637_v21  ;;  %v444_v27 = vadd.f32 %v12267_v43, %v12272_v44  ;;  %v449_v43 = vadd.f32 %v12272_v44, %v12287_v51 }
 0x1db   :  { %9617 = vmatprep.subr.msk.mxu1 %vm1059_vm1, %v780_v2  ;;  %2088 = vmatpush1.msra.mxu0 %v971_v32 }
 0x1dc   :  { %v12458_v24 = vpop.f32.mrf.mxu0  ;;  %2089 = vmatprep.subr.mxu0 %v17637_v21 }
 0x1dd   :  { %2090 = vmatpush1.msra.mxu0 %v966_v7 }
 0x1de   :  { %v12464_v22 = vpop.f32.mrf.mxu0  ;;  %9618 = vmatpush3.xpose.msk.msra.mxu1 %vm1059_vm1, %v700_v58  ;;  %2091 = vmatprep.subr.mxu0 %v17637_v21 }
 0x1df   :  { %9619 = vmatprep.subr.msk.mxu1 %vm1059_vm1, %v775_v29  ;;  %2092 = vmatpush1.msra.mxu0 %v961_v62  ;;  %v921_v29 = vadd.f32 %v12440_v19, %v12409_v14  ;;  %v911_v14 = vadd.f32 %v12440_v19, %v12401_v20 }
 0x1e0   :  { %v12472_v16 = vpop.f32.mrf.mxu0  ;;  %2093 = vmatprep.subr.mxu0 %v17637_v21 }
 0x1e1   :  { %2094 = vmatpush1.msra.mxu0 %v956_v34 }
 0x1e2   :  { %v12478_v0 = vpop.f32.mrf.mxu0  ;;  %9620 = vmatpush3.xpose.msk.msra.mxu1 %vm1059_vm1, %v695_v60  ;;  %2095 = vmatprep.subr.mxu0 %v17637_v21 }
 0x1e3   :  { %9621 = vmatprep.subr.msk.mxu1 %vm1059_vm1, %v770_v13  ;;  %2096 = vmatpush1.msra.mxu0 %v951_v25 }
 0x1e4   :  { %v12486_v2 = vpop.f32.mrf.mxu0  ;;  %2097 = vmatprep.subr.mxu0 %v17637_v21 }
 0x1e5   :  { %2098 = vmatpush1.msra.mxu0 %v946_v11 }
 0x1e6   :  { %v12492_v32 = vpop.f32.mrf.mxu0  ;;  %9622 = vmatpush3.xpose.msk.msra.mxu1 %vm1059_vm1, %v690_v54  ;;  %2099 = vmatprep.subr.mxu0 %v17637_v21 }
 0x1e7   :  { %9623 = vmatprep.subr.msk.mxu1 %vm1059_vm1, %v765_v35  ;;  %2100 = vmatpush1.msra.mxu0 %v941_v15  ;;  %v464_v35 = vadd.f32 %v12291_v53, %v12272_v44  ;;  %v1006_v15 = vadd.f32 %v12478_v0, %v12440_v19  ;;  %v1001_v53 = vadd.f32 %v12440_v19, %v12486_v2 }
 0x1e8   :  { %v12501_v7 = vpop.f32.mrf.mxu0  ;;  %2101 = vmatprep.subr.mxu0 %v17637_v21  ;;  %v474_v0 = vadd.f32 %v12299_v57, %v12272_v44  ;;  %v986_v2 = vadd.f32 %v12450_v30, %v12440_v19  ;;  %v981_v57 = vadd.f32 %v12440_v19, %v12458_v24  ;;  %v484_v30 = vadd.f32 %v12307_v61, %v12272_v44 }
 0x1e9   :  { %2102 = vmatpush1.msra.mxu0 %v936_v10  ;;  %v996_v10 = vadd.f32 %v12464_v22, %v12440_v19  ;;  %v479_v22 = vadd.f32 %v12272_v44, %v12311_v63  ;;  %v489_v63 = vadd.f32 %v12272_v44, %v12319_v5  ;;  %v504_v61 = vadd.f32 %v12323_v12, %v12272_v44  ;;  %v17638_v12 = vld [vmem:[#allocation45_spill] sm:$0xff] }
 0x1ea   :  { %v12508_v58 = vpop.f32.mrf.mxu0  ;;  %9624 = vmatpush3.xpose.msk.msra.mxu1 %vm1059_vm1, %v685_v56  ;;  %2103 = vmatprep.subr.mxu0 %v17637_v21  ;;  %v519_v5 = vadd.f32 %v12272_v44, %v12335_v31  ;;  %v17639_v31 = vld [vmem:[#allocation44_spill] sm:$0xff]  ;;  %v17641_v56 = vld [vmem:[#allocation46_spill] sm:$0xff] }
 0x1eb   :  { %9625 = vmatprep.subr.msk.mxu1 %vm1059_vm1, %v760_v23  ;;  %2104 = vmatpush1.msra.mxu0 %v931_v41  ;;  %v1026_v54 = vadd.f32 %v12508_v58, %v12440_v19  ;;  %v534_v24 = vadd.f32 %v17639_v31, %v12272_v44  ;;  %v17642_v23 = vld [vmem:[#allocation49_spill] sm:$0xff]  ;;  %v17643_v58 = vld [vmem:[#allocation48_spill] sm:$0xff] }
 0x1ec   :  { %v12517_v18 = vpop.f32.mrf.mxu0  ;;  %2105 = vmatprep.subr.mxu0 %v17637_v21  ;;  %v549_v41 = vadd.f32 %v12272_v44, %v17642_v23  ;;  %v85_v23 = vld [vmem:[#allocation6 + $0x68] sm:$0xff] }
 0x1ed   :  { %2106 = vmatpush1.msra.mxu0 %v926_v50  ;;  %v554_v50 = vadd.f32 %v17643_v58, %v12272_v44 }
 0x1ee   :  { %v10438_v62 = vpop.f32.mrf.mxu0  ;;  %9626 = vmatpush3.xpose.msk.msra.mxu1 %vm1059_vm1, %v680_v37  ;;  %2107 = vmatprep.subr.mxu0 %v17637_v21  ;;  %v17644_v37 = vld [vmem:[#allocation51_spill] sm:$0xff] }
 0x1ef   :  { %9627 = vmatprep.subr.msk.mxu1 %vm1059_vm1, %v755_v45  ;;  %2108 = vmatpush1.msra.mxu0 %v921_v29  ;;  %v17645_v45 = vld [vmem:[#allocation50_spill] sm:$0xff] }
 0x1f0   :  { %v1030_v34 = vpop.f32.mrf.mxu0  ;;  %2109 = vmatprep.subr.mxu0 %v17637_v21  ;;  %v564_v29 = vadd.f32 %v17645_v45, %v12272_v44 }
 0x1f1   :  { %2110 = vmatpush1.msra.mxu0 %v916_v17  ;;  %v1031_v51 = vadd.f32 %v12440_v19, %v1030_v34 }
 0x1f2   :  { %v10441_v60 = vpop.f32.mrf.mxu0  ;;  %9628 = vmatpush3.xpose.msk.msra.mxu1 %vm1059_vm1, %v675_v52  ;;  %2111 = vmatprep.subr.mxu0 %v17637_v21  ;;  %v17647_v52 = vld [vmem:[#allocation52_spill] sm:$0xff] }
 0x1f3   :  { %9629 = vmatprep.subr.msk.mxu1 %vm1059_vm1, %v750_v33  ;;  %2112 = vmatpush1.msra.mxu0 %v911_v14  ;;  %v1046_v26 = vadd.f32 %v10441_v60, %v12440_v19  ;;  %v574_v34 = vadd.f32 %v17647_v52, %v12272_v44  ;;  %v17648_v33 = vld [vmem:[#allocation55_spill] sm:$0xff]  ;;  %v17649_v60 = vld [vmem:[#allocation54_spill] sm:$0xff] }
 0x1f4   :  { %v1040_v13 = vpop.f32.mrf.mxu0  ;;  %2113 = vmatprep.subr.mxu0 %v17637_v21  ;;  %v579_v14 = vadd.f32 %v12272_v44, %v17648_v33  ;;  %v88_v33 = vld [vmem:[#allocation6 + $0x80] sm:$0xff] }
 0x1f5   :  { %2114 = vmatpush1.msra.mxu0 %v906_v39  ;;  %v1041_v11 = vadd.f32 %v12440_v19, %v1040_v13  ;;  %v584_v39 = vadd.f32 %v17649_v60, %v12272_v44  ;;  %v89_v60 = vld [vmem:[#allocation6 + $0x88] sm:$0xff] }
 0x1f6   :  { %v10444_v20 = vpop.f32.mrf.mxu0  ;;  %9630 = vmatpush3.xpose.msk.msra.mxu1 %vm1059_vm1, %v670_v47  ;;  %2115 = vmatprep.subr.mxu0 %v17637_v21  ;;  %v17650_v47 = vld [vmem:[#allocation57_spill] sm:$0xff] }
 0x1f7   :  { %v1056_v9 = vadd.f32 %v10444_v20, %v12440_v19  ;;  %2116 = vmatpush1.msra.mxu0 %v901_v28  ;;  %10445 = vmatprep.subr.mxu1 %v11979_v3  ;;  %v589_v13 = vadd.f32 %v12272_v44, %v17650_v47  ;;  %v17651_v28 = vld [vmem:[#allocation56_spill] sm:$0xff] }
 0x1f8   :  { %v1050_v48 = vpop.f32.mrf.mxu0  ;;  %2117 = vmatprep.subr.mxu0 %v17637_v21  ;;  %v594_v20 = vadd.f32 %v17651_v28, %v12272_v44 }
 0x1f9   :  { %v1051_v25 = vadd.f32 %v12440_v19, %v1050_v48  ;;  %9632 = vmatmul.mubr.msk.f32.vlgmr.msra.gmra.mxu1 %vm1059_vm1, %v12275_v46  ;;  %2118 = vmatpush2.msra.mxu0 %v1056_v9  ;;  %v1036_v46 = vadd.f32 %v10438_v62, %v12440_v19  ;;  %v17646_v62 = vld [vmem:[#allocation53_spill] sm:$0xff]  ;;  %v72_v9 = vld [vmem:[#allocation6] sm:$0xff] }
 0x1fa   :  { %9633 = vmatprep.mubr.msk.f32.mxu1 %vm1059_vm1, %v444_v27  ;;  %2119 = vmatprep.subr.mxu0 %v17637_v21  ;;  %v569_v17 = vadd.f32 %v12272_v44, %v17646_v62  ;;  %v73_v48 = vld [vmem:[#allocation6 + $0x8] sm:$0xff] }
 0x1fb   :  { %2120 = vmatpush2.msra.mxu0 %v1051_v25  ;;  %10446 = vmatpush3.msra.mxu1 %v11979_v3  ;;  %v454_v3 = vadd.f32 %v12283_v49, %v12272_v44  ;;  %v1016_v49 = vadd.f32 %v12492_v32, %v12440_v19  ;;  %v469_v32 = vadd.f32 %v12272_v44, %v12303_v59 }
 0x1fc   :  { %2121 = vmatprep.subr.mxu0 %v17637_v21  ;;  %10447 = vmatprep.subr.mxu1 %v11991_v6  ;;  %v991_v59 = vadd.f32 %v12440_v19, %v12472_v16  ;;  %v17640_v16 = vld [vmem:[#allocation47_spill] sm:$0xff] }
 0x1fd   :  { %9634 = vmatmul.mubr.msk.f32.gmra.mxu1 %vm1059_vm1, %v444_v27  ;;  %2122 = vmatpush2.msra.mxu0 %v1046_v26 }
 0x1fe   :  { %9635 = vmatprep.mubr.msk.f32.mxu1 %vm1059_vm1, %v449_v43  ;;  %2123 = vmatprep.subr.mxu0 %v17637_v21 }
 0x1ff   :  { %2124 = vmatpush2.msra.mxu0 %v1041_v11  ;;  %10448 = vmatpush3.msra.mxu1 %v11991_v6  ;;  %v459_v6 = vadd.f32 %v12272_v44, %v12295_v55  ;;  %v1011_v55 = vadd.f32 %v12440_v19, %v12501_v7  ;;  %v544_v7 = vadd.f32 %v17641_v56, %v12272_v44  ;;  %v74_v11 = vld [vmem:[#allocation6 + $0x10] sm:$0xff]  ;;  %v84_v56 = vld [vmem:[#allocation6 + $0x60] sm:$0xff] }
 0x200   :  { %2125 = vmatprep.subr.mxu0 %v17637_v21  ;;  %10549 = vmatprep.subr.mxu1 %v12003_v8  ;;  %v1021_v8 = vadd.f32 %v12440_v19, %v12517_v18  ;;  %v494_v19 = vadd.f32 %v12315_v1, %v12272_v44  ;;  %v509_v1 = vadd.f32 %v12272_v44, %v12329_v38 }
 0x201   :  { %9636 = vmatmul.mubr.msk.f32.gmra.mxu1 %vm1059_vm1, %v449_v43  ;;  %2126 = vmatpush2.msra.mxu0 %v1036_v46  ;;  %v524_v38 = vadd.f32 %v12331_v36, %v12272_v44  ;;  %v539_v36 = vadd.f32 %v12272_v44, %v17640_v16  ;;  %v559_v18 = vadd.f32 %v12272_v44, %v17644_v37 }
 0x202   :  { %9637 = vmatprep.mubr.msk.f32.mxu1 %vm1059_vm1, %v454_v3  ;;  %2127 = vmatprep.subr.mxu0 %v17637_v21 }
 0x203   :  { %2128 = vmatpush2.msra.mxu0 %v1031_v51 }
 0x204   :  { %2129 = vmatprep.subr.mxu0 %v17637_v21 }
 0x205   :  { %9638 = vmatmul.mubr.msk.f32.gmra.mxu1 %vm1059_vm1, %v454_v3  ;;  %2130 = vmatpush2.msra.mxu0 %v1026_v54  ;;  %v75_v3 = vld [vmem:[#allocation6 + $0x18] sm:$0xff] }
 0x206   :  { %9639 = vmatprep.mubr.msk.f32.mxu1 %vm1059_vm1, %v459_v6  ;;  %2131 = vmatprep.subr.mxu0 %v17637_v21 }
 0x207   :  { %2132 = vmatpush2.msra.mxu0 %v1021_v8  ;;  %v76_v8 = vld [vmem:[#allocation6 + $0x20] sm:$0xff] }
 0x208   :  { %2133 = vmatprep.subr.mxu0 %v17637_v21 }
 0x209   :  { %9640 = vmatmul.mubr.msk.f32.gmra.mxu1 %vm1059_vm1, %v459_v6  ;;  %2134 = vmatpush2.msra.mxu0 %v1016_v49 }
 0x20a   :  { %9641 = vmatprep.mubr.msk.f32.mxu1 %vm1059_vm1, %v464_v35  ;;  %2135 = vmatprep.subr.mxu0 %v17637_v21 }
 0x20b   :  { %2136 = vmatpush2.msra.mxu0 %v1011_v55 }
 0x20c   :  { %2137 = vmatprep.subr.mxu0 %v17637_v21 }
 0x20d   :  { %9642 = vmatmul.mubr.msk.f32.gmra.mxu1 %vm1059_vm1, %v464_v35  ;;  %2138 = vmatpush2.msra.mxu0 %v1006_v15  ;;  %v77_v35 = vld [vmem:[#allocation6 + $0x28] sm:$0xff] }
 0x20e   :  { %9643 = vmatprep.mubr.msk.f32.mxu1 %vm1059_vm1, %v469_v32  ;;  %2139 = vmatprep.subr.mxu0 %v17637_v21 }
 0x20f   :  { %2140 = vmatpush2.msra.mxu0 %v1001_v53 }
 0x210   :  { %2141 = vmatprep.subr.mxu0 %v17637_v21 }
 0x211   :  { %9644 = vmatmul.mubr.msk.f32.gmra.mxu1 %vm1059_vm1, %v469_v32  ;;  %2142 = vmatpush2.msra.mxu0 %v996_v10  ;;  %v78_v10 = vld [vmem:[#allocation6 + $0x30] sm:$0xff] }
 0x212   :  { %9645 = vmatprep.mubr.msk.f32.mxu1 %vm1059_vm1, %v474_v0  ;;  %2143 = vmatprep.subr.mxu0 %v17637_v21 }
 0x213   :  { %2144 = vmatpush2.msra.mxu0 %v991_v59  ;;  %v79_v59 = vld [vmem:[#allocation6 + $0x38] sm:$0xff] }
 0x214   :  { %2145 = vmatprep.subr.mxu0 %v17637_v21 }
 0x215   :  { %9646 = vmatmul.mubr.msk.f32.gmra.mxu1 %vm1059_vm1, %v474_v0  ;;  %2146 = vmatpush2.msra.mxu0 %v986_v2 }
 0x216   :  { %9647 = vmatprep.mubr.msk.f32.mxu1 %vm1059_vm1, %v479_v22  ;;  %2147 = vmatprep.subr.mxu0 %v17637_v21 }
 0x217   :  { %2148 = vmatpush2.msra.mxu0 %v981_v57 }
 0x218   :  { %10497 = vmatprep.subr.mxu0 %v11984_v4  ;;  %v499_v4 = vadd.f32 %v12272_v44, %v12325_v42  ;;  %v514_v42 = vadd.f32 %v12327_v40, %v12272_v44  ;;  %v529_v40 = vadd.f32 %v12272_v44, %v17638_v12 }
 0x219   :  { %9648 = vmatmul.mubr.msk.f32.gmra.mxu1 %vm1059_vm1, %v479_v22 }
 0x21a   :  { %9649 = vmatprep.mubr.msk.f32.mxu1 %vm1059_vm1, %v484_v30 }
 0x21d   :  { %9650 = vmatmul.mubr.msk.f32.gmra.mxu1 %vm1059_vm1, %v484_v30 }
 0x21e   :  { %9651 = vmatprep.mubr.msk.f32.mxu1 %vm1059_vm1, %v489_v63 }
 0x221   :  { %9652 = vmatmul.mubr.msk.f32.gmra.mxu1 %vm1059_vm1, %v489_v63  ;;  %v80_v63 = vld [vmem:[#allocation6 + $0x40] sm:$0xff] }
 0x222   :  { %9653 = vmatprep.mubr.msk.f32.mxu1 %vm1059_vm1, %v494_v19 }
 0x225   :  { %9654 = vmatmul.mubr.msk.f32.gmra.mxu1 %vm1059_vm1, %v494_v19 }
 0x226   :  { %9655 = vmatprep.mubr.msk.f32.mxu1 %vm1059_vm1, %v499_v4 }
 0x229   :  { %9656 = vmatmul.mubr.msk.f32.gmra.mxu1 %vm1059_vm1, %v499_v4  ;;  %v81_v4 = vld [vmem:[#allocation6 + $0x48] sm:$0xff] }
 0x22a   :  { %9657 = vmatprep.mubr.msk.f32.mxu1 %vm1059_vm1, %v504_v61 }
 0x22d   :  { %9658 = vmatmul.mubr.msk.f32.gmra.mxu1 %vm1059_vm1, %v504_v61 }
 0x22e   :  { %9659 = vmatprep.mubr.msk.f32.mxu1 %vm1059_vm1, %v509_v1 }
 0x231   :  { %9660 = vmatmul.mubr.msk.f32.gmra.mxu1 %vm1059_vm1, %v509_v1 }
 0x232   :  { %9661 = vmatprep.mubr.msk.f32.mxu1 %vm1059_vm1, %v514_v42 }
 0x235   :  { %9662 = vmatmul.mubr.msk.f32.gmra.mxu1 %vm1059_vm1, %v514_v42 }
 0x236   :  { %9663 = vmatprep.mubr.msk.f32.mxu1 %vm1059_vm1, %v519_v5 }
 0x239   :  { %9664 = vmatmul.mubr.msk.f32.gmra.mxu1 %vm1059_vm1, %v519_v5 }
 0x23a   :  { %9665 = vmatprep.mubr.msk.f32.mxu1 %vm1059_vm1, %v524_v38 }
 0x23d   :  { %9666 = vmatmul.mubr.msk.f32.gmra.mxu1 %vm1059_vm1, %v524_v38  ;;  %v82_v38 = vld [vmem:[#allocation6 + $0x50] sm:$0xff] }
 0x23e   :  { %9667 = vmatprep.mubr.msk.f32.mxu1 %vm1059_vm1, %v529_v40 }
 0x241   :  { %9668 = vmatmul.mubr.msk.f32.gmra.mxu1 %vm1059_vm1, %v529_v40  ;;  %v83_v40 = vld [vmem:[#allocation6 + $0x58] sm:$0xff] }
 0x242   :  { %9669 = vmatprep.mubr.msk.f32.mxu1 %vm1059_vm1, %v534_v24 }
 0x245   :  { %9670 = vmatmul.mubr.msk.f32.gmra.mxu1 %vm1059_vm1, %v534_v24 }
 0x246   :  { %9671 = vmatprep.mubr.msk.f32.mxu1 %vm1059_vm1, %v539_v36 }
 0x249   :  { %9672 = vmatmul.mubr.msk.f32.gmra.mxu1 %vm1059_vm1, %v539_v36 }
 0x24a   :  { %9673 = vmatprep.mubr.msk.f32.mxu1 %vm1059_vm1, %v544_v7 }
 0x24d   :  { %9674 = vmatmul.mubr.msk.f32.gmra.mxu1 %vm1059_vm1, %v544_v7 }
 0x24e   :  { %9675 = vmatprep.mubr.msk.f32.mxu1 %vm1059_vm1, %v549_v41 }
 0x251   :  { %9676 = vmatmul.mubr.msk.f32.gmra.mxu1 %vm1059_vm1, %v549_v41 }
 0x252   :  { %9677 = vmatprep.mubr.msk.f32.mxu1 %vm1059_vm1, %v554_v50 }
 0x255   :  { %9678 = vmatmul.mubr.msk.f32.gmra.mxu1 %vm1059_vm1, %v554_v50 }
 0x256   :  { %9679 = vmatprep.mubr.msk.f32.mxu1 %vm1059_vm1, %v559_v18 }
 0x259   :  { %9680 = vmatmul.mubr.msk.f32.gmra.mxu1 %vm1059_vm1, %v559_v18  ;;  %v86_v18 = vld [vmem:[#allocation6 + $0x70] sm:$0xff] }
 0x25a   :  { %9681 = vmatprep.mubr.msk.f32.mxu1 %vm1059_vm1, %v564_v29 }
 0x25d   :  { %9682 = vmatmul.mubr.msk.f32.gmra.mxu1 %vm1059_vm1, %v564_v29  ;;  %v87_v29 = vld [vmem:[#allocation6 + $0x78] sm:$0xff] }
 0x25e   :  { %9683 = vmatprep.mubr.msk.f32.mxu1 %vm1059_vm1, %v569_v17 }
 0x261   :  { %9684 = vmatmul.mubr.msk.f32.gmra.mxu1 %vm1059_vm1, %v569_v17 }
 0x262   :  { %9685 = vmatprep.mubr.msk.f32.mxu1 %vm1059_vm1, %v574_v34 }
 0x265   :  { %9686 = vmatmul.mubr.msk.f32.gmra.mxu1 %vm1059_vm1, %v574_v34 }
 0x266   :  { %9687 = vmatprep.mubr.msk.f32.mxu1 %vm1059_vm1, %v579_v14 }
 0x269   :  { %9688 = vmatmul.mubr.msk.f32.gmra.mxu1 %vm1059_vm1, %v579_v14 }
 0x26a   :  { %9689 = vmatprep.mubr.msk.f32.mxu1 %vm1059_vm1, %v584_v39 }
 0x26d   :  { %9690 = vmatmul.mubr.msk.f32.gmra.mxu1 %vm1059_vm1, %v584_v39 }
 0x26e   :  { %9691 = vmatprep.mubr.msk.f32.mxu1 %vm1059_vm1, %v589_v13 }
 0x271   :  { %9692 = vmatmul.mubr.msk.f32.gmra.mxu1 %vm1059_vm1, %v589_v13 }
 0x272   :  { %9693 = vmatprep.mubr.msk.f32.mxu1 %vm1059_vm1, %v594_v20 }
 0x275   :  { %9694 = vmatmul.mubr.msk.f32.gmra.mxu1 %vm1059_vm1, %v594_v20  ;;  %v90_v20 = vld [vmem:[#allocation6 + $0x90] sm:$0xff] }
 0x2b9   :  { %v1318_v27 = vpop.f32.mrf.mxu1 }
 0x2ba   :  { %v12722_v26 = vadd.f32 %v1318_v27, %v72_v9  ;;  %v91_v27 = vld [vmem:[#allocation6 + $0x98] sm:$0xff] }
 0x2bb   :  { %v1320_v25 = vpop.f32.mrf.mxu1 }
 0x2bc   :  { %v12724_v43 = vadd.f32 %v1320_v25, %v73_v48 }
 0x2bd   :  { %v1324_v46 = vpop.f32.mrf.mxu1 }
 0x2be   :  { %v1509_v44 = vmax.f32 %v12722_v26, %v12724_v43  ;;  %v12728_v54 = vadd.f32 %v1324_v46, %v74_v11 }
 0x2bf   :  { %v1326_v51 = vpop.f32.mrf.mxu1 }
 0x2c0   :  { %v12730_v6 = vadd.f32 %v1326_v51, %v75_v3  ;;  %1510 = vmax.xlane.f32.xlu0 %v1509_v44  ;;  %v92_v3 = vld [vmem:[#allocation6 + $0xa0] sm:$0xff]  ;;  %v93_v51 = vld [vmem:[#allocation6 + $0xa8] sm:$0xff] }
 0x2c1   :  { %v1330_v49 = vpop.f32.mrf.mxu1 }
 0x2c2   :  { %v1512_v55 = vmax.f32 %v12728_v54, %v12730_v6  ;;  %v12734_v32 = vadd.f32 %v1330_v49, %v76_v8 }
 0x2c3   :  { %v1332_v15 = vpop.f32.mrf.mxu1 }
 0x2c4   :  { %v12736_v53 = vadd.f32 %v1332_v15, %v77_v35  ;;  %1513 = vmax.xlane.f32.xlu1 %v1512_v55  ;;  %v94_v15 = vld [vmem:[#allocation6 + $0xb0] sm:$0xff] }
 0x2c5   :  { %v1336_v0 = vpop.f32.mrf.mxu1 }
 0x2c6   :  { %v1515_v2 = vmax.f32 %v12734_v32, %v12736_v53  ;;  %v12740_v57 = vadd.f32 %v1336_v0, %v78_v10  ;;  %v95_v0 = vld [vmem:[#allocation6 + $0xb8] sm:$0xff] }
 0x2c7   :  { %v1338_v22 = vpop.f32.mrf.mxu1 }
 0x2c8   :  { %v12742_v30 = vadd.f32 %v1338_v22, %v79_v59  ;;  %1516 = vmax.xlane.f32.xlu1 %v1515_v2 }
 0x2c9   :  { %v1342_v19 = vpop.f32.mrf.mxu1 }
 0x2ca   :  { %v1518_v61 = vmax.f32 %v12740_v57, %v12742_v30  ;;  %v12746_v42 = vadd.f32 %v1342_v19, %v80_v63  ;;  %v96_v19 = vld [vmem:[#allocation6 + $0xc0] sm:$0xff] }
 0x2cb   :  { %v1344_v1 = vpop.f32.mrf.mxu1 }
 0x2cc   :  { %v12748_v5 = vadd.f32 %v1344_v1, %v81_v4  ;;  %1519 = vmax.xlane.f32.xlu1 %v1518_v61  ;;  %v97_v61 = vld [vmem:[#allocation6 + $0xc8] sm:$0xff] }
 0x2cd   :  { %v1348_v12 = vpop.f32.mrf.mxu1 }
 0x2ce   :  { %v1521_v31 = vmax.f32 %v12746_v42, %v12748_v5  ;;  %v12752_v16 = vadd.f32 %v1348_v12, %v82_v38 }
 0x2cf   :  { %v1350_v24 = vpop.f32.mrf.mxu1 }
 0x2d0   :  { %v12754_v36 = vadd.f32 %v1350_v24, %v83_v40  ;;  %1522 = vmax.xlane.f32.xlu0 %v1521_v31  ;;  %v98_v31 = vld [vmem:[#allocation6 + $0xd0] sm:$0xff] }
 0x2d1   :  { %v1354_v7 = vpop.f32.mrf.mxu1 }
 0x2d2   :  { %v1524_v41 = vmax.f32 %v12752_v16, %v12754_v36  ;;  %v12758_v50 = vadd.f32 %v1354_v7, %v84_v56  ;;  %v99_v56 = vld [vmem:[#allocation6 + $0xd8] sm:$0xff] }
 0x2d3   :  { %v1356_v58 = vpop.f32.mrf.mxu1 }
 0x2d4   :  { %v12760_v37 = vadd.f32 %v1356_v58, %v85_v23  ;;  %1525 = vmax.xlane.f32.xlu1 %v1524_v41 }
 0x2d5   :  { %v1360_v45 = vpop.f32.mrf.mxu1 }
 0x2d6   :  { %v1527_v62 = vmax.f32 %v12758_v50, %v12760_v37  ;;  %v12764_v52 = vadd.f32 %v1360_v45, %v86_v18  ;;  %v100_v18 = vld [vmem:[#allocation6 + $0xe0] sm:$0xff] }
 0x2d7   :  { %v1362_v17 = vpop.f32.mrf.mxu1 }
 0x2d8   :  { %v12766_v34 = vadd.f32 %v1362_v17, %v87_v29  ;;  %1528 = vmax.xlane.f32.xlu0 %v1527_v62  ;;  %v101_v29 = vld [vmem:[#allocation6 + $0xe8] sm:$0xff] }
 0x2d9   :  { %v1366_v14 = vpop.f32.mrf.mxu1 }
 0x2da   :  { %v1530_v39 = vmax.f32 %v12764_v52, %v12766_v34  ;;  %v12770_v13 = vadd.f32 %v1366_v14, %v88_v33 }
 0x2db   :  { %v1368_v47 = vpop.f32.mrf.mxu1 }
 0x2dc   :  { %v12772_v28 = vadd.f32 %v1368_v47, %v89_v60  ;;  %1531 = vmax.xlane.f32.xlu1 %v1530_v39  ;;  %v102_v60 = vld [vmem:[#allocation6 + $0xf0] sm:$0xff]  ;;  %v103_v47 = vld [vmem:[#allocation6 + $0xf8] sm:$0xff] }
 0x2dd   :  { %v1372_v9 = vpop.f32.mrf.mxu1 }
 0x2de   :  { %v1533_v48 = vmax.f32 %v12770_v13, %v12772_v28  ;;  %v12776_v11 = vadd.f32 %v1372_v9, %v90_v20 }
 0x2df   :  { %v1374_v25 = vpop.f32.mrf.mxu1 }
 0x2e0   :  { %v12778_v46 = vadd.f32 %v1374_v25, %v91_v27  ;;  %1534 = vmax.xlane.f32.xlu0 %v1533_v48  ;;  %v104_v25 = vld [vmem:[#allocation6 + $0x100] sm:$0xff] }
 0x2e1   :  { %v1378_v44 = vpop.f32.mrf.mxu1 }
 0x2e2   :  { %v1536_v8 = vmax.f32 %v12776_v11, %v12778_v46  ;;  %v12782_v35 = vadd.f32 %v1378_v44, %v92_v3  ;;  %v105_v44 = vld [vmem:[#allocation6 + $0x108] sm:$0xff] }
 0x2e3   :  { %v1380_v49 = vpop.f32.mrf.mxu1 }
 0x2e4   :  { %v12784_v55 = vadd.f32 %v1380_v49, %v93_v51  ;;  %1537 = vmax.xlane.f32.xlu1 %v1536_v8 }
 0x2e5   :  { %v1384_v10 = vpop.f32.mrf.mxu1 }
 0x2e6   :  { %v1539_v59 = vmax.f32 %v12782_v35, %v12784_v55  ;;  %v12788_v22 = vadd.f32 %v1384_v10, %v94_v15  ;;  %v106_v10 = vld [vmem:[#allocation6 + $0x110] sm:$0xff] }
 0x2e7   :  { %v1386_v2 = vpop.f32.mrf.mxu1 }
 0x2e8   :  { %v12790_v63 = vadd.f32 %v1386_v2, %v95_v0  ;;  %1540 = vmax.xlane.f32.xlu0 %v1539_v59  ;;  %v107_v59 = vld [vmem:[#allocation6 + $0x118] sm:$0xff] }
 0x2e9   :  { %v1390_v4 = vpop.f32.mrf.mxu1 }
 0x2ea   :  { %v1542_v1 = vmax.f32 %v12788_v22, %v12790_v63  ;;  %v12794_v12 = vadd.f32 %v1390_v4, %v96_v19 }
 0x2eb   :  { %v1392_v38 = vpop.f32.mrf.mxu1 }
 0x2ec   :  { %v12796_v40 = vadd.f32 %v1392_v38, %v97_v61  ;;  %1543 = vmax.xlane.f32.xlu1 %v1542_v1  ;;  %v108_v1 = vld [vmem:[#allocation6 + $0x120] sm:$0xff] }
 0x2ed   :  { %v1396_v24 = vpop.f32.mrf.mxu1 }
 0x2ee   :  { %v1545_v7 = vmax.f32 %v12794_v12, %v12796_v40  ;;  %v12800_v41 = vadd.f32 %v1396_v24, %v98_v31  ;;  %v109_v31 = vld [vmem:[#allocation6 + $0x128] sm:$0xff] }
 0x2ef   :  { %v1398_v23 = vpop.f32.mrf.mxu1 }
 0x2f0   :  { %v12802_v58 = vadd.f32 %v1398_v23, %v99_v56  ;;  %1546 = vmax.xlane.f32.xlu0 %v1545_v7 }
 0x2f1   :  { %v1402_v45 = vpop.f32.mrf.mxu1 }
 0x2f2   :  { %v1548_v62 = vmax.f32 %v12800_v41, %v12802_v58  ;;  %v12806_v33 = vadd.f32 %v1402_v45, %v100_v18  ;;  %v110_v18 = vld [vmem:[#allocation6 + $0x130] sm:$0xff] }
 0x2f3   :  { %v1404_v17 = vpop.f32.mrf.mxu1 }
 0x2f4   :  { %v12808_v14 = vadd.f32 %v1404_v17, %v101_v29  ;;  %1549 = vmax.xlane.f32.xlu1 %v1548_v62  ;;  %v111_v29 = vld [vmem:[#allocation6 + $0x138] sm:$0xff] }
 0x2f5   :  { %v1408_v39 = vpop.f32.mrf.mxu1 }
 0x2f6   :  { %v1551_v20 = vmax.f32 %v12806_v33, %v12808_v14  ;;  %v12812_v27 = vadd.f32 %v1408_v39, %v102_v60 }
 0x2f7   :  { %v1410_v9 = vpop.f32.mrf.mxu1 }
 0x2f8   :  { %v12814_v48 = vadd.f32 %v1410_v9, %v103_v47  ;;  %1552 = vmax.xlane.f32.xlu0 %v1551_v20  ;;  %v112_v47 = vld [vmem:[#allocation6 + $0x140] sm:$0xff]  ;;  %v113_v9 = vld [vmem:[#allocation6 + $0x148] sm:$0xff] }
 0x2f9   :  { %v1414_v3 = vpop.f32.mrf.mxu1 }
 0x2fa   :  { %v1554_v51 = vmax.f32 %v12812_v27, %v12814_v48  ;;  %v12818_v49 = vadd.f32 %v1414_v3, %v104_v25 }
 0x2fb   :  { %v1416_v8 = vpop.f32.mrf.mxu1 }
 0x2fc   :  { %v12820_v15 = vadd.f32 %v1416_v8, %v105_v44  ;;  %1555 = vmax.xlane.f32.xlu1 %v1554_v51  ;;  %v114_v8 = vld [vmem:[#allocation6 + $0x150] sm:$0xff] }
 0x2fd   :  { %v1420_v0 = vpop.f32.mrf.mxu1 }
 0x2fe   :  { %v1557_v2 = vmax.f32 %v12818_v49, %v12820_v15  ;;  %v12824_v4 = vadd.f32 %v1420_v0, %v106_v10  ;;  %v115_v0 = vld [vmem:[#allocation6 + $0x158] sm:$0xff] }
 0x2ff   :  { %v1422_v19 = vpop.f32.mrf.mxu1 }
 0x300   :  { %v12826_v61 = vadd.f32 %v1422_v19, %v107_v59  ;;  %1558 = vmax.xlane.f32.xlu0 %v1557_v2 }
 0x301   :  { %v1426_v38 = vpop.f32.mrf.mxu1 }
 0x302   :  { %v1560_v24 = vmax.f32 %v12824_v4, %v12826_v61  ;;  %v12830_v7 = vadd.f32 %v1426_v38, %v108_v1  ;;  %v116_v38 = vld [vmem:[#allocation6 + $0x160] sm:$0xff] }
 0x303   :  { %v1428_v56 = vpop.f32.mrf.mxu1 }
 0x304   :  { %v12832_v23 = vadd.f32 %v1428_v56, %v109_v31  ;;  %1561 = vmax.xlane.f32.xlu1 %v1560_v24  ;;  %v117_v24 = vld [vmem:[#allocation6 + $0x168] sm:$0xff] }
 0x305   :  { %v1432_v45 = vpop.f32.mrf.mxu1 }
 0x306   :  { %v1563_v62 = vmax.f32 %v12830_v7, %v12832_v23  ;;  %v12836_v60 = vadd.f32 %v1432_v45, %v110_v18 }
 0x307   :  { %v1434_v17 = vpop.f32.mrf.mxu1 }
 0x308   :  { %v12838_v39 = vadd.f32 %v1434_v17, %v111_v29  ;;  %1564 = vmax.xlane.f32.xlu0 %v1563_v62  ;;  %v118_v62 = vld [vmem:[#allocation6 + $0x170] sm:$0xff] }
 0x309   :  { %v1438_v20 = vpop.f32.mrf.mxu1 }
 0x30a   :  { %v1566_v25 = vmax.f32 %v12836_v60, %v12838_v39  ;;  %v12842_v44 = vadd.f32 %v1438_v20, %v112_v47  ;;  %v119_v47 = vld [vmem:[#allocation6 + $0x178] sm:$0xff] }
 0x30b   :  { %v1440_v3 = vpop.f32.mrf.mxu1 }
 0x30c   :  { %v12844_v51 = vadd.f32 %v1440_v3, %v113_v9  ;;  %1567 = vmax.xlane.f32.xlu1 %v1566_v25 }
 0x30d   :  { %v1444_v10 = vpop.f32.mrf.mxu1 }
 0x30e   :  { %v1569_v59 = vmax.f32 %v12842_v44, %v12844_v51  ;;  %v12848_v19 = vadd.f32 %v1444_v10, %v114_v8  ;;  %v120_v8 = vld [vmem:[#allocation6 + $0x180] sm:$0xff] }
 0x30f   :  { %v1446_v2 = vpop.f32.mrf.mxu1 }
 0x310   :  { %v12850_v1 = vadd.f32 %v1446_v2, %v115_v0  ;;  %1570 = vmax.xlane.f32.xlu0 %v1569_v59  ;;  %v121_v0 = vld [vmem:[#allocation6 + $0x188] sm:$0xff] }
 0x311   :  { %v1450_v31 = vpop.f32.mrf.mxu1 }
 0x312   :  { %v1572_v56 = vmax.f32 %v12848_v19, %v12850_v1  ;;  %v12854_v45 = vadd.f32 %v1450_v31, %v116_v38 }
 0x313   :  { %v1452_v18 = vpop.f32.mrf.mxu1 }
 0x314   :  { %v12856_v29 = vadd.f32 %v1452_v18, %v117_v24  ;;  %1573 = vmax.xlane.f32.xlu1 %v1572_v56  ;;  %v122_v24 = vld [vmem:[#allocation6 + $0x190] sm:$0xff]  ;;  %v123_v18 = vld [vmem:[#allocation6 + $0x198] sm:$0xff] }
 0x315   :  { %v1456_v17 = vpop.f32.mrf.mxu1 }
 0x316   :  { %v1575_v20 = vmax.f32 %v12854_v45, %v12856_v29  ;;  %v12860_v25 = vadd.f32 %v1456_v17, %v118_v62 }
 0x317   :  { %v1458_v9 = vpop.f32.mrf.mxu1 }
 0x318   :  { %v12862_v3 = vadd.f32 %v1458_v9, %v119_v47  ;;  %1576 = vmax.xlane.f32.xlu0 %v1575_v20  ;;  %v124_v9 = vld [vmem:[#allocation6 + $0x1a0] sm:$0xff] }
 0x319   :  { %v1462_v10 = vpop.f32.mrf.mxu1 }
 0x31a   :  { %17652 = vst [vmem:[#allocation45_spill] sm:$0xff] %v12862_v3  ;;  %v1578_v59 = vmax.f32 %v12860_v25, %v12862_v3  ;;  %v12866_v38 = vadd.f32 %v1462_v10, %v120_v8  ;;  %v125_v3 = vld [vmem:[#allocation6 + $0x1a8] sm:$0xff] }
 0x31b   :  { %v1464_v2 = vpop.f32.mrf.mxu1 }
 0x31c   :  { %17653 = vst [vmem:[#allocation44_spill] sm:$0xff] %v12866_v38  ;;  %v12868_v31 = vadd.f32 %v1464_v2, %v121_v0  ;;  %1579 = vmax.xlane.f32.xlu0 %v1578_v59  ;;  %v126_v2 = vld [vmem:[#allocation6 + $0x1b0] sm:$0xff] }
 0x31d   :  { %v1468_v56 = vpop.f32.mrf.mxu1 }
 0x31e   :  { %17654 = vst [vmem:[#allocation47_spill] sm:$0xff] %v12868_v31  ;;  %v1581_v62 = vmax.f32 %v12866_v38, %v12868_v31  ;;  %v12872_v47 = vadd.f32 %v1468_v56, %v122_v24  ;;  %v127_v38 = vld [vmem:[#allocation6 + $0x1b8] sm:$0xff] }
 0x31f   :  { %v1470_v17 = vpop.f32.mrf.mxu1 }
 0x320   :  { %17655 = vst [vmem:[#allocation46_spill] sm:$0xff] %v12872_v47  ;;  %v12874_v20 = vadd.f32 %v1470_v17, %v123_v18  ;;  %1582 = vmax.xlane.f32.xlu0 %v1581_v62  ;;  %v128_v17 = vld [vmem:[#allocation6 + $0x1c0] sm:$0xff] }
 0x321   :  { %v1474_v21 = vpop.f32.mrf.mxu1 }
 0x322   :  { %17656 = vst [vmem:[#allocation49_spill] sm:$0xff] %v12874_v20  ;;  %v1584_v8 = vmax.f32 %v12872_v47, %v12874_v20  ;;  %v12878_v0 = vadd.f32 %v1474_v21, %v124_v9  ;;  %v129_v47 = vld [vmem:[#allocation6 + $0x1c8] sm:$0xff] }
 0x323   :  { %v1476_v10 = vpop.f32.mrf.mxu1 }
 0x324   :  { %17657 = vst [vmem:[#allocation48_spill] sm:$0xff] %v12878_v0  ;;  %v12880_v59 = vadd.f32 %v1476_v10, %v125_v3  ;;  %1585 = vmax.xlane.f32.xlu0 %v1584_v8  ;;  %v130_v10 = vld [vmem:[#allocation6 + $0x1d0] sm:$0xff] }
 0x325   :  { %v1480_v31 = vpop.f32.mrf.mxu1 }
 0x326   :  { %17658 = vst [vmem:[#allocation51_spill] sm:$0xff] %v12880_v59  ;;  %v1587_v24 = vmax.f32 %v12878_v0, %v12880_v59  ;;  %v12884_v18 = vadd.f32 %v1480_v31, %v126_v2  ;;  %v131_v0 = vld [vmem:[#allocation6 + $0x1d8] sm:$0xff] }
 0x327   :  { %v1482_v56 = vpop.f32.mrf.mxu1 }
 0x328   :  { %17659 = vst [vmem:[#allocation50_spill] sm:$0xff] %v12884_v18  ;;  %v12886_v62 = vadd.f32 %v1482_v56, %v127_v38  ;;  %1588 = vmax.xlane.f32.xlu0 %v1587_v24  ;;  %v132_v56 = vld [vmem:[#allocation6 + $0x1e0] sm:$0xff] }
 0x329   :  { %v1486_v20 = vpop.f32.mrf.mxu1 }
 0x32a   :  { %17660 = vst [vmem:[#allocation53_spill] sm:$0xff] %v12886_v62  ;;  %v1590_v21 = vmax.f32 %v12884_v18, %v12886_v62  ;;  %v12890_v9 = vadd.f32 %v1486_v20, %v128_v17  ;;  %v133_v18 = vld [vmem:[#allocation6 + $0x1e8] sm:$0xff] }
 0x32b   :  { %v1488_v3 = vpop.f32.mrf.mxu1 }
 0x32c   :  { %17661 = vst [vmem:[#allocation52_spill] sm:$0xff] %v12890_v9  ;;  %v12892_v8 = vadd.f32 %v1488_v3, %v129_v47  ;;  %1591 = vmax.xlane.f32.xlu0 %v1590_v21  ;;  %v134_v3 = vld [vmem:[#allocation6 + $0x1f0] sm:$0xff] }
 0x32d   :  { %v1492_v59 = vpop.f32.mrf.mxu1 }
 0x32e   :  { %17662 = vst [vmem:[#allocation55_spill] sm:$0xff] %v12892_v8  ;;  %v1593_v38 = vmax.f32 %v12890_v9, %v12892_v8  ;;  %v12896_v2 = vadd.f32 %v1492_v59, %v130_v10  ;;  %v135_v9 = vld [vmem:[#allocation6 + $0x1f8] sm:$0xff] }
 0x32f   :  { %v1494_v31 = vpop.f32.mrf.mxu1 }
 0x330   :  { %v12898_v24 = vadd.f32 %v1494_v31, %v131_v0  ;;  %1594 = vmax.xlane.f32.xlu0 %v1593_v38 }
 0x331   :  { %v1498_v62 = vpop.f32.mrf.mxu1 }
 0x332   :  { %17663 = vst [vmem:[#allocation54_spill] sm:$0xff] %v12898_v24  ;;  %v1596_v47 = vmax.f32 %v12896_v2, %v12898_v24  ;;  %v12902_v17 = vadd.f32 %v1498_v62, %v132_v56 }
 0x333   :  { %v1500_v20 = vpop.f32.mrf.mxu1 }
 0x334   :  { %v12904_v21 = vadd.f32 %v1500_v20, %v133_v18  ;;  %1597 = vmax.xlane.f32.xlu0 %v1596_v47 }
 0x335   :  { %v1504_v8 = vpop.f32.mrf.mxu1 }
 0x336   :  { %17664 = vst [vmem:[#allocation57_spill] sm:$0xff] %v12904_v21  ;;  %v1599_v0 = vmax.f32 %v12902_v17, %v12904_v21  ;;  %v12908_v10 = vadd.f32 %v1504_v8, %v134_v3 }
 0x337   :  { %v1506_v59 = vpop.f32.mrf.mxu1 }
 0x338   :  { %v12910_v38 = vadd.f32 %v1506_v59, %v135_v9  ;;  %1600 = vmax.xlane.f32.xlu0 %v1599_v0 }
 0x33a   :  { %v1602_v31 = vmax.f32 %v12908_v10, %v12910_v38 }
 0x33c   :  { %1603 = vmax.xlane.f32.xlu0 %v1602_v31 }
 0x349   :  { %v1511_v62 = vpop.xlane.xlu0 %1510 }
 0x34a   :  { %v1605_v18 = vsub.f32 %v12722_v26, %v1511_v62  ;;  %v1606_v56 = vsub.f32 %v12724_v43, %v1511_v62 }
 0x34c   :  { %v1669_v47 = vmul.f32 1.442695, %v1605_v18  ;;  %v1671_v20 = vmul.f32 1.442695, %v1606_v56 }
 0x34d   :  { %v1514_v24 = vpop.xlane.xlu1 %1513 }
 0x34e   :  { %10919 = vpow2.f32 %v1669_v47  ;;  %v1607_v21 = vsub.f32 %v12728_v54, %v1514_v24  ;;  %v1608_v8 = vsub.f32 %v12730_v6, %v1514_v24 }
 0x34f   :  { %10921 = vpow2.f32 %v1671_v20 }
 0x350   :  { %v1673_v9 = vmul.f32 1.442695, %v1607_v21  ;;  %v1675_v3 = vmul.f32 1.442695, %v1608_v8 }
 0x351   :  { %v1517_v0 = vpop.xlane.xlu1 %1516 }
 0x352   :  { %10923 = vpow2.f32 %v1673_v9  ;;  %v1609_v59 = vsub.f32 %v12734_v32, %v1517_v0  ;;  %v1610_v31 = vsub.f32 %v12736_v53, %v1517_v0 }
 0x353   :  { %10925 = vpow2.f32 %v1675_v3 }
 0x354   :  { %v1677_v26 = vmul.f32 1.442695, %v1609_v59  ;;  %v1679_v43 = vmul.f32 1.442695, %v1610_v31 }
 0x355   :  { %v1520_v62 = vpop.xlane.xlu1 %1519 }
 0x356   :  { %10927 = vpow2.f32 %v1677_v26  ;;  %v1611_v18 = vsub.f32 %v12740_v57, %v1520_v62  ;;  %v1612_v54 = vsub.f32 %v12742_v30, %v1520_v62 }
 0x357   :  { %10929 = vpow2.f32 %v1679_v43 }
 0x358   :  { %v1681_v6 = vmul.f32 1.442695, %v1611_v18  ;;  %v1683_v24 = vmul.f32 1.442695, %v1612_v54 }
 0x359   :  { %v1523_v21 = vpop.xlane.xlu0 %1522 }
 0x35a   :  { %10931 = vpow2.f32 %v1681_v6  ;;  %v1613_v56 = vsub.f32 %v12746_v42, %v1523_v21  ;;  %v1614_v32 = vsub.f32 %v12748_v5, %v1523_v21 }
 0x35b   :  { %v12924_v47 = vpop.eup %10919  ;;  %10933 = vpow2.f32 %v1683_v24 }
 0x35c   :  { %v12926_v53 = vpop.eup %10921  ;;  %v1685_v20 = vmul.f32 1.442695, %v1613_v56  ;;  %v1687_v8 = vmul.f32 1.442695, %v1614_v32 }
 0x35d   :  { %v1526_v9 = vpop.xlane.xlu1 %1525  ;;  %v1797_v57 = vadd.f32 %v12926_v53, %v12924_v47 }
 0x35e   :  { %10935 = vpow2.f32 %v1685_v20  ;;  %v1615_v30 = vsub.f32 %v12752_v16, %v1526_v9  ;;  %v1616_v3 = vsub.f32 %v12754_v36, %v1526_v9 }
 0x35f   :  { %v12932_v0 = vpop.eup %10923  ;;  %10937 = vpow2.f32 %v1687_v8  ;;  %1798 = vadd.xlane.f32.xlu1 %v1797_v57 }
 0x360   :  { %v12934_v42 = vpop.eup %10925  ;;  %v1689_v5 = vmul.f32 1.442695, %v1615_v30  ;;  %v1691_v59 = vmul.f32 1.442695, %v1616_v3 }
 0x361   :  { %v1529_v31 = vpop.xlane.xlu0 %1528  ;;  %v1800_v26 = vadd.f32 %v12934_v42, %v12932_v0 }
 0x362   :  { %10939 = vpow2.f32 %v1689_v5  ;;  %v1617_v43 = vsub.f32 %v12758_v50, %v1529_v31  ;;  %v1618_v62 = vsub.f32 %v12760_v37, %v1529_v31 }
 0x363   :  { %v12940_v16 = vpop.eup %10927  ;;  %10941 = vpow2.f32 %v1691_v59  ;;  %1801 = vadd.xlane.f32.xlu1 %v1800_v26 }
 0x364   :  { %v12942_v36 = vpop.eup %10929  ;;  %v1693_v18 = vmul.f32 1.442695, %v1617_v43  ;;  %v1695_v54 = vmul.f32 1.442695, %v1618_v62 }
 0x365   :  { %v1532_v6 = vpop.xlane.xlu1 %1531  ;;  %v1803_v24 = vadd.f32 %v12942_v36, %v12940_v16 }
 0x366   :  { %10943 = vpow2.f32 %v1693_v18  ;;  %v1619_v21 = vsub.f32 %v12764_v52, %v1532_v6  ;;  %v1620_v56 = vsub.f32 %v12766_v34, %v1532_v6 }
 0x367   :  { %v12948_v50 = vpop.eup %10931  ;;  %10945 = vpow2.f32 %v1695_v54  ;;  %1804 = vadd.xlane.f32.xlu1 %v1803_v24 }
 0x368   :  { %v12950_v37 = vpop.eup %10933  ;;  %v1697_v32 = vmul.f32 1.442695, %v1619_v21  ;;  %v1699_v20 = vmul.f32 1.442695, %v1620_v56 }
 0x369   :  { %v1535_v8 = vpop.xlane.xlu0 %1534  ;;  %v1806_v9 = vadd.f32 %v12950_v37, %v12948_v50 }
 0x36a   :  { %10947 = vpow2.f32 %v1697_v32  ;;  %v1621_v57 = vsub.f32 %v12770_v13, %v1535_v8  ;;  %v1622_v30 = vsub.f32 %v12772_v28, %v1535_v8 }
 0x36b   :  { %v12956_v52 = vpop.eup %10935  ;;  %10949 = vpow2.f32 %v1699_v20  ;;  %1807 = vadd.xlane.f32.xlu1 %v1806_v9 }
 0x36c   :  { %v12958_v34 = vpop.eup %10937  ;;  %v1701_v3 = vmul.f32 1.442695, %v1621_v57  ;;  %v1703_v5 = vmul.f32 1.442695, %v1622_v30 }
 0x36d   :  { %v1538_v59 = vpop.xlane.xlu1 %1537  ;;  %v1809_v31 = vadd.f32 %v12958_v34, %v12956_v52 }
 0x36e   :  { %10951 = vpow2.f32 %v1701_v3  ;;  %v1623_v26 = vsub.f32 %v12776_v11, %v1538_v59  ;;  %v1624_v43 = vsub.f32 %v12778_v46, %v1538_v59 }
 0x36f   :  { %v12964_v13 = vpop.eup %10939  ;;  %10953 = vpow2.f32 %v1703_v5  ;;  %1810 = vadd.xlane.f32.xlu1 %v1809_v31 }
 0x370   :  { %v12966_v28 = vpop.eup %10941  ;;  %v1705_v62 = vmul.f32 1.442695, %v1623_v26  ;;  %v1707_v18 = vmul.f32 1.442695, %v1624_v43 }
 0x371   :  { %v1541_v54 = vpop.xlane.xlu0 %1540  ;;  %v1812_v6 = vadd.f32 %v12966_v28, %v12964_v13 }
 0x372   :  { %10955 = vpow2.f32 %v1705_v62  ;;  %v1625_v24 = vsub.f32 %v12782_v35, %v1541_v54  ;;  %v1626_v21 = vsub.f32 %v12784_v55, %v1541_v54 }
 0x373   :  { %v12972_v11 = vpop.eup %10943  ;;  %10957 = vpow2.f32 %v1707_v18  ;;  %1813 = vadd.xlane.f32.xlu1 %v1812_v6 }
 0x374   :  { %v12974_v46 = vpop.eup %10945  ;;  %v1709_v56 = vmul.f32 1.442695, %v1625_v24  ;;  %v1711_v32 = vmul.f32 1.442695, %v1626_v21 }
 0x375   :  { %v1544_v20 = vpop.xlane.xlu1 %1543  ;;  %v1815_v8 = vadd.f32 %v12974_v46, %v12972_v11 }
 0x376   :  { %10959 = vpow2.f32 %v1709_v56  ;;  %v1627_v9 = vsub.f32 %v12788_v22, %v1544_v20  ;;  %v1628_v57 = vsub.f32 %v12790_v63, %v1544_v20 }
 0x377   :  { %v12980_v35 = vpop.eup %10947  ;;  %10961 = vpow2.f32 %v1711_v32  ;;  %1816 = vadd.xlane.f32.xlu1 %v1815_v8 }
 0x378   :  { %v12982_v55 = vpop.eup %10949  ;;  %v1713_v30 = vmul.f32 1.442695, %v1627_v9  ;;  %v1715_v3 = vmul.f32 1.442695, %v1628_v57 }
 0x379   :  { %v1547_v5 = vpop.xlane.xlu0 %1546  ;;  %v1818_v59 = vadd.f32 %v12982_v55, %v12980_v35 }
 0x37a   :  { %10963 = vpow2.f32 %v1713_v30  ;;  %v1629_v31 = vsub.f32 %v12794_v12, %v1547_v5  ;;  %v1630_v26 = vsub.f32 %v12796_v40, %v1547_v5 }
 0x37b   :  { %v12988_v22 = vpop.eup %10951  ;;  %10965 = vpow2.f32 %v1715_v3  ;;  %1819 = vadd.xlane.f32.xlu1 %v1818_v59 }
 0x37c   :  { %v12990_v63 = vpop.eup %10953  ;;  %v1717_v43 = vmul.f32 1.442695, %v1629_v31  ;;  %v1719_v62 = vmul.f32 1.442695, %v1630_v26 }
 0x37d   :  { %v1550_v18 = vpop.xlane.xlu1 %1549  ;;  %v1821_v54 = vadd.f32 %v12990_v63, %v12988_v22 }
 0x37e   :  { %10967 = vpow2.f32 %v1717_v43  ;;  %v1631_v6 = vsub.f32 %v12800_v41, %v1550_v18  ;;  %v1632_v24 = vsub.f32 %v12802_v58, %v1550_v18 }
 0x37f   :  { %v12996_v12 = vpop.eup %10955  ;;  %10969 = vpow2.f32 %v1719_v62  ;;  %1822 = vadd.xlane.f32.xlu1 %v1821_v54 }
 0x380   :  { %v12998_v40 = vpop.eup %10957  ;;  %v1721_v21 = vmul.f32 1.442695, %v1631_v6  ;;  %v1723_v56 = vmul.f32 1.442695, %v1632_v24 }
 0x381   :  { %v1553_v32 = vpop.xlane.xlu0 %1552  ;;  %v1824_v20 = vadd.f32 %v12998_v40, %v12996_v12 }
 0x382   :  { %10971 = vpow2.f32 %v1721_v21  ;;  %v1633_v8 = vsub.f32 %v12806_v33, %v1553_v32  ;;  %v1634_v9 = vsub.f32 %v12808_v14, %v1553_v32 }
 0x383   :  { %v13004_v41 = vpop.eup %10959  ;;  %10973 = vpow2.f32 %v1723_v56  ;;  %1825 = vadd.xlane.f32.xlu1 %v1824_v20 }
 0x384   :  { %v13006_v58 = vpop.eup %10961  ;;  %v1725_v57 = vmul.f32 1.442695, %v1633_v8  ;;  %v1727_v30 = vmul.f32 1.442695, %v1634_v9 }
 0x385   :  { %v1556_v3 = vpop.xlane.xlu1 %1555  ;;  %v1827_v5 = vadd.f32 %v13006_v58, %v13004_v41 }
 0x386   :  { %10975 = vpow2.f32 %v1725_v57  ;;  %v1635_v59 = vsub.f32 %v12812_v27, %v1556_v3  ;;  %v1636_v31 = vsub.f32 %v12814_v48, %v1556_v3 }
 0x387   :  { %v13012_v33 = vpop.eup %10963  ;;  %10977 = vpow2.f32 %v1727_v30  ;;  %1828 = vadd.xlane.f32.xlu0 %v1827_v5 }
 0x388   :  { %v13014_v14 = vpop.eup %10965  ;;  %v1729_v26 = vmul.f32 1.442695, %v1635_v59  ;;  %v1731_v43 = vmul.f32 1.442695, %v1636_v31 }
 0x389   :  { %v1559_v62 = vpop.xlane.xlu0 %1558  ;;  %v1830_v18 = vadd.f32 %v13014_v14, %v13012_v33 }
 0x38a   :  { %10979 = vpow2.f32 %v1729_v26  ;;  %v1637_v54 = vsub.f32 %v12818_v49, %v1559_v62  ;;  %v1638_v6 = vsub.f32 %v12820_v15, %v1559_v62 }
 0x38b   :  { %v13020_v27 = vpop.eup %10967  ;;  %10981 = vpow2.f32 %v1731_v43  ;;  %1831 = vadd.xlane.f32.xlu1 %v1830_v18 }
 0x38c   :  { %v13022_v48 = vpop.eup %10969  ;;  %v1733_v24 = vmul.f32 1.442695, %v1637_v54  ;;  %v1735_v21 = vmul.f32 1.442695, %v1638_v6 }
 0x38d   :  { %v1562_v56 = vpop.xlane.xlu1 %1561  ;;  %v1833_v32 = vadd.f32 %v13022_v48, %v13020_v27 }
 0x38e   :  { %10983 = vpow2.f32 %v1733_v24  ;;  %v1639_v20 = vsub.f32 %v12824_v4, %v1562_v56  ;;  %v1640_v8 = vsub.f32 %v12826_v61, %v1562_v56 }
 0x38f   :  { %v13028_v49 = vpop.eup %10971  ;;  %10985 = vpow2.f32 %v1735_v21  ;;  %1834 = vadd.xlane.f32.xlu0 %v1833_v32 }
 0x390   :  { %v13030_v15 = vpop.eup %10973  ;;  %v1737_v9 = vmul.f32 1.442695, %v1639_v20  ;;  %v1739_v57 = vmul.f32 1.442695, %v1640_v8 }
 0x391   :  { %v1565_v30 = vpop.xlane.xlu0 %1564  ;;  %v1836_v3 = vadd.f32 %v13030_v15, %v13028_v49 }
 0x392   :  { %10987 = vpow2.f32 %v1737_v9  ;;  %v1641_v5 = vsub.f32 %v12830_v7, %v1565_v30  ;;  %v1642_v59 = vsub.f32 %v12832_v23, %v1565_v30 }
 0x393   :  { %v13036_v4 = vpop.eup %10975  ;;  %10989 = vpow2.f32 %v1739_v57  ;;  %1837 = vadd.xlane.f32.xlu1 %v1836_v3 }
 0x394   :  { %v13038_v61 = vpop.eup %10977  ;;  %v1741_v31 = vmul.f32 1.442695, %v1641_v5  ;;  %v1743_v26 = vmul.f32 1.442695, %v1642_v59 }
 0x395   :  { %v1568_v43 = vpop.xlane.xlu1 %1567  ;;  %v1839_v62 = vadd.f32 %v13038_v61, %v13036_v4 }
 0x396   :  { %10991 = vpow2.f32 %v1741_v31  ;;  %v1643_v18 = vsub.f32 %v12836_v60, %v1568_v43  ;;  %v1644_v54 = vsub.f32 %v12838_v39, %v1568_v43 }
 0x397   :  { %v13044_v7 = vpop.eup %10979  ;;  %10993 = vpow2.f32 %v1743_v26  ;;  %1840 = vadd.xlane.f32.xlu0 %v1839_v62 }
 0x398   :  { %v13046_v23 = vpop.eup %10981  ;;  %v1745_v6 = vmul.f32 1.442695, %v1643_v18  ;;  %v1747_v24 = vmul.f32 1.442695, %v1644_v54 }
 0x399   :  { %v1571_v21 = vpop.xlane.xlu0 %1570  ;;  %v1842_v56 = vadd.f32 %v13046_v23, %v13044_v7 }
 0x39a   :  { %10995 = vpow2.f32 %v1745_v6  ;;  %v1645_v32 = vsub.f32 %v12842_v44, %v1571_v21  ;;  %v1646_v20 = vsub.f32 %v12844_v51, %v1571_v21 }
 0x39b   :  { %v13052_v60 = vpop.eup %10983  ;;  %10997 = vpow2.f32 %v1747_v24  ;;  %1843 = vadd.xlane.f32.xlu1 %v1842_v56 }
 0x39c   :  { %v13054_v39 = vpop.eup %10985  ;;  %v1749_v8 = vmul.f32 1.442695, %v1645_v32  ;;  %v1751_v9 = vmul.f32 1.442695, %v1646_v20  ;;  %v17665_v32 = vld [vmem:[#allocation45_spill] sm:$0xff] }
 0x39d   :  { %v1574_v57 = vpop.xlane.xlu1 %1573  ;;  %v1845_v30 = vadd.f32 %v13054_v39, %v13052_v60 }
 0x39e   :  { %10999 = vpow2.f32 %v1749_v8  ;;  %v1647_v3 = vsub.f32 %v12848_v19, %v1574_v57  ;;  %v1648_v5 = vsub.f32 %v12850_v1, %v1574_v57 }
 0x39f   :  { %v13060_v44 = vpop.eup %10987  ;;  %11001 = vpow2.f32 %v1751_v9  ;;  %1846 = vadd.xlane.f32.xlu0 %v1845_v30 }
 0x3a0   :  { %v13062_v51 = vpop.eup %10989  ;;  %v1753_v59 = vmul.f32 1.442695, %v1647_v3  ;;  %v1755_v31 = vmul.f32 1.442695, %v1648_v5  ;;  %v17666_v3 = vld [vmem:[#allocation44_spill] sm:$0xff] }
 0x3a1   :  { %v1577_v26 = vpop.xlane.xlu0 %1576  ;;  %v1848_v43 = vadd.f32 %v13062_v51, %v13060_v44 }
 0x3a2   :  { %11003 = vpow2.f32 %v1753_v59  ;;  %v1649_v62 = vsub.f32 %v12854_v45, %v1577_v26  ;;  %v1650_v18 = vsub.f32 %v12856_v29, %v1577_v26  ;;  %v17667_v59 = vld [vmem:[#allocation47_spill] sm:$0xff] }
 0x3a3   :  { %v13068_v19 = vpop.eup %10991  ;;  %11005 = vpow2.f32 %v1755_v31  ;;  %1849 = vadd.xlane.f32.xlu1 %v1848_v43 }
 0x3a4   :  { %v13070_v1 = vpop.eup %10993  ;;  %v1757_v54 = vmul.f32 1.442695, %v1649_v62  ;;  %v1759_v6 = vmul.f32 1.442695, %v1650_v18 }
 0x3a5   :  { %v1580_v24 = vpop.xlane.xlu0 %1579  ;;  %v1851_v21 = vadd.f32 %v13070_v1, %v13068_v19 }
 0x3a6   :  { %11007 = vpow2.f32 %v1757_v54  ;;  %v1651_v56 = vsub.f32 %v12860_v25, %v1580_v24  ;;  %v1652_v20 = vsub.f32 %v17665_v32, %v1580_v24 }
 0x3a7   :  { %v13076_v45 = vpop.eup %10995  ;;  %11009 = vpow2.f32 %v1759_v6  ;;  %1852 = vadd.xlane.f32.xlu0 %v1851_v21  ;;  %v17668_v6 = vld [vmem:[#allocation46_spill] sm:$0xff]  ;;  %v17669_v21 = vld [vmem:[#allocation49_spill] sm:$0xff] }
 0x3a8   :  { %v13078_v29 = vpop.eup %10997  ;;  %v1761_v8 = vmul.f32 1.442695, %v1651_v56  ;;  %v1763_v9 = vmul.f32 1.442695, %v1652_v20 }
 0x3a9   :  { %v1583_v57 = vpop.xlane.xlu0 %1582  ;;  %v1854_v30 = vadd.f32 %v13078_v29, %v13076_v45 }
 0x3aa   :  { %11011 = vpow2.f32 %v1761_v8  ;;  %v1653_v5 = vsub.f32 %v17666_v3, %v1583_v57  ;;  %v1654_v31 = vsub.f32 %v17667_v59, %v1583_v57  ;;  %v17671_v3 = vld [vmem:[#allocation48_spill] sm:$0xff]  ;;  %v17672_v59 = vld [vmem:[#allocation51_spill] sm:$0xff] }
 0x3ab   :  { %v13084_v25 = vpop.eup %10999  ;;  %11013 = vpow2.f32 %v1763_v9  ;;  %1855 = vadd.xlane.f32.xlu1 %v1854_v30 }
 0x3ac   :  { %v13086_v26 = vpop.eup %11001  ;;  %v1765_v43 = vmul.f32 1.442695, %v1653_v5  ;;  %v1767_v62 = vmul.f32 1.442695, %v1654_v31 }
 0x3ad   :  { %v1586_v18 = vpop.xlane.xlu0 %1585  ;;  %v1857_v54 = vadd.f32 %v13086_v26, %v13084_v25 }
 0x3ae   :  { %11015 = vpow2.f32 %v1765_v43  ;;  %v1655_v24 = vsub.f32 %v17668_v6, %v1586_v18  ;;  %v1656_v56 = vsub.f32 %v17669_v21, %v1586_v18  ;;  %v17675_v21 = vld [vmem:[#allocation50_spill] sm:$0xff] }
 0x3af   :  { %v13092_v32 = vpop.eup %11003  ;;  %11017 = vpow2.f32 %v1767_v62  ;;  %1858 = vadd.xlane.f32.xlu0 %v1857_v54 }
 0x3b0   :  { %17670 = vst [vmem:[#allocation56_spill] sm:$0xff] %v13092_v32  ;;  %v13094_v20 = vpop.eup %11005  ;;  %v1769_v8 = vmul.f32 1.442695, %v1655_v24  ;;  %v1771_v9 = vmul.f32 1.442695, %v1656_v56 }
 0x3b1   :  { %v1589_v57 = vpop.xlane.xlu0 %1588  ;;  %v1860_v30 = vadd.f32 %v13094_v20, %v13092_v32 }
 0x3b2   :  { %11019 = vpow2.f32 %v1769_v8  ;;  %v1657_v5 = vsub.f32 %v17671_v3, %v1589_v57  ;;  %v1658_v31 = vsub.f32 %v17672_v59, %v1589_v57  ;;  %v17676_v8 = vld [vmem:[#allocation53_spill] sm:$0xff] }
 0x3b3   :  { %v13100_v43 = vpop.eup %11007  ;;  %11021 = vpow2.f32 %v1771_v9  ;;  %1861 = vadd.xlane.f32.xlu1 %v1860_v30 }
 0x3b4   :  { %17673 = vst [vmem:[#allocation45_spill] sm:$0xff] %v13100_v43  ;;  %v13102_v18 = vpop.eup %11009  ;;  %v1773_v62 = vmul.f32 1.442695, %v1657_v5  ;;  %v1775_v54 = vmul.f32 1.442695, %v1658_v31  ;;  %v17678_v31 = vld [vmem:[#allocation52_spill] sm:$0xff] }
 0x3b5   :  { %17674 = vst [vmem:[#allocation44_spill] sm:$0xff] %v13102_v18  ;;  %v1592_v6 = vpop.xlane.xlu0 %1591  ;;  %v1863_v24 = vadd.f32 %v13102_v18, %v13100_v43 }
 0x3b6   :  { %11023 = vpow2.f32 %v1773_v62  ;;  %v1659_v56 = vsub.f32 %v17675_v21, %v1592_v6  ;;  %v1660_v32 = vsub.f32 %v17676_v8, %v1592_v6  ;;  %v17679_v62 = vld [vmem:[#allocation55_spill] sm:$0xff] }
 0x3b7   :  { %v13108_v3 = vpop.eup %11011  ;;  %11025 = vpow2.f32 %v1775_v54  ;;  %1864 = vadd.xlane.f32.xlu0 %v1863_v24 }
 0x3b8   :  { %17677 = vst [vmem:[#allocation47_spill] sm:$0xff] %v13108_v3  ;;  %v13110_v57 = vpop.eup %11013  ;;  %v1777_v9 = vmul.f32 1.442695, %v1659_v56  ;;  %v1779_v30 = vmul.f32 1.442695, %v1660_v32 }
 0x3b9   :  { %v1595_v59 = vpop.xlane.xlu0 %1594  ;;  %v1866_v5 = vadd.f32 %v13110_v57, %v13108_v3 }
 0x3ba   :  { %11027 = vpow2.f32 %v1777_v9  ;;  %v1661_v43 = vsub.f32 %v17678_v31, %v1595_v59  ;;  %v1662_v18 = vsub.f32 %v17679_v62, %v1595_v59  ;;  %v17681_v9 = vld [vmem:[#allocation54_spill] sm:$0xff] }
 0x3bb   :  { %v13116_v21 = vpop.eup %11015  ;;  %11029 = vpow2.f32 %v1779_v30  ;;  %1867 = vadd.xlane.f32.xlu1 %v1866_v5 }
 0x3bc   :  { %v13118_v6 = vpop.eup %11017  ;;  %v1781_v54 = vmul.f32 1.442695, %v1661_v43  ;;  %v1783_v24 = vmul.f32 1.442695, %v1662_v18 }
 0x3bd   :  { %17680 = vst [vmem:[#allocation46_spill] sm:$0xff] %v13118_v6  ;;  %v1598_v8 = vpop.xlane.xlu0 %1597  ;;  %v1869_v32 = vadd.f32 %v13118_v6, %v13116_v21 }
 0x3be   :  { %11031 = vpow2.f32 %v1781_v54  ;;  %v1663_v56 = vsub.f32 %v12896_v2, %v1598_v8  ;;  %v1664_v3 = vsub.f32 %v17681_v9, %v1598_v8  ;;  %v17684_v54 = vld [vmem:[#allocation57_spill] sm:$0xff] }
 0x3bf   :  { %v13124_v31 = vpop.eup %11019  ;;  %11033 = vpow2.f32 %v1783_v24  ;;  %1870 = vadd.xlane.f32.xlu0 %v1869_v32 }
 0x3c0   :  { %17682 = vst [vmem:[#allocation49_spill] sm:$0xff] %v13124_v31  ;;  %v13126_v59 = vpop.eup %11021  ;;  %v1785_v30 = vmul.f32 1.442695, %v1663_v56  ;;  %v1787_v5 = vmul.f32 1.442695, %v1664_v3 }
 0x3c1   :  { %17683 = vst [vmem:[#allocation48_spill] sm:$0xff] %v13126_v59  ;;  %v1601_v62 = vpop.xlane.xlu0 %1600  ;;  %v1872_v43 = vadd.f32 %v13126_v59, %v13124_v31 }
 0x3c2   :  { %11035 = vpow2.f32 %v1785_v30  ;;  %v1665_v18 = vsub.f32 %v12902_v17, %v1601_v62  ;;  %v1666_v6 = vsub.f32 %v17684_v54, %v1601_v62 }
 0x3c3   :  { %v13132_v2 = vpop.eup %11023  ;;  %11037 = vpow2.f32 %v1787_v5  ;;  %1873 = vadd.xlane.f32.xlu1 %v1872_v43 }
 0x3c4   :  { %17685 = vst [vmem:[#allocation51_spill] sm:$0xff] %v13132_v2  ;;  %v13134_v8 = vpop.eup %11025  ;;  %v1789_v24 = vmul.f32 1.442695, %v1665_v18  ;;  %v1791_v32 = vmul.f32 1.442695, %v1666_v6 }
 0x3c5   :  { %17686 = vst [vmem:[#allocation50_spill] sm:$0xff] %v13134_v8  ;;  %v1604_v9 = vpop.xlane.xlu0 %1603  ;;  %v1875_v3 = vadd.f32 %v13134_v8, %v13132_v2 }
 0x3c6   :  { %11039 = vpow2.f32 %v1789_v24  ;;  %v1667_v56 = vsub.f32 %v12908_v10, %v1604_v9  ;;  %v1668_v30 = vsub.f32 %v12910_v38, %v1604_v9 }
 0x3c7   :  { %v13140_v17 = vpop.eup %11027  ;;  %11041 = vpow2.f32 %v1791_v32  ;;  %1876 = vadd.xlane.f32.xlu0 %v1875_v3 }
 0x3c8   :  { %17687 = vst [vmem:[#allocation53_spill] sm:$0xff] %v13140_v17  ;;  %v13142_v62 = vpop.eup %11029  ;;  %v1793_v5 = vmul.f32 1.442695, %v1667_v56  ;;  %v1795_v43 = vmul.f32 1.442695, %v1668_v30 }
 0x3c9   :  { %17688 = vst [vmem:[#allocation52_spill] sm:$0xff] %v13142_v62  ;;  %v1878_v6 = vadd.f32 %v13142_v62, %v13140_v17 }
 0x3ca   :  { %11043 = vpow2.f32 %v1793_v5 }
 0x3cb   :  { %v13146_v18 = vpop.eup %11031  ;;  %11045 = vpow2.f32 %v1795_v43  ;;  %1879 = vadd.xlane.f32.xlu1 %v1878_v6 }
 0x3cc   :  { %17689 = vst [vmem:[#allocation55_spill] sm:$0xff] %v13146_v18  ;;  %v13148_v54 = vpop.eup %11033 }
 0x3cd   :  { %17690 = vst [vmem:[#allocation54_spill] sm:$0xff] %v13148_v54  ;;  %v1881_v10 = vadd.f32 %v13148_v54, %v13146_v18 }
 0x3cf   :  { %v13152_v38 = vpop.eup %11035  ;;  %1882 = vadd.xlane.f32.xlu0 %v1881_v10 }
 0x3d0   :  { %17691 = vst [vmem:[#allocation57_spill] sm:$0xff] %v13152_v38  ;;  %v13154_v24 = vpop.eup %11037 }
 0x3d1   :  { %17692 = vst [vmem:[#allocation58_spill] sm:$0xff] %v13154_v24  ;;  %v1884_v32 = vadd.f32 %v13154_v24, %v13152_v38 }
 0x3d3   :  { %v13158_v9 = vpop.eup %11039  ;;  %1885 = vadd.xlane.f32.xlu1 %v1884_v32 }
 0x3d4   :  { %17693 = vst [vmem:[#allocation59_spill] sm:$0xff] %v13158_v9  ;;  %v13160_v3 = vpop.eup %11041 }
 0x3d5   :  { %17694 = vst [vmem:[#allocation60_spill] sm:$0xff] %v13160_v3  ;;  %v1887_v56 = vadd.f32 %v13160_v3, %v13158_v9 }
 0x3d7   :  { %v13164_v30 = vpop.eup %11043  ;;  %1888 = vadd.xlane.f32.xlu0 %v1887_v56 }
 0x3d8   :  { %17695 = vst [vmem:[#allocation61_spill] sm:$0xff] %v13164_v30  ;;  %v13166_v5 = vpop.eup %11045 }
 0x3d9   :  { %17696 = vst [vmem:[#allocation62_spill] sm:$0xff] %v13166_v5  ;;  %v1890_v43 = vadd.f32 %v13166_v5, %v13164_v30 }
 0x3db   :  { %1891 = vadd.xlane.f32.xlu1 %v1890_v43 }
 0x3e8   :  { %v1799_v6 = vpop.xlane.xlu1 %1798 }
 0x3e9   :  { %11047 = vrcp.f32 %v1799_v6 }
 0x3ec   :  { %v1802_v10 = vpop.xlane.xlu1 %1801 }
 0x3ed   :  { %11049 = vrcp.f32 %v1802_v10 }
 0x3f0   :  { %v1805_v38 = vpop.xlane.xlu1 %1804 }
 0x3f1   :  { %11051 = vrcp.f32 %v1805_v38 }
 0x3f4   :  { %v1808_v32 = vpop.xlane.xlu1 %1807 }
 0x3f5   :  { %11053 = vrcp.f32 %v1808_v32 }
 0x3f6   :  { %v11048_v24 = vpop.eup %11047 }
 0x3f7   :  { %v1925_v18 = vmul.f32 %v11048_v24, %v1799_v6 }
 0x3f8   :  { %v1811_v9 = vpop.xlane.xlu1 %1810 }
 0x3f9   :  { %v1957_v3 = vsub.f32 2.0, %v1925_v18  ;;  %11055 = vrcp.f32 %v1811_v9 }
 0x3fa   :  { %v11050_v56 = vpop.eup %11049 }
 0x3fb   :  { %v1926_v54 = vmul.f32 %v11050_v56, %v1802_v10  ;;  %v1989_v62 = vmul.f32 %v11048_v24, %v1957_v3 }
 0x3fc   :  { %v1814_v17 = vpop.xlane.xlu1 %1813 }
 0x3fd   :  { %v1958_v8 = vsub.f32 2.0, %v1926_v54  ;;  %11057 = vrcp.f32 %v1814_v17  ;;  %v2021_v43 = vmul.f32 %v12924_v47, %v1989_v62  ;;  %v2022_v30 = vmul.f32 %v12926_v53, %v1989_v62  ;;  %v11687_v54 = vld [vmem:[%s17315_s2 + $0x8] sm:$0xff]  ;;  %v11688_v53 = vld [vmem:[%s17315_s2] sm:$0xff] }
 0x3fe   :  { %v11052_v5 = vpop.eup %11051 }
 0x3ff   :  { %v1927_v2 = vmul.f32 %v11052_v5, %v1805_v38  ;;  %2149 = vmatprep.mubr.f32.mxu0 %v2022_v30  ;;  %v1990_v59 = vmul.f32 %v11050_v56, %v1958_v8 }
 0x400   :  { %2150 = vmatmul.mubr.f32.vlgmr.msra.gmra.mxu0 %v2021_v43  ;;  %v1817_v31 = vpop.xlane.xlu1 %1816 }
 0x401   :  { %v1959_v6 = vsub.f32 2.0, %v1927_v2  ;;  %11059 = vrcp.f32 %v1817_v31  ;;  %v2024_v18 = vmul.f32 %v12934_v42, %v1990_v59  ;;  %v2023_v10 = vmul.f32 %v12932_v0, %v1990_v59  ;;  %10498 = vmatpush3.msra.mxu0 %v11687_v54 }
 0x402   :  { %v11054_v47 = vpop.eup %11053  ;;  %10499 = vmatprep.subr.mxu0 %v11688_v53 }
 0x403   :  { %v1928_v8 = vmul.f32 %v11054_v47, %v1808_v32  ;;  %2154 = vmatprep.mubr.f32.mxu0 %v2024_v18  ;;  %v1991_v62 = vmul.f32 %v11052_v5, %v1959_v6  ;;  %10500 = vmatpush3.msra.mxu0 %v11688_v53 }
 0x404   :  { %2155 = vmatmul.mubr.f32.gmra.mxu0 %v2023_v10  ;;  %v1820_v2 = vpop.xlane.xlu1 %1819 }
 0x405   :  { %v1960_v42 = vsub.f32 2.0, %v1928_v8  ;;  %11061 = vrcp.f32 %v1820_v2  ;;  %v2026_v0 = vmul.f32 %v12942_v36, %v1991_v62  ;;  %v2025_v59 = vmul.f32 %v12940_v16, %v1991_v62 }
 0x406   :  { %v11056_v38 = vpop.eup %11055 }
 0x407   :  { %v1929_v24 = vmul.f32 %v11056_v38, %v1811_v9  ;;  %2159 = vmatprep.mubr.f32.mxu0 %v2026_v0  ;;  %v1992_v3 = vmul.f32 %v11054_v47, %v1960_v42 }
 0x408   :  { %2160 = vmatmul.mubr.f32.gmra.mxu0 %v2025_v59  ;;  %v1823_v30 = vpop.xlane.xlu1 %1822 }
 0x409   :  { %v1961_v56 = vsub.f32 2.0, %v1929_v24  ;;  %11063 = vrcp.f32 %v1823_v30  ;;  %v2028_v32 = vmul.f32 %v12950_v37, %v1992_v3  ;;  %v2027_v5 = vmul.f32 %v12948_v50, %v1992_v3 }
 0x40a   :  { %v11058_v43 = vpop.eup %11057 }
 0x40b   :  { %v1993_v6 = vmul.f32 %v11056_v38, %v1961_v56  ;;  %v1930_v18 = vmul.f32 %v11058_v43, %v1814_v17  ;;  %2164 = vmatprep.mubr.f32.mxu0 %v2028_v32 }
 0x40c   :  { %2165 = vmatmul.mubr.f32.gmra.mxu0 %v2027_v5  ;;  %v1826_v36 = vpop.xlane.xlu1 %1825 }
 0x40d   :  { %v1962_v10 = vsub.f32 2.0, %v1930_v18  ;;  %11065 = vrcp.f32 %v1826_v36  ;;  %v2030_v16 = vmul.f32 %v12958_v34, %v1993_v6  ;;  %v2029_v9 = vmul.f32 %v12956_v52, %v1993_v6 }
 0x40e   :  { %v11060_v54 = vpop.eup %11059 }
 0x40f   :  { %v1994_v47 = vmul.f32 %v11058_v43, %v1962_v10  ;;  %v1931_v53 = vmul.f32 %v11060_v54, %v1817_v31  ;;  %2169 = vmatprep.mubr.f32.mxu0 %v2030_v16 }
 0x410   :  { %2170 = vmatmul.mubr.f32.gmra.mxu0 %v2029_v9  ;;  %v1829_v37 = vpop.xlane.xlu0 %1828 }
 0x411   :  { %v1963_v8 = vsub.f32 2.0, %v1931_v53  ;;  %11067 = vrcp.f32 %v1829_v37  ;;  %v2032_v50 = vmul.f32 %v12966_v28, %v1994_v47  ;;  %v2031_v17 = vmul.f32 %v12964_v13, %v1994_v47 }
 0x412   :  { %v11062_v62 = vpop.eup %11061 }
 0x413   :  { %v1995_v42 = vmul.f32 %v11060_v54, %v1963_v8  ;;  %v1932_v0 = vmul.f32 %v11062_v62, %v1820_v2  ;;  %2174 = vmatprep.mubr.f32.mxu0 %v2032_v50 }
 0x414   :  { %2175 = vmatmul.mubr.f32.gmra.mxu0 %v2031_v17  ;;  %v1832_v34 = vpop.xlane.xlu1 %1831 }
 0x415   :  { %v1964_v59 = vsub.f32 2.0, %v1932_v0  ;;  %11069 = vrcp.f32 %v1832_v34  ;;  %v2034_v52 = vmul.f32 %v12974_v46, %v1995_v42  ;;  %v2033_v31 = vmul.f32 %v12972_v11, %v1995_v42 }
 0x416   :  { %v11064_v38 = vpop.eup %11063 }
 0x417   :  { %v1996_v24 = vmul.f32 %v11062_v62, %v1964_v59  ;;  %v1933_v3 = vmul.f32 %v11064_v38, %v1823_v30  ;;  %2179 = vmatprep.mubr.f32.mxu0 %v2034_v52 }
 0x418   :  { %2180 = vmatmul.mubr.f32.gmra.mxu0 %v2033_v31  ;;  %v1835_v28 = vpop.xlane.xlu0 %1834 }
 0x419   :  { %v1965_v56 = vsub.f32 2.0, %v1933_v3  ;;  %11071 = vrcp.f32 %v1835_v28  ;;  %v2036_v13 = vmul.f32 %v12982_v55, %v1996_v24  ;;  %v2035_v2 = vmul.f32 %v12980_v35, %v1996_v24 }
 0x41a   :  { %v11066_v32 = vpop.eup %11065 }
 0x41b   :  { %v1997_v5 = vmul.f32 %v11064_v38, %v1965_v56  ;;  %v1934_v43 = vmul.f32 %v11066_v32, %v1826_v36  ;;  %2184 = vmatprep.mubr.f32.mxu0 %v2036_v13 }
 0x41c   :  { %2185 = vmatmul.mubr.f32.gmra.mxu0 %v2035_v2  ;;  %v1838_v46 = vpop.xlane.xlu1 %1837 }
 0x41d   :  { %v1966_v6 = vsub.f32 2.0, %v1934_v43  ;;  %11073 = vrcp.f32 %v1838_v46  ;;  %v2038_v11 = vmul.f32 %v12990_v63, %v1997_v5  ;;  %v2037_v30 = vmul.f32 %v12988_v22, %v1997_v5 }
 0x41e   :  { %v11068_v18 = vpop.eup %11067 }
 0x41f   :  { %v1998_v10 = vmul.f32 %v11066_v32, %v1966_v6  ;;  %v1935_v16 = vmul.f32 %v11068_v18, %v1829_v37  ;;  %2189 = vmatprep.mubr.f32.mxu0 %v2038_v11 }
 0x420   :  { %2190 = vmatmul.mubr.f32.gmra.mxu0 %v2037_v30  ;;  %v1841_v55 = vpop.xlane.xlu0 %1840 }
 0x421   :  { %v1967_v9 = vsub.f32 2.0, %v1935_v16  ;;  %11075 = vrcp.f32 %v1841_v55  ;;  %v2040_v35 = vmul.f32 %v12998_v40, %v1998_v10  ;;  %v2039_v36 = vmul.f32 %v12996_v12, %v1998_v10 }
 0x422   :  { %v11070_v54 = vpop.eup %11069 }
 0x423   :  { %v1999_v47 = vmul.f32 %v11068_v18, %v1967_v9  ;;  %v1936_v53 = vmul.f32 %v11070_v54, %v1832_v34  ;;  %2194 = vmatprep.mubr.f32.mxu0 %v2040_v35 }
 0x424   :  { %2195 = vmatmul.mubr.f32.gmra.mxu0 %v2039_v36  ;;  %v1844_v63 = vpop.xlane.xlu1 %1843 }
 0x425   :  { %v1968_v8 = vsub.f32 2.0, %v1936_v53  ;;  %11077 = vrcp.f32 %v1844_v63  ;;  %v2042_v22 = vmul.f32 %v13006_v58, %v1999_v47  ;;  %v2041_v37 = vmul.f32 %v13004_v41, %v1999_v47 }
 0x426   :  { %v11072_v50 = vpop.eup %11071 }
 0x427   :  { %v2000_v17 = vmul.f32 %v11070_v54, %v1968_v8  ;;  %v1937_v62 = vmul.f32 %v11072_v50, %v1835_v28  ;;  %2199 = vmatprep.mubr.f32.mxu0 %v2042_v22 }
 0x428   :  { %2200 = vmatmul.mubr.f32.gmra.mxu0 %v2041_v37  ;;  %v1847_v40 = vpop.xlane.xlu0 %1846 }
 0x429   :  { %v1969_v42 = vsub.f32 2.0, %v1937_v62  ;;  %11079 = vrcp.f32 %v1847_v40  ;;  %v2044_v12 = vmul.f32 %v13014_v14, %v2000_v17  ;;  %v2043_v0 = vmul.f32 %v13012_v33, %v2000_v17 }
 0x42a   :  { %v11074_v34 = vpop.eup %11073 }
 0x42b   :  { %v2001_v59 = vmul.f32 %v11072_v50, %v1969_v42  ;;  %v1938_v52 = vmul.f32 %v11074_v34, %v1838_v46  ;;  %2204 = vmatprep.mubr.f32.mxu0 %v2044_v12 }
 0x42c   :  { %v1850_v31 = vpop.xlane.xlu1 %1849  ;;  %2205 = vmatmul.mubr.f32.gmra.mxu0 %v2043_v0 }
 0x42d   :  { %v1970_v58 = vsub.f32 2.0, %v1938_v52  ;;  %11081 = vrcp.f32 %v1850_v31  ;;  %v2046_v41 = vmul.f32 %v13022_v48, %v2001_v59  ;;  %v2045_v38 = vmul.f32 %v13020_v27, %v2001_v59 }
 0x42e   :  { %v11076_v24 = vpop.eup %11075 }
 0x42f   :  { %v2002_v3 = vmul.f32 %v11074_v34, %v1970_v58  ;;  %v1939_v28 = vmul.f32 %v11076_v24, %v1841_v55  ;;  %2209 = vmatprep.mubr.f32.mxu0 %v2046_v41 }
 0x430   :  { %2210 = vmatmul.mubr.f32.gmra.mxu0 %v2045_v38  ;;  %v1853_v14 = vpop.xlane.xlu0 %1852 }
 0x431   :  { %v1971_v56 = vsub.f32 2.0, %v1939_v28  ;;  %11083 = vrcp.f32 %v1853_v14  ;;  %v2048_v33 = vmul.f32 %v13030_v15, %v2002_v3  ;;  %v2047_v13 = vmul.f32 %v13028_v49, %v2002_v3 }
 0x432   :  { %v11078_v2 = vpop.eup %11077 }
 0x433   :  { %v2003_v32 = vmul.f32 %v11076_v24, %v1971_v56  ;;  %v1940_v5 = vmul.f32 %v11078_v2, %v1844_v63  ;;  %2214 = vmatprep.mubr.f32.mxu0 %v2048_v33 }
 0x434   :  { %v1856_v43 = vpop.xlane.xlu1 %1855  ;;  %2215 = vmatmul.mubr.f32.gmra.mxu0 %v2047_v13 }
 0x435   :  { %v1972_v48 = vsub.f32 2.0, %v1940_v5  ;;  %11085 = vrcp.f32 %v1856_v43  ;;  %v2050_v27 = vmul.f32 %v13038_v61, %v2003_v32  ;;  %v2049_v46 = vmul.f32 %v13036_v4, %v2003_v32 }
 0x436   :  { %v11080_v6 = vpop.eup %11079 }
 0x437   :  { %v2004_v11 = vmul.f32 %v11078_v2, %v1972_v48  ;;  %v1941_v30 = vmul.f32 %v11080_v6, %v1847_v40  ;;  %2219 = vmatprep.mubr.f32.mxu0 %v2050_v27 }
 0x438   :  { %2220 = vmatmul.mubr.f32.gmra.mxu0 %v2049_v46  ;;  %v1859_v15 = vpop.xlane.xlu0 %1858 }
 0x439   :  { %v1973_v18 = vsub.f32 2.0, %v1941_v30  ;;  %11087 = vrcp.f32 %v1859_v15  ;;  %v2052_v49 = vmul.f32 %v13046_v23, %v2004_v11  ;;  %v2051_v10 = vmul.f32 %v13044_v7, %v2004_v11 }
 0x43a   :  { %v11082_v16 = vpop.eup %11081 }
 0x43b   :  { %v2005_v55 = vmul.f32 %v11080_v6, %v1973_v18  ;;  %v1942_v9 = vmul.f32 %v11082_v16, %v1850_v31  ;;  %2224 = vmatprep.mubr.f32.mxu0 %v2052_v49 }
 0x43c   :  { %v1862_v35 = vpop.xlane.xlu1 %1861  ;;  %2225 = vmatmul.mubr.f32.gmra.mxu0 %v2051_v10 }
 0x43d   :  { %v1974_v61 = vsub.f32 2.0, %v1942_v9  ;;  %11089 = vrcp.f32 %v1862_v35  ;;  %v2054_v4 = vmul.f32 %v13054_v39, %v2005_v55  ;;  %v2053_v36 = vmul.f32 %v13052_v60, %v2005_v55 }
 0x43e   :  { %v11084_v54 = vpop.eup %11083 }
 0x43f   :  { %v2006_v47 = vmul.f32 %v11082_v16, %v1974_v61  ;;  %v1943_v53 = vmul.f32 %v11084_v54, %v1853_v14  ;;  %2229 = vmatprep.mubr.f32.mxu0 %v2054_v4  ;;  %v17697_v14 = vld [vmem:[#allocation56_spill] sm:$0xff]  ;;  %v17701_v61 = vld [vmem:[#allocation46_spill] sm:$0xff] }
 0x440   :  { %2230 = vmatmul.mubr.f32.gmra.mxu0 %v2053_v36  ;;  %v1865_v23 = vpop.xlane.xlu0 %1864 }
 0x441   :  { %v1975_v63 = vsub.f32 2.0, %v1943_v53  ;;  %11091 = vrcp.f32 %v1865_v23  ;;  %v2056_v7 = vmul.f32 %v13062_v51, %v2006_v47  ;;  %v2055_v8 = vmul.f32 %v13060_v44, %v2006_v47  ;;  %v17702_v53 = vld [vmem:[#allocation49_spill] sm:$0xff] }
 0x442   :  { %v11086_v22 = vpop.eup %11085 }
 0x443   :  { %v2007_v37 = vmul.f32 %v11084_v54, %v1975_v63  ;;  %v1944_v50 = vmul.f32 %v11086_v22, %v1856_v43  ;;  %2234 = vmatprep.mubr.f32.mxu0 %v2056_v7  ;;  %v17699_v43 = vld [vmem:[#allocation45_spill] sm:$0xff]  ;;  %v17703_v7 = vld [vmem:[#allocation48_spill] sm:$0xff] }
 0x444   :  { %v1868_v17 = vpop.xlane.xlu1 %1867  ;;  %2235 = vmatmul.mubr.f32.gmra.mxu0 %v2055_v8 }
 0x445   :  { %v1976_v39 = vsub.f32 2.0, %v1944_v50  ;;  %11093 = vrcp.f32 %v1868_v17  ;;  %v2058_v60 = vmul.f32 %v13070_v1, %v2007_v37  ;;  %v2057_v62 = vmul.f32 %v13068_v19, %v2007_v37 }
 0x446   :  { %v11088_v40 = vpop.eup %11087 }
 0x447   :  { %v2008_v42 = vmul.f32 %v11086_v22, %v1976_v39  ;;  %v1945_v12 = vmul.f32 %v11088_v40, %v1859_v15  ;;  %2239 = vmatprep.mubr.f32.mxu0 %v2058_v60  ;;  %v17700_v15 = vld [vmem:[#allocation47_spill] sm:$0xff] }
 0x448   :  { %2240 = vmatmul.mubr.f32.gmra.mxu0 %v2057_v62  ;;  %v1871_v51 = vpop.xlane.xlu0 %1870  ;;  %v17705_v62 = vld [vmem:[#allocation50_spill] sm:$0xff] }
 0x449   :  { %v1977_v0 = vsub.f32 2.0, %v1945_v12  ;;  %11095 = vrcp.f32 %v1871_v51  ;;  %v2060_v44 = vmul.f32 %v13078_v29, %v2008_v42  ;;  %v2059_v34 = vmul.f32 %v13076_v45, %v2008_v42 }
 0x44a   :  { %v11090_v59 = vpop.eup %11089 }
 0x44b   :  { %v2009_v52 = vmul.f32 %v11088_v40, %v1977_v0  ;;  %v1946_v31 = vmul.f32 %v11090_v59, %v1862_v35  ;;  %2244 = vmatprep.mubr.f32.mxu0 %v2060_v44  ;;  %v17706_v0 = vld [vmem:[#allocation53_spill] sm:$0xff] }
 0x44c   :  { %v1874_v58 = vpop.xlane.xlu1 %1873  ;;  %2245 = vmatmul.mubr.f32.gmra.mxu0 %v2059_v34 }
 0x44d   :  { %v1978_v1 = vsub.f32 2.0, %v1946_v31  ;;  %11097 = vrcp.f32 %v1874_v58  ;;  %v2062_v19 = vmul.f32 %v13086_v26, %v2009_v52  ;;  %v2061_v41 = vmul.f32 %v13084_v25, %v2009_v52  ;;  %v17698_v25 = vld [vmem:[#allocation44_spill] sm:$0xff] }
 0x44e   :  { %v11092_v38 = vpop.eup %11091 }
 0x44f   :  { %v2010_v24 = vmul.f32 %v11090_v59, %v1978_v1  ;;  %v1947_v3 = vmul.f32 %v11092_v38, %v1865_v23  ;;  %2249 = vmatprep.mubr.f32.mxu0 %v2062_v19  ;;  %v17707_v59 = vld [vmem:[#allocation52_spill] sm:$0xff] }
 0x450   :  { %2250 = vmatmul.mubr.f32.gmra.mxu0 %v2061_v41  ;;  %v1877_v29 = vpop.xlane.xlu0 %1876  ;;  %v17708_v41 = vld [vmem:[#allocation54_spill] sm:$0xff] }
 0x451   :  { %v1979_v28 = vsub.f32 2.0, %v1947_v3  ;;  %11099 = vrcp.f32 %v1877_v29  ;;  %v2064_v45 = vmul.f32 %v13094_v20, %v2010_v24  ;;  %v2063_v56 = vmul.f32 %v17697_v14, %v2010_v24  ;;  %v17709_v24 = vld [vmem:[#allocation55_spill] sm:$0xff] }
 0x452   :  { %v11094_v33 = vpop.eup %11093 }
 0x453   :  { %v2011_v13 = vmul.f32 %v11092_v38, %v1979_v28  ;;  %v1948_v2 = vmul.f32 %v11094_v33, %v1868_v17  ;;  %2254 = vmatprep.mubr.f32.mxu0 %v2064_v45  ;;  %v17704_v17 = vld [vmem:[#allocation51_spill] sm:$0xff] }
 0x454   :  { %v1880_v32 = vpop.xlane.xlu1 %1879  ;;  %2255 = vmatmul.mubr.f32.gmra.mxu0 %v2063_v56  ;;  %v17710_v56 = vld [vmem:[#allocation58_spill] sm:$0xff] }
 0x455   :  { %v1980_v26 = vsub.f32 2.0, %v1948_v2  ;;  %11101 = vrcp.f32 %v1880_v32  ;;  %v2066_v5 = vmul.f32 %v17698_v25, %v2011_v13  ;;  %v2065_v48 = vmul.f32 %v17699_v43, %v2011_v13  ;;  %v17711_v13 = vld [vmem:[#allocation57_spill] sm:$0xff]  ;;  %v17712_v43 = vld [vmem:[#allocation60_spill] sm:$0xff] }
 0x456   :  { %v11096_v27 = vpop.eup %11095 }
 0x457   :  { %v2012_v46 = vmul.f32 %v11094_v33, %v1980_v26  ;;  %v1949_v6 = vmul.f32 %v11096_v27, %v1871_v51  ;;  %2259 = vmatprep.mubr.f32.mxu0 %v2066_v5 }
 0x458   :  { %2260 = vmatmul.mubr.f32.gmra.mxu0 %v2065_v48  ;;  %v1883_v20 = vpop.xlane.xlu0 %1882 }
 0x459   :  { %v1981_v11 = vsub.f32 2.0, %v1949_v6  ;;  %11103 = vrcp.f32 %v1883_v20  ;;  %v2068_v30 = vmul.f32 %v13110_v57, %v2012_v46  ;;  %v2067_v18 = vmul.f32 %v17700_v15, %v2012_v46 }
 0x45a   :  { %v11098_v49 = vpop.eup %11097 }
 0x45b   :  { %v2013_v10 = vmul.f32 %v11096_v27, %v1981_v11  ;;  %v1950_v16 = vmul.f32 %v11098_v49, %v1874_v58  ;;  %2264 = vmatprep.mubr.f32.mxu0 %v2068_v30  ;;  %v17713_v27 = vld [vmem:[#allocation59_spill] sm:$0xff]  ;;  %v17715_v30 = vld [vmem:[#allocation61_spill] sm:$0xff] }
 0x45c   :  { %v1886_v55 = vpop.xlane.xlu1 %1885  ;;  %2265 = vmatmul.mubr.f32.gmra.mxu0 %v2067_v18  ;;  %v13243_v18 = vstv %s17321_s8 }
 0x45d   :  { %v2069_v9 = vmul.f32 %v13116_v21, %v2013_v10  ;;  %v1982_v35 = vsub.f32 2.0, %v1950_v16  ;;  %11105 = vrcp.f32 %v1886_v55  ;;  %v2070_v4 = vmul.f32 %v17701_v61, %v2013_v10  ;;  %17716 = vst [vmem:[#allocation56_spill] sm:$0xff] %v13243_v18 }
 0x45e   :  { %v11100_v36 = vpop.eup %11099 }
 0x45f   :  { %v2014_v54 = vmul.f32 %v11098_v49, %v1982_v35  ;;  %v1951_v47 = vmul.f32 %v11100_v36, %v1877_v29  ;;  %2269 = vmatprep.mubr.f32.mxu0 %v2070_v4 }
 0x460   :  { %2270 = vmatmul.mubr.f32.gmra.mxu0 %v2069_v9  ;;  %v1889_v57 = vpop.xlane.xlu0 %1888 }
 0x461   :  { %v2071_v23 = vmul.f32 %v17702_v53, %v2014_v54  ;;  %v1983_v63 = vsub.f32 2.0, %v1951_v47  ;;  %11107 = vrcp.f32 %v1889_v57  ;;  %v2072_v8 = vmul.f32 %v17703_v7, %v2014_v54 }
 0x462   :  { %v11102_v22 = vpop.eup %11101 }
 0x463   :  { %v2015_v37 = vmul.f32 %v11100_v36, %v1983_v63  ;;  %v1952_v50 = vmul.f32 %v11102_v22, %v1880_v32  ;;  %2274 = vmatprep.mubr.f32.mxu0 %v2072_v8  ;;  %v17719_v36 = vld [vmem:[#allocation14_spill] sm:$0xff]  ;;  %v17721_v63 = vld [vmem:[#allocation16_spill] sm:$0xff] }
 0x464   :  { %v1892_v21 = vpop.xlane.xlu1 %1891  ;;  %2275 = vmatmul.mubr.f32.gmra.mxu0 %v2071_v23  ;;  %v13265_v23 = vld [vmem:[%s17316_s3 + $0x8] sm:$0xff]  ;;  %v11690_v8 = vld [vmem:[%s17316_s3] sm:$0xff] }
 0x465   :  { %v2073_v39 = vmul.f32 %v17704_v17, %v2015_v37  ;;  %v1984_v60 = vsub.f32 2.0, %v1952_v50  ;;  %11109 = vrcp.f32 %v1892_v21  ;;  %v2074_v40 = vmul.f32 %v17705_v62, %v2015_v37  ;;  %v17724_v17 = vld [vmem:[#allocation17_spill] sm:$0xff] }
 0x466   :  { %v11104_v42 = vpop.eup %11103 }
 0x467   :  { %v2016_v12 = vmul.f32 %v11102_v22, %v1984_v60  ;;  %v1953_v51 = vmul.f32 %v11104_v42, %v1883_v20  ;;  %2279 = vmatprep.mubr.f32.mxu0 %v2074_v40  ;;  %v17714_v20 = vld [vmem:[#allocation62_spill] sm:$0xff] }
 0x468   :  { %2280 = vmatmul.mubr.f32.gmra.mxu0 %v2073_v39 }
 0x469   :  { %v2075_v44 = vmul.f32 %v17706_v0, %v2016_v12  ;;  %v1985_v34 = vsub.f32 2.0, %v1953_v51  ;;  %v2076_v52 = vmul.f32 %v17707_v59, %v2016_v12 }
 0x46a   :  { %v11106_v31 = vpop.eup %11105 }
 0x46b   :  { %v1954_v58 = vmul.f32 %v11106_v31, %v1886_v55  ;;  %2284 = vmatprep.mubr.f32.mxu0 %v2076_v52  ;;  %v2017_v1 = vmul.f32 %v11104_v42, %v1985_v34  ;;  %v17717_v55 = vld [vmem:[#allocation12_spill] sm:$0xff]  ;;  %v17726_v42 = vld [vmem:[#allocation19_spill] sm:$0xff]  ;;  %v17728_v34 = vld [vmem:[#allocation21_spill] sm:$0xff] }
 0x46c   :  { %2285 = vmatmul.mubr.f32.gmra.mxu0 %v2075_v44 }
 0x46d   :  { %v1986_v19 = vsub.f32 2.0, %v1954_v58  ;;  %v2078_v38 = vmul.f32 %v17708_v41, %v2017_v1  ;;  %v2077_v3 = vmul.f32 %v17709_v24, %v2017_v1  ;;  %v17730_v1 = vld [vmem:[#allocation22_spill] sm:$0xff] }
 0x46e   :  { %v11108_v29 = vpop.eup %11107 }
 0x46f   :  { %v1955_v28 = vmul.f32 %v11108_v29, %v1889_v57  ;;  %2289 = vmatprep.mubr.f32.mxu0 %v2078_v38  ;;  %v2018_v45 = vmul.f32 %v11106_v31, %v1986_v19 }
 0x470   :  { %2290 = vmatmul.mubr.f32.gmra.mxu0 %v2077_v3  ;;  %v17732_v3 = vld [vmem:[#allocation24_spill] sm:$0xff] }
 0x471   :  { %v1987_v14 = vsub.f32 2.0, %v1955_v28  ;;  %v2080_v33 = vmul.f32 %v17710_v56, %v2018_v45  ;;  %v2079_v2 = vmul.f32 %v17711_v13, %v2018_v45  ;;  %v17734_v56 = vld [vmem:[#allocation26_spill] sm:$0xff] }
 0x472   :  { %v11110_v32 = vpop.eup %11109 }
 0x473   :  { %v1956_v26 = vmul.f32 %v11110_v32, %v1892_v21  ;;  %2294 = vmatprep.mubr.f32.mxu0 %v2080_v33  ;;  %v2019_v25 = vmul.f32 %v11108_v29, %v1987_v14  ;;  %v17723_v21 = vmov 0.0  }
 0x474   :  { %2295 = vmatmul.mubr.f32.gmra.mxu0 %v2079_v2 }
 0x475   :  { %v1988_v5 = vsub.f32 2.0, %v1956_v26  ;;  %v2082_v48 = vmul.f32 %v17712_v43, %v2019_v25  ;;  %v2081_v46 = vmul.f32 %v17713_v27, %v2019_v25  ;;  %v17736_v26 = vld [vmem:[#allocation27_spill] sm:$0xff]  ;;  %v17738_v27 = vld [vmem:[#allocation29_spill] sm:$0xff] }
 0x477   :  { %2299 = vmatprep.mubr.f32.mxu0 %v2082_v48  ;;  %v2020_v6 = vmul.f32 %v11110_v32, %v1988_v5 }
 0x478   :  { %2300 = vmatmul.mubr.f32.gmra.mxu0 %v2081_v46 }
 0x479   :  { %v2084_v11 = vmul.f32 %v17714_v20, %v2020_v6  ;;  %v2083_v15 = vmul.f32 %v17715_v30, %v2020_v6  ;;  %v17740_v30 = vld [vmem:[#allocation31_spill] sm:$0xff] }
 0x47b   :  { %2304 = vmatprep.mubr.f32.mxu0 %v2084_v11 }
 0x47c   :  { %2305 = vmatmul.mubr.f32.gmra.mxu0 %v2083_v15 }
 0x4c0   :  { %v2151_v49 = vpop.f32.mrf.mxu0 }
 0x4c1   :  { %v2311_v10 = vmul.f32 %v13243_v18, %v2151_v49 }
 0x4c2   :  { %v2153_v16 = vpop.f32.mrf.mxu0 }
 0x4c3   :  { %v13247_v9 = vadd.f32 %v2311_v10, %v17717_v55  ;;  %v17742_v55 = vld [vmem:[#allocation32_spill] sm:$0xff] }
 0x4c4   :  { %v2156_v35 = vpop.f32.mrf.mxu0 }
 0x4c5   :  { %17718 = vst [vmem:[#allocation44_spill] sm:$0xff] %v13247_v9  ;;  %v2312_v61 = vmul.f32 %v13243_v18, %v2156_v35  ;;  %10449 = vmatprep.mubr.msk.f32.mxu1 %vm275_vm0, %v13247_v9  ;;  %10501 = vmatprep.mubr.msk.f32.mxu0 %vm275_vm0, %v13247_v9 }
 0x4c6   :  { %v2158_v4 = vpop.f32.mrf.mxu0 }
 0x4c7   :  { %v13255_v54 = vadd.f32 %v2312_v61, %v17719_v36 }
 0x4c8   :  { %v2161_v47 = vpop.f32.mrf.mxu0 }
 0x4c9   :  { %17720 = vst [vmem:[#allocation45_spill] sm:$0xff] %v13255_v54  ;;  %v2313_v57 = vmul.f32 %v13243_v18, %v2161_v47  ;;  %10450 = vmatmul.mubr.msk.f32.vlgmr.msra.gmra.mxu1 %vm275_vm0, %v13255_v54  ;;  %10502 = vmatmul.mubr.msk.f32.vlgmr.msra.gmra.mxu0 %vm275_vm0, %v13255_v54  ;;  %v17744_v47 = vld [vmem:[#allocation34_spill] sm:$0xff] }
 0x4ca   :  { %v2163_v53 = vpop.f32.mrf.mxu0  ;;  %10550 = vmatpush3.msra.mxu1 %v13265_v23 }
 0x4cb   :  { %v13269_v7 = vadd.f32 %v2313_v57, %v17721_v63  ;;  %10551 = vmatprep.subr.mxu1 %v11690_v8 }
 0x4cc   :  { %v2166_v22 = vpop.f32.mrf.mxu0  ;;  %10552 = vmatpush3.msra.mxu1 %v11690_v8 }
 0x4cd   :  { %17722 = vst [vmem:[#allocation47_spill] sm:$0xff] %v13269_v7  ;;  %v2314_v37 = vmul.f32 %v13243_v18, %v2166_v22  ;;  %10452 = vmatprep.mubr.msk.f32.mxu1 %vm275_vm0, %v13269_v7  ;;  %10504 = vmatprep.mubr.msk.f32.mxu0 %vm275_vm0, %v13269_v7  ;;  %v17746_v22 = vld [vmem:[#allocation36_spill] sm:$0xff] }
 0x4ce   :  { %v2168_v50 = vpop.f32.mrf.mxu0  ;;  %4171 = vmatprep.subr.mxu1 %v17723_v21 }
 0x4cf   :  { %v13281_v39 = vadd.f32 %v2314_v37, %v17724_v17 }
 0x4d0   :  { %v2171_v60 = vpop.f32.mrf.mxu0 }
 0x4d1   :  { %17725 = vst [vmem:[#allocation46_spill] sm:$0xff] %v13281_v39  ;;  %v2315_v62 = vmul.f32 %v13243_v18, %v2171_v60  ;;  %10453 = vmatmul.mubr.msk.f32.gmra.mxu1 %vm275_vm0, %v13281_v39  ;;  %10505 = vmatmul.mubr.msk.f32.gmra.mxu0 %vm275_vm0, %v13281_v39 }
 0x4d2   :  { %v2173_v40 = vpop.f32.mrf.mxu0 }
 0x4d3   :  { %v13289_v12 = vadd.f32 %v2315_v62, %v17726_v42  ;;  %v17748_v62 = vld [vmem:[#allocation37_spill] sm:$0xff] }
 0x4d4   :  { %v2176_v51 = vpop.f32.mrf.mxu0 }
 0x4d5   :  { %17727 = vst [vmem:[#allocation49_spill] sm:$0xff] %v13289_v12  ;;  %v2316_v0 = vmul.f32 %v13243_v18, %v2176_v51  ;;  %10455 = vmatprep.mubr.msk.f32.mxu1 %vm275_vm0, %v13289_v12  ;;  %10507 = vmatprep.mubr.msk.f32.mxu0 %vm275_vm0, %v13289_v12 }
 0x4d6   :  { %v2178_v44 = vpop.f32.mrf.mxu0 }
 0x4d7   :  { %v13297_v59 = vadd.f32 %v2316_v0, %v17728_v34  ;;  %v17750_v44 = vld [vmem:[#allocation13_spill] sm:$0xff] }
 0x4d8   :  { %v2181_v52 = vpop.f32.mrf.mxu0 }
 0x4d9   :  { %17729 = vst [vmem:[#allocation48_spill] sm:$0xff] %v13297_v59  ;;  %v2317_v31 = vmul.f32 %v13243_v18, %v2181_v52  ;;  %10456 = vmatmul.mubr.msk.f32.gmra.mxu1 %vm275_vm0, %v13297_v59  ;;  %10508 = vmatmul.mubr.msk.f32.gmra.mxu0 %vm275_vm0, %v13297_v59 }
 0x4da   :  { %v2183_v58 = vpop.f32.mrf.mxu0 }
 0x4db   :  { %v13305_v19 = vadd.f32 %v2317_v31, %v17730_v1  ;;  %v17752_v1 = vld [vmem:[#allocation15_spill] sm:$0xff] }
 0x4dc   :  { %v2186_v41 = vpop.f32.mrf.mxu0 }
 0x4dd   :  { %17731 = vst [vmem:[#allocation51_spill] sm:$0xff] %v13305_v19  ;;  %v2318_v38 = vmul.f32 %v13243_v18, %v2186_v41  ;;  %10458 = vmatprep.mubr.msk.f32.mxu1 %vm275_vm0, %v13305_v19  ;;  %10510 = vmatprep.mubr.msk.f32.mxu0 %vm275_vm0, %v13305_v19 }
 0x4de   :  { %v2188_v24 = vpop.f32.mrf.mxu0 }
 0x4df   :  { %v13313_v29 = vadd.f32 %v2318_v38, %v17732_v3 }
 0x4e0   :  { %v2191_v28 = vpop.f32.mrf.mxu0 }
 0x4e1   :  { %17733 = vst [vmem:[#allocation50_spill] sm:$0xff] %v13313_v29  ;;  %v2319_v45 = vmul.f32 %v13243_v18, %v2191_v28  ;;  %10459 = vmatmul.mubr.msk.f32.gmra.mxu1 %vm275_vm0, %v13313_v29  ;;  %10511 = vmatmul.mubr.msk.f32.gmra.mxu0 %vm275_vm0, %v13313_v29  ;;  %v17754_v28 = vld [vmem:[#allocation18_spill] sm:$0xff] }
 0x4e2   :  { %v2193_v14 = vpop.f32.mrf.mxu0 }
 0x4e3   :  { %v13321_v33 = vadd.f32 %v2319_v45, %v17734_v56 }
 0x4e4   :  { %v2196_v13 = vpop.f32.mrf.mxu0 }
 0x4e5   :  { %17735 = vst [vmem:[#allocation53_spill] sm:$0xff] %v13321_v33  ;;  %v2320_v2 = vmul.f32 %v13243_v18, %v2196_v13  ;;  %10461 = vmatprep.mubr.msk.f32.mxu1 %vm275_vm0, %v13321_v33  ;;  %10513 = vmatprep.mubr.msk.f32.mxu0 %vm275_vm0, %v13321_v33 }
 0x4e6   :  { %v2198_v32 = vpop.f32.mrf.mxu0 }
 0x4e7   :  { %v13329_v25 = vadd.f32 %v2320_v2, %v17736_v26  ;;  %v17756_v2 = vld [vmem:[#allocation20_spill] sm:$0xff] }
 0x4e8   :  { %v2201_v5 = vpop.f32.mrf.mxu0 }
 0x4e9   :  { %17737 = vst [vmem:[#allocation52_spill] sm:$0xff] %v13329_v25  ;;  %v2321_v43 = vmul.f32 %v13243_v18, %v2201_v5  ;;  %10462 = vmatmul.mubr.msk.f32.gmra.mxu1 %vm275_vm0, %v13329_v25  ;;  %10514 = vmatmul.mubr.msk.f32.gmra.mxu0 %vm275_vm0, %v13329_v25 }
 0x4ea   :  { %v2203_v48 = vpop.f32.mrf.mxu0 }
 0x4eb   :  { %v13337_v46 = vadd.f32 %v2321_v43, %v17738_v27  ;;  %v17758_v48 = vld [vmem:[#allocation23_spill] sm:$0xff] }
 0x4ec   :  { %v2206_v6 = vpop.f32.mrf.mxu0 }
 0x4ed   :  { %17739 = vst [vmem:[#allocation54_spill] sm:$0xff] %v13337_v46  ;;  %v2322_v20 = vmul.f32 %v13243_v18, %v2206_v6  ;;  %10464 = vmatprep.mubr.msk.f32.mxu1 %vm275_vm0, %v13337_v46  ;;  %10516 = vmatprep.mubr.msk.f32.mxu0 %vm275_vm0, %v13337_v46 }
 0x4ee   :  { %v2208_v11 = vpop.f32.mrf.mxu0 }
 0x4ef   :  { %v13345_v15 = vadd.f32 %v2322_v20, %v17740_v30  ;;  %v17760_v30 = vld [vmem:[#allocation25_spill] sm:$0xff] }
 0x4f0   :  { %v2211_v49 = vpop.f32.mrf.mxu0 }
 0x4f1   :  { %17741 = vst [vmem:[#allocation55_spill] sm:$0xff] %v13345_v15  ;;  %v2323_v10 = vmul.f32 %v13243_v18, %v2211_v49  ;;  %10465 = vmatmul.mubr.msk.f32.gmra.mxu1 %vm275_vm0, %v13345_v15  ;;  %10517 = vmatmul.mubr.msk.f32.gmra.mxu0 %vm275_vm0, %v13345_v15 }
 0x4f2   :  { %v2213_v16 = vpop.f32.mrf.mxu0 }
 0x4f3   :  { %v13353_v35 = vadd.f32 %v2323_v10, %v17742_v55 }
 0x4f4   :  { %v2216_v61 = vpop.f32.mrf.mxu0 }
 0x4f5   :  { %17743 = vst [vmem:[#allocation58_spill] sm:$0xff] %v13353_v35  ;;  %v2324_v4 = vmul.f32 %v13243_v18, %v2216_v61  ;;  %10467 = vmatprep.mubr.msk.f32.mxu1 %vm275_vm0, %v13353_v35  ;;  %10519 = vmatprep.mubr.msk.f32.mxu0 %vm275_vm0, %v13353_v35  ;;  %v17762_v61 = vld [vmem:[#allocation28_spill] sm:$0xff] }
 0x4f6   :  { %v2218_v36 = vpop.f32.mrf.mxu0 }
 0x4f7   :  { %v13361_v57 = vadd.f32 %v2324_v4, %v17744_v47 }
 0x4f8   :  { %v2221_v53 = vpop.f32.mrf.mxu0 }
 0x4f9   :  { %17745 = vst [vmem:[#allocation57_spill] sm:$0xff] %v13361_v57  ;;  %v2325_v63 = vmul.f32 %v13243_v18, %v2221_v53  ;;  %10468 = vmatmul.mubr.msk.f32.gmra.mxu1 %vm275_vm0, %v13361_v57  ;;  %10520 = vmatmul.mubr.msk.f32.gmra.mxu0 %vm275_vm0, %v13361_v57 }
 0x4fa   :  { %v2223_v8 = vpop.f32.mrf.mxu0 }
 0x4fb   :  { %v13369_v37 = vadd.f32 %v2325_v63, %v17746_v22  ;;  %v17764_v63 = vld [vmem:[#allocation30_spill] sm:$0xff] }
 0x4fc   :  { %v2226_v50 = vpop.f32.mrf.mxu0 }
 0x4fd   :  { %17747 = vst [vmem:[#allocation60_spill] sm:$0xff] %v13369_v37  ;;  %v2326_v17 = vmul.f32 %v13243_v18, %v2226_v50  ;;  %10470 = vmatprep.mubr.msk.f32.mxu1 %vm275_vm0, %v13369_v37  ;;  %10522 = vmatprep.mubr.msk.f32.mxu0 %vm275_vm0, %v13369_v37 }
 0x4fe   :  { %v2228_v60 = vpop.f32.mrf.mxu0 }
 0x4ff   :  { %v13377_v40 = vadd.f32 %v2326_v17, %v17748_v62  ;;  %v17766_v60 = vld [vmem:[#allocation33_spill] sm:$0xff] }
 0x500   :  { %v2231_v42 = vpop.f32.mrf.mxu0 }
 0x501   :  { %17749 = vst [vmem:[#allocation59_spill] sm:$0xff] %v13377_v40  ;;  %v2327_v51 = vmul.f32 %v13243_v18, %v2231_v42  ;;  %10471 = vmatmul.mubr.msk.f32.gmra.mxu1 %vm275_vm0, %v13377_v40  ;;  %10523 = vmatmul.mubr.msk.f32.gmra.mxu0 %vm275_vm0, %v13377_v40 }
 0x502   :  { %v2233_v0 = vpop.f32.mrf.mxu0 }
 0x503   :  { %v13385_v34 = vadd.f32 %v2327_v51, %v17750_v44  ;;  %v17768_v44 = vld [vmem:[#allocation35_spill] sm:$0xff] }
 0x504   :  { %v2236_v52 = vpop.f32.mrf.mxu0 }
 0x505   :  { %17751 = vst [vmem:[#allocation62_spill] sm:$0xff] %v13385_v34  ;;  %v2328_v31 = vmul.f32 %v13243_v18, %v2236_v52  ;;  %10473 = vmatprep.mubr.msk.f32.mxu1 %vm275_vm0, %v13385_v34  ;;  %10525 = vmatprep.mubr.msk.f32.mxu0 %vm275_vm0, %v13385_v34 }
 0x506   :  { %v2238_v58 = vpop.f32.mrf.mxu0 }
 0x507   :  { %v13393_v41 = vadd.f32 %v2328_v31, %v17752_v1 }
 0x508   :  { %v2241_v38 = vpop.f32.mrf.mxu0 }
 0x509   :  { %17753 = vst [vmem:[#allocation61_spill] sm:$0xff] %v13393_v41  ;;  %v2329_v24 = vmul.f32 %v13243_v18, %v2241_v38  ;;  %10474 = vmatmul.mubr.msk.f32.gmra.mxu1 %vm275_vm0, %v13393_v41  ;;  %10526 = vmatmul.mubr.msk.f32.gmra.mxu0 %vm275_vm0, %v13393_v41  ;;  %v17770_v38 = vld [vmem:[#allocation38_spill] sm:$0xff] }
 0x50a   :  { %v2243_v3 = vpop.f32.mrf.mxu0 }
 0x50b   :  { %v13401_v45 = vadd.f32 %v2329_v24, %v17754_v28 }
 0x50c   :  { %v2246_v14 = vpop.f32.mrf.mxu0 }
 0x50d   :  { %17755 = vst [vmem:[#allocation12_spill] sm:$0xff] %v13401_v45  ;;  %v2330_v56 = vmul.f32 %v13243_v18, %v2246_v14  ;;  %10476 = vmatprep.mubr.msk.f32.mxu1 %vm275_vm0, %v13401_v45  ;;  %10528 = vmatprep.mubr.msk.f32.mxu0 %vm275_vm0, %v13401_v45 }
 0x50e   :  { %v2248_v13 = vpop.f32.mrf.mxu0 }
 0x50f   :  { %v13409_v32 = vadd.f32 %v2330_v56, %v17756_v2  ;;  %v17772_v56 = vld [vmem:[#allocation39_spill] sm:$0xff] }
 0x510   :  { %v2251_v26 = vpop.f32.mrf.mxu0 }
 0x511   :  { %17757 = vst [vmem:[#allocation14_spill] sm:$0xff] %v13409_v32  ;;  %v2331_v5 = vmul.f32 %v13243_v18, %v2251_v26  ;;  %10477 = vmatmul.mubr.msk.f32.gmra.mxu1 %vm275_vm0, %v13409_v32  ;;  %10529 = vmatmul.mubr.msk.f32.gmra.mxu0 %vm275_vm0, %v13409_v32 }
 0x512   :  { %v2253_v43 = vpop.f32.mrf.mxu0 }
 0x513   :  { %v13417_v27 = vadd.f32 %v2331_v5, %v17758_v48  ;;  %v17774_v43 = vld [vmem:[#allocation40_spill] sm:$0xff] }
 0x514   :  { %v2256_v6 = vpop.f32.mrf.mxu0 }
 0x515   :  { %17759 = vst [vmem:[#allocation16_spill] sm:$0xff] %v13417_v27  ;;  %v2332_v20 = vmul.f32 %v13243_v18, %v2256_v6  ;;  %10479 = vmatprep.mubr.msk.f32.mxu1 %vm275_vm0, %v13417_v27  ;;  %10531 = vmatprep.mubr.msk.f32.mxu0 %vm275_vm0, %v13417_v27 }
 0x516   :  { %v2258_v11 = vpop.f32.mrf.mxu0 }
 0x517   :  { %v13425_v49 = vadd.f32 %v2332_v20, %v17760_v30  ;;  %v17776_v30 = vld [vmem:[#allocation41_spill] sm:$0xff] }
 0x518   :  { %v2261_v10 = vpop.f32.mrf.mxu0 }
 0x519   :  { %17761 = vst [vmem:[#allocation17_spill] sm:$0xff] %v13425_v49  ;;  %v2333_v16 = vmul.f32 %v13243_v18, %v2261_v10  ;;  %10480 = vmatmul.mubr.msk.f32.gmra.mxu1 %vm275_vm0, %v13425_v49  ;;  %10532 = vmatmul.mubr.msk.f32.gmra.mxu0 %vm275_vm0, %v13425_v49 }
 0x51a   :  { %v2263_v55 = vpop.f32.mrf.mxu0 }
 0x51b   :  { %v13433_v4 = vadd.f32 %v2333_v16, %v17762_v61 }
 0x51c   :  { %v2266_v36 = vpop.f32.mrf.mxu0 }
 0x51d   :  { %17763 = vst [vmem:[#allocation19_spill] sm:$0xff] %v13433_v4  ;;  %v2334_v47 = vmul.f32 %v13243_v18, %v2266_v36  ;;  %10482 = vmatprep.mubr.msk.f32.mxu1 %vm275_vm0, %v13433_v4  ;;  %10534 = vmatprep.mubr.msk.f32.mxu0 %vm275_vm0, %v13433_v4  ;;  %v17778_v36 = vld [vmem:[#allocation42_spill] sm:$0xff] }
 0x51e   :  { %v2268_v53 = vpop.f32.mrf.mxu0 }
 0x51f   :  { %v13441_v8 = vadd.f32 %v2334_v47, %v17764_v63 }
 0x520   :  { %v2271_v22 = vpop.f32.mrf.mxu0 }
 0x521   :  { %17765 = vst [vmem:[#allocation21_spill] sm:$0xff] %v13441_v8  ;;  %v2335_v50 = vmul.f32 %v13243_v18, %v2271_v22  ;;  %10483 = vmatmul.mubr.msk.f32.gmra.mxu1 %vm275_vm0, %v13441_v8  ;;  %10535 = vmatmul.mubr.msk.f32.gmra.mxu0 %vm275_vm0, %v13441_v8 }
 0x522   :  { %v2273_v17 = vpop.f32.mrf.mxu0 }
 0x523   :  { %v13449_v62 = vadd.f32 %v2335_v50, %v17766_v60  ;;  %v17780_v50 = vld [vmem:[#allocation43_spill] sm:$0xff] }
 0x524   :  { %v2276_v42 = vpop.f32.mrf.mxu0 }
 0x525   :  { %17767 = vst [vmem:[#allocation22_spill] sm:$0xff] %v13449_v62  ;;  %v2336_v51 = vmul.f32 %v13243_v18, %v2276_v42  ;;  %10485 = vmatprep.mubr.msk.f32.mxu1 %vm275_vm0, %v13449_v62  ;;  %10537 = vmatprep.mubr.msk.f32.mxu0 %vm275_vm0, %v13449_v62 }
 0x526   :  { %v2278_v0 = vpop.f32.mrf.mxu0 }
 0x527   :  { %v13457_v52 = vadd.f32 %v2336_v51, %v17768_v44  ;;  %v13580_v51 = vld [vmem:[%s17317_s4] ss:$0 sm:$0xff] }
 0x528   :  { %v2281_v31 = vpop.f32.mrf.mxu0 }
 0x529   :  { %17769 = vst [vmem:[#allocation24_spill] sm:$0xff] %v13457_v52  ;;  %v2337_v58 = vmul.f32 %v13243_v18, %v2281_v31  ;;  %10486 = vmatmul.mubr.msk.f32.gmra.mxu1 %vm275_vm0, %v13457_v52  ;;  %10538 = vmatmul.mubr.msk.f32.gmra.mxu0 %vm275_vm0, %v13457_v52 }
 0x52a   :  { %v2283_v1 = vpop.f32.mrf.mxu0 }
 0x52b   :  { %v13465_v24 = vadd.f32 %v2337_v58, %v17770_v38 }
 0x52c   :  { %v2286_v3 = vpop.f32.mrf.mxu0 }
 0x52d   :  { %17771 = vst [vmem:[#allocation26_spill] sm:$0xff] %v13465_v24  ;;  %v2338_v28 = vmul.f32 %v13243_v18, %v2286_v3  ;;  %10488 = vmatprep.mubr.msk.f32.mxu1 %vm275_vm0, %v13465_v24  ;;  %10540 = vmatprep.mubr.msk.f32.mxu0 %vm275_vm0, %v13465_v24 }
 0x52e   :  { %v2288_v14 = vpop.f32.mrf.mxu0 }
 0x52f   :  { %v13473_v13 = vadd.f32 %v2338_v28, %v17772_v56 }
 0x530   :  { %v2291_v2 = vpop.f32.mrf.mxu0 }
 0x531   :  { %17773 = vst [vmem:[#allocation27_spill] sm:$0xff] %v13473_v13  ;;  %v2339_v26 = vmul.f32 %v13243_v18, %v2291_v2  ;;  %10489 = vmatmul.mubr.msk.f32.gmra.mxu1 %vm275_vm0, %v13473_v13  ;;  %10541 = vmatmul.mubr.msk.f32.gmra.mxu0 %vm275_vm0, %v13473_v13 }
 0x532   :  { %v2293_v5 = vpop.f32.mrf.mxu0 }
 0x533   :  { %v13481_v48 = vadd.f32 %v2339_v26, %v17774_v43 }
 0x534   :  { %v2296_v6 = vpop.f32.mrf.mxu0 }
 0x535   :  { %17775 = vst [vmem:[#allocation29_spill] sm:$0xff] %v13481_v48  ;;  %v2340_v20 = vmul.f32 %v13243_v18, %v2296_v6  ;;  %10491 = vmatprep.mubr.msk.f32.mxu1 %vm275_vm0, %v13481_v48  ;;  %10543 = vmatprep.mubr.msk.f32.mxu0 %vm275_vm0, %v13481_v48 }
 0x536   :  { %v2298_v11 = vpop.f32.mrf.mxu0 }
 0x537   :  { %v13489_v10 = vadd.f32 %v2340_v20, %v17776_v30 }
 0x538   :  { %v2301_v16 = vpop.f32.mrf.mxu0 }
 0x539   :  { %17777 = vst [vmem:[#allocation31_spill] sm:$0xff] %v13489_v10  ;;  %v2341_v55 = vmul.f32 %v13243_v18, %v2301_v16  ;;  %10492 = vmatmul.mubr.msk.f32.gmra.mxu1 %vm275_vm0, %v13489_v10  ;;  %10544 = vmatmul.mubr.msk.f32.gmra.mxu0 %vm275_vm0, %v13489_v10 }
 0x53a   :  { %v2303_v61 = vpop.f32.mrf.mxu0 }
 0x53b   :  { %v13497_v47 = vadd.f32 %v2341_v55, %v17778_v36 }
 0x53c   :  { %v2306_v53 = vpop.f32.mrf.mxu0 }
 0x53d   :  { %17779 = vst [vmem:[#allocation32_spill] sm:$0xff] %v13497_v47  ;;  %v2342_v63 = vmul.f32 %v13243_v18, %v2306_v53  ;;  %10494 = vmatprep.mubr.msk.f32.mxu1 %vm275_vm0, %v13497_v47  ;;  %10546 = vmatprep.mubr.msk.f32.mxu0 %vm275_vm0, %v13497_v47 }
 0x53e   :  { %v2308_v22 = vpop.f32.mrf.mxu0 }
 0x53f   :  { %v13505_v17 = vadd.f32 %v2342_v63, %v17780_v50 }
 0x541   :  { %17781 = vst [vmem:[#allocation34_spill] sm:$0xff] %v13505_v17  ;;  %10495 = vmatmul.mubr.msk.f32.gmra.mxu1 %vm275_vm0, %v13505_v17  ;;  %10547 = vmatmul.mubr.msk.f32.gmra.mxu0 %vm275_vm0, %v13505_v17 }
 0x542   :  { %10553 = vmatprep.mubr.msk.f32.mxu1 %vm275_vm0, %v13247_v9 }
 0x545   :  { %10554 = vmatmul.mubr.msk.f32.vlgmr.msra.gmra.mxu1 %vm275_vm0, %v13255_v54 }
 0x546   :  { %10556 = vmatprep.mubr.msk.f32.mxu1 %vm275_vm0, %v13269_v7 }
 0x549   :  { %10557 = vmatmul.mubr.msk.f32.gmra.mxu1 %vm275_vm0, %v13281_v39 }
 0x54a   :  { %10559 = vmatprep.mubr.msk.f32.mxu1 %vm275_vm0, %v13289_v12 }
 0x54d   :  { %10560 = vmatmul.mubr.msk.f32.gmra.mxu1 %vm275_vm0, %v13297_v59 }
 0x54e   :  { %10562 = vmatprep.mubr.msk.f32.mxu1 %vm275_vm0, %v13305_v19 }
 0x551   :  { %10563 = vmatmul.mubr.msk.f32.gmra.mxu1 %vm275_vm0, %v13313_v29 }
 0x552   :  { %10565 = vmatprep.mubr.msk.f32.mxu1 %vm275_vm0, %v13321_v33 }
 0x555   :  { %10566 = vmatmul.mubr.msk.f32.gmra.mxu1 %vm275_vm0, %v13329_v25 }
 0x556   :  { %10568 = vmatprep.mubr.msk.f32.mxu1 %vm275_vm0, %v13337_v46 }
 0x559   :  { %10569 = vmatmul.mubr.msk.f32.gmra.mxu1 %vm275_vm0, %v13345_v15 }
 0x55a   :  { %10571 = vmatprep.mubr.msk.f32.mxu1 %vm275_vm0, %v13353_v35 }
 0x55d   :  { %10572 = vmatmul.mubr.msk.f32.gmra.mxu1 %vm275_vm0, %v13361_v57 }
 0x55e   :  { %10574 = vmatprep.mubr.msk.f32.mxu1 %vm275_vm0, %v13369_v37 }
 0x561   :  { %10575 = vmatmul.mubr.msk.f32.gmra.mxu1 %vm275_vm0, %v13377_v40 }
 0x562   :  { %10577 = vmatprep.mubr.msk.f32.mxu1 %vm275_vm0, %v13385_v34 }
 0x565   :  { %10578 = vmatmul.mubr.msk.f32.gmra.mxu1 %vm275_vm0, %v13393_v41 }
 0x566   :  { %10580 = vmatprep.mubr.msk.f32.mxu1 %vm275_vm0, %v13401_v45 }
 0x569   :  { %10581 = vmatmul.mubr.msk.f32.gmra.mxu1 %vm275_vm0, %v13409_v32 }
 0x56a   :  { %10583 = vmatprep.mubr.msk.f32.mxu1 %vm275_vm0, %v13417_v27 }
 0x56d   :  { %10584 = vmatmul.mubr.msk.f32.gmra.mxu1 %vm275_vm0, %v13425_v49 }
 0x56e   :  { %10586 = vmatprep.mubr.msk.f32.mxu1 %vm275_vm0, %v13433_v4 }
 0x571   :  { %10587 = vmatmul.mubr.msk.f32.gmra.mxu1 %vm275_vm0, %v13441_v8 }
 0x572   :  { %10589 = vmatprep.mubr.msk.f32.mxu1 %vm275_vm0, %v13449_v62 }
 0x575   :  { %10590 = vmatmul.mubr.msk.f32.gmra.mxu1 %vm275_vm0, %v13457_v52 }
 0x576   :  { %10592 = vmatprep.mubr.msk.f32.mxu1 %vm275_vm0, %v13465_v24 }
 0x579   :  { %10593 = vmatmul.mubr.msk.f32.gmra.mxu1 %vm275_vm0, %v13473_v13 }
 0x57a   :  { %10595 = vmatprep.mubr.msk.f32.mxu1 %vm275_vm0, %v13481_v48 }
 0x57d   :  { %10596 = vmatmul.mubr.msk.f32.gmra.mxu1 %vm275_vm0, %v13489_v10 }
 0x57e   :  { %10598 = vmatprep.mubr.msk.f32.mxu1 %vm275_vm0, %v13497_v47 }
 0x581   :  { %10599 = vmatmul.mubr.msk.f32.gmra.mxu1 %vm275_vm0, %v13505_v17 }
 0x589   :  { %v13575_v60 = vpop.f32.mrf.mxu1  ;;  %v13587_v44 = vpop.f32.mrf.mxu0 }
 0x58b   :  { %v2537_v42 = vpop.f32.mrf.mxu1  ;;  %v13589_v31 = vpop.f32.mrf.mxu0 }
 0x58c   :  { %v13583_v0 = vadd.f32 %v13580_v51, %v2537_v42 }
 0x58e   :  { %9829 = vmatprep.mubr.msk.f32.mxu0 %vm1059_vm1, %v13583_v0 }
 0x591   :  { %v13591_v58 = vpop.f32.mrf.mxu1  ;;  %v13593_v1 = vpop.f32.mrf.mxu0 }
 0x593   :  { %v13595_v38 = vpop.f32.mrf.mxu1  ;;  %v13597_v3 = vpop.f32.mrf.mxu0 }
 0x599   :  { %v13599_v28 = vpop.f32.mrf.mxu1  ;;  %v13601_v14 = vpop.f32.mrf.mxu0 }
 0x59b   :  { %v13603_v56 = vpop.f32.mrf.mxu1  ;;  %v13605_v2 = vpop.f32.mrf.mxu0 }
 0x5a1   :  { %v13607_v26 = vpop.f32.mrf.mxu1  ;;  %v13609_v5 = vpop.f32.mrf.mxu0 }
 0x5a3   :  { %v13611_v43 = vpop.f32.mrf.mxu1  ;;  %v13613_v6 = vpop.f32.mrf.mxu0 }
 0x5a9   :  { %v13615_v20 = vpop.f32.mrf.mxu1  ;;  %v13617_v11 = vpop.f32.mrf.mxu0 }
 0x5ab   :  { %v13619_v30 = vpop.f32.mrf.mxu1  ;;  %v13621_v16 = vpop.f32.mrf.mxu0 }
 0x5b1   :  { %v13623_v55 = vpop.f32.mrf.mxu1  ;;  %v13625_v61 = vpop.f32.mrf.mxu0 }
 0x5b3   :  { %v13627_v36 = vpop.f32.mrf.mxu1  ;;  %v13629_v53 = vpop.f32.mrf.mxu0 }
 0x5b9   :  { %v13631_v63 = vpop.f32.mrf.mxu1  ;;  %v10521_v22 = vpop.f32.mrf.mxu0 }
 0x5bb   :  { %v13633_v50 = vpop.f32.mrf.mxu1  ;;  %v2822_v42 = vpop.f32.mrf.mxu0 }
 0x5c1   :  { %v13635_v17 = vpop.f32.mrf.mxu1  ;;  %v10524_v47 = vpop.f32.mrf.mxu0 }
 0x5c3   :  { %v13637_v10 = vpop.f32.mrf.mxu1  ;;  %v2832_v40 = vpop.f32.mrf.mxu0 }
 0x5c9   :  { %v13639_v48 = vpop.f32.mrf.mxu1  ;;  %v13641_v37 = vpop.f32.mrf.mxu0 }
 0x5cb   :  { %v13643_v13 = vpop.f32.mrf.mxu1  ;;  %v13645_v57 = vpop.f32.mrf.mxu0 }
 0x5d1   :  { %v13647_v24 = vpop.f32.mrf.mxu1  ;;  %v13649_v35 = vpop.f32.mrf.mxu0 }
 0x5d3   :  { %v13651_v52 = vpop.f32.mrf.mxu1  ;;  %v13653_v15 = vpop.f32.mrf.mxu0 }
 0x5d9   :  { %v13655_v62 = vpop.f32.mrf.mxu1  ;;  %v13657_v46 = vpop.f32.mrf.mxu0 }
 0x5da   :  { %17782 = vst [vmem:[#allocation36_spill] sm:$0xff] %v13655_v62 }
 0x5db   :  { %v13659_v8 = vpop.f32.mrf.mxu1  ;;  %v13661_v25 = vpop.f32.mrf.mxu0 }
 0x5e1   :  { %v13663_v4 = vpop.f32.mrf.mxu1  ;;  %v13665_v33 = vpop.f32.mrf.mxu0 }
 0x5e2   :  { %17783 = vst [vmem:[#allocation37_spill] sm:$0xff] %v13663_v4 }
 0x5e3   :  { %v13667_v49 = vpop.f32.mrf.mxu1  ;;  %v13669_v29 = vpop.f32.mrf.mxu0 }
 0x5e4   :  { %17784 = vst [vmem:[#allocation13_spill] sm:$0xff] %v13667_v49 }
 0x5e9   :  { %v13671_v27 = vpop.f32.mrf.mxu1  ;;  %v10539_v19 = vpop.f32.mrf.mxu0 }
 0x5ea   :  { %17785 = vst [vmem:[#allocation15_spill] sm:$0xff] %v13671_v27  ;;  %v13688_v27 = vld [vmem:[%s17318_s5] ss:$0 sm:$0xff] }
 0x5eb   :  { %v13673_v32 = vpop.f32.mrf.mxu1  ;;  %v2882_v59 = vpop.f32.mrf.mxu0 }
 0x5ec   :  { %17786 = vst [vmem:[#allocation18_spill] sm:$0xff] %v13673_v32  ;;  %v2838_v32 = vadd.f32 %v13688_v27, %v10524_v47 }
 0x5f1   :  { %v13675_v45 = vpop.f32.mrf.mxu1  ;;  %v10542_v12 = vpop.f32.mrf.mxu0 }
 0x5f2   :  { %17787 = vst [vmem:[#allocation20_spill] sm:$0xff] %v13675_v45 }
 0x5f3   :  { %v13677_v41 = vpop.f32.mrf.mxu1  ;;  %v2892_v39 = vpop.f32.mrf.mxu0 }
 0x5f4   :  { %17788 = vst [vmem:[#allocation23_spill] sm:$0xff] %v13677_v41 }
 0x5f9   :  { %v13679_v34 = vpop.f32.mrf.mxu1  ;;  %v10545_v7 = vpop.f32.mrf.mxu0 }
 0x5fa   :  { %17789 = vst [vmem:[#allocation25_spill] sm:$0xff] %v13679_v34 }
 0x5fb   :  { %v13681_v54 = vpop.f32.mrf.mxu1  ;;  %v2902_v9 = vpop.f32.mrf.mxu0 }
 0x5fc   :  { %17790 = vst [vmem:[#allocation28_spill] sm:$0xff] %v13681_v54 }
 0x601   :  { %v13683_v18 = vpop.f32.mrf.mxu1  ;;  %v10548_v4 = vpop.f32.mrf.mxu0 }
 0x602   :  { %17791 = vst [vmem:[#allocation30_spill] sm:$0xff] %v13683_v18  ;;  %v2918_v45 = vadd.f32 %v13688_v27, %v10548_v4  ;;  %v2833_v18 = vadd.f32 %v13688_v27, %v2832_v40  ;;  %v2908_v4 = vadd.f32 %v13688_v27, %v10545_v7  ;;  %v2823_v7 = vadd.f32 %v13688_v27, %v2822_v42 }
 0x603   :  { %v13692_v41 = vpop.f32.mrf.mxu1  ;;  %v2912_v49 = vpop.f32.mrf.mxu0 }
 0x604   :  { %17792 = vst [vmem:[#allocation33_spill] sm:$0xff] %v13692_v41  ;;  %v2913_v34 = vadd.f32 %v13688_v27, %v2912_v49  ;;  %9797 = vmatprep.subr.msk.mxu0 %vm1059_vm1, %v2918_v45  ;;  %v2828_v45 = vadd.f32 %v13688_v27, %v10521_v22 }
 0x605   :  { %v13696_v54 = vpop.f32.mrf.mxu1  ;;  %9798 = vmatpush3.xpose.msk.msra.mxu0 %vm1059_vm1, %v2838_v32  ;;  %v2903_v32 = vadd.f32 %v13688_v27, %v2902_v9  ;;  %v2818_v9 = vadd.f32 %v13688_v27, %v13625_v61  ;;  %v2808_v61 = vadd.f32 %v13688_v27, %v13617_v11  ;;  %v13749_v11 = vld [vmem:[%s17319_s6] ss:$0 sm:$0xff] }
 0x606   :  { %9799 = vmatprep.subr.msk.mxu0 %vm1059_vm1, %v2913_v34 }
 0x607   :  { %v13701_v62 = vpop.f32.mrf.mxu1 }
 0x609   :  { %v13704_v47 = vpop.f32.mrf.mxu1  ;;  %9800 = vmatpush3.xpose.msk.msra.mxu0 %vm1059_vm1, %v2833_v18  ;;  %v2898_v18 = vadd.f32 %v13688_v27, %v10542_v12  ;;  %v2813_v12 = vadd.f32 %v13688_v27, %v13629_v53  ;;  %v2803_v53 = vadd.f32 %v13688_v27, %v13621_v16 }
 0x60a   :  { %9801 = vmatprep.subr.msk.mxu0 %vm1059_vm1, %v2908_v4  ;;  %v2893_v4 = vadd.f32 %v13688_v27, %v2892_v39 }
 0x60b   :  { %v13709_v49 = vpop.f32.mrf.mxu1 }
 0x60d   :  { %v13712_v41 = vpop.f32.mrf.mxu1  ;;  %9802 = vmatpush3.xpose.msk.msra.mxu0 %vm1059_vm1, %v2828_v45 }
 0x60e   :  { %9803 = vmatprep.subr.msk.mxu0 %vm1059_vm1, %v2903_v32  ;;  %v2888_v32 = vadd.f32 %v13688_v27, %v10539_v19 }
 0x60f   :  { %v13717_v40 = vpop.f32.mrf.mxu1 }
 0x611   :  { %v13720_v34 = vpop.f32.mrf.mxu1  ;;  %9804 = vmatpush3.xpose.msk.msra.mxu0 %vm1059_vm1, %v2823_v7 }
 0x612   :  { %9805 = vmatprep.subr.msk.mxu0 %vm1059_vm1, %v2898_v18  ;;  %v2883_v18 = vadd.f32 %v13688_v27, %v2882_v59 }
 0x613   :  { %v13726_v22 = vpop.f32.mrf.mxu1 }
 0x615   :  { %v10567_v45 = vpop.f32.mrf.mxu1  ;;  %9806 = vmatpush3.xpose.msk.msra.mxu0 %vm1059_vm1, %v2818_v9 }
 0x616   :  { %9807 = vmatprep.subr.msk.mxu0 %vm1059_vm1, %v2893_v4  ;;  %v2878_v4 = vadd.f32 %v13688_v27, %v13665_v33 }
 0x617   :  { %v3027_v42 = vpop.f32.mrf.mxu1 }
 0x619   :  { %v10570_v7 = vpop.f32.mrf.mxu1  ;;  %9808 = vmatpush3.xpose.msk.msra.mxu0 %vm1059_vm1, %v2813_v12 }
 0x61a   :  { %9809 = vmatprep.subr.msk.mxu0 %vm1059_vm1, %v2888_v32  ;;  %v2798_v32 = vadd.f32 %v13688_v27, %v13609_v5  ;;  %v2793_v5 = vadd.f32 %v13688_v27, %v13613_v6  ;;  %v2788_v6 = vadd.f32 %v13688_v27, %v13601_v14  ;;  %v2783_v14 = vadd.f32 %v13688_v27, %v13605_v2 }
 0x61b   :  { %v3037_v39 = vpop.f32.mrf.mxu1  ;;  %v2778_v2 = vadd.f32 %v13688_v27, %v13593_v1  ;;  %v3013_v1 = vadd.f32 %v13749_v11, %v13712_v41  ;;  %v3003_v41 = vadd.f32 %v13749_v11, %v13704_v47  ;;  %v2993_v47 = vadd.f32 %v13749_v11, %v13696_v54 }
 0x61d   :  { %v10573_v9 = vpop.f32.mrf.mxu1  ;;  %9810 = vmatpush3.xpose.msk.msra.mxu0 %vm1059_vm1, %v2808_v61  ;;  %v2873_v61 = vadd.f32 %v13688_v27, %v13669_v29  ;;  %v2868_v29 = vadd.f32 %v13688_v27, %v13657_v46  ;;  %v2863_v46 = vadd.f32 %v13688_v27, %v13661_v25  ;;  %v2858_v25 = vadd.f32 %v13688_v27, %v13649_v35 }
 0x61e   :  { %9811 = vmatprep.subr.msk.mxu0 %vm1059_vm1, %v2883_v18  ;;  %v2853_v35 = vadd.f32 %v13688_v27, %v13653_v15 }
 0x61f   :  { %v3047_v19 = vpop.f32.mrf.mxu1 }
 0x621   :  { %v10576_v12 = vpop.f32.mrf.mxu1  ;;  %9812 = vmatpush3.xpose.msk.msra.mxu0 %vm1059_vm1, %v2803_v53  ;;  %v3053_v53 = vadd.f32 %v13749_v11, %v10573_v9  ;;  %v3043_v9 = vadd.f32 %v13749_v11, %v10570_v7  ;;  %v3033_v7 = vadd.f32 %v13749_v11, %v10567_v45  ;;  %v3023_v45 = vadd.f32 %v13749_v11, %v13720_v34 }
 0x622   :  { %v3063_v59 = vadd.f32 %v13749_v11, %v10576_v12  ;;  %9813 = vmatprep.subr.msk.mxu0 %vm1059_vm1, %v2878_v4  ;;  %v3048_v12 = vadd.f32 %v13749_v11, %v3047_v19  ;;  %v3038_v19 = vadd.f32 %v13749_v11, %v3037_v39  ;;  %v3028_v39 = vadd.f32 %v13749_v11, %v3027_v42 }
 0x623   :  { %v3057_v16 = vpop.f32.mrf.mxu1  ;;  %v3018_v42 = vadd.f32 %v13749_v11, %v13726_v22  ;;  %v2773_v34 = vadd.f32 %v13688_v27, %v13597_v3  ;;  %v2848_v22 = vadd.f32 %v13688_v27, %v13641_v37  ;;  %v2768_v3 = vadd.f32 %v13688_v27, %v13587_v44 }
 0x624   :  { %v3058_v33 = vadd.f32 %v13749_v11, %v3057_v16  ;;  %4172 = vmatpush1.msra.mxu1 %v3063_v59  ;;  %v2843_v37 = vadd.f32 %v13688_v27, %v13645_v57  ;;  %v2763_v44 = vadd.f32 %v13688_v27, %v13589_v31  ;;  %v2988_v57 = vadd.f32 %v13749_v11, %v13701_v62 }
 0x625   :  { %v13758_v18 = vpop.f32.mrf.mxu1  ;;  %9814 = vmatpush3.xpose.msk.msra.mxu0 %vm1059_vm1, %v2798_v32  ;;  %4173 = vmatprep.subr.mxu1 %v17723_v21  ;;  %v2543_v27 = vadd.f32 %v13580_v51, %v13575_v60  ;;  %v2548_v60 = vadd.f32 %v13580_v51, %v13595_v38  ;;  %v2553_v38 = vadd.f32 %v13580_v51, %v13591_v58 }
 0x626   :  { %9815 = vmatprep.subr.msk.mxu0 %vm1059_vm1, %v2873_v61  ;;  %4174 = vmatpush1.msra.mxu1 %v3058_v33  ;;  %v2558_v58 = vadd.f32 %v13580_v51, %v13603_v56 }
 0x627   :  { %v13766_v4 = vpop.f32.mrf.mxu1  ;;  %4175 = vmatprep.subr.mxu1 %v17723_v21 }
 0x628   :  { %4176 = vmatpush1.msra.mxu1 %v3053_v53 }
 0x629   :  { %v13772_v59 = vpop.f32.mrf.mxu1  ;;  %9816 = vmatpush3.xpose.msk.msra.mxu0 %vm1059_vm1, %v2793_v5  ;;  %4177 = vmatprep.subr.mxu1 %v17723_v21 }
 0x62a   :  { %9817 = vmatprep.subr.msk.mxu0 %vm1059_vm1, %v2868_v29  ;;  %4178 = vmatpush1.msra.mxu1 %v3048_v12  ;;  %v3008_v29 = vadd.f32 %v13749_v11, %v13717_v40  ;;  %v2998_v40 = vadd.f32 %v13749_v11, %v13709_v49 }
 0x62b   :  { %v13780_v32 = vpop.f32.mrf.mxu1  ;;  %4179 = vmatprep.subr.mxu1 %v17723_v21 }
 0x62c   :  { %4180 = vmatpush1.msra.mxu1 %v3043_v9 }
 0x62d   :  { %v13786_v16 = vpop.f32.mrf.mxu1  ;;  %9818 = vmatpush3.xpose.msk.msra.mxu0 %vm1059_vm1, %v2788_v6  ;;  %4181 = vmatprep.subr.mxu1 %v17723_v21 }
 0x62e   :  { %9819 = vmatprep.subr.msk.mxu0 %vm1059_vm1, %v2863_v46  ;;  %4182 = vmatpush1.msra.mxu1 %v3038_v19  ;;  %v11694_v19 = vld [vmem:[%s17314_s1 + $0x8] sm:$0xff] }
 0x62f   :  { %v13794_v61 = vpop.f32.mrf.mxu1  ;;  %4183 = vmatprep.subr.mxu1 %v17723_v21 }
 0x630   :  { %4184 = vmatpush1.msra.mxu1 %v3033_v7 }
 0x631   :  { %v13800_v33 = vpop.f32.mrf.mxu1  ;;  %9820 = vmatpush3.xpose.msk.msra.mxu0 %vm1059_vm1, %v2783_v14  ;;  %4185 = vmatprep.subr.mxu1 %v17723_v21  ;;  %v11695_v14 = vld [vmem:[%s17314_s1] sm:$0xff] }
 0x632   :  { %9821 = vmatprep.subr.msk.mxu0 %vm1059_vm1, %v2858_v25  ;;  %4186 = vmatpush1.msra.mxu1 %v3028_v39 }
 0x633   :  { %v13809_v53 = vpop.f32.mrf.mxu1  ;;  %4187 = vmatprep.subr.mxu1 %v17723_v21 }
 0x634   :  { %4188 = vmatpush1.msra.mxu1 %v3023_v45  ;;  %v3098_v56 = vadd.f32 %v13749_v11, %v13809_v53  ;;  %v3083_v53 = vadd.f32 %v13749_v11, %v13772_v59  ;;  %v2578_v59 = vadd.f32 %v13580_v51, %v13619_v30  ;;  %v11696_v30 = vld [vmem:[%s17315_s2 + $0x8] sm:$0xff] }
 0x635   :  { %v13816_v5 = vpop.f32.mrf.mxu1  ;;  %9822 = vmatpush3.xpose.msk.msra.mxu0 %vm1059_vm1, %v2778_v2  ;;  %4189 = vmatprep.subr.mxu1 %v17723_v21  ;;  %v3103_v2 = vadd.f32 %v13749_v11, %v13800_v33  ;;  %v2568_v33 = vadd.f32 %v13580_v51, %v13611_v43  ;;  %v3078_v43 = vadd.f32 %v13749_v11, %v13780_v32  ;;  %v17793_v32 = vld [vmem:[#allocation36_spill] sm:$0xff] }
 0x636   :  { %9823 = vmatprep.subr.msk.mxu0 %vm1059_vm1, %v2853_v35  ;;  %4190 = vmatpush1.msra.mxu1 %v3018_v42  ;;  %v3113_v45 = vadd.f32 %v13749_v11, %v13816_v5  ;;  %v2563_v35 = vadd.f32 %v13580_v51, %v13599_v28  ;;  %v3093_v42 = vadd.f32 %v13749_v11, %v13786_v16  ;;  %v17794_v5 = vld [vmem:[#allocation13_spill] sm:$0xff] }
 0x637   :  { %v13825_v15 = vpop.f32.mrf.mxu1  ;;  %4191 = vmatprep.subr.mxu1 %v17723_v21  ;;  %v3088_v28 = vadd.f32 %v13749_v11, %v13794_v61  ;;  %v2573_v16 = vadd.f32 %v13580_v51, %v13607_v26  ;;  %v3073_v61 = vadd.f32 %v13749_v11, %v13758_v18  ;;  %v3068_v26 = vadd.f32 %v13749_v11, %v13766_v4 }
 0x638   :  { %4192 = vmatpush1.msra.mxu1 %v3013_v1  ;;  %v2583_v18 = vadd.f32 %v13580_v51, %v13615_v20  ;;  %v2593_v4 = vadd.f32 %v13580_v51, %v13623_v55  ;;  %v2598_v20 = vadd.f32 %v13580_v51, %v13633_v50  ;;  %v2608_v55 = vadd.f32 %v13580_v51, %v13637_v10  ;;  %v17795_v1 = vld [vmem:[#allocation37_spill] sm:$0xff] }
 0x639   :  { %v10594_v12 = vpop.f32.mrf.mxu1  ;;  %9824 = vmatpush3.xpose.msk.msra.mxu0 %vm1059_vm1, %v2773_v34  ;;  %4193 = vmatprep.subr.mxu1 %v17723_v21  ;;  %v2613_v50 = vadd.f32 %v13580_v51, %v13635_v17  ;;  %v2623_v10 = vadd.f32 %v13580_v51, %v13639_v48  ;;  %v2628_v17 = vadd.f32 %v13580_v51, %v13651_v52  ;;  %v17796_v34 = vld [vmem:[#allocation18_spill] sm:$0xff] }
 0x63a   :  { %9825 = vmatprep.subr.msk.mxu0 %vm1059_vm1, %v2848_v22  ;;  %4194 = vmatpush1.msra.mxu1 %v3008_v29  ;;  %v3123_v25 = vadd.f32 %v13749_v11, %v10594_v12  ;;  %v2638_v48 = vadd.f32 %v13580_v51, %v13659_v8  ;;  %v2643_v52 = vadd.f32 %v13580_v51, %v17793_v32  ;;  %v17797_v22 = vld [vmem:[#allocation15_spill] sm:$0xff]  ;;  %v149_v32 = vld [vmem:[#allocation6 + $0x260] sm:$0xff] }
 0x63b   :  { %v3117_v9 = vpop.f32.mrf.mxu1  ;;  %4195 = vmatprep.subr.mxu1 %v17723_v21  ;;  %v2653_v8 = vadd.f32 %v13580_v51, %v17795_v1  ;;  %v2663_v29 = vadd.f32 %v13580_v51, %v17797_v22  ;;  %v17798_v12 = vld [vmem:[#allocation23_spill] sm:$0xff] }
 0x63c   :  { %4196 = vmatpush1.msra.mxu1 %v3003_v41  ;;  %v3118_v39 = vadd.f32 %v13749_v11, %v3117_v9  ;;  %v2668_v41 = vadd.f32 %v13580_v51, %v17798_v12 }
 0x63d   :  { %v10597_v6 = vpop.f32.mrf.mxu1  ;;  %9826 = vmatpush3.xpose.msk.msra.mxu0 %vm1059_vm1, %v2768_v3  ;;  %4197 = vmatprep.subr.mxu1 %v17723_v21  ;;  %v17799_v3 = vld [vmem:[#allocation20_spill] sm:$0xff] }
 0x63e   :  { %9827 = vmatprep.subr.msk.mxu0 %vm1059_vm1, %v2843_v37  ;;  %4198 = vmatpush1.msra.mxu1 %v2998_v40  ;;  %v3133_v7 = vadd.f32 %v13749_v11, %v10597_v6  ;;  %v2673_v9 = vadd.f32 %v13580_v51, %v17799_v3  ;;  %v17800_v37 = vld [vmem:[#allocation28_spill] sm:$0xff]  ;;  %v17801_v6 = vld [vmem:[#allocation25_spill] sm:$0xff] }
 0x63f   :  { %v3127_v46 = vpop.f32.mrf.mxu1  ;;  %4199 = vmatprep.subr.mxu1 %v17723_v21  ;;  %v2678_v40 = vadd.f32 %v13580_v51, %v17800_v37  ;;  %v153_v37 = vld [vmem:[#allocation6 + $0x280] sm:$0xff] }
 0x640   :  { %4200 = vmatpush1.msra.mxu1 %v2993_v47  ;;  %v2683_v47 = vadd.f32 %v13580_v51, %v17801_v6  ;;  %v154_v6 = vld [vmem:[#allocation6 + $0x288] sm:$0xff] }
 0x641   :  { %v10600_v49 = vpop.f32.mrf.mxu1  ;;  %9828 = vmatpush3.xpose.msk.msra.mxu0 %vm1059_vm1, %v2763_v44  ;;  %4201 = vmatprep.subr.mxu1 %v17723_v21  ;;  %v17802_v44 = vld [vmem:[#allocation33_spill] sm:$0xff] }
 0x642   :  { %v3143_v54 = vadd.f32 %v13749_v11, %v10600_v49  ;;  %4202 = vmatpush1.msra.mxu1 %v2988_v57  ;;  %10601 = vmatprep.subr.mxu0 %v11694_v19  ;;  %v17803_v57 = vld [vmem:[#allocation30_spill] sm:$0xff] }
 0x643   :  { %v3137_v31 = vpop.f32.mrf.mxu1  ;;  %4203 = vmatprep.subr.mxu1 %v17723_v21  ;;  %v2693_v49 = vadd.f32 %v13580_v51, %v17803_v57 }
 0x644   :  { %v3138_v62 = vadd.f32 %v13749_v11, %v3137_v31  ;;  %9830 = vmatmul.mubr.msk.f32.vlgmr.msra.gmra.mxu0 %vm1059_vm1, %v13583_v0  ;;  %4204 = vmatpush2.msra.mxu1 %v3143_v54  ;;  %v3128_v0 = vadd.f32 %v13749_v11, %v3127_v46  ;;  %v2688_v46 = vadd.f32 %v13580_v51, %v17802_v44  ;;  %v137_v54 = vld [vmem:[#allocation6 + $0x200] sm:$0xff] }
 0x645   :  { %9831 = vmatprep.mubr.msk.f32.mxu0 %vm1059_vm1, %v2543_v27  ;;  %4205 = vmatprep.subr.mxu1 %v17723_v21 }
 0x646   :  { %4206 = vmatpush2.msra.mxu1 %v3138_v62  ;;  %10602 = vmatpush3.msra.mxu0 %v11694_v19 }
 0x647   :  { %4207 = vmatprep.subr.mxu1 %v17723_v21  ;;  %10603 = vmatprep.subr.mxu0 %v11695_v14 }
 0x648   :  { %9832 = vmatmul.mubr.msk.f32.gmra.mxu0 %vm1059_vm1, %v2543_v27  ;;  %4208 = vmatpush2.msra.mxu1 %v3133_v7  ;;  %v138_v27 = vld [vmem:[#allocation6 + $0x208] sm:$0xff] }
 0x649   :  { %9833 = vmatprep.mubr.msk.f32.mxu0 %vm1059_vm1, %v2548_v60  ;;  %4209 = vmatprep.subr.mxu1 %v17723_v21 }
 0x64a   :  { %4210 = vmatpush2.msra.mxu1 %v3128_v0  ;;  %10604 = vmatpush3.msra.mxu0 %v11695_v14  ;;  %v140_v0 = vld [vmem:[#allocation6 + $0x218] sm:$0xff] }
 0x64b   :  { %4211 = vmatprep.subr.mxu1 %v17723_v21  ;;  %10705 = vmatprep.subr.mxu0 %v13265_v23  ;;  %v3108_v23 = vadd.f32 %v13749_v11, %v13825_v15  ;;  %v2588_v11 = vadd.f32 %v13580_v51, %v13627_v36  ;;  %v2603_v36 = vadd.f32 %v13580_v51, %v13631_v63 }
 0x64c   :  { %9834 = vmatmul.mubr.msk.f32.gmra.mxu0 %vm1059_vm1, %v2548_v60  ;;  %4212 = vmatpush2.msra.mxu1 %v3123_v25  ;;  %v2618_v63 = vadd.f32 %v13580_v51, %v13643_v13  ;;  %v2633_v13 = vadd.f32 %v13580_v51, %v13647_v24  ;;  %v2648_v24 = vadd.f32 %v13580_v51, %v17794_v5  ;;  %v139_v60 = vld [vmem:[#allocation6 + $0x210] sm:$0xff]  ;;  %v150_v5 = vld [vmem:[#allocation6 + $0x268] sm:$0xff] }
 0x64d   :  { %9835 = vmatprep.mubr.msk.f32.mxu0 %vm1059_vm1, %v2553_v38  ;;  %4213 = vmatprep.subr.mxu1 %v17723_v21  ;;  %v2658_v15 = vadd.f32 %v13580_v51, %v17796_v34 }
 0x64e   :  { %4214 = vmatpush2.msra.mxu1 %v3118_v39 }
 0x64f   :  { %4215 = vmatprep.subr.mxu1 %v17723_v21 }
 0x650   :  { %9836 = vmatmul.mubr.msk.f32.gmra.mxu0 %vm1059_vm1, %v2553_v38  ;;  %4216 = vmatpush2.msra.mxu1 %v3113_v45  ;;  %v141_v45 = vld [vmem:[#allocation6 + $0x220] sm:$0xff] }
 0x651   :  { %9837 = vmatprep.mubr.msk.f32.mxu0 %vm1059_vm1, %v2558_v58  ;;  %4217 = vmatprep.subr.mxu1 %v17723_v21 }
 0x652   :  { %4218 = vmatpush2.msra.mxu1 %v3108_v23  ;;  %v142_v23 = vld [vmem:[#allocation6 + $0x228] sm:$0xff] }
 0x653   :  { %4219 = vmatprep.subr.mxu1 %v17723_v21 }
 0x654   :  { %9838 = vmatmul.mubr.msk.f32.gmra.mxu0 %vm1059_vm1, %v2558_v58  ;;  %4220 = vmatpush2.msra.mxu1 %v3103_v2 }
 0x655   :  { %9839 = vmatprep.mubr.msk.f32.mxu0 %vm1059_vm1, %v2563_v35  ;;  %4221 = vmatprep.subr.mxu1 %v17723_v21 }
 0x656   :  { %4222 = vmatpush2.msra.mxu1 %v3098_v56 }
 0x657   :  { %4223 = vmatprep.subr.mxu1 %v17723_v21 }
 0x658   :  { %9840 = vmatmul.mubr.msk.f32.gmra.mxu0 %vm1059_vm1, %v2563_v35  ;;  %4224 = vmatpush2.msra.mxu1 %v3093_v42 }
 0x659   :  { %9841 = vmatprep.mubr.msk.f32.mxu0 %vm1059_vm1, %v2568_v33  ;;  %4225 = vmatprep.subr.mxu1 %v17723_v21 }
 0x65a   :  { %4226 = vmatpush2.msra.mxu1 %v3088_v28 }
 0x65b   :  { %4227 = vmatprep.subr.mxu1 %v17723_v21 }
 0x65c   :  { %9842 = vmatmul.mubr.msk.f32.gmra.mxu0 %vm1059_vm1, %v2568_v33  ;;  %4228 = vmatpush2.msra.mxu1 %v3083_v53  ;;  %v143_v33 = vld [vmem:[#allocation6 + $0x230] sm:$0xff]  ;;  %v144_v53 = vld [vmem:[#allocation6 + $0x238] sm:$0xff] }
 0x65d   :  { %9843 = vmatprep.mubr.msk.f32.mxu0 %vm1059_vm1, %v2573_v16  ;;  %4229 = vmatprep.subr.mxu1 %v17723_v21 }
 0x65e   :  { %4230 = vmatpush2.msra.mxu1 %v3078_v43 }
 0x65f   :  { %4231 = vmatprep.subr.mxu1 %v17723_v21 }
 0x660   :  { %9844 = vmatmul.mubr.msk.f32.gmra.mxu0 %vm1059_vm1, %v2573_v16  ;;  %4232 = vmatpush2.msra.mxu1 %v3073_v61 }
 0x661   :  { %9845 = vmatprep.mubr.msk.f32.mxu0 %vm1059_vm1, %v2578_v59  ;;  %4233 = vmatprep.subr.mxu1 %v17723_v21 }
 0x662   :  { %4234 = vmatpush2.msra.mxu1 %v3068_v26  ;;  %v145_v26 = vld [vmem:[#allocation6 + $0x240] sm:$0xff] }
 0x663   :  { %10653 = vmatprep.subr.mxu1 %v11696_v30  ;;  %v146_v30 = vld [vmem:[#allocation6 + $0x248] sm:$0xff] }
 0x664   :  { %9846 = vmatmul.mubr.msk.f32.gmra.mxu0 %vm1059_vm1, %v2578_v59 }
 0x665   :  { %9847 = vmatprep.mubr.msk.f32.mxu0 %vm1059_vm1, %v2583_v18 }
 0x668   :  { %9848 = vmatmul.mubr.msk.f32.gmra.mxu0 %vm1059_vm1, %v2583_v18 }
 0x669   :  { %9849 = vmatprep.mubr.msk.f32.mxu0 %vm1059_vm1, %v2588_v11 }
 0x66c   :  { %9850 = vmatmul.mubr.msk.f32.gmra.mxu0 %vm1059_vm1, %v2588_v11 }
 0x66d   :  { %9851 = vmatprep.mubr.msk.f32.mxu0 %vm1059_vm1, %v2593_v4 }
 0x670   :  { %9852 = vmatmul.mubr.msk.f32.gmra.mxu0 %vm1059_vm1, %v2593_v4 }
 0x671   :  { %9853 = vmatprep.mubr.msk.f32.mxu0 %vm1059_vm1, %v2598_v20 }
 0x674   :  { %9854 = vmatmul.mubr.msk.f32.gmra.mxu0 %vm1059_vm1, %v2598_v20 }
 0x675   :  { %9855 = vmatprep.mubr.msk.f32.mxu0 %vm1059_vm1, %v2603_v36 }
 0x678   :  { %9856 = vmatmul.mubr.msk.f32.gmra.mxu0 %vm1059_vm1, %v2603_v36 }
 0x679   :  { %9857 = vmatprep.mubr.msk.f32.mxu0 %vm1059_vm1, %v2608_v55 }
 0x67c   :  { %9858 = vmatmul.mubr.msk.f32.gmra.mxu0 %vm1059_vm1, %v2608_v55  ;;  %v147_v55 = vld [vmem:[#allocation6 + $0x250] sm:$0xff] }
 0x67d   :  { %9859 = vmatprep.mubr.msk.f32.mxu0 %vm1059_vm1, %v2613_v50 }
 0x680   :  { %9860 = vmatmul.mubr.msk.f32.gmra.mxu0 %vm1059_vm1, %v2613_v50 }
 0x681   :  { %9861 = vmatprep.mubr.msk.f32.mxu0 %vm1059_vm1, %v2618_v63 }
 0x684   :  { %9862 = vmatmul.mubr.msk.f32.gmra.mxu0 %vm1059_vm1, %v2618_v63  ;;  %v148_v63 = vld [vmem:[#allocation6 + $0x258] sm:$0xff] }
 0x685   :  { %9863 = vmatprep.mubr.msk.f32.mxu0 %vm1059_vm1, %v2623_v10 }
 0x688   :  { %9864 = vmatmul.mubr.msk.f32.gmra.mxu0 %vm1059_vm1, %v2623_v10 }
 0x689   :  { %9865 = vmatprep.mubr.msk.f32.mxu0 %vm1059_vm1, %v2628_v17 }
 0x68c   :  { %9866 = vmatmul.mubr.msk.f32.gmra.mxu0 %vm1059_vm1, %v2628_v17 }
 0x68d   :  { %9867 = vmatprep.mubr.msk.f32.mxu0 %vm1059_vm1, %v2633_v13 }
 0x690   :  { %9868 = vmatmul.mubr.msk.f32.gmra.mxu0 %vm1059_vm1, %v2633_v13 }
 0x691   :  { %9869 = vmatprep.mubr.msk.f32.mxu0 %vm1059_vm1, %v2638_v48 }
 0x694   :  { %9870 = vmatmul.mubr.msk.f32.gmra.mxu0 %vm1059_vm1, %v2638_v48 }
 0x695   :  { %9871 = vmatprep.mubr.msk.f32.mxu0 %vm1059_vm1, %v2643_v52 }
 0x698   :  { %9872 = vmatmul.mubr.msk.f32.gmra.mxu0 %vm1059_vm1, %v2643_v52 }
 0x699   :  { %9873 = vmatprep.mubr.msk.f32.mxu0 %vm1059_vm1, %v2648_v24 }
 0x69c   :  { %9874 = vmatmul.mubr.msk.f32.gmra.mxu0 %vm1059_vm1, %v2648_v24 }
 0x69d   :  { %9875 = vmatprep.mubr.msk.f32.mxu0 %vm1059_vm1, %v2653_v8 }
 0x6a0   :  { %9876 = vmatmul.mubr.msk.f32.gmra.mxu0 %vm1059_vm1, %v2653_v8 }
 0x6a1   :  { %9877 = vmatprep.mubr.msk.f32.mxu0 %vm1059_vm1, %v2658_v15 }
 0x6a4   :  { %9878 = vmatmul.mubr.msk.f32.gmra.mxu0 %vm1059_vm1, %v2658_v15  ;;  %v151_v15 = vld [vmem:[#allocation6 + $0x270] sm:$0xff] }
 0x6a5   :  { %9879 = vmatprep.mubr.msk.f32.mxu0 %vm1059_vm1, %v2663_v29 }
 0x6a8   :  { %9880 = vmatmul.mubr.msk.f32.gmra.mxu0 %vm1059_vm1, %v2663_v29  ;;  %v152_v29 = vld [vmem:[#allocation6 + $0x278] sm:$0xff] }
 0x6a9   :  { %9881 = vmatprep.mubr.msk.f32.mxu0 %vm1059_vm1, %v2668_v41 }
 0x6ac   :  { %9882 = vmatmul.mubr.msk.f32.gmra.mxu0 %vm1059_vm1, %v2668_v41 }
 0x6ad   :  { %9883 = vmatprep.mubr.msk.f32.mxu0 %vm1059_vm1, %v2673_v9 }
 0x6b0   :  { %9884 = vmatmul.mubr.msk.f32.gmra.mxu0 %vm1059_vm1, %v2673_v9 }
 0x6b1   :  { %9885 = vmatprep.mubr.msk.f32.mxu0 %vm1059_vm1, %v2678_v40 }
 0x6b4   :  { %9886 = vmatmul.mubr.msk.f32.gmra.mxu0 %vm1059_vm1, %v2678_v40 }
 0x6b5   :  { %9887 = vmatprep.mubr.msk.f32.mxu0 %vm1059_vm1, %v2683_v47 }
 0x6b8   :  { %9888 = vmatmul.mubr.msk.f32.gmra.mxu0 %vm1059_vm1, %v2683_v47 }
 0x6b9   :  { %9889 = vmatprep.mubr.msk.f32.mxu0 %vm1059_vm1, %v2688_v46 }
 0x6bc   :  { %9890 = vmatmul.mubr.msk.f32.gmra.mxu0 %vm1059_vm1, %v2688_v46 }
 0x6bd   :  { %9891 = vmatprep.mubr.msk.f32.mxu0 %vm1059_vm1, %v2693_v49 }
 0x6c0   :  { %9892 = vmatmul.mubr.msk.f32.gmra.mxu0 %vm1059_vm1, %v2693_v49  ;;  %v155_v49 = vld [vmem:[#allocation6 + $0x290] sm:$0xff] }
 0x704   :  { %v3404_v19 = vpop.f32.mrf.mxu0 }
 0x705   :  { %v14034_v62 = vadd.f32 %v3404_v19, %v137_v54  ;;  %v156_v19 = vld [vmem:[#allocation6 + $0x298] sm:$0xff] }
 0x706   :  { %v3406_v31 = vpop.f32.mrf.mxu0 }
 0x707   :  { %v14036_v7 = vadd.f32 %v3406_v31, %v138_v27 }
 0x708   :  { %v3410_v14 = vpop.f32.mrf.mxu0 }
 0x709   :  { %v3595_v51 = vmax.f32 %v14034_v62, %v14036_v7  ;;  %v14040_v38 = vadd.f32 %v3410_v14, %v139_v60 }
 0x70a   :  { %v3412_v25 = vpop.f32.mrf.mxu0 }
 0x70b   :  { %v14042_v39 = vadd.f32 %v3412_v25, %v140_v0  ;;  %3596 = vmax.xlane.f32.xlu0 %v3595_v51  ;;  %v157_v0 = vld [vmem:[#allocation6 + $0x2a0] sm:$0xff]  ;;  %v158_v25 = vld [vmem:[#allocation6 + $0x2a8] sm:$0xff] }
 0x70c   :  { %v3416_v58 = vpop.f32.mrf.mxu0 }
 0x70d   :  { %v3598_v2 = vmax.f32 %v14040_v38, %v14042_v39  ;;  %v14046_v56 = vadd.f32 %v3416_v58, %v141_v45 }
 0x70e   :  { %v3418_v35 = vpop.f32.mrf.mxu0 }
 0x70f   :  { %v14048_v42 = vadd.f32 %v3418_v35, %v142_v23  ;;  %3599 = vmax.xlane.f32.xlu1 %v3598_v2  ;;  %v159_v35 = vld [vmem:[#allocation6 + $0x2b0] sm:$0xff] }
 0x710   :  { %v3422_v28 = vpop.f32.mrf.mxu0 }
 0x711   :  { %v3601_v16 = vmax.f32 %v14046_v56, %v14048_v42  ;;  %v14052_v61 = vadd.f32 %v3422_v28, %v143_v33  ;;  %v160_v28 = vld [vmem:[#allocation6 + $0x2b8] sm:$0xff] }
 0x712   :  { %v3424_v43 = vpop.f32.mrf.mxu0 }
 0x713   :  { %v14054_v59 = vadd.f32 %v3424_v43, %v144_v53  ;;  %3602 = vmax.xlane.f32.xlu0 %v3601_v16 }
 0x714   :  { %v3428_v18 = vpop.f32.mrf.mxu0 }
 0x715   :  { %v3604_v11 = vmax.f32 %v14052_v61, %v14054_v59  ;;  %v14058_v20 = vadd.f32 %v3428_v18, %v145_v26  ;;  %v161_v18 = vld [vmem:[#allocation6 + $0x2c0] sm:$0xff] }
 0x716   :  { %v3430_v4 = vpop.f32.mrf.mxu0 }
 0x717   :  { %v14060_v36 = vadd.f32 %v3430_v4, %v146_v30  ;;  %3605 = vmax.xlane.f32.xlu1 %v3604_v11  ;;  %v162_v11 = vld [vmem:[#allocation6 + $0x2c8] sm:$0xff] }
 0x718   :  { %v3434_v50 = vpop.f32.mrf.mxu0 }
 0x719   :  { %v3607_v10 = vmax.f32 %v14058_v20, %v14060_v36  ;;  %v14064_v13 = vadd.f32 %v3434_v50, %v147_v55 }
 0x71a   :  { %v3436_v17 = vpop.f32.mrf.mxu0 }
 0x71b   :  { %v14066_v48 = vadd.f32 %v3436_v17, %v148_v63  ;;  %3608 = vmax.xlane.f32.xlu0 %v3607_v10  ;;  %v163_v10 = vld [vmem:[#allocation6 + $0x2d0] sm:$0xff] }
 0x71c   :  { %v3440_v52 = vpop.f32.mrf.mxu0 }
 0x71d   :  { %v3610_v24 = vmax.f32 %v14064_v13, %v14066_v48  ;;  %v14070_v8 = vadd.f32 %v3440_v52, %v149_v32  ;;  %v164_v32 = vld [vmem:[#allocation6 + $0x2d8] sm:$0xff] }
 0x71e   :  { %v3442_v1 = vpop.f32.mrf.mxu0 }
 0x71f   :  { %v14072_v34 = vadd.f32 %v3442_v1, %v150_v5  ;;  %3611 = vmax.xlane.f32.xlu1 %v3610_v24 }
 0x720   :  { %v3446_v22 = vpop.f32.mrf.mxu0 }
 0x721   :  { %v3613_v12 = vmax.f32 %v14070_v8, %v14072_v34  ;;  %v14076_v3 = vadd.f32 %v3446_v22, %v151_v15  ;;  %v165_v15 = vld [vmem:[#allocation6 + $0x2e0] sm:$0xff] }
 0x722   :  { %v3448_v41 = vpop.f32.mrf.mxu0 }
 0x723   :  { %v14078_v9 = vadd.f32 %v3448_v41, %v152_v29  ;;  %3614 = vmax.xlane.f32.xlu0 %v3613_v12  ;;  %v166_v29 = vld [vmem:[#allocation6 + $0x2e8] sm:$0xff] }
 0x724   :  { %v3452_v40 = vpop.f32.mrf.mxu0 }
 0x725   :  { %v3616_v47 = vmax.f32 %v14076_v3, %v14078_v9  ;;  %v14082_v46 = vadd.f32 %v3452_v40, %v153_v37 }
 0x726   :  { %v3454_v44 = vpop.f32.mrf.mxu0 }
 0x727   :  { %v14084_v57 = vadd.f32 %v3454_v44, %v154_v6  ;;  %3617 = vmax.xlane.f32.xlu1 %v3616_v47  ;;  %v167_v6 = vld [vmem:[#allocation6 + $0x2f0] sm:$0xff]  ;;  %v168_v44 = vld [vmem:[#allocation6 + $0x2f8] sm:$0xff] }
 0x728   :  { %v3458_v54 = vpop.f32.mrf.mxu0 }
 0x729   :  { %v3619_v27 = vmax.f32 %v14082_v46, %v14084_v57  ;;  %v14088_v60 = vadd.f32 %v3458_v54, %v155_v49 }
 0x72a   :  { %v3460_v31 = vpop.f32.mrf.mxu0 }
 0x72b   :  { %v14090_v14 = vadd.f32 %v3460_v31, %v156_v19  ;;  %3620 = vmax.xlane.f32.xlu0 %v3619_v27  ;;  %v169_v31 = vld [vmem:[#allocation6 + $0x300] sm:$0xff] }
 0x72c   :  { %v3464_v51 = vpop.f32.mrf.mxu0 }
 0x72d   :  { %v3622_v45 = vmax.f32 %v14088_v60, %v14090_v14  ;;  %v14094_v23 = vadd.f32 %v3464_v51, %v157_v0  ;;  %v170_v51 = vld [vmem:[#allocation6 + $0x308] sm:$0xff] }
 0x72e   :  { %v3466_v58 = vpop.f32.mrf.mxu0 }
 0x72f   :  { %v14096_v2 = vadd.f32 %v3466_v58, %v158_v25  ;;  %3623 = vmax.xlane.f32.xlu1 %v3622_v45 }
 0x730   :  { %v3470_v33 = vpop.f32.mrf.mxu0 }
 0x731   :  { %v3625_v53 = vmax.f32 %v14094_v23, %v14096_v2  ;;  %v14100_v43 = vadd.f32 %v3470_v33, %v159_v35  ;;  %v171_v33 = vld [vmem:[#allocation6 + $0x310] sm:$0xff] }
 0x732   :  { %v3472_v16 = vpop.f32.mrf.mxu0 }
 0x733   :  { %v14102_v26 = vadd.f32 %v3472_v16, %v160_v28  ;;  %3626 = vmax.xlane.f32.xlu0 %v3625_v53  ;;  %v172_v53 = vld [vmem:[#allocation6 + $0x318] sm:$0xff] }
 0x734   :  { %v3476_v30 = vpop.f32.mrf.mxu0 }
 0x735   :  { %v3628_v4 = vmax.f32 %v14100_v43, %v14102_v26  ;;  %v14106_v50 = vadd.f32 %v3476_v30, %v161_v18 }
 0x736   :  { %v3478_v55 = vpop.f32.mrf.mxu0 }
 0x737   :  { %v14108_v63 = vadd.f32 %v3478_v55, %v162_v11  ;;  %3629 = vmax.xlane.f32.xlu1 %v3628_v4  ;;  %v173_v4 = vld [vmem:[#allocation6 + $0x320] sm:$0xff] }
 0x738   :  { %v3482_v17 = vpop.f32.mrf.mxu0 }
 0x739   :  { %v3631_v52 = vmax.f32 %v14106_v50, %v14108_v63  ;;  %v14112_v24 = vadd.f32 %v3482_v17, %v163_v10  ;;  %v174_v10 = vld [vmem:[#allocation6 + $0x328] sm:$0xff] }
 0x73a   :  { %v3484_v5 = vpop.f32.mrf.mxu0 }
 0x73b   :  { %v14114_v1 = vadd.f32 %v3484_v5, %v164_v32  ;;  %3632 = vmax.xlane.f32.xlu0 %v3631_v52 }
 0x73c   :  { %v3488_v22 = vpop.f32.mrf.mxu0 }
 0x73d   :  { %v3634_v12 = vmax.f32 %v14112_v24, %v14114_v1  ;;  %v14118_v37 = vadd.f32 %v3488_v22, %v165_v15  ;;  %v175_v15 = vld [vmem:[#allocation6 + $0x330] sm:$0xff] }
 0x73e   :  { %v3490_v41 = vpop.f32.mrf.mxu0 }
 0x73f   :  { %v14120_v40 = vadd.f32 %v3490_v41, %v166_v29  ;;  %3635 = vmax.xlane.f32.xlu1 %v3634_v12  ;;  %v176_v29 = vld [vmem:[#allocation6 + $0x338] sm:$0xff] }
 0x740   :  { %v3494_v47 = vpop.f32.mrf.mxu0 }
 0x741   :  { %v3637_v49 = vmax.f32 %v14118_v37, %v14120_v40  ;;  %v14124_v19 = vadd.f32 %v3494_v47, %v167_v6 }
 0x742   :  { %v3496_v54 = vpop.f32.mrf.mxu0 }
 0x743   :  { %v14126_v27 = vadd.f32 %v3496_v54, %v168_v44  ;;  %3638 = vmax.xlane.f32.xlu0 %v3637_v49  ;;  %v177_v44 = vld [vmem:[#allocation6 + $0x340] sm:$0xff]  ;;  %v178_v54 = vld [vmem:[#allocation6 + $0x348] sm:$0xff] }
 0x744   :  { %v3500_v0 = vpop.f32.mrf.mxu0 }
 0x745   :  { %v3640_v25 = vmax.f32 %v14124_v19, %v14126_v27  ;;  %v14130_v58 = vadd.f32 %v3500_v0, %v169_v31 }
 0x746   :  { %v3502_v45 = vpop.f32.mrf.mxu0 }
 0x747   :  { %v14132_v35 = vadd.f32 %v3502_v45, %v170_v51  ;;  %3641 = vmax.xlane.f32.xlu1 %v3640_v25  ;;  %v179_v45 = vld [vmem:[#allocation6 + $0x350] sm:$0xff] }
 0x748   :  { %v3506_v28 = vpop.f32.mrf.mxu0 }
 0x749   :  { %v3643_v16 = vmax.f32 %v14130_v58, %v14132_v35  ;;  %v14136_v30 = vadd.f32 %v3506_v28, %v171_v33  ;;  %v180_v28 = vld [vmem:[#allocation6 + $0x358] sm:$0xff] }
 0x74a   :  { %v3508_v18 = vpop.f32.mrf.mxu0 }
 0x74b   :  { %v14138_v11 = vadd.f32 %v3508_v18, %v172_v53  ;;  %3644 = vmax.xlane.f32.xlu0 %v3643_v16 }
 0x74c   :  { %v3512_v55 = vpop.f32.mrf.mxu0 }
 0x74d   :  { %v3646_v17 = vmax.f32 %v14136_v30, %v14138_v11  ;;  %v14142_v52 = vadd.f32 %v3512_v55, %v173_v4  ;;  %v181_v55 = vld [vmem:[#allocation6 + $0x360] sm:$0xff] }
 0x74e   :  { %v3514_v32 = vpop.f32.mrf.mxu0 }
 0x74f   :  { %v14144_v5 = vadd.f32 %v3514_v32, %v174_v10  ;;  %3647 = vmax.xlane.f32.xlu1 %v3646_v17  ;;  %v182_v17 = vld [vmem:[#allocation6 + $0x368] sm:$0xff] }
 0x750   :  { %v3518_v22 = vpop.f32.mrf.mxu0 }
 0x751   :  { %v3649_v12 = vmax.f32 %v14142_v52, %v14144_v5  ;;  %v14148_v6 = vadd.f32 %v3518_v22, %v175_v15 }
 0x752   :  { %v3520_v41 = vpop.f32.mrf.mxu0 }
 0x753   :  { %v14150_v47 = vadd.f32 %v3520_v41, %v176_v29  ;;  %3650 = vmax.xlane.f32.xlu0 %v3649_v12  ;;  %v183_v12 = vld [vmem:[#allocation6 + $0x370] sm:$0xff] }
 0x754   :  { %v3524_v49 = vpop.f32.mrf.mxu0 }
 0x755   :  { %v3652_v31 = vmax.f32 %v14148_v6, %v14150_v47  ;;  %v14154_v51 = vadd.f32 %v3524_v49, %v177_v44  ;;  %v184_v44 = vld [vmem:[#allocation6 + $0x378] sm:$0xff] }
 0x756   :  { %v3526_v0 = vpop.f32.mrf.mxu0 }
 0x757   :  { %v14156_v25 = vadd.f32 %v3526_v0, %v178_v54  ;;  %3653 = vmax.xlane.f32.xlu1 %v3652_v31 }
 0x758   :  { %v3530_v33 = vpop.f32.mrf.mxu0 }
 0x759   :  { %v3655_v53 = vmax.f32 %v14154_v51, %v14156_v25  ;;  %v14160_v18 = vadd.f32 %v3530_v33, %v179_v45  ;;  %v185_v45 = vld [vmem:[#allocation6 + $0x380] sm:$0xff] }
 0x75a   :  { %v3532_v16 = vpop.f32.mrf.mxu0 }
 0x75b   :  { %v14162_v4 = vadd.f32 %v3532_v16, %v180_v28  ;;  %3656 = vmax.xlane.f32.xlu0 %v3655_v53  ;;  %v186_v28 = vld [vmem:[#allocation6 + $0x388] sm:$0xff] }
 0x75c   :  { %v3536_v10 = vpop.f32.mrf.mxu0 }
 0x75d   :  { %v3658_v32 = vmax.f32 %v14160_v18, %v14162_v4  ;;  %v14166_v22 = vadd.f32 %v3536_v10, %v181_v55 }
 0x75e   :  { %v3538_v15 = vpop.f32.mrf.mxu0 }
 0x75f   :  { %v14168_v29 = vadd.f32 %v3538_v15, %v182_v17  ;;  %3659 = vmax.xlane.f32.xlu1 %v3658_v32  ;;  %v187_v17 = vld [vmem:[#allocation6 + $0x390] sm:$0xff]  ;;  %v188_v15 = vld [vmem:[#allocation6 + $0x398] sm:$0xff] }
 0x760   :  { %v3542_v41 = vpop.f32.mrf.mxu0 }
 0x761   :  { %v3661_v49 = vmax.f32 %v14166_v22, %v14168_v29  ;;  %v14172_v31 = vadd.f32 %v3542_v41, %v183_v12 }
 0x762   :  { %v3544_v54 = vpop.f32.mrf.mxu0 }
 0x763   :  { %v14174_v0 = vadd.f32 %v3544_v54, %v184_v44  ;;  %3662 = vmax.xlane.f32.xlu0 %v3661_v49  ;;  %v189_v54 = vld [vmem:[#allocation6 + $0x3a0] sm:$0xff] }
 0x764   :  { %v3548_v33 = vpop.f32.mrf.mxu0 }
 0x765   :  { %17804 = vst [vmem:[#allocation35_spill] sm:$0xff] %v14174_v0  ;;  %v3664_v53 = vmax.f32 %v14172_v31, %v14174_v0  ;;  %v14178_v55 = vadd.f32 %v3548_v33, %v185_v45  ;;  %v190_v0 = vld [vmem:[#allocation6 + $0x3a8] sm:$0xff] }
 0x766   :  { %v3550_v16 = vpop.f32.mrf.mxu0 }
 0x767   :  { %17805 = vst [vmem:[#allocation38_spill] sm:$0xff] %v14178_v55  ;;  %v14180_v10 = vadd.f32 %v3550_v16, %v186_v28  ;;  %3665 = vmax.xlane.f32.xlu0 %v3664_v53  ;;  %v191_v16 = vld [vmem:[#allocation6 + $0x3b0] sm:$0xff] }
 0x768   :  { %v3554_v32 = vpop.f32.mrf.mxu0 }
 0x769   :  { %17806 = vst [vmem:[#allocation39_spill] sm:$0xff] %v14180_v10  ;;  %v3667_v12 = vmax.f32 %v14178_v55, %v14180_v10  ;;  %v14184_v44 = vadd.f32 %v3554_v32, %v187_v17  ;;  %v192_v55 = vld [vmem:[#allocation6 + $0x3b8] sm:$0xff] }
 0x76a   :  { %v3556_v41 = vpop.f32.mrf.mxu0 }
 0x76b   :  { %17807 = vst [vmem:[#allocation40_spill] sm:$0xff] %v14184_v44  ;;  %v14186_v49 = vadd.f32 %v3556_v41, %v188_v15  ;;  %3668 = vmax.xlane.f32.xlu0 %v3667_v12  ;;  %v193_v41 = vld [vmem:[#allocation6 + $0x3c0] sm:$0xff] }
 0x76c   :  { %v3560_v21 = vpop.f32.mrf.mxu0 }
 0x76d   :  { %17808 = vst [vmem:[#allocation41_spill] sm:$0xff] %v14186_v49  ;;  %v3670_v45 = vmax.f32 %v14184_v44, %v14186_v49  ;;  %v14190_v28 = vadd.f32 %v3560_v21, %v189_v54  ;;  %v194_v44 = vld [vmem:[#allocation6 + $0x3c8] sm:$0xff] }
 0x76e   :  { %v3562_v33 = vpop.f32.mrf.mxu0 }
 0x76f   :  { %17809 = vst [vmem:[#allocation42_spill] sm:$0xff] %v14190_v28  ;;  %v14192_v53 = vadd.f32 %v3562_v33, %v190_v0  ;;  %3671 = vmax.xlane.f32.xlu0 %v3670_v45  ;;  %v195_v33 = vld [vmem:[#allocation6 + $0x3d0] sm:$0xff] }
 0x770   :  { %v3566_v10 = vpop.f32.mrf.mxu0 }
 0x771   :  { %17810 = vst [vmem:[#allocation43_spill] sm:$0xff] %v14192_v53  ;;  %v3673_v17 = vmax.f32 %v14190_v28, %v14192_v53  ;;  %v14196_v15 = vadd.f32 %v3566_v10, %v191_v16  ;;  %v196_v28 = vld [vmem:[#allocation6 + $0x3d8] sm:$0xff] }
 0x772   :  { %v3568_v32 = vpop.f32.mrf.mxu0 }
 0x773   :  { %17811 = vst [vmem:[#allocation36_spill] sm:$0xff] %v14196_v15  ;;  %v14198_v12 = vadd.f32 %v3568_v32, %v192_v55  ;;  %3674 = vmax.xlane.f32.xlu0 %v3673_v17  ;;  %v197_v32 = vld [vmem:[#allocation6 + $0x3e0] sm:$0xff] }
 0x774   :  { %v3572_v49 = vpop.f32.mrf.mxu0 }
 0x775   :  { %17812 = vst [vmem:[#allocation13_spill] sm:$0xff] %v14198_v12  ;;  %v3676_v21 = vmax.f32 %v14196_v15, %v14198_v12  ;;  %v14202_v54 = vadd.f32 %v3572_v49, %v193_v41  ;;  %v198_v15 = vld [vmem:[#allocation6 + $0x3e8] sm:$0xff] }
 0x776   :  { %v3574_v0 = vpop.f32.mrf.mxu0 }
 0x777   :  { %17813 = vst [vmem:[#allocation37_spill] sm:$0xff] %v14202_v54  ;;  %v14204_v45 = vadd.f32 %v3574_v0, %v194_v44  ;;  %3677 = vmax.xlane.f32.xlu0 %v3676_v21  ;;  %v199_v0 = vld [vmem:[#allocation6 + $0x3f0] sm:$0xff] }
 0x778   :  { %v3578_v53 = vpop.f32.mrf.mxu0 }
 0x779   :  { %17814 = vst [vmem:[#allocation18_spill] sm:$0xff] %v14204_v45  ;;  %v3679_v55 = vmax.f32 %v14202_v54, %v14204_v45  ;;  %v14208_v16 = vadd.f32 %v3578_v53, %v195_v33  ;;  %v200_v54 = vld [vmem:[#allocation6 + $0x3f8] sm:$0xff] }
 0x77a   :  { %v3580_v10 = vpop.f32.mrf.mxu0 }
 0x77b   :  { %v14210_v17 = vadd.f32 %v3580_v10, %v196_v28  ;;  %3680 = vmax.xlane.f32.xlu0 %v3679_v55 }
 0x77c   :  { %v3584_v12 = vpop.f32.mrf.mxu0 }
 0x77d   :  { %17815 = vst [vmem:[#allocation15_spill] sm:$0xff] %v14210_v17  ;;  %v3682_v44 = vmax.f32 %v14208_v16, %v14210_v17  ;;  %v14214_v41 = vadd.f32 %v3584_v12, %v197_v32 }
 0x77e   :  { %v3586_v49 = vpop.f32.mrf.mxu0 }
 0x77f   :  { %v14216_v21 = vadd.f32 %v3586_v49, %v198_v15  ;;  %3683 = vmax.xlane.f32.xlu0 %v3682_v44 }
 0x780   :  { %v3590_v45 = vpop.f32.mrf.mxu0 }
 0x781   :  { %17816 = vst [vmem:[#allocation23_spill] sm:$0xff] %v14216_v21  ;;  %v3685_v28 = vmax.f32 %v14214_v41, %v14216_v21  ;;  %v14220_v33 = vadd.f32 %v3590_v45, %v199_v0 }
 0x782   :  { %v3592_v53 = vpop.f32.mrf.mxu0 }
 0x783   :  { %v14222_v55 = vadd.f32 %v3592_v53, %v200_v54  ;;  %3686 = vmax.xlane.f32.xlu0 %v3685_v28 }
 0x785   :  { %v3688_v10 = vmax.f32 %v14220_v33, %v14222_v55 }
 0x787   :  { %3689 = vmax.xlane.f32.xlu0 %v3688_v10 }
 0x794   :  { %v3597_v12 = vpop.xlane.xlu0 %3596 }
 0x795   :  { %v3691_v15 = vsub.f32 %v14034_v62, %v3597_v12  ;;  %v3692_v32 = vsub.f32 %v14036_v7, %v3597_v12 }
 0x797   :  { %v3755_v44 = vmul.f32 1.442695, %v3691_v15  ;;  %v3757_v49 = vmul.f32 1.442695, %v3692_v32 }
 0x798   :  { %v3600_v17 = vpop.xlane.xlu1 %3599 }
 0x799   :  { %11111 = vpow2.f32 %v3755_v44  ;;  %v3693_v21 = vsub.f32 %v14040_v38, %v3600_v17  ;;  %v3694_v45 = vsub.f32 %v14042_v39, %v3600_v17 }
 0x79a   :  { %11113 = vpow2.f32 %v3757_v49 }
 0x79b   :  { %v3759_v54 = vmul.f32 1.442695, %v3693_v21  ;;  %v3761_v0 = vmul.f32 1.442695, %v3694_v45 }
 0x79c   :  { %v3603_v28 = vpop.xlane.xlu0 %3602 }
 0x79d   :  { %11115 = vpow2.f32 %v3759_v54  ;;  %v3695_v53 = vsub.f32 %v14046_v56, %v3603_v28  ;;  %v3696_v10 = vsub.f32 %v14048_v42, %v3603_v28 }
 0x79e   :  { %11117 = vpow2.f32 %v3761_v0 }
 0x79f   :  { %v3763_v62 = vmul.f32 1.442695, %v3695_v53  ;;  %v3765_v7 = vmul.f32 1.442695, %v3696_v10 }
 0x7a0   :  { %v3606_v12 = vpop.xlane.xlu1 %3605 }
 0x7a1   :  { %11119 = vpow2.f32 %v3763_v62  ;;  %v3697_v15 = vsub.f32 %v14052_v61, %v3606_v12  ;;  %v3698_v38 = vsub.f32 %v14054_v59, %v3606_v12 }
 0x7a2   :  { %11121 = vpow2.f32 %v3765_v7 }
 0x7a3   :  { %v3767_v39 = vmul.f32 1.442695, %v3697_v15  ;;  %v3769_v17 = vmul.f32 1.442695, %v3698_v38 }
 0x7a4   :  { %v3609_v21 = vpop.xlane.xlu0 %3608 }
 0x7a5   :  { %11123 = vpow2.f32 %v3767_v39  ;;  %v3699_v32 = vsub.f32 %v14058_v20, %v3609_v21  ;;  %v3700_v56 = vsub.f32 %v14060_v36, %v3609_v21 }
 0x7a6   :  { %v14236_v44 = vpop.eup %11111  ;;  %11125 = vpow2.f32 %v3769_v17 }
 0x7a7   :  { %v14238_v42 = vpop.eup %11113  ;;  %v3771_v49 = vmul.f32 1.442695, %v3699_v32  ;;  %v3773_v45 = vmul.f32 1.442695, %v3700_v56 }
 0x7a8   :  { %v3612_v54 = vpop.xlane.xlu1 %3611  ;;  %v3883_v61 = vadd.f32 %v14238_v42, %v14236_v44 }
 0x7a9   :  { %11127 = vpow2.f32 %v3771_v49  ;;  %v3701_v59 = vsub.f32 %v14064_v13, %v3612_v54  ;;  %v3702_v0 = vsub.f32 %v14066_v48, %v3612_v54 }
 0x7aa   :  { %v14244_v28 = vpop.eup %11115  ;;  %11129 = vpow2.f32 %v3773_v45  ;;  %3884 = vadd.xlane.f32.xlu1 %v3883_v61 }
 0x7ab   :  { %v14246_v20 = vpop.eup %11117  ;;  %v3775_v36 = vmul.f32 1.442695, %v3701_v59  ;;  %v3777_v53 = vmul.f32 1.442695, %v3702_v0 }
 0x7ac   :  { %v3615_v10 = vpop.xlane.xlu0 %3614  ;;  %v3886_v62 = vadd.f32 %v14246_v20, %v14244_v28 }
 0x7ad   :  { %11131 = vpow2.f32 %v3775_v36  ;;  %v3703_v7 = vsub.f32 %v14070_v8, %v3615_v10  ;;  %v3704_v12 = vsub.f32 %v14072_v34, %v3615_v10 }
 0x7ae   :  { %v14252_v13 = vpop.eup %11119  ;;  %11133 = vpow2.f32 %v3777_v53  ;;  %3887 = vadd.xlane.f32.xlu1 %v3886_v62 }
 0x7af   :  { %v14254_v48 = vpop.eup %11121  ;;  %v3779_v15 = vmul.f32 1.442695, %v3703_v7  ;;  %v3781_v38 = vmul.f32 1.442695, %v3704_v12 }
 0x7b0   :  { %v3618_v39 = vpop.xlane.xlu1 %3617  ;;  %v3889_v17 = vadd.f32 %v14254_v48, %v14252_v13 }
 0x7b1   :  { %11135 = vpow2.f32 %v3779_v15  ;;  %v3705_v21 = vsub.f32 %v14076_v3, %v3618_v39  ;;  %v3706_v32 = vsub.f32 %v14078_v9, %v3618_v39 }
 0x7b2   :  { %v14260_v8 = vpop.eup %11123  ;;  %11137 = vpow2.f32 %v3781_v38  ;;  %3890 = vadd.xlane.f32.xlu1 %v3889_v17 }
 0x7b3   :  { %v14262_v34 = vpop.eup %11125  ;;  %v3783_v56 = vmul.f32 1.442695, %v3705_v21  ;;  %v3785_v49 = vmul.f32 1.442695, %v3706_v32 }
 0x7b4   :  { %v3621_v45 = vpop.xlane.xlu0 %3620  ;;  %v3892_v54 = vadd.f32 %v14262_v34, %v14260_v8 }
 0x7b5   :  { %11139 = vpow2.f32 %v3783_v56  ;;  %v3707_v61 = vsub.f32 %v14082_v46, %v3621_v45  ;;  %v3708_v59 = vsub.f32 %v14084_v57, %v3621_v45 }
 0x7b6   :  { %v14268_v3 = vpop.eup %11127  ;;  %11141 = vpow2.f32 %v3785_v49  ;;  %3893 = vadd.xlane.f32.xlu1 %v3892_v54 }
 0x7b7   :  { %v14270_v9 = vpop.eup %11129  ;;  %v3787_v0 = vmul.f32 1.442695, %v3707_v61  ;;  %v3789_v36 = vmul.f32 1.442695, %v3708_v59 }
 0x7b8   :  { %v3624_v53 = vpop.xlane.xlu1 %3623  ;;  %v3895_v10 = vadd.f32 %v14270_v9, %v14268_v3 }
 0x7b9   :  { %11143 = vpow2.f32 %v3787_v0  ;;  %v3709_v62 = vsub.f32 %v14088_v60, %v3624_v53  ;;  %v3710_v7 = vsub.f32 %v14090_v14, %v3624_v53 }
 0x7ba   :  { %v14276_v46 = vpop.eup %11131  ;;  %11145 = vpow2.f32 %v3789_v36  ;;  %3896 = vadd.xlane.f32.xlu1 %v3895_v10 }
 0x7bb   :  { %v14278_v57 = vpop.eup %11133  ;;  %v3791_v12 = vmul.f32 1.442695, %v3709_v62  ;;  %v3793_v15 = vmul.f32 1.442695, %v3710_v7 }
 0x7bc   :  { %v3627_v38 = vpop.xlane.xlu0 %3626  ;;  %v3898_v39 = vadd.f32 %v14278_v57, %v14276_v46 }
 0x7bd   :  { %11147 = vpow2.f32 %v3791_v12  ;;  %v3711_v17 = vsub.f32 %v14094_v23, %v3627_v38  ;;  %v3712_v21 = vsub.f32 %v14096_v2, %v3627_v38 }
 0x7be   :  { %v14284_v60 = vpop.eup %11135  ;;  %11149 = vpow2.f32 %v3793_v15  ;;  %3899 = vadd.xlane.f32.xlu1 %v3898_v39 }
 0x7bf   :  { %v14286_v14 = vpop.eup %11137  ;;  %v3795_v32 = vmul.f32 1.442695, %v3711_v17  ;;  %v3797_v56 = vmul.f32 1.442695, %v3712_v21 }
 0x7c0   :  { %v3630_v49 = vpop.xlane.xlu1 %3629  ;;  %v3901_v45 = vadd.f32 %v14286_v14, %v14284_v60 }
 0x7c1   :  { %11151 = vpow2.f32 %v3795_v32  ;;  %v3713_v54 = vsub.f32 %v14100_v43, %v3630_v49  ;;  %v3714_v61 = vsub.f32 %v14102_v26, %v3630_v49 }
 0x7c2   :  { %v14292_v23 = vpop.eup %11139  ;;  %11153 = vpow2.f32 %v3797_v56  ;;  %3902 = vadd.xlane.f32.xlu1 %v3901_v45 }
 0x7c3   :  { %v14294_v2 = vpop.eup %11141  ;;  %v3799_v59 = vmul.f32 1.442695, %v3713_v54  ;;  %v3801_v0 = vmul.f32 1.442695, %v3714_v61 }
 0x7c4   :  { %v3633_v36 = vpop.xlane.xlu0 %3632  ;;  %v3904_v53 = vadd.f32 %v14294_v2, %v14292_v23 }
 0x7c5   :  { %11155 = vpow2.f32 %v3799_v59  ;;  %v3715_v10 = vsub.f32 %v14106_v50, %v3633_v36  ;;  %v3716_v62 = vsub.f32 %v14108_v63, %v3633_v36 }
 0x7c6   :  { %v14300_v43 = vpop.eup %11143  ;;  %11157 = vpow2.f32 %v3801_v0  ;;  %3905 = vadd.xlane.f32.xlu1 %v3904_v53 }
 0x7c7   :  { %v14302_v26 = vpop.eup %11145  ;;  %v3803_v7 = vmul.f32 1.442695, %v3715_v10  ;;  %v3805_v12 = vmul.f32 1.442695, %v3716_v62 }
 0x7c8   :  { %v3636_v15 = vpop.xlane.xlu1 %3635  ;;  %v3907_v38 = vadd.f32 %v14302_v26, %v14300_v43 }
 0x7c9   :  { %11159 = vpow2.f32 %v3803_v7  ;;  %v3717_v39 = vsub.f32 %v14112_v24, %v3636_v15  ;;  %v3718_v17 = vsub.f32 %v14114_v1, %v3636_v15 }
 0x7ca   :  { %v14308_v50 = vpop.eup %11147  ;;  %11161 = vpow2.f32 %v3805_v12  ;;  %3908 = vadd.xlane.f32.xlu1 %v3907_v38 }
 0x7cb   :  { %v14310_v63 = vpop.eup %11149  ;;  %v3807_v21 = vmul.f32 1.442695, %v3717_v39  ;;  %v3809_v32 = vmul.f32 1.442695, %v3718_v17 }
 0x7cc   :  { %v3639_v56 = vpop.xlane.xlu0 %3638  ;;  %v3910_v49 = vadd.f32 %v14310_v63, %v14308_v50 }
 0x7cd   :  { %11163 = vpow2.f32 %v3807_v21  ;;  %v3719_v45 = vsub.f32 %v14118_v37, %v3639_v56  ;;  %v3720_v54 = vsub.f32 %v14120_v40, %v3639_v56 }
 0x7ce   :  { %v14316_v24 = vpop.eup %11151  ;;  %11165 = vpow2.f32 %v3809_v32  ;;  %3911 = vadd.xlane.f32.xlu1 %v3910_v49 }
 0x7cf   :  { %v14318_v1 = vpop.eup %11153  ;;  %v3811_v61 = vmul.f32 1.442695, %v3719_v45  ;;  %v3813_v59 = vmul.f32 1.442695, %v3720_v54 }
 0x7d0   :  { %v3642_v0 = vpop.xlane.xlu1 %3641  ;;  %v3913_v36 = vadd.f32 %v14318_v1, %v14316_v24 }
 0x7d1   :  { %11167 = vpow2.f32 %v3811_v61  ;;  %v3721_v53 = vsub.f32 %v14124_v19, %v3642_v0  ;;  %v3722_v10 = vsub.f32 %v14126_v27, %v3642_v0 }
 0x7d2   :  { %v14324_v37 = vpop.eup %11155  ;;  %11169 = vpow2.f32 %v3813_v59  ;;  %3914 = vadd.xlane.f32.xlu0 %v3913_v36 }
 0x7d3   :  { %v14326_v40 = vpop.eup %11157  ;;  %v3815_v62 = vmul.f32 1.442695, %v3721_v53  ;;  %v3817_v7 = vmul.f32 1.442695, %v3722_v10 }
 0x7d4   :  { %v3645_v12 = vpop.xlane.xlu0 %3644  ;;  %v3916_v15 = vadd.f32 %v14326_v40, %v14324_v37 }
 0x7d5   :  { %11171 = vpow2.f32 %v3815_v62  ;;  %v3723_v38 = vsub.f32 %v14130_v58, %v3645_v12  ;;  %v3724_v39 = vsub.f32 %v14132_v35, %v3645_v12 }
 0x7d6   :  { %v14332_v19 = vpop.eup %11159  ;;  %11173 = vpow2.f32 %v3817_v7  ;;  %3917 = vadd.xlane.f32.xlu1 %v3916_v15 }
 0x7d7   :  { %v14334_v27 = vpop.eup %11161  ;;  %v3819_v17 = vmul.f32 1.442695, %v3723_v38  ;;  %v3821_v21 = vmul.f32 1.442695, %v3724_v39 }
 0x7d8   :  { %v3648_v32 = vpop.xlane.xlu1 %3647  ;;  %v3919_v56 = vadd.f32 %v14334_v27, %v14332_v19 }
 0x7d9   :  { %11175 = vpow2.f32 %v3819_v17  ;;  %v3725_v49 = vsub.f32 %v14136_v30, %v3648_v32  ;;  %v3726_v45 = vsub.f32 %v14138_v11, %v3648_v32 }
 0x7da   :  { %v14340_v58 = vpop.eup %11163  ;;  %11177 = vpow2.f32 %v3821_v21  ;;  %3920 = vadd.xlane.f32.xlu0 %v3919_v56 }
 0x7db   :  { %v14342_v35 = vpop.eup %11165  ;;  %v3823_v54 = vmul.f32 1.442695, %v3725_v49  ;;  %v3825_v61 = vmul.f32 1.442695, %v3726_v45 }
 0x7dc   :  { %v3651_v59 = vpop.xlane.xlu0 %3650  ;;  %v3922_v0 = vadd.f32 %v14342_v35, %v14340_v58 }
 0x7dd   :  { %11179 = vpow2.f32 %v3823_v54  ;;  %v3727_v36 = vsub.f32 %v14142_v52, %v3651_v59  ;;  %v3728_v53 = vsub.f32 %v14144_v5, %v3651_v59 }
 0x7de   :  { %v14348_v30 = vpop.eup %11167  ;;  %11181 = vpow2.f32 %v3825_v61  ;;  %3923 = vadd.xlane.f32.xlu1 %v3922_v0 }
 0x7df   :  { %v14350_v11 = vpop.eup %11169  ;;  %v3827_v10 = vmul.f32 1.442695, %v3727_v36  ;;  %v3829_v62 = vmul.f32 1.442695, %v3728_v53 }
 0x7e0   :  { %v3654_v7 = vpop.xlane.xlu1 %3653  ;;  %v3925_v12 = vadd.f32 %v14350_v11, %v14348_v30 }
 0x7e1   :  { %11183 = vpow2.f32 %v3827_v10  ;;  %v3729_v15 = vsub.f32 %v14148_v6, %v3654_v7  ;;  %v3730_v38 = vsub.f32 %v14150_v47, %v3654_v7 }
 0x7e2   :  { %v14356_v52 = vpop.eup %11171  ;;  %11185 = vpow2.f32 %v3829_v62  ;;  %3926 = vadd.xlane.f32.xlu0 %v3925_v12 }
 0x7e3   :  { %v14358_v5 = vpop.eup %11173  ;;  %v3831_v39 = vmul.f32 1.442695, %v3729_v15  ;;  %v3833_v17 = vmul.f32 1.442695, %v3730_v38 }
 0x7e4   :  { %v3657_v21 = vpop.xlane.xlu0 %3656  ;;  %v3928_v32 = vadd.f32 %v14358_v5, %v14356_v52 }
 0x7e5   :  { %11187 = vpow2.f32 %v3831_v39  ;;  %v3731_v56 = vsub.f32 %v14154_v51, %v3657_v21  ;;  %v3732_v49 = vsub.f32 %v14156_v25, %v3657_v21 }
 0x7e6   :  { %v14364_v6 = vpop.eup %11175  ;;  %11189 = vpow2.f32 %v3833_v17  ;;  %3929 = vadd.xlane.f32.xlu1 %v3928_v32 }
 0x7e7   :  { %v14366_v47 = vpop.eup %11177  ;;  %v3835_v45 = vmul.f32 1.442695, %v3731_v56  ;;  %v3837_v54 = vmul.f32 1.442695, %v3732_v49  ;;  %v17817_v56 = vld [vmem:[#allocation35_spill] sm:$0xff] }
 0x7e8   :  { %v3660_v61 = vpop.xlane.xlu1 %3659  ;;  %v3931_v59 = vadd.f32 %v14366_v47, %v14364_v6 }
 0x7e9   :  { %11191 = vpow2.f32 %v3835_v45  ;;  %v3733_v0 = vsub.f32 %v14160_v18, %v3660_v61  ;;  %v3734_v36 = vsub.f32 %v14162_v4, %v3660_v61 }
 0x7ea   :  { %v14372_v51 = vpop.eup %11179  ;;  %11193 = vpow2.f32 %v3837_v54  ;;  %3932 = vadd.xlane.f32.xlu0 %v3931_v59 }
 0x7eb   :  { %v14374_v25 = vpop.eup %11181  ;;  %v3839_v53 = vmul.f32 1.442695, %v3733_v0  ;;  %v3841_v10 = vmul.f32 1.442695, %v3734_v36  ;;  %v17818_v0 = vld [vmem:[#allocation38_spill] sm:$0xff] }
 0x7ec   :  { %v3663_v62 = vpop.xlane.xlu0 %3662  ;;  %v3934_v7 = vadd.f32 %v14374_v25, %v14372_v51 }
 0x7ed   :  { %11195 = vpow2.f32 %v3839_v53  ;;  %v3735_v12 = vsub.f32 %v14166_v22, %v3663_v62  ;;  %v3736_v15 = vsub.f32 %v14168_v29, %v3663_v62  ;;  %v17819_v53 = vld [vmem:[#allocation39_spill] sm:$0xff] }
 0x7ee   :  { %v14380_v18 = vpop.eup %11183  ;;  %11197 = vpow2.f32 %v3841_v10  ;;  %3935 = vadd.xlane.f32.xlu1 %v3934_v7 }
 0x7ef   :  { %v14382_v4 = vpop.eup %11185  ;;  %v3843_v38 = vmul.f32 1.442695, %v3735_v12  ;;  %v3845_v39 = vmul.f32 1.442695, %v3736_v15 }
 0x7f0   :  { %v3666_v17 = vpop.xlane.xlu0 %3665  ;;  %v3937_v21 = vadd.f32 %v14382_v4, %v14380_v18 }
 0x7f1   :  { %11199 = vpow2.f32 %v3843_v38  ;;  %v3737_v32 = vsub.f32 %v14172_v31, %v3666_v17  ;;  %v3738_v49 = vsub.f32 %v17817_v56, %v3666_v17 }
 0x7f2   :  { %v14388_v22 = vpop.eup %11187  ;;  %11201 = vpow2.f32 %v3845_v39  ;;  %3938 = vadd.xlane.f32.xlu0 %v3937_v21  ;;  %v17820_v39 = vld [vmem:[#allocation40_spill] sm:$0xff]  ;;  %v17821_v21 = vld [vmem:[#allocation41_spill] sm:$0xff] }
 0x7f3   :  { %v14390_v29 = vpop.eup %11189  ;;  %v3847_v45 = vmul.f32 1.442695, %v3737_v32  ;;  %v3849_v54 = vmul.f32 1.442695, %v3738_v49 }
 0x7f4   :  { %v3669_v61 = vpop.xlane.xlu0 %3668  ;;  %v3940_v59 = vadd.f32 %v14390_v29, %v14388_v22 }
 0x7f5   :  { %11203 = vpow2.f32 %v3847_v45  ;;  %v3739_v36 = vsub.f32 %v17818_v0, %v3669_v61  ;;  %v3740_v10 = vsub.f32 %v17819_v53, %v3669_v61  ;;  %v17823_v0 = vld [vmem:[#allocation42_spill] sm:$0xff]  ;;  %v17824_v53 = vld [vmem:[#allocation43_spill] sm:$0xff] }
 0x7f6   :  { %v14396_v31 = vpop.eup %11191  ;;  %11205 = vpow2.f32 %v3849_v54  ;;  %3941 = vadd.xlane.f32.xlu1 %v3940_v59 }
 0x7f7   :  { %v14398_v62 = vpop.eup %11193  ;;  %v3851_v7 = vmul.f32 1.442695, %v3739_v36  ;;  %v3853_v12 = vmul.f32 1.442695, %v3740_v10 }
 0x7f8   :  { %v3672_v15 = vpop.xlane.xlu0 %3671  ;;  %v3943_v38 = vadd.f32 %v14398_v62, %v14396_v31 }
 0x7f9   :  { %11207 = vpow2.f32 %v3851_v7  ;;  %v3741_v17 = vsub.f32 %v17820_v39, %v3672_v15  ;;  %v3742_v32 = vsub.f32 %v17821_v21, %v3672_v15  ;;  %v17827_v21 = vld [vmem:[#allocation36_spill] sm:$0xff] }
 0x7fa   :  { %v14404_v56 = vpop.eup %11195  ;;  %11209 = vpow2.f32 %v3853_v12  ;;  %3944 = vadd.xlane.f32.xlu0 %v3943_v38 }
 0x7fb   :  { %17822 = vst [vmem:[#allocation20_spill] sm:$0xff] %v14404_v56  ;;  %v14406_v49 = vpop.eup %11197  ;;  %v3855_v45 = vmul.f32 1.442695, %v3741_v17  ;;  %v3857_v54 = vmul.f32 1.442695, %v3742_v32 }
 0x7fc   :  { %v3675_v61 = vpop.xlane.xlu0 %3674  ;;  %v3946_v59 = vadd.f32 %v14406_v49, %v14404_v56 }
 0x7fd   :  { %11211 = vpow2.f32 %v3855_v45  ;;  %v3743_v36 = vsub.f32 %v17823_v0, %v3675_v61  ;;  %v3744_v10 = vsub.f32 %v17824_v53, %v3675_v61  ;;  %v17828_v45 = vld [vmem:[#allocation13_spill] sm:$0xff] }
 0x7fe   :  { %v14412_v7 = vpop.eup %11199  ;;  %11213 = vpow2.f32 %v3857_v54  ;;  %3947 = vadd.xlane.f32.xlu1 %v3946_v59 }
 0x7ff   :  { %17825 = vst [vmem:[#allocation28_spill] sm:$0xff] %v14412_v7  ;;  %v14414_v15 = vpop.eup %11201  ;;  %v3859_v12 = vmul.f32 1.442695, %v3743_v36  ;;  %v3861_v38 = vmul.f32 1.442695, %v3744_v10  ;;  %v17830_v10 = vld [vmem:[#allocation37_spill] sm:$0xff] }
 0x800   :  { %17826 = vst [vmem:[#allocation25_spill] sm:$0xff] %v14414_v15  ;;  %v3678_v39 = vpop.xlane.xlu0 %3677  ;;  %v3949_v17 = vadd.f32 %v14414_v15, %v14412_v7 }
 0x801   :  { %11215 = vpow2.f32 %v3859_v12  ;;  %v3745_v32 = vsub.f32 %v17827_v21, %v3678_v39  ;;  %v3746_v56 = vsub.f32 %v17828_v45, %v3678_v39  ;;  %v17831_v12 = vld [vmem:[#allocation18_spill] sm:$0xff] }
 0x802   :  { %v14420_v0 = vpop.eup %11203  ;;  %11217 = vpow2.f32 %v3861_v38  ;;  %3950 = vadd.xlane.f32.xlu0 %v3949_v17 }
 0x803   :  { %17829 = vst [vmem:[#allocation33_spill] sm:$0xff] %v14420_v0  ;;  %v14422_v61 = vpop.eup %11205  ;;  %v3863_v54 = vmul.f32 1.442695, %v3745_v32  ;;  %v3865_v59 = vmul.f32 1.442695, %v3746_v56 }
 0x804   :  { %v3681_v53 = vpop.xlane.xlu0 %3680  ;;  %v3952_v36 = vadd.f32 %v14422_v61, %v14420_v0 }
 0x805   :  { %11219 = vpow2.f32 %v3863_v54  ;;  %v3747_v7 = vsub.f32 %v17830_v10, %v3681_v53  ;;  %v3748_v15 = vsub.f32 %v17831_v12, %v3681_v53  ;;  %v17833_v54 = vld [vmem:[#allocation15_spill] sm:$0xff] }
 0x806   :  { %v14428_v21 = vpop.eup %11207  ;;  %11221 = vpow2.f32 %v3865_v59  ;;  %3953 = vadd.xlane.f32.xlu1 %v3952_v36 }
 0x807   :  { %17832 = vst [vmem:[#allocation30_spill] sm:$0xff] %v14428_v21  ;;  %v14430_v39 = vpop.eup %11209  ;;  %v3867_v38 = vmul.f32 1.442695, %v3747_v7  ;;  %v3869_v17 = vmul.f32 1.442695, %v3748_v15 }
 0x808   :  { %v3684_v45 = vpop.xlane.xlu0 %3683  ;;  %v3955_v56 = vadd.f32 %v14430_v39, %v14428_v21 }
 0x809   :  { %11223 = vpow2.f32 %v3867_v38  ;;  %v3749_v32 = vsub.f32 %v14208_v16, %v3684_v45  ;;  %v3750_v0 = vsub.f32 %v17833_v54, %v3684_v45  ;;  %v17836_v38 = vld [vmem:[#allocation23_spill] sm:$0xff] }
 0x80a   :  { %v14436_v10 = vpop.eup %11211  ;;  %11225 = vpow2.f32 %v3869_v17  ;;  %3956 = vadd.xlane.f32.xlu0 %v3955_v56 }
 0x80b   :  { %17834 = vst [vmem:[#allocation35_spill] sm:$0xff] %v14436_v10  ;;  %v14438_v53 = vpop.eup %11213  ;;  %v3871_v59 = vmul.f32 1.442695, %v3749_v32  ;;  %v3873_v36 = vmul.f32 1.442695, %v3750_v0 }
 0x80c   :  { %17835 = vst [vmem:[#allocation38_spill] sm:$0xff] %v14438_v53  ;;  %v3687_v12 = vpop.xlane.xlu0 %3686  ;;  %v3958_v7 = vadd.f32 %v14438_v53, %v14436_v10 }
 0x80d   :  { %11227 = vpow2.f32 %v3871_v59  ;;  %v3751_v15 = vsub.f32 %v14214_v41, %v3687_v12  ;;  %v3752_v21 = vsub.f32 %v17836_v38, %v3687_v12 }
 0x80e   :  { %v14444_v16 = vpop.eup %11215  ;;  %11229 = vpow2.f32 %v3873_v36  ;;  %3959 = vadd.xlane.f32.xlu1 %v3958_v7 }
 0x80f   :  { %17837 = vst [vmem:[#allocation39_spill] sm:$0xff] %v14444_v16  ;;  %v14446_v45 = vpop.eup %11217  ;;  %v3875_v17 = vmul.f32 1.442695, %v3751_v15  ;;  %v3877_v56 = vmul.f32 1.442695, %v3752_v21 }
 0x810   :  { %17838 = vst [vmem:[#allocation40_spill] sm:$0xff] %v14446_v45  ;;  %v3690_v54 = vpop.xlane.xlu0 %3689  ;;  %v3961_v0 = vadd.f32 %v14446_v45, %v14444_v16 }
 0x811   :  { %11231 = vpow2.f32 %v3875_v17  ;;  %v3753_v32 = vsub.f32 %v14220_v33, %v3690_v54  ;;  %v3754_v59 = vsub.f32 %v14222_v55, %v3690_v54 }
 0x812   :  { %v14452_v41 = vpop.eup %11219  ;;  %11233 = vpow2.f32 %v3877_v56  ;;  %3962 = vadd.xlane.f32.xlu0 %v3961_v0 }
 0x813   :  { %17839 = vst [vmem:[#allocation41_spill] sm:$0xff] %v14452_v41  ;;  %v14454_v12 = vpop.eup %11221  ;;  %v3879_v36 = vmul.f32 1.442695, %v3753_v32  ;;  %v3881_v7 = vmul.f32 1.442695, %v3754_v59 }
 0x814   :  { %17840 = vst [vmem:[#allocation42_spill] sm:$0xff] %v14454_v12  ;;  %v3964_v21 = vadd.f32 %v14454_v12, %v14452_v41 }
 0x815   :  { %11235 = vpow2.f32 %v3879_v36 }
 0x816   :  { %v14458_v15 = vpop.eup %11223  ;;  %11237 = vpow2.f32 %v3881_v7  ;;  %3965 = vadd.xlane.f32.xlu1 %v3964_v21 }
 0x817   :  { %17841 = vst [vmem:[#allocation43_spill] sm:$0xff] %v14458_v15  ;;  %v14460_v38 = vpop.eup %11225 }
 0x818   :  { %17842 = vst [vmem:[#allocation36_spill] sm:$0xff] %v14460_v38  ;;  %v3967_v33 = vadd.f32 %v14460_v38, %v14458_v15 }
 0x81a   :  { %v14464_v55 = vpop.eup %11227  ;;  %3968 = vadd.xlane.f32.xlu0 %v3967_v33 }
 0x81b   :  { %17843 = vst [vmem:[#allocation13_spill] sm:$0xff] %v14464_v55  ;;  %v14466_v17 = vpop.eup %11229 }
 0x81c   :  { %17844 = vst [vmem:[#allocation37_spill] sm:$0xff] %v14466_v17  ;;  %v3970_v56 = vadd.f32 %v14466_v17, %v14464_v55 }
 0x81e   :  { %v14470_v54 = vpop.eup %11231  ;;  %3971 = vadd.xlane.f32.xlu1 %v3970_v56 }
 0x81f   :  { %17845 = vst [vmem:[#allocation18_spill] sm:$0xff] %v14470_v54  ;;  %v14472_v0 = vpop.eup %11233 }
 0x820   :  { %17846 = vst [vmem:[#allocation15_spill] sm:$0xff] %v14472_v0  ;;  %v3973_v32 = vadd.f32 %v14472_v0, %v14470_v54 }
 0x822   :  { %v14476_v59 = vpop.eup %11235  ;;  %3974 = vadd.xlane.f32.xlu0 %v3973_v32 }
 0x823   :  { %17847 = vst [vmem:[#allocation23_spill] sm:$0xff] %v14476_v59  ;;  %v14478_v36 = vpop.eup %11237 }
 0x824   :  { %17848 = vst [vmem:[#allocation63_spill] sm:$0xff] %v14478_v36  ;;  %v3976_v7 = vadd.f32 %v14478_v36, %v14476_v59 }
 0x826   :  { %3977 = vadd.xlane.f32.xlu1 %v3976_v7 }
 0x833   :  { %v3885_v21 = vpop.xlane.xlu1 %3884 }
 0x834   :  { %11239 = vrcp.f32 %v3885_v21 }
 0x837   :  { %v3888_v33 = vpop.xlane.xlu1 %3887 }
 0x838   :  { %11241 = vrcp.f32 %v3888_v33 }
 0x83b   :  { %v3891_v55 = vpop.xlane.xlu1 %3890 }
 0x83c   :  { %11243 = vrcp.f32 %v3891_v55 }
 0x83f   :  { %v3894_v56 = vpop.xlane.xlu1 %3893 }
 0x840   :  { %11245 = vrcp.f32 %v3894_v56 }
 0x841   :  { %v11240_v17 = vpop.eup %11239 }
 0x842   :  { %v4011_v15 = vmul.f32 %v11240_v17, %v3885_v21 }
 0x843   :  { %v3897_v54 = vpop.xlane.xlu1 %3896 }
 0x844   :  { %v4043_v0 = vsub.f32 2.0, %v4011_v15  ;;  %11247 = vrcp.f32 %v3897_v54 }
 0x845   :  { %v11242_v32 = vpop.eup %11241 }
 0x846   :  { %v4012_v38 = vmul.f32 %v11242_v32, %v3888_v33  ;;  %v4075_v41 = vmul.f32 %v11240_v17, %v4043_v0  ;;  %v4529_v17 = vld [vmem:[#allocation3 + $0x20] sm:$0xff] }
 0x847   :  { %v3900_v12 = vpop.xlane.xlu1 %3899 }
 0x848   :  { %v4044_v16 = vsub.f32 2.0, %v4012_v38  ;;  %11249 = vrcp.f32 %v3900_v12  ;;  %v4107_v7 = vmul.f32 %v14236_v44, %v4075_v41  ;;  %v4108_v59 = vmul.f32 %v14238_v42, %v4075_v41  ;;  %v11697_v38 = vld [vmem:[%s17315_s2 + $0x8] sm:$0xff]  ;;  %v11698_v42 = vld [vmem:[%s17315_s2] sm:$0xff] }
 0x849   :  { %v11244_v36 = vpop.eup %11243 }
 0x84a   :  { %v4013_v45 = vmul.f32 %v11244_v36, %v3891_v55  ;;  %4235 = vmatprep.mubr.f32.mxu1 %v4108_v59  ;;  %v4076_v10 = vmul.f32 %v11242_v32, %v4044_v16  ;;  %v4531_v55 = vld [vmem:[#allocation3 + $0x30] sm:$0xff] }
 0x84b   :  { %4236 = vmatmul.mubr.f32.vlgmr.msra.gmra.mxu1 %v4107_v7  ;;  %v3903_v53 = vpop.xlane.xlu1 %3902 }
 0x84c   :  { %v4045_v21 = vsub.f32 2.0, %v4013_v45  ;;  %11251 = vrcp.f32 %v3903_v53  ;;  %v4110_v15 = vmul.f32 %v14246_v20, %v4076_v10  ;;  %v4109_v33 = vmul.f32 %v14244_v28, %v4076_v10  ;;  %10654 = vmatpush3.msra.mxu1 %v11697_v38 }
 0x84d   :  { %v11246_v44 = vpop.eup %11245  ;;  %10655 = vmatprep.subr.mxu1 %v11698_v42 }
 0x84e   :  { %v4014_v16 = vmul.f32 %v11246_v44, %v3894_v56  ;;  %4240 = vmatprep.mubr.f32.mxu1 %v4110_v15  ;;  %v4077_v45 = vmul.f32 %v11244_v36, %v4045_v21  ;;  %10656 = vmatpush3.msra.mxu1 %v11698_v42 }
 0x84f   :  { %4241 = vmatmul.mubr.f32.gmra.mxu1 %v4109_v33  ;;  %v3906_v20 = vpop.xlane.xlu1 %3905  ;;  %4533 = vxpose.xlu0.b32.start [1/2] (short) %v4529_v17, 128  ;;  %v4530_v17 = vld [vmem:[#allocation3 + $0x28] sm:$0xff] }
 0x850   :  { %v4046_v28 = vsub.f32 2.0, %v4014_v16  ;;  %11253 = vrcp.f32 %v3906_v20  ;;  %v4112_v10 = vmul.f32 %v14254_v48, %v4077_v45  ;;  %v4111_v41 = vmul.f32 %v14252_v13, %v4077_v45  ;;  %v4532_v45 = vld [vmem:[#allocation3 + $0x38] sm:$0xff] }
 0x851   :  { %v11248_v0 = vpop.eup %11247 }
 0x852   :  { %v4015_v59 = vmul.f32 %v11248_v0, %v3897_v54  ;;  %4245 = vmatprep.mubr.f32.mxu1 %v4112_v10  ;;  %v4078_v32 = vmul.f32 %v11246_v44, %v4046_v28 }
 0x853   :  { %4246 = vmatmul.mubr.f32.gmra.mxu1 %v4111_v41  ;;  %v3909_v7 = vpop.xlane.xlu1 %3908  ;;  %4534 = vxpose.xlu0.b32.end [2/2] (short) %v4531_v55, 128 }
 0x854   :  { %v4047_v56 = vsub.f32 2.0, %v4015_v59  ;;  %11255 = vrcp.f32 %v3909_v7  ;;  %v4114_v36 = vmul.f32 %v14262_v34, %v4078_v32  ;;  %v4113_v21 = vmul.f32 %v14260_v8, %v4078_v32 }
 0x855   :  { %v11250_v15 = vpop.eup %11249 }
 0x856   :  { %v4016_v33 = vmul.f32 %v11250_v15, %v3900_v12  ;;  %4250 = vmatprep.mubr.f32.mxu1 %v4114_v36  ;;  %v4079_v48 = vmul.f32 %v11248_v0, %v4047_v56 }
 0x857   :  { %4251 = vmatmul.mubr.f32.gmra.mxu1 %v4113_v21  ;;  %v3912_v13 = vpop.xlane.xlu1 %3911 }
 0x858   :  { %v4048_v38 = vsub.f32 2.0, %v4016_v33  ;;  %11257 = vrcp.f32 %v3912_v13  ;;  %v4116_v54 = vmul.f32 %v14270_v9, %v4079_v48  ;;  %v4115_v44 = vmul.f32 %v14268_v3, %v4079_v48 }
 0x859   :  { %v11252_v42 = vpop.eup %11251  ;;  %4565 = vxpose.xlu1.b32.start [1/2] (short) %v4530_v17, 128 }
 0x85a   :  { %v4017_v16 = vmul.f32 %v11252_v42, %v3903_v53  ;;  %4255 = vmatprep.mubr.f32.mxu1 %v4116_v54  ;;  %v4080_v34 = vmul.f32 %v11250_v15, %v4048_v38 }
 0x85b   :  { %4256 = vmatmul.mubr.f32.gmra.mxu1 %v4115_v44  ;;  %v3915_v8 = vpop.xlane.xlu0 %3914 }
 0x85c   :  { %v4049_v12 = vsub.f32 2.0, %v4017_v16  ;;  %11259 = vrcp.f32 %v3915_v8  ;;  %v4118_v28 = vmul.f32 %v14278_v57, %v4080_v34  ;;  %v4117_v10 = vmul.f32 %v14276_v46, %v4080_v34 }
 0x85d   :  { %v11254_v41 = vpop.eup %11253  ;;  %4566 = vxpose.xlu1.b32.end [2/2] (short) %v4532_v45, 128 }
 0x85e   :  { %v4018_v55 = vmul.f32 %v11254_v41, %v3906_v20  ;;  %4260 = vmatprep.mubr.f32.mxu1 %v4118_v28  ;;  %v4081_v9 = vmul.f32 %v11252_v42, %v4049_v12 }
 0x85f   :  { %4261 = vmatmul.mubr.f32.gmra.mxu1 %v4117_v10  ;;  %v3918_v3 = vpop.xlane.xlu1 %3917 }
 0x860   :  { %v4050_v0 = vsub.f32 2.0, %v4018_v55  ;;  %11261 = vrcp.f32 %v3918_v3  ;;  %v4120_v53 = vmul.f32 %v14286_v14, %v4081_v9  ;;  %v4119_v59 = vmul.f32 %v14284_v60, %v4081_v9 }
 0x861   :  { %v11256_v32 = vpop.eup %11255 }
 0x862   :  { %v4019_v56 = vmul.f32 %v11256_v32, %v3909_v7  ;;  %4265 = vmatprep.mubr.f32.mxu1 %v4120_v53  ;;  %v4082_v36 = vmul.f32 %v11254_v41, %v4050_v0 }
 0x863   :  { %4266 = vmatmul.mubr.f32.gmra.mxu1 %v4119_v59  ;;  %v3921_v57 = vpop.xlane.xlu0 %3920 }
 0x864   :  { %v4051_v46 = vsub.f32 2.0, %v4019_v56  ;;  %11263 = vrcp.f32 %v3921_v57  ;;  %v4122_v20 = vmul.f32 %v14294_v2, %v4082_v36  ;;  %v4121_v21 = vmul.f32 %v14292_v23, %v4082_v36 }
 0x865   :  { %v11258_v15 = vpop.eup %11257 }
 0x866   :  { %v4020_v33 = vmul.f32 %v11258_v15, %v3912_v13  ;;  %4270 = vmatprep.mubr.f32.mxu1 %v4122_v20  ;;  %v4083_v48 = vmul.f32 %v11256_v32, %v4051_v46 }
 0x867   :  { %4271 = vmatmul.mubr.f32.gmra.mxu1 %v4121_v21  ;;  %v3924_v14 = vpop.xlane.xlu1 %3923 }
 0x868   :  { %v4052_v17 = vsub.f32 2.0, %v4020_v33  ;;  %11265 = vrcp.f32 %v3924_v14  ;;  %v4124_v60 = vmul.f32 %v14302_v26, %v4083_v48  ;;  %v4123_v7 = vmul.f32 %v14300_v43, %v4083_v48 }
 0x869   :  { %v11260_v38 = vpop.eup %11259 }
 0x86a   :  { %v4021_v54 = vmul.f32 %v11260_v38, %v3915_v8  ;;  %4275 = vmatprep.mubr.f32.mxu1 %v4124_v60  ;;  %v4084_v44 = vmul.f32 %v11258_v15, %v4052_v17 }
 0x86b   :  { %4276 = vmatmul.mubr.f32.gmra.mxu1 %v4123_v7  ;;  %v3927_v2 = vpop.xlane.xlu0 %3926 }
 0x86c   :  { %v4053_v42 = vsub.f32 2.0, %v4021_v54  ;;  %11267 = vrcp.f32 %v3927_v2  ;;  %v4126_v23 = vmul.f32 %v14310_v63, %v4084_v44  ;;  %v4125_v13 = vmul.f32 %v14308_v50, %v4084_v44 }
 0x86d   :  { %v11262_v16 = vpop.eup %11261 }
 0x86e   :  { %v4022_v34 = vmul.f32 %v11262_v16, %v3918_v3  ;;  %4280 = vmatprep.mubr.f32.mxu1 %v4126_v23  ;;  %v4085_v45 = vmul.f32 %v11260_v38, %v4053_v42 }
 0x86f   :  { %4281 = vmatmul.mubr.f32.gmra.mxu1 %v4125_v13  ;;  %v3930_v26 = vpop.xlane.xlu1 %3929 }
 0x870   :  { %v4054_v12 = vsub.f32 2.0, %v4022_v34  ;;  %11269 = vrcp.f32 %v3930_v26  ;;  %v4128_v43 = vmul.f32 %v14318_v1, %v4085_v45  ;;  %v4127_v8 = vmul.f32 %v14316_v24, %v4085_v45 }
 0x871   :  { %v11264_v28 = vpop.eup %11263 }
 0x872   :  { %v4023_v10 = vmul.f32 %v11264_v28, %v3921_v57  ;;  %4285 = vmatprep.mubr.f32.mxu1 %v4128_v43  ;;  %v4086_v41 = vmul.f32 %v11262_v16, %v4054_v12 }
 0x873   :  { %4286 = vmatmul.mubr.f32.gmra.mxu1 %v4127_v8  ;;  %v3933_v63 = vpop.xlane.xlu0 %3932 }
 0x874   :  { %v4055_v55 = vsub.f32 2.0, %v4023_v10  ;;  %11271 = vrcp.f32 %v3933_v63  ;;  %v4130_v50 = vmul.f32 %v14326_v40, %v4086_v41  ;;  %v4129_v9 = vmul.f32 %v14324_v37, %v4086_v41 }
 0x875   :  { %v11266_v3 = vpop.eup %11265 }
 0x876   :  { %v4024_v0 = vmul.f32 %v11266_v3, %v3924_v14  ;;  %4290 = vmatprep.mubr.f32.mxu1 %v4130_v50  ;;  %v4087_v53 = vmul.f32 %v11264_v28, %v4055_v55 }
 0x877   :  { %v3936_v59 = vpop.xlane.xlu1 %3935  ;;  %4291 = vmatmul.mubr.f32.gmra.mxu1 %v4129_v9 }
 0x878   :  { %v4056_v1 = vsub.f32 2.0, %v4024_v0  ;;  %11273 = vrcp.f32 %v3936_v59  ;;  %v4132_v24 = vmul.f32 %v14334_v27, %v4087_v53  ;;  %v4131_v32 = vmul.f32 %v14332_v19, %v4087_v53 }
 0x879   :  { %v11268_v56 = vpop.eup %11267 }
 0x87a   :  { %v4025_v36 = vmul.f32 %v11268_v56, %v3927_v2  ;;  %4295 = vmatprep.mubr.f32.mxu1 %v4132_v24  ;;  %v4088_v57 = vmul.f32 %v11266_v3, %v4056_v1 }
 0x87b   :  { %4296 = vmatmul.mubr.f32.gmra.mxu1 %v4131_v32  ;;  %v3939_v40 = vpop.xlane.xlu0 %3938 }
 0x87c   :  { %v4057_v46 = vsub.f32 2.0, %v4025_v36  ;;  %11275 = vrcp.f32 %v3939_v40  ;;  %v4134_v37 = vmul.f32 %v14342_v35, %v4088_v57  ;;  %v4133_v20 = vmul.f32 %v14340_v58, %v4088_v57 }
 0x87d   :  { %v11270_v21 = vpop.eup %11269 }
 0x87e   :  { %v4026_v15 = vmul.f32 %v11270_v21, %v3930_v26  ;;  %4300 = vmatprep.mubr.f32.mxu1 %v4134_v37  ;;  %v4089_v33 = vmul.f32 %v11268_v56, %v4057_v46 }
 0x87f   :  { %v3942_v48 = vpop.xlane.xlu1 %3941  ;;  %4301 = vmatmul.mubr.f32.gmra.mxu1 %v4133_v20 }
 0x880   :  { %v4058_v27 = vsub.f32 2.0, %v4026_v15  ;;  %11277 = vrcp.f32 %v3942_v48  ;;  %v4136_v19 = vmul.f32 %v14350_v11, %v4089_v33  ;;  %v4135_v14 = vmul.f32 %v14348_v30, %v4089_v33 }
 0x881   :  { %v11272_v17 = vpop.eup %11271 }
 0x882   :  { %v4027_v60 = vmul.f32 %v11272_v17, %v3933_v63  ;;  %4305 = vmatprep.mubr.f32.mxu1 %v4136_v19  ;;  %v4090_v7 = vmul.f32 %v11270_v21, %v4058_v27 }
 0x883   :  { %4306 = vmatmul.mubr.f32.gmra.mxu1 %v4135_v14  ;;  %v3945_v35 = vpop.xlane.xlu0 %3944 }
 0x884   :  { %v4059_v38 = vsub.f32 2.0, %v4027_v60  ;;  %11279 = vrcp.f32 %v3945_v35  ;;  %v4138_v58 = vmul.f32 %v14358_v5, %v4090_v7  ;;  %v4137_v54 = vmul.f32 %v14356_v52, %v4090_v7 }
 0x885   :  { %v11274_v44 = vpop.eup %11273 }
 0x886   :  { %v4028_v2 = vmul.f32 %v11274_v44, %v3936_v59  ;;  %4310 = vmatprep.mubr.f32.mxu1 %v4138_v58  ;;  %v4091_v42 = vmul.f32 %v11272_v17, %v4059_v38 }
 0x887   :  { %v3948_v23 = vpop.xlane.xlu1 %3947  ;;  %4311 = vmatmul.mubr.f32.gmra.mxu1 %v4137_v54 }
 0x888   :  { %v4060_v11 = vsub.f32 2.0, %v4028_v2  ;;  %11281 = vrcp.f32 %v3948_v23  ;;  %v4140_v30 = vmul.f32 %v14366_v47, %v4091_v42  ;;  %v4139_v13 = vmul.f32 %v14364_v6, %v4091_v42 }
 0x889   :  { %v11276_v16 = vpop.eup %11275 }
 0x88a   :  { %v4029_v34 = vmul.f32 %v11276_v16, %v3939_v40  ;;  %4315 = vmatprep.mubr.f32.mxu1 %v4140_v30  ;;  %v4092_v45 = vmul.f32 %v11274_v44, %v4060_v11  ;;  %v17849_v40 = vld [vmem:[#allocation20_spill] sm:$0xff]  ;;  %v17853_v11 = vld [vmem:[#allocation30_spill] sm:$0xff] }
 0x88b   :  { %4316 = vmatmul.mubr.f32.gmra.mxu1 %v4139_v13  ;;  %v3951_v5 = vpop.xlane.xlu0 %3950 }
 0x88c   :  { %v4061_v26 = vsub.f32 2.0, %v4029_v34  ;;  %11283 = vrcp.f32 %v3951_v5  ;;  %v4142_v52 = vmul.f32 %v14374_v25, %v4092_v45  ;;  %v4141_v12 = vmul.f32 %v14372_v51, %v4092_v45 }
 0x88d   :  { %v11278_v43 = vpop.eup %11277 }
 0x88e   :  { %v4030_v8 = vmul.f32 %v11278_v43, %v3942_v48  ;;  %4320 = vmatprep.mubr.f32.mxu1 %v4142_v52  ;;  %v4093_v28 = vmul.f32 %v11276_v16, %v4061_v26  ;;  %v17851_v48 = vld [vmem:[#allocation28_spill] sm:$0xff]  ;;  %v17855_v52 = vld [vmem:[#allocation35_spill] sm:$0xff] }
 0x88f   :  { %v3954_v10 = vpop.xlane.xlu1 %3953  ;;  %4321 = vmatmul.mubr.f32.gmra.mxu1 %v4141_v12 }
 0x890   :  { %v4062_v47 = vsub.f32 2.0, %v4030_v8  ;;  %11285 = vrcp.f32 %v3954_v10  ;;  %v4144_v6 = vmul.f32 %v14382_v4, %v4093_v28  ;;  %v4143_v41 = vmul.f32 %v14380_v18, %v4093_v28 }
 0x891   :  { %v11280_v63 = vpop.eup %11279 }
 0x892   :  { %v4031_v55 = vmul.f32 %v11280_v63, %v3945_v35  ;;  %4325 = vmatprep.mubr.f32.mxu1 %v4144_v6  ;;  %v4094_v50 = vmul.f32 %v11278_v43, %v4062_v47  ;;  %v17852_v35 = vld [vmem:[#allocation33_spill] sm:$0xff]  ;;  %v17856_v47 = vld [vmem:[#allocation40_spill] sm:$0xff] }
 0x893   :  { %4326 = vmatmul.mubr.f32.gmra.mxu1 %v4143_v41  ;;  %v3957_v25 = vpop.xlane.xlu0 %3956  ;;  %v17857_v41 = vld [vmem:[#allocation39_spill] sm:$0xff] }
 0x894   :  { %v4063_v9 = vsub.f32 2.0, %v4031_v55  ;;  %11287 = vrcp.f32 %v3957_v25  ;;  %v4146_v51 = vmul.f32 %v14390_v29, %v4094_v50  ;;  %v4145_v3 = vmul.f32 %v14388_v22, %v4094_v50 }
 0x895   :  { %v11282_v0 = vpop.eup %11281 }
 0x896   :  { %v4032_v53 = vmul.f32 %v11282_v0, %v3948_v23  ;;  %4330 = vmatprep.mubr.f32.mxu1 %v4146_v51  ;;  %v4095_v59 = vmul.f32 %v11280_v63, %v4063_v9  ;;  %v17858_v51 = vld [vmem:[#allocation42_spill] sm:$0xff] }
 0x897   :  { %v3960_v1 = vpop.xlane.xlu1 %3959  ;;  %4331 = vmatmul.mubr.f32.gmra.mxu1 %v4145_v3 }
 0x898   :  { %v4064_v4 = vsub.f32 2.0, %v4032_v53  ;;  %11289 = vrcp.f32 %v3960_v1  ;;  %v4148_v18 = vmul.f32 %v14398_v62, %v4095_v59  ;;  %v4147_v24 = vmul.f32 %v14396_v31, %v4095_v59  ;;  %v17850_v31 = vld [vmem:[#allocation25_spill] sm:$0xff] }
 0x899   :  { %v11284_v32 = vpop.eup %11283 }
 0x89a   :  { %v4033_v56 = vmul.f32 %v11284_v32, %v3951_v5  ;;  %4335 = vmatprep.mubr.f32.mxu1 %v4148_v18  ;;  %v4096_v36 = vmul.f32 %v11282_v0, %v4064_v4  ;;  %v17854_v5 = vld [vmem:[#allocation38_spill] sm:$0xff]  ;;  %v17859_v0 = vld [vmem:[#allocation41_spill] sm:$0xff] }
 0x89b   :  { %4336 = vmatmul.mubr.f32.gmra.mxu1 %v4147_v24  ;;  %v3963_v29 = vpop.xlane.xlu0 %3962  ;;  %v17860_v24 = vld [vmem:[#allocation36_spill] sm:$0xff] }
 0x89c   :  { %v4065_v57 = vsub.f32 2.0, %v4033_v56  ;;  %11291 = vrcp.f32 %v3963_v29  ;;  %v4150_v22 = vmul.f32 %v14406_v49, %v4096_v36  ;;  %v4149_v46 = vmul.f32 %v17849_v40, %v4096_v36  ;;  %v17861_v56 = vld [vmem:[#allocation43_spill] sm:$0xff] }
 0x89d   :  { %v11286_v37 = vpop.eup %11285 }
 0x89e   :  { %v4034_v20 = vmul.f32 %v11286_v37, %v3954_v10  ;;  %4340 = vmatprep.mubr.f32.mxu1 %v4150_v22  ;;  %v4097_v21 = vmul.f32 %v11284_v32, %v4065_v57 }
 0x89f   :  { %v3966_v15 = vpop.xlane.xlu1 %3965  ;;  %4341 = vmatmul.mubr.f32.gmra.mxu1 %v4149_v46  ;;  %v17862_v46 = vld [vmem:[#allocation37_spill] sm:$0xff] }
 0x8a0   :  { %v4066_v62 = vsub.f32 2.0, %v4034_v20  ;;  %11293 = vrcp.f32 %v3966_v15  ;;  %v4152_v33 = vmul.f32 %v17850_v31, %v4097_v21  ;;  %v4151_v27 = vmul.f32 %v17851_v48, %v4097_v21  ;;  %v17863_v20 = vld [vmem:[#allocation13_spill] sm:$0xff]  ;;  %v17864_v48 = vld [vmem:[#allocation15_spill] sm:$0xff] }
 0x8a1   :  { %v11288_v19 = vpop.eup %11287 }
 0x8a2   :  { %v4035_v14 = vmul.f32 %v11288_v19, %v3957_v25  ;;  %4345 = vmatprep.mubr.f32.mxu1 %v4152_v33  ;;  %v4098_v17 = vmul.f32 %v11286_v37, %v4066_v62 }
 0x8a3   :  { %4346 = vmatmul.mubr.f32.gmra.mxu1 %v4151_v27  ;;  %v3969_v49 = vpop.xlane.xlu0 %3968 }
 0x8a4   :  { %v4067_v60 = vsub.f32 2.0, %v4035_v14  ;;  %11295 = vrcp.f32 %v3969_v49  ;;  %v4154_v7 = vmul.f32 %v14422_v61, %v4098_v17  ;;  %v4153_v38 = vmul.f32 %v17852_v35, %v4098_v17 }
 0x8a5   :  { %v11290_v58 = vpop.eup %11289 }
 0x8a6   :  { %v4036_v54 = vmul.f32 %v11290_v58, %v3960_v1  ;;  %4350 = vmatprep.mubr.f32.mxu1 %v4154_v7  ;;  %v4099_v44 = vmul.f32 %v11288_v19, %v4067_v60  ;;  %v17865_v19 = vld [vmem:[#allocation18_spill] sm:$0xff]  ;;  %v17867_v7 = vld [vmem:[#allocation23_spill] sm:$0xff] }
 0x8a7   :  { %v3972_v2 = vpop.xlane.xlu1 %3971  ;;  %4351 = vmatmul.mubr.f32.gmra.mxu1 %v4153_v38 }
 0x8a8   :  { %v4068_v42 = vsub.f32 2.0, %v4036_v54  ;;  %11297 = vrcp.f32 %v3972_v2  ;;  %v4156_v23 = vmul.f32 %v14430_v39, %v4099_v44  ;;  %v4155_v30 = vmul.f32 %v17853_v11, %v4099_v44  ;;  %v14567_v54 = vld [vmem:[%s17316_s3 + $0x8] sm:$0xff]  ;;  %v11700_v44 = vld [vmem:[%s17316_s3] sm:$0xff] }
 0x8a9   :  { %v11292_v13 = vpop.eup %11291 }
 0x8aa   :  { %v4037_v16 = vmul.f32 %v11292_v13, %v3963_v29  ;;  %4355 = vmatprep.mubr.f32.mxu1 %v4156_v23  ;;  %v4100_v34 = vmul.f32 %v11290_v58, %v4068_v42  ;;  %v17872_v23 = vmov 0.0  }
 0x8ab   :  { %4356 = vmatmul.mubr.f32.gmra.mxu1 %v4155_v30  ;;  %v3975_v61 = vpop.xlane.xlu0 %3974 }
 0x8ac   :  { %v4069_v45 = vsub.f32 2.0, %v4037_v16  ;;  %11299 = vrcp.f32 %v3975_v61  ;;  %v4158_v26 = vmul.f32 %v17854_v5, %v4100_v34  ;;  %v4157_v12 = vmul.f32 %v17855_v52, %v4100_v34 }
 0x8ad   :  { %v11294_v43 = vpop.eup %11293 }
 0x8ae   :  { %v4038_v8 = vmul.f32 %v11294_v43, %v3966_v15  ;;  %4360 = vmatprep.mubr.f32.mxu1 %v4158_v26  ;;  %v4101_v28 = vmul.f32 %v11292_v13, %v4069_v45 }
 0x8af   :  { %v3978_v10 = vpop.xlane.xlu1 %3977  ;;  %4361 = vmatmul.mubr.f32.gmra.mxu1 %v4157_v12 }
 0x8b0   :  { %v4070_v39 = vsub.f32 2.0, %v4038_v8  ;;  %11301 = vrcp.f32 %v3978_v10  ;;  %v4160_v6 = vmul.f32 %v17856_v47, %v4101_v28  ;;  %v4159_v63 = vmul.f32 %v17857_v41, %v4101_v28 }
 0x8b1   :  { %v11296_v55 = vpop.eup %11295 }
 0x8b2   :  { %v4039_v50 = vmul.f32 %v11296_v55, %v3969_v49  ;;  %4365 = vmatprep.mubr.f32.mxu1 %v4160_v6  ;;  %v4102_v25 = vmul.f32 %v11294_v43, %v4070_v39  ;;  %v17866_v49 = vld [vmem:[#allocation63_spill] sm:$0xff] }
 0x8b3   :  { %4366 = vmatmul.mubr.f32.gmra.mxu1 %v4159_v63 }
 0x8b4   :  { %v4071_v9 = vsub.f32 2.0, %v4039_v50  ;;  %v4162_v3 = vmul.f32 %v17858_v51, %v4102_v25  ;;  %v4161_v53 = vmul.f32 %v17859_v0, %v4102_v25 }
 0x8b5   :  { %v11298_v59 = vpop.eup %11297 }
 0x8b6   :  { %v4040_v1 = vmul.f32 %v11298_v59, %v3972_v2  ;;  %4370 = vmatprep.mubr.f32.mxu1 %v4162_v3  ;;  %v4103_v4 = vmul.f32 %v11296_v55, %v4071_v9 }
 0x8b7   :  { %4371 = vmatmul.mubr.f32.gmra.mxu1 %v4161_v53 }
 0x8b8   :  { %v4072_v18 = vsub.f32 2.0, %v4040_v1  ;;  %v4164_v32 = vmul.f32 %v17860_v24, %v4103_v4  ;;  %v4163_v36 = vmul.f32 %v17861_v56, %v4103_v4 }
 0x8b9   :  { %v11300_v29 = vpop.eup %11299 }
 0x8ba   :  { %v4041_v57 = vmul.f32 %v11300_v29, %v3975_v61  ;;  %4375 = vmatprep.mubr.f32.mxu1 %v4164_v32  ;;  %v4104_v22 = vmul.f32 %v11298_v59, %v4072_v18 }
 0x8bb   :  { %4376 = vmatmul.mubr.f32.gmra.mxu1 %v4163_v36 }
 0x8bc   :  { %v4073_v40 = vsub.f32 2.0, %v4041_v57  ;;  %v4166_v37 = vmul.f32 %v17862_v46, %v4104_v22  ;;  %v4165_v21 = vmul.f32 %v17863_v20, %v4104_v22 }
 0x8bd   :  { %v11302_v15 = vpop.eup %11301 }
 0x8be   :  { %v4042_v62 = vmul.f32 %v11302_v15, %v3978_v10  ;;  %4380 = vmatprep.mubr.f32.mxu1 %v4166_v37  ;;  %v4105_v31 = vmul.f32 %v11300_v29, %v4073_v40 }
 0x8bf   :  { %4381 = vmatmul.mubr.f32.gmra.mxu1 %v4165_v21 }
 0x8c0   :  { %v4074_v33 = vsub.f32 2.0, %v4042_v62  ;;  %v4168_v27 = vmul.f32 %v17864_v48, %v4105_v31  ;;  %v4167_v14 = vmul.f32 %v17865_v19, %v4105_v31 }
 0x8c2   :  { %4385 = vmatprep.mubr.f32.mxu1 %v4168_v27  ;;  %v4106_v17 = vmul.f32 %v11302_v15, %v4074_v33 }
 0x8c3   :  { %4386 = vmatmul.mubr.f32.gmra.mxu1 %v4167_v14 }
 0x8c4   :  { %v4170_v60 = vmul.f32 %v17866_v49, %v4106_v17  ;;  %v4169_v35 = vmul.f32 %v17867_v7, %v4106_v17 }
 0x8c6   :  { %4390 = vmatprep.mubr.f32.mxu1 %v4170_v60 }
 0x8c7   :  { %4391 = vmatmul.mubr.f32.gmra.mxu1 %v4169_v35 }
 0x8cb   :  { %v14552_v38 = vpop.trf.xlu0 }
 0x8cc   :  { %17868 = vst [vmem:[#allocation20_spill] sm:$0xff] %v14552_v38  ;;  %10605 = vmatprep.mubr.msk.f32.mxu0 %vm275_vm0, %v14552_v38  ;;  %10657 = vmatprep.mubr.msk.f32.mxu1 %vm275_vm0, %v14552_v38 }
 0x8cf   :  { %v14558_v58 = vpop.trf.xlu0 }
 0x8d0   :  { %17869 = vst [vmem:[#allocation25_spill] sm:$0xff] %v14558_v58  ;;  %10606 = vmatmul.mubr.msk.f32.vlgmr.msra.gmra.mxu0 %vm275_vm0, %v14558_v58  ;;  %10658 = vmatmul.mubr.msk.f32.vlgmr.msra.gmra.mxu1 %vm275_vm0, %v14558_v58 }
 0x8d1   :  { %10706 = vmatpush3.msra.mxu0 %v14567_v54 }
 0x8d2   :  { %10707 = vmatprep.subr.mxu0 %v11700_v44 }
 0x8d3   :  { %v14573_v2 = vpop.trf.xlu0  ;;  %10708 = vmatpush3.msra.mxu0 %v11700_v44 }
 0x8d4   :  { %17870 = vst [vmem:[#allocation28_spill] sm:$0xff] %v14573_v2  ;;  %10608 = vmatprep.mubr.msk.f32.mxu0 %vm275_vm0, %v14573_v2  ;;  %10660 = vmatprep.mubr.msk.f32.mxu1 %vm275_vm0, %v14573_v2 }
 0x8d5   :  { %v14579_v42 = vpop.trf.xlu1  ;;  %6393 = vmatprep.subr.mxu0 %v17872_v23 }
 0x8d6   :  { %17871 = vst [vmem:[#allocation33_spill] sm:$0xff] %v14579_v42 }
 0x8d7   :  { %v14582_v11 = vpop.trf.xlu0 }
 0x8d8   :  { %17873 = vst [vmem:[#allocation30_spill] sm:$0xff] %v14582_v11  ;;  %10609 = vmatmul.mubr.msk.f32.gmra.mxu0 %vm275_vm0, %v14582_v11  ;;  %10661 = vmatmul.mubr.msk.f32.gmra.mxu1 %vm275_vm0, %v14582_v11 }
 0x8d9   :  { %v14588_v30 = vpop.trf.xlu1 }
 0x8da   :  { %17874 = vst [vmem:[#allocation38_spill] sm:$0xff] %v14588_v30 }
 0x8db   :  { %v14590_v13 = vpop.trf.xlu0 }
 0x8dc   :  { %17875 = vst [vmem:[#allocation35_spill] sm:$0xff] %v14590_v13  ;;  %10611 = vmatprep.mubr.msk.f32.mxu0 %vm275_vm0, %v14590_v13  ;;  %10663 = vmatprep.mubr.msk.f32.mxu1 %vm275_vm0, %v14590_v13 }
 0x8dd   :  { %v14596_v16 = vpop.trf.xlu1 }
 0x8de   :  { %17876 = vst [vmem:[#allocation40_spill] sm:$0xff] %v14596_v16 }
 0x8df   :  { %v14598_v34 = vpop.trf.xlu0 }
 0x8e0   :  { %17877 = vst [vmem:[#allocation39_spill] sm:$0xff] %v14598_v34  ;;  %10612 = vmatmul.mubr.msk.f32.gmra.mxu0 %vm275_vm0, %v14598_v34  ;;  %10664 = vmatmul.mubr.msk.f32.gmra.mxu1 %vm275_vm0, %v14598_v34 }
 0x8e1   :  { %v14604_v61 = vpop.trf.xlu1 }
 0x8e2   :  { %17878 = vst [vmem:[#allocation42_spill] sm:$0xff] %v14604_v61 }
 0x8e3   :  { %v14606_v45 = vpop.trf.xlu0 }
 0x8e4   :  { %17879 = vst [vmem:[#allocation41_spill] sm:$0xff] %v14606_v45  ;;  %10614 = vmatprep.mubr.msk.f32.mxu0 %vm275_vm0, %v14606_v45  ;;  %10666 = vmatprep.mubr.msk.f32.mxu1 %vm275_vm0, %v14606_v45 }
 0x8e5   :  { %v14612_v5 = vpop.trf.xlu1 }
 0x8e6   :  { %17880 = vst [vmem:[#allocation36_spill] sm:$0xff] %v14612_v5 }
 0x8e7   :  { %v14614_v26 = vpop.trf.xlu0 }
 0x8e8   :  { %17881 = vst [vmem:[#allocation43_spill] sm:$0xff] %v14614_v26  ;;  %10615 = vmatmul.mubr.msk.f32.gmra.mxu0 %vm275_vm0, %v14614_v26  ;;  %10667 = vmatmul.mubr.msk.f32.gmra.mxu1 %vm275_vm0, %v14614_v26 }
 0x8e9   :  { %v14620_v52 = vpop.trf.xlu1 }
 0x8ea   :  { %17882 = vst [vmem:[#allocation37_spill] sm:$0xff] %v14620_v52 }
 0x8eb   :  { %v14622_v12 = vpop.trf.xlu0 }
 0x8ec   :  { %17883 = vst [vmem:[#allocation13_spill] sm:$0xff] %v14622_v12  ;;  %10617 = vmatprep.mubr.msk.f32.mxu0 %vm275_vm0, %v14622_v12  ;;  %10669 = vmatprep.mubr.msk.f32.mxu1 %vm275_vm0, %v14622_v12 }
 0x8ed   :  { %v14630_v8 = vpop.trf.xlu1 }
 0x8ee   :  { %17885 = vst [vmem:[#allocation18_spill] sm:$0xff] %v14630_v8 }
 0x8ef   :  { %v14628_v43 = vpop.trf.xlu0 }
 0x8f0   :  { %17884 = vst [vmem:[#allocation15_spill] sm:$0xff] %v14628_v43  ;;  %10618 = vmatmul.mubr.msk.f32.gmra.mxu0 %vm275_vm0, %v14628_v43  ;;  %10670 = vmatmul.mubr.msk.f32.gmra.mxu1 %vm275_vm0, %v14628_v43 }
 0x8f1   :  { %v14642_v10 = vpop.trf.xlu1 }
 0x8f2   :  { %17887 = vst [vmem:[#allocation23_spill] sm:$0xff] %v14642_v10 }
 0x8f3   :  { %v14636_v28 = vpop.trf.xlu0 }
 0x8f4   :  { %17886 = vst [vmem:[#allocation63_spill] sm:$0xff] %v14636_v28  ;;  %10620 = vmatprep.mubr.msk.f32.mxu0 %vm275_vm0, %v14636_v28  ;;  %10672 = vmatprep.mubr.msk.f32.mxu1 %vm275_vm0, %v14636_v28 }
 0x8f5   :  { %v14652_v6 = vpop.trf.xlu1 }
 0x8f6   :  { %17890 = vst [vmem:[#allocation66_spill] sm:$0xff] %v14652_v6 }
 0x8f7   :  { %v14644_v39 = vpop.trf.xlu0 }
 0x8f8   :  { %17888 = vst [vmem:[#allocation64_spill] sm:$0xff] %v14644_v39  ;;  %10621 = vmatmul.mubr.msk.f32.gmra.mxu0 %vm275_vm0, %v14644_v39  ;;  %10673 = vmatmul.mubr.msk.f32.gmra.mxu1 %vm275_vm0, %v14644_v39 }
 0x8f9   :  { %v14664_v63 = vpop.trf.xlu1 }
 0x8fa   :  { %17892 = vst [vmem:[#allocation68_spill] sm:$0xff] %v14664_v63 }
 0x8fb   :  { %v14650_v47 = vpop.trf.xlu0 }
 0x8fc   :  { %17889 = vst [vmem:[#allocation65_spill] sm:$0xff] %v14650_v47  ;;  %10623 = vmatprep.mubr.msk.f32.mxu0 %vm275_vm0, %v14650_v47  ;;  %10675 = vmatprep.mubr.msk.f32.mxu1 %vm275_vm0, %v14650_v47 }
 0x8fd   :  { %v14674_v25 = vpop.trf.xlu1 }
 0x8fe   :  { %17895 = vst [vmem:[#allocation71_spill] sm:$0xff] %v14674_v25 }
 0x8ff   :  { %v14658_v41 = vpop.trf.xlu0 }
 0x900   :  { %17891 = vst [vmem:[#allocation67_spill] sm:$0xff] %v14658_v41  ;;  %10624 = vmatmul.mubr.msk.f32.gmra.mxu0 %vm275_vm0, %v14658_v41  ;;  %10676 = vmatmul.mubr.msk.f32.gmra.mxu1 %vm275_vm0, %v14658_v41 }
 0x901   :  { %v14694_v3 = vpop.trf.xlu1 }
 0x902   :  { %17897 = vst [vmem:[#allocation73_spill] sm:$0xff] %v14694_v3 }
 0x903   :  { %v14666_v55 = vpop.trf.xlu0 }
 0x904   :  { %17893 = vst [vmem:[#allocation69_spill] sm:$0xff] %v14666_v55  ;;  %10626 = vmatprep.mubr.msk.f32.mxu0 %vm275_vm0, %v14666_v55  ;;  %10678 = vmatprep.mubr.msk.f32.mxu1 %vm275_vm0, %v14666_v55 }
 0x905   :  { %v14708_v1 = vpop.trf.xlu1 }
 0x906   :  { %17900 = vst [vmem:[#allocation76_spill] sm:$0xff] %v14708_v1 }
 0x907   :  { %v14672_v50 = vpop.trf.xlu0 }
 0x908   :  { %17894 = vst [vmem:[#allocation70_spill] sm:$0xff] %v14672_v50  ;;  %10627 = vmatmul.mubr.msk.f32.gmra.mxu0 %vm275_vm0, %v14672_v50  ;;  %10679 = vmatmul.mubr.msk.f32.gmra.mxu1 %vm275_vm0, %v14672_v50 }
 0x909   :  { %10629 = vmatprep.mubr.msk.f32.mxu0 %vm275_vm0, %v14579_v42  ;;  %10681 = vmatprep.mubr.msk.f32.mxu1 %vm275_vm0, %v14579_v42  ;;  %v14728_v32 = vpop.trf.xlu1 }
 0x90a   :  { %17902 = vst [vmem:[#allocation78_spill] sm:$0xff] %v14728_v32 }
 0x90b   :  { %v14684_v9 = vpop.f32.mrf.mxu1 }
 0x90c   :  { %17896 = vst [vmem:[#allocation72_spill] sm:$0xff] %v14684_v9  ;;  %10630 = vmatmul.mubr.msk.f32.gmra.mxu0 %vm275_vm0, %v14588_v30  ;;  %10682 = vmatmul.mubr.msk.f32.gmra.mxu1 %vm275_vm0, %v14588_v30 }
 0x90d   :  { %v4239_v51 = vpop.f32.mrf.mxu1  ;;  %10632 = vmatprep.mubr.msk.f32.mxu0 %vm275_vm0, %v14596_v16  ;;  %10684 = vmatprep.mubr.msk.f32.mxu1 %vm275_vm0, %v14596_v16  ;;  %v14742_v57 = vpop.trf.xlu1 }
 0x90e   :  { %17905 = vst [vmem:[#allocation81_spill] sm:$0xff] %v14742_v57 }
 0x90f   :  { %v14696_v0 = vpop.f32.mrf.mxu1 }
 0x910   :  { %17898 = vst [vmem:[#allocation74_spill] sm:$0xff] %v14696_v0  ;;  %10633 = vmatmul.mubr.msk.f32.gmra.mxu0 %vm275_vm0, %v14604_v61  ;;  %10685 = vmatmul.mubr.msk.f32.gmra.mxu1 %vm275_vm0, %v14604_v61 }
 0x911   :  { %v4244_v53 = vpop.f32.mrf.mxu1  ;;  %10635 = vmatprep.mubr.msk.f32.mxu0 %vm275_vm0, %v14612_v5  ;;  %10687 = vmatprep.mubr.msk.f32.mxu1 %vm275_vm0, %v14612_v5  ;;  %v14762_v37 = vpop.trf.xlu1 }
 0x912   :  { %17907 = vst [vmem:[#allocation83_spill] sm:$0xff] %v14762_v37 }
 0x913   :  { %v14706_v59 = vpop.f32.mrf.mxu1 }
 0x914   :  { %17899 = vst [vmem:[#allocation75_spill] sm:$0xff] %v14706_v59  ;;  %10636 = vmatmul.mubr.msk.f32.gmra.mxu0 %vm275_vm0, %v14620_v52  ;;  %10688 = vmatmul.mubr.msk.f32.gmra.mxu1 %vm275_vm0, %v14620_v52 }
 0x915   :  { %v4249_v4 = vpop.f32.mrf.mxu1  ;;  %10638 = vmatprep.mubr.msk.f32.mxu0 %vm275_vm0, %v14630_v8  ;;  %10690 = vmatprep.mubr.msk.f32.mxu1 %vm275_vm0, %v14630_v8 }
 0x917   :  { %v14718_v18 = vpop.f32.mrf.mxu1 }
 0x918   :  { %17901 = vst [vmem:[#allocation77_spill] sm:$0xff] %v14718_v18  ;;  %10639 = vmatmul.mubr.msk.f32.gmra.mxu0 %vm275_vm0, %v14642_v10  ;;  %10691 = vmatmul.mubr.msk.f32.gmra.mxu1 %vm275_vm0, %v14642_v10 }
 0x919   :  { %v4254_v24 = vpop.f32.mrf.mxu1  ;;  %10641 = vmatprep.mubr.msk.f32.mxu0 %vm275_vm0, %v14652_v6  ;;  %10693 = vmatprep.mubr.msk.f32.mxu1 %vm275_vm0, %v14652_v6 }
 0x91b   :  { %v14730_v56 = vpop.f32.mrf.mxu1 }
 0x91c   :  { %17903 = vst [vmem:[#allocation79_spill] sm:$0xff] %v14730_v56  ;;  %10642 = vmatmul.mubr.msk.f32.gmra.mxu0 %vm275_vm0, %v14664_v63  ;;  %10694 = vmatmul.mubr.msk.f32.gmra.mxu1 %vm275_vm0, %v14664_v63 }
 0x91d   :  { %v4259_v36 = vpop.f32.mrf.mxu1  ;;  %10644 = vmatprep.mubr.msk.f32.mxu0 %vm275_vm0, %v14674_v25  ;;  %10696 = vmatprep.mubr.msk.f32.mxu1 %vm275_vm0, %v14674_v25 }
 0x91f   :  { %v14740_v29 = vpop.f32.mrf.mxu1 }
 0x920   :  { %17904 = vst [vmem:[#allocation80_spill] sm:$0xff] %v14740_v29  ;;  %10645 = vmatmul.mubr.msk.f32.gmra.mxu0 %vm275_vm0, %v14694_v3  ;;  %10697 = vmatmul.mubr.msk.f32.gmra.mxu1 %vm275_vm0, %v14694_v3 }
 0x921   :  { %v4264_v22 = vpop.f32.mrf.mxu1  ;;  %10647 = vmatprep.mubr.msk.f32.mxu0 %vm275_vm0, %v14708_v1  ;;  %10699 = vmatprep.mubr.msk.f32.mxu1 %vm275_vm0, %v14708_v1 }
 0x923   :  { %v14752_v40 = vpop.f32.mrf.mxu1 }
 0x924   :  { %17906 = vst [vmem:[#allocation82_spill] sm:$0xff] %v14752_v40  ;;  %10648 = vmatmul.mubr.msk.f32.gmra.mxu0 %vm275_vm0, %v14728_v32  ;;  %10700 = vmatmul.mubr.msk.f32.gmra.mxu1 %vm275_vm0, %v14728_v32 }
 0x925   :  { %v4269_v46 = vpop.f32.mrf.mxu1  ;;  %10650 = vmatprep.mubr.msk.f32.mxu0 %vm275_vm0, %v14742_v57  ;;  %10702 = vmatprep.mubr.msk.f32.mxu1 %vm275_vm0, %v14742_v57 }
 0x927   :  { %v14764_v20 = vpop.f32.mrf.mxu1 }
 0x928   :  { %17908 = vst [vmem:[#allocation84_spill] sm:$0xff] %v14764_v20  ;;  %10651 = vmatmul.mubr.msk.f32.gmra.mxu0 %vm275_vm0, %v14762_v37  ;;  %10703 = vmatmul.mubr.msk.f32.gmra.mxu1 %vm275_vm0, %v14762_v37 }
 0x929   :  { %v4274_v21 = vpop.f32.mrf.mxu1  ;;  %10709 = vmatprep.mubr.msk.f32.mxu0 %vm275_vm0, %v14552_v38 }
 0x92b   :  { %v14772_v15 = vpop.f32.mrf.mxu1 }
 0x92c   :  { %17909 = vst [vmem:[#allocation85_spill] sm:$0xff] %v14772_v15  ;;  %10710 = vmatmul.mubr.msk.f32.vlgmr.msra.gmra.mxu0 %vm275_vm0, %v14558_v58 }
 0x92d   :  { %v4279_v62 = vpop.f32.mrf.mxu1  ;;  %10712 = vmatprep.mubr.msk.f32.mxu0 %vm275_vm0, %v14573_v2 }
 0x92f   :  { %v14778_v31 = vpop.f32.mrf.mxu1 }
 0x930   :  { %17910 = vst [vmem:[#allocation86_spill] sm:$0xff] %v14778_v31  ;;  %10713 = vmatmul.mubr.msk.f32.gmra.mxu0 %vm275_vm0, %v14582_v11 }
 0x931   :  { %v4284_v33 = vpop.f32.mrf.mxu1  ;;  %10715 = vmatprep.mubr.msk.f32.mxu0 %vm275_vm0, %v14590_v13 }
 0x933   :  { %v14784_v48 = vpop.f32.mrf.mxu1 }
 0x934   :  { %17911 = vst [vmem:[#allocation87_spill] sm:$0xff] %v14784_v48  ;;  %10716 = vmatmul.mubr.msk.f32.gmra.mxu0 %vm275_vm0, %v14598_v34 }
 0x935   :  { %v4289_v27 = vpop.f32.mrf.mxu1  ;;  %10718 = vmatprep.mubr.msk.f32.mxu0 %vm275_vm0, %v14606_v45 }
 0x937   :  { %v14790_v19 = vpop.f32.mrf.mxu1 }
 0x938   :  { %17912 = vst [vmem:[#allocation88_spill] sm:$0xff] %v14790_v19  ;;  %10719 = vmatmul.mubr.msk.f32.gmra.mxu0 %vm275_vm0, %v14614_v26 }
 0x939   :  { %v4294_v14 = vpop.f32.mrf.mxu1  ;;  %10721 = vmatprep.mubr.msk.f32.mxu0 %vm275_vm0, %v14622_v12 }
 0x93b   :  { %v14796_v17 = vpop.f32.mrf.mxu1 }
 0x93c   :  { %17913 = vst [vmem:[#allocation89_spill] sm:$0xff] %v14796_v17  ;;  %10722 = vmatmul.mubr.msk.f32.gmra.mxu0 %vm275_vm0, %v14628_v43 }
 0x93d   :  { %v4299_v49 = vpop.f32.mrf.mxu1  ;;  %10724 = vmatprep.mubr.msk.f32.mxu0 %vm275_vm0, %v14636_v28 }
 0x93f   :  { %v14802_v60 = vpop.f32.mrf.mxu1 }
 0x940   :  { %17914 = vst [vmem:[#allocation90_spill] sm:$0xff] %v14802_v60  ;;  %10725 = vmatmul.mubr.msk.f32.gmra.mxu0 %vm275_vm0, %v14644_v39 }
 0x941   :  { %v4304_v7 = vpop.f32.mrf.mxu1  ;;  %10727 = vmatprep.mubr.msk.f32.mxu0 %vm275_vm0, %v14650_v47 }
 0x943   :  { %v14808_v35 = vpop.f32.mrf.mxu1 }
 0x944   :  { %17915 = vst [vmem:[#allocation91_spill] sm:$0xff] %v14808_v35  ;;  %10728 = vmatmul.mubr.msk.f32.gmra.mxu0 %vm275_vm0, %v14658_v41 }
 0x945   :  { %v4309_v44 = vpop.f32.mrf.mxu1  ;;  %10730 = vmatprep.mubr.msk.f32.mxu0 %vm275_vm0, %v14666_v55 }
 0x947   :  { %v14814_v51 = vpop.f32.mrf.mxu1 }
 0x948   :  { %17916 = vst [vmem:[#allocation92_spill] sm:$0xff] %v14814_v51  ;;  %10731 = vmatmul.mubr.msk.f32.gmra.mxu0 %vm275_vm0, %v14672_v50 }
 0x949   :  { %v4314_v53 = vpop.f32.mrf.mxu1  ;;  %10733 = vmatprep.mubr.msk.f32.mxu0 %vm275_vm0, %v14579_v42 }
 0x94b   :  { %v14820_v4 = vpop.f32.mrf.mxu1 }
 0x94c   :  { %17917 = vst [vmem:[#allocation93_spill] sm:$0xff] %v14820_v4  ;;  %10734 = vmatmul.mubr.msk.f32.gmra.mxu0 %vm275_vm0, %v14588_v30 }
 0x94d   :  { %v4319_v24 = vpop.f32.mrf.mxu1  ;;  %10736 = vmatprep.mubr.msk.f32.mxu0 %vm275_vm0, %v14596_v16 }
 0x94f   :  { %v14826_v36 = vpop.f32.mrf.mxu1 }
 0x950   :  { %17918 = vst [vmem:[#allocation94_spill] sm:$0xff] %v14826_v36  ;;  %10737 = vmatmul.mubr.msk.f32.gmra.mxu0 %vm275_vm0, %v14604_v61 }
 0x951   :  { %v4324_v22 = vpop.f32.mrf.mxu1  ;;  %10739 = vmatprep.mubr.msk.f32.mxu0 %vm275_vm0, %v14612_v5 }
 0x953   :  { %v14832_v46 = vpop.f32.mrf.mxu1 }
 0x954   :  { %17919 = vst [vmem:[#allocation95_spill] sm:$0xff] %v14832_v46  ;;  %10740 = vmatmul.mubr.msk.f32.gmra.mxu0 %vm275_vm0, %v14620_v52 }
 0x955   :  { %v4329_v21 = vpop.f32.mrf.mxu1  ;;  %10742 = vmatprep.mubr.msk.f32.mxu0 %vm275_vm0, %v14630_v8 }
 0x957   :  { %v14838_v62 = vpop.f32.mrf.mxu1 }
 0x958   :  { %17920 = vst [vmem:[#allocation96_spill] sm:$0xff] %v14838_v62  ;;  %10743 = vmatmul.mubr.msk.f32.gmra.mxu0 %vm275_vm0, %v14642_v10 }
 0x959   :  { %v4334_v33 = vpop.f32.mrf.mxu1  ;;  %10745 = vmatprep.mubr.msk.f32.mxu0 %vm275_vm0, %v14652_v6 }
 0x95b   :  { %v14844_v27 = vpop.f32.mrf.mxu1 }
 0x95c   :  { %17921 = vst [vmem:[#allocation97_spill] sm:$0xff] %v14844_v27  ;;  %10746 = vmatmul.mubr.msk.f32.gmra.mxu0 %vm275_vm0, %v14664_v63 }
 0x95d   :  { %v4339_v14 = vpop.f32.mrf.mxu1  ;;  %10748 = vmatprep.mubr.msk.f32.mxu0 %vm275_vm0, %v14674_v25 }
 0x95f   :  { %v14850_v49 = vpop.f32.mrf.mxu1 }
 0x960   :  { %17922 = vst [vmem:[#allocation98_spill] sm:$0xff] %v14850_v49  ;;  %10749 = vmatmul.mubr.msk.f32.gmra.mxu0 %vm275_vm0, %v14694_v3 }
 0x961   :  { %v4344_v7 = vpop.f32.mrf.mxu1  ;;  %10751 = vmatprep.mubr.msk.f32.mxu0 %vm275_vm0, %v14708_v1 }
 0x963   :  { %v14856_v44 = vpop.f32.mrf.mxu1 }
 0x964   :  { %17923 = vst [vmem:[#allocation99_spill] sm:$0xff] %v14856_v44  ;;  %10752 = vmatmul.mubr.msk.f32.gmra.mxu0 %vm275_vm0, %v14728_v32 }
 0x965   :  { %v4349_v53 = vpop.f32.mrf.mxu1  ;;  %10754 = vmatprep.mubr.msk.f32.mxu0 %vm275_vm0, %v14742_v57 }
 0x967   :  { %v14862_v24 = vpop.f32.mrf.mxu1 }
 0x968   :  { %17924 = vst [vmem:[#allocation100_spill] sm:$0xff] %v14862_v24  ;;  %10755 = vmatmul.mubr.msk.f32.gmra.mxu0 %vm275_vm0, %v14762_v37 }
 0x969   :  { %v4354_v22 = vpop.f32.mrf.mxu1 }
 0x96b   :  { %v14866_v21 = vpop.f32.mrf.mxu1 }
 0x96c   :  { %17925 = vst [vmem:[#allocation101_spill] sm:$0xff] %v14866_v21 }
 0x96d   :  { %v4359_v33 = vpop.f32.mrf.mxu1 }
 0x96f   :  { %v14868_v14 = vpop.f32.mrf.mxu1 }
 0x970   :  { %17926 = vst [vmem:[#allocation102_spill] sm:$0xff] %v14868_v14 }
 0x971   :  { %v4364_v7 = vpop.f32.mrf.mxu1 }
 0x973   :  { %v14870_v51 = vpop.f32.mrf.mxu1 }
 0x974   :  { %17927 = vst [vmem:[#allocation103_spill] sm:$0xff] %v14870_v51 }
 0x975   :  { %v4369_v35 = vpop.f32.mrf.mxu1 }
 0x976   :  { %v14887_v35 = vld [vmem:[%s17317_s4] ss:$0 sm:$0xff] }
 0x977   :  { %v14872_v60 = vpop.f32.mrf.mxu1 }
 0x978   :  { %17928 = vst [vmem:[#allocation104_spill] sm:$0xff] %v14872_v60 }
 0x979   :  { %v4374_v53 = vpop.f32.mrf.mxu1 }
 0x97b   :  { %v14874_v17 = vpop.f32.mrf.mxu1 }
 0x97c   :  { %17929 = vst [vmem:[#allocation105_spill] sm:$0xff] %v14874_v17 }
 0x97d   :  { %v4379_v19 = vpop.f32.mrf.mxu1 }
 0x97f   :  { %v14876_v48 = vpop.f32.mrf.mxu1 }
 0x980   :  { %17930 = vst [vmem:[#allocation106_spill] sm:$0xff] %v14876_v48 }
 0x981   :  { %v4384_v24 = vpop.f32.mrf.mxu1 }
 0x983   :  { %v14878_v31 = vpop.f32.mrf.mxu1 }
 0x984   :  { %17931 = vst [vmem:[#allocation107_spill] sm:$0xff] %v14878_v31 }
 0x985   :  { %v4389_v22 = vpop.f32.mrf.mxu1 }
 0x987   :  { %v14880_v21 = vpop.f32.mrf.mxu1 }
 0x988   :  { %17932 = vst [vmem:[#allocation108_spill] sm:$0xff] %v14880_v21 }
 0x989   :  { %v4394_v33 = vpop.f32.mrf.mxu1 }
 0x990   :  { %v14882_v14 = vpop.f32.mrf.mxu0  ;;  %v14894_v19 = vpop.f32.mrf.mxu1 }
 0x992   :  { %v4759_v7 = vpop.f32.mrf.mxu0  ;;  %v14896_v24 = vpop.f32.mrf.mxu1 }
 0x993   :  { %v14890_v53 = vadd.f32 %v14887_v35, %v4759_v7 }
 0x995   :  { %10027 = vmatprep.mubr.msk.f32.mxu1 %vm1059_vm1, %v14890_v53 }
 0x998   :  { %v14898_v22 = vpop.f32.mrf.mxu0  ;;  %v14900_v33 = vpop.f32.mrf.mxu1 }
 0x99a   :  { %v14902_v21 = vpop.f32.mrf.mxu0  ;;  %v14904_v31 = vpop.f32.mrf.mxu1 }
 0x9a0   :  { %v14906_v48 = vpop.f32.mrf.mxu0  ;;  %v14908_v17 = vpop.f32.mrf.mxu1 }
 0x9a2   :  { %v14910_v7 = vpop.f32.mrf.mxu0  ;;  %v14912_v60 = vpop.f32.mrf.mxu1 }
 0x9a8   :  { %v14914_v51 = vpop.f32.mrf.mxu0  ;;  %v14916_v44 = vpop.f32.mrf.mxu1 }
 0x9aa   :  { %v14918_v15 = vpop.f32.mrf.mxu0  ;;  %v14920_v49 = vpop.f32.mrf.mxu1 }
 0x9b0   :  { %v14922_v20 = vpop.f32.mrf.mxu0  ;;  %v14924_v27 = vpop.f32.mrf.mxu1 }
 0x9b2   :  { %v14926_v40 = vpop.f32.mrf.mxu0  ;;  %v14928_v62 = vpop.f32.mrf.mxu1 }
 0x9b8   :  { %v14930_v29 = vpop.f32.mrf.mxu0  ;;  %v14932_v46 = vpop.f32.mrf.mxu1 }
 0x9ba   :  { %v14934_v56 = vpop.f32.mrf.mxu0  ;;  %v14936_v36 = vpop.f32.mrf.mxu1 }
 0x9c0   :  { %v14938_v18 = vpop.f32.mrf.mxu0  ;;  %v10677_v4 = vpop.f32.mrf.mxu1 }
 0x9c2   :  { %v14940_v59 = vpop.f32.mrf.mxu0  ;;  %v5044_v0 = vpop.f32.mrf.mxu1 }
 0x9c8   :  { %v14942_v9 = vpop.f32.mrf.mxu0  ;;  %v10680_v37 = vpop.f32.mrf.mxu1 }
 0x9ca   :  { %v14944_v57 = vpop.f32.mrf.mxu0  ;;  %v5054_v32 = vpop.f32.mrf.mxu1 }
 0x9cc   :  { %v14946_v1 = vpop.f32.mrf.mxu0  ;;  %v14948_v3 = vpop.f32.mrf.mxu1 }
 0x9ce   :  { %v14950_v25 = vpop.f32.mrf.mxu0  ;;  %v14952_v63 = vpop.f32.mrf.mxu1 }
 0x9d0   :  { %v14954_v6 = vpop.f32.mrf.mxu0  ;;  %v14956_v10 = vpop.f32.mrf.mxu1 }
 0x9d2   :  { %v14958_v8 = vpop.f32.mrf.mxu0  ;;  %v14960_v52 = vpop.f32.mrf.mxu1 }
 0x9d4   :  { %v14962_v5 = vpop.f32.mrf.mxu0  ;;  %v14964_v61 = vpop.f32.mrf.mxu1 }
 0x9d5   :  { %17933 = vst [vmem:[#allocation109_spill] sm:$0xff] %v14962_v5 }
 0x9d6   :  { %v14966_v16 = vpop.f32.mrf.mxu0  ;;  %v14968_v30 = vpop.f32.mrf.mxu1 }
 0x9d8   :  { %v14970_v42 = vpop.f32.mrf.mxu0  ;;  %v14972_v50 = vpop.f32.mrf.mxu1 }
 0x9d9   :  { %17934 = vst [vmem:[#allocation110_spill] sm:$0xff] %v14970_v42 }
 0x9da   :  { %v14974_v55 = vpop.f32.mrf.mxu0  ;;  %v14976_v41 = vpop.f32.mrf.mxu1 }
 0x9db   :  { %17935 = vst [vmem:[#allocation111_spill] sm:$0xff] %v14974_v55 }
 0x9dc   :  { %v14978_v47 = vpop.f32.mrf.mxu0  ;;  %v10695_v39 = vpop.f32.mrf.mxu1 }
 0x9dd   :  { %17936 = vst [vmem:[#allocation112_spill] sm:$0xff] %v14978_v47  ;;  %v14995_v47 = vld [vmem:[%s17318_s5] ss:$0 sm:$0xff] }
 0x9de   :  { %v14980_v28 = vpop.f32.mrf.mxu0  ;;  %v5104_v43 = vpop.f32.mrf.mxu1 }
 0x9df   :  { %17937 = vst [vmem:[#allocation113_spill] sm:$0xff] %v14980_v28  ;;  %v5060_v28 = vadd.f32 %v14995_v47, %v10680_v37 }
 0x9e0   :  { %v14982_v12 = vpop.f32.mrf.mxu0  ;;  %v10698_v26 = vpop.f32.mrf.mxu1 }
 0x9e1   :  { %17938 = vst [vmem:[#allocation114_spill] sm:$0xff] %v14982_v12 }
 0x9e2   :  { %v14984_v45 = vpop.f32.mrf.mxu0  ;;  %v5114_v34 = vpop.f32.mrf.mxu1 }
 0x9e3   :  { %17939 = vst [vmem:[#allocation115_spill] sm:$0xff] %v14984_v45 }
 0x9e4   :  { %v14986_v13 = vpop.f32.mrf.mxu0  ;;  %v10701_v11 = vpop.f32.mrf.mxu1 }
 0x9e5   :  { %17940 = vst [vmem:[#allocation116_spill] sm:$0xff] %v14986_v13 }
 0x9e6   :  { %v14988_v2 = vpop.f32.mrf.mxu0  ;;  %v5124_v58 = vpop.f32.mrf.mxu1 }
 0x9e7   :  { %17941 = vst [vmem:[#allocation117_spill] sm:$0xff] %v14988_v2 }
 0x9e8   :  { %v14990_v38 = vpop.f32.mrf.mxu0  ;;  %v10704_v42 = vpop.f32.mrf.mxu1 }
 0x9e9   :  { %17942 = vst [vmem:[#allocation118_spill] sm:$0xff] %v14990_v38  ;;  %v5140_v12 = vadd.f32 %v14995_v47, %v10704_v42  ;;  %v5055_v38 = vadd.f32 %v14995_v47, %v5054_v32  ;;  %v5130_v42 = vadd.f32 %v14995_v47, %v10701_v11  ;;  %v5045_v11 = vadd.f32 %v14995_v47, %v5044_v0 }
 0x9ea   :  { %v14999_v45 = vpop.f32.mrf.mxu0  ;;  %v5134_v55 = vpop.f32.mrf.mxu1 }
 0x9eb   :  { %17943 = vst [vmem:[#allocation119_spill] sm:$0xff] %v14999_v45  ;;  %v5135_v13 = vadd.f32 %v14995_v47, %v5134_v55  ;;  %9995 = vmatprep.subr.msk.mxu1 %vm1059_vm1, %v5140_v12  ;;  %v5050_v12 = vadd.f32 %v14995_v47, %v10677_v4 }
 0x9ec   :  { %v15003_v2 = vpop.f32.mrf.mxu0  ;;  %9996 = vmatpush3.xpose.msk.msra.mxu1 %vm1059_vm1, %v5060_v28  ;;  %v5125_v28 = vadd.f32 %v14995_v47, %v5124_v58  ;;  %v5040_v58 = vadd.f32 %v14995_v47, %v14932_v46  ;;  %v5030_v46 = vadd.f32 %v14995_v47, %v14924_v27  ;;  %v15056_v27 = vld [vmem:[%s17319_s6] ss:$0 sm:$0xff] }
 0x9ed   :  { %9997 = vmatprep.subr.msk.mxu1 %vm1059_vm1, %v5135_v13 }
 0x9ee   :  { %v15008_v5 = vpop.f32.mrf.mxu0 }
 0x9f0   :  { %v15011_v37 = vpop.f32.mrf.mxu0  ;;  %9998 = vmatpush3.xpose.msk.msra.mxu1 %vm1059_vm1, %v5055_v38  ;;  %v5120_v38 = vadd.f32 %v14995_v47, %v10698_v26  ;;  %v5035_v26 = vadd.f32 %v14995_v47, %v14936_v36  ;;  %v5025_v36 = vadd.f32 %v14995_v47, %v14928_v62 }
 0x9f1   :  { %9999 = vmatprep.subr.msk.mxu1 %vm1059_vm1, %v5130_v42  ;;  %v5115_v42 = vadd.f32 %v14995_v47, %v5114_v34 }
 0x9f2   :  { %v15016_v55 = vpop.f32.mrf.mxu0 }
 0x9f4   :  { %v15019_v45 = vpop.f32.mrf.mxu0  ;;  %10000 = vmatpush3.xpose.msk.msra.mxu1 %vm1059_vm1, %v5050_v12 }
 0x9f5   :  { %10001 = vmatprep.subr.msk.mxu1 %vm1059_vm1, %v5125_v28  ;;  %v5110_v28 = vadd.f32 %v14995_v47, %v10695_v39 }
 0x9f6   :  { %v15024_v13 = vpop.f32.mrf.mxu0 }
 0x9f8   :  { %v15027_v32 = vpop.f32.mrf.mxu0  ;;  %10002 = vmatpush3.xpose.msk.msra.mxu1 %vm1059_vm1, %v5045_v11 }
 0x9f9   :  { %10003 = vmatprep.subr.msk.mxu1 %vm1059_vm1, %v5120_v38  ;;  %v5105_v38 = vadd.f32 %v14995_v47, %v5104_v43 }
 0x9fa   :  { %v15033_v4 = vpop.f32.mrf.mxu0 }
 0x9fc   :  { %v10723_v12 = vpop.f32.mrf.mxu0  ;;  %10004 = vmatpush3.xpose.msk.msra.mxu1 %vm1059_vm1, %v5040_v58 }
 0x9fd   :  { %10005 = vmatprep.subr.msk.mxu1 %vm1059_vm1, %v5115_v42  ;;  %v5100_v42 = vadd.f32 %v14995_v47, %v14972_v50 }
 0x9fe   :  { %v5249_v0 = vpop.f32.mrf.mxu0 }
 0xa00   :  { %v10726_v11 = vpop.f32.mrf.mxu0  ;;  %10006 = vmatpush3.xpose.msk.msra.mxu1 %vm1059_vm1, %v5035_v26 }
 0xa01   :  { %10007 = vmatprep.subr.msk.mxu1 %vm1059_vm1, %v5110_v28  ;;  %v5020_v28 = vadd.f32 %v14995_v47, %v14916_v44  ;;  %v5015_v44 = vadd.f32 %v14995_v47, %v14920_v49  ;;  %v5010_v49 = vadd.f32 %v14995_v47, %v14908_v17  ;;  %v5005_v17 = vadd.f32 %v14995_v47, %v14912_v60 }
 0xa02   :  { %v5259_v34 = vpop.f32.mrf.mxu0  ;;  %v5000_v60 = vadd.f32 %v14995_v47, %v14900_v33  ;;  %v5235_v33 = vadd.f32 %v15056_v27, %v15019_v45  ;;  %v5225_v45 = vadd.f32 %v15056_v27, %v15011_v37  ;;  %v5215_v37 = vadd.f32 %v15056_v27, %v15003_v2 }
 0xa04   :  { %v10729_v58 = vpop.f32.mrf.mxu0  ;;  %10008 = vmatpush3.xpose.msk.msra.mxu1 %vm1059_vm1, %v5030_v46  ;;  %v5095_v46 = vadd.f32 %v14995_v47, %v14976_v41  ;;  %v5090_v41 = vadd.f32 %v14995_v47, %v14964_v61  ;;  %v5085_v61 = vadd.f32 %v14995_v47, %v14968_v30  ;;  %v5080_v30 = vadd.f32 %v14995_v47, %v14956_v10 }
 0xa05   :  { %10009 = vmatprep.subr.msk.mxu1 %vm1059_vm1, %v5105_v38  ;;  %v5075_v10 = vadd.f32 %v14995_v47, %v14960_v52 }
 0xa06   :  { %v5269_v39 = vpop.f32.mrf.mxu0 }
 0xa08   :  { %v10732_v26 = vpop.f32.mrf.mxu0  ;;  %10010 = vmatpush3.xpose.msk.msra.mxu1 %vm1059_vm1, %v5025_v36  ;;  %v5275_v36 = vadd.f32 %v15056_v27, %v10729_v58  ;;  %v5265_v58 = vadd.f32 %v15056_v27, %v10726_v11  ;;  %v5255_v11 = vadd.f32 %v15056_v27, %v10723_v12  ;;  %v5245_v12 = vadd.f32 %v15056_v27, %v15027_v32 }
 0xa09   :  { %v5285_v43 = vadd.f32 %v15056_v27, %v10732_v26  ;;  %10011 = vmatprep.subr.msk.mxu1 %vm1059_vm1, %v5100_v42  ;;  %v5270_v26 = vadd.f32 %v15056_v27, %v5269_v39  ;;  %v5260_v39 = vadd.f32 %v15056_v27, %v5259_v34  ;;  %v5250_v34 = vadd.f32 %v15056_v27, %v5249_v0 }
 0xa0a   :  { %v5279_v62 = vpop.f32.mrf.mxu0  ;;  %v5240_v0 = vadd.f32 %v15056_v27, %v15033_v4  ;;  %v4995_v32 = vadd.f32 %v14995_v47, %v14904_v31  ;;  %v5070_v4 = vadd.f32 %v14995_v47, %v14948_v3  ;;  %v4990_v31 = vadd.f32 %v14995_v47, %v14894_v19 }
 0xa0b   :  { %v5280_v50 = vadd.f32 %v15056_v27, %v5279_v62  ;;  %6394 = vmatpush1.msra.mxu0 %v5285_v43  ;;  %v5065_v3 = vadd.f32 %v14995_v47, %v14952_v63  ;;  %v4985_v19 = vadd.f32 %v14995_v47, %v14896_v24  ;;  %v5210_v63 = vadd.f32 %v15056_v27, %v15008_v5 }
 0xa0c   :  { %v15065_v38 = vpop.f32.mrf.mxu0  ;;  %10012 = vmatpush3.xpose.msk.msra.mxu1 %vm1059_vm1, %v5020_v28  ;;  %6395 = vmatprep.subr.mxu0 %v17872_v23  ;;  %v4765_v47 = vadd.f32 %v14887_v35, %v14882_v14  ;;  %v4770_v14 = vadd.f32 %v14887_v35, %v14902_v21  ;;  %v4775_v21 = vadd.f32 %v14887_v35, %v14898_v22 }
 0xa0d   :  { %10013 = vmatprep.subr.msk.mxu1 %vm1059_vm1, %v5095_v46  ;;  %6396 = vmatpush1.msra.mxu0 %v5280_v50  ;;  %v4780_v22 = vadd.f32 %v14887_v35, %v14910_v7 }
 0xa0e   :  { %v15073_v42 = vpop.f32.mrf.mxu0  ;;  %6397 = vmatprep.subr.mxu0 %v17872_v23 }
 0xa0f   :  { %6398 = vmatpush1.msra.mxu0 %v5275_v36 }
 0xa10   :  { %v15079_v43 = vpop.f32.mrf.mxu0  ;;  %10014 = vmatpush3.xpose.msk.msra.mxu1 %vm1059_vm1, %v5015_v44  ;;  %6399 = vmatprep.subr.mxu0 %v17872_v23 }
 0xa11   :  { %10015 = vmatprep.subr.msk.mxu1 %vm1059_vm1, %v5090_v41  ;;  %6400 = vmatpush1.msra.mxu0 %v5270_v26  ;;  %v5230_v41 = vadd.f32 %v15056_v27, %v15024_v13  ;;  %v5220_v13 = vadd.f32 %v15056_v27, %v15016_v55 }
 0xa12   :  { %v15087_v28 = vpop.f32.mrf.mxu0  ;;  %6401 = vmatprep.subr.mxu0 %v17872_v23 }
 0xa13   :  { %6402 = vmatpush1.msra.mxu0 %v5265_v58 }
 0xa14   :  { %v15093_v62 = vpop.f32.mrf.mxu0  ;;  %10016 = vmatpush3.xpose.msk.msra.mxu1 %vm1059_vm1, %v5010_v49  ;;  %6403 = vmatprep.subr.mxu0 %v17872_v23 }
 0xa15   :  { %10017 = vmatprep.subr.msk.mxu1 %vm1059_vm1, %v5085_v61  ;;  %6404 = vmatpush1.msra.mxu0 %v5260_v39  ;;  %v11704_v39 = vld [vmem:[%s17314_s1 + $0x8] sm:$0xff] }
 0xa16   :  { %v15101_v46 = vpop.f32.mrf.mxu0  ;;  %6405 = vmatprep.subr.mxu0 %v17872_v23 }
 0xa17   :  { %6406 = vmatpush1.msra.mxu0 %v5255_v11 }
 0xa18   :  { %v15107_v50 = vpop.f32.mrf.mxu0  ;;  %10018 = vmatpush3.xpose.msk.msra.mxu1 %vm1059_vm1, %v5005_v17  ;;  %6407 = vmatprep.subr.mxu0 %v17872_v23  ;;  %v11705_v17 = vld [vmem:[%s17314_s1] sm:$0xff] }
 0xa19   :  { %10019 = vmatprep.subr.msk.mxu1 %vm1059_vm1, %v5080_v30  ;;  %6408 = vmatpush1.msra.mxu0 %v5250_v34 }
 0xa1a   :  { %v15116_v36 = vpop.f32.mrf.mxu0  ;;  %6409 = vmatprep.subr.mxu0 %v17872_v23 }
 0xa1b   :  { %6410 = vmatpush1.msra.mxu0 %v5245_v12  ;;  %v5320_v7 = vadd.f32 %v15056_v27, %v15116_v36  ;;  %v5305_v36 = vadd.f32 %v15056_v27, %v15079_v43  ;;  %v4800_v43 = vadd.f32 %v14887_v35, %v14926_v40  ;;  %v11706_v40 = vld [vmem:[%s17315_s2 + $0x8] sm:$0xff] }
 0xa1c   :  { %v15123_v44 = vpop.f32.mrf.mxu0  ;;  %10020 = vmatpush3.xpose.msk.msra.mxu1 %vm1059_vm1, %v5000_v60  ;;  %6411 = vmatprep.subr.mxu0 %v17872_v23  ;;  %v5325_v60 = vadd.f32 %v15056_v27, %v15107_v50  ;;  %v4790_v50 = vadd.f32 %v14887_v35, %v14918_v15  ;;  %v5300_v15 = vadd.f32 %v15056_v27, %v15087_v28  ;;  %v17944_v28 = vld [vmem:[#allocation109_spill] sm:$0xff] }
 0xa1d   :  { %10021 = vmatprep.subr.msk.mxu1 %vm1059_vm1, %v5075_v10  ;;  %6412 = vmatpush1.msra.mxu0 %v5240_v0  ;;  %v5335_v12 = vadd.f32 %v15056_v27, %v15123_v44  ;;  %v4785_v10 = vadd.f32 %v14887_v35, %v14906_v48  ;;  %v5315_v0 = vadd.f32 %v15056_v27, %v15093_v62  ;;  %v17945_v44 = vld [vmem:[#allocation111_spill] sm:$0xff] }
 0xa1e   :  { %v15132_v52 = vpop.f32.mrf.mxu0  ;;  %6413 = vmatprep.subr.mxu0 %v17872_v23  ;;  %v5310_v48 = vadd.f32 %v15056_v27, %v15101_v46  ;;  %v4795_v62 = vadd.f32 %v14887_v35, %v14914_v51  ;;  %v5295_v46 = vadd.f32 %v15056_v27, %v15065_v38  ;;  %v5290_v51 = vadd.f32 %v15056_v27, %v15073_v42 }
 0xa1f   :  { %6414 = vmatpush1.msra.mxu0 %v5235_v33  ;;  %v4805_v38 = vadd.f32 %v14887_v35, %v14922_v20  ;;  %v4815_v42 = vadd.f32 %v14887_v35, %v14930_v29  ;;  %v4820_v20 = vadd.f32 %v14887_v35, %v14940_v59  ;;  %v4830_v29 = vadd.f32 %v14887_v35, %v14944_v57  ;;  %v17946_v33 = vld [vmem:[#allocation110_spill] sm:$0xff] }
 0xa20   :  { %v10750_v26 = vpop.f32.mrf.mxu0  ;;  %10022 = vmatpush3.xpose.msk.msra.mxu1 %vm1059_vm1, %v4995_v32  ;;  %6415 = vmatprep.subr.mxu0 %v17872_v23  ;;  %v4835_v59 = vadd.f32 %v14887_v35, %v14942_v9  ;;  %v4845_v57 = vadd.f32 %v14887_v35, %v14946_v1  ;;  %v4850_v9 = vadd.f32 %v14887_v35, %v14958_v8  ;;  %v17947_v32 = vld [vmem:[#allocation113_spill] sm:$0xff] }
 0xa21   :  { %10023 = vmatprep.subr.msk.mxu1 %vm1059_vm1, %v5070_v4  ;;  %6416 = vmatpush1.msra.mxu0 %v5230_v41  ;;  %v5345_v30 = vadd.f32 %v15056_v27, %v10750_v26  ;;  %v4860_v1 = vadd.f32 %v14887_v35, %v14966_v16  ;;  %v4865_v8 = vadd.f32 %v14887_v35, %v17944_v28  ;;  %v17948_v4 = vld [vmem:[#allocation112_spill] sm:$0xff]  ;;  %v17949_v26 = vld [vmem:[#allocation115_spill] sm:$0xff] }
 0xa22   :  { %v5339_v58 = vpop.f32.mrf.mxu0  ;;  %6417 = vmatprep.subr.mxu0 %v17872_v23  ;;  %v4875_v16 = vadd.f32 %v14887_v35, %v17946_v33  ;;  %v4885_v41 = vadd.f32 %v14887_v35, %v17948_v4 }
 0xa23   :  { %6418 = vmatpush1.msra.mxu0 %v5225_v45  ;;  %v5340_v34 = vadd.f32 %v15056_v27, %v5339_v58  ;;  %v4890_v45 = vadd.f32 %v14887_v35, %v17949_v26  ;;  %v11721_v26 = vld [vmem:[#allocation6 + $0x70] sm:$0xff] }
 0xa24   :  { %v10753_v49 = vpop.f32.mrf.mxu0  ;;  %10024 = vmatpush3.xpose.msk.msra.mxu1 %vm1059_vm1, %v4990_v31  ;;  %6419 = vmatprep.subr.mxu0 %v17872_v23  ;;  %v17950_v31 = vld [vmem:[#allocation114_spill] sm:$0xff] }
 0xa25   :  { %10025 = vmatprep.subr.msk.mxu1 %vm1059_vm1, %v5065_v3  ;;  %6420 = vmatpush1.msra.mxu0 %v5220_v13  ;;  %v5355_v11 = vadd.f32 %v15056_v27, %v10753_v49  ;;  %v4895_v58 = vadd.f32 %v14887_v35, %v17950_v31  ;;  %v17951_v3 = vld [vmem:[#allocation117_spill] sm:$0xff]  ;;  %v17952_v49 = vld [vmem:[#allocation116_spill] sm:$0xff]  ;;  %v11722_v31 = vld [vmem:[#allocation6 + $0x78] sm:$0xff] }
 0xa26   :  { %v5349_v61 = vpop.f32.mrf.mxu0  ;;  %6421 = vmatprep.subr.mxu0 %v17872_v23  ;;  %v4900_v13 = vadd.f32 %v14887_v35, %v17951_v3 }
 0xa27   :  { %6422 = vmatpush1.msra.mxu0 %v5215_v37  ;;  %v4905_v37 = vadd.f32 %v14887_v35, %v17952_v49 }
 0xa28   :  { %v10756_v55 = vpop.f32.mrf.mxu0  ;;  %10026 = vmatpush3.xpose.msk.msra.mxu1 %vm1059_vm1, %v4985_v19  ;;  %6423 = vmatprep.subr.mxu0 %v17872_v23  ;;  %v17953_v19 = vld [vmem:[#allocation119_spill] sm:$0xff] }
 0xa29   :  { %v5365_v2 = vadd.f32 %v15056_v27, %v10756_v55  ;;  %6424 = vmatpush1.msra.mxu0 %v5210_v63  ;;  %10757 = vmatprep.subr.mxu1 %v11704_v39  ;;  %v17954_v63 = vld [vmem:[#allocation118_spill] sm:$0xff] }
 0xa2a   :  { %v5359_v24 = vpop.f32.mrf.mxu0  ;;  %6425 = vmatprep.subr.mxu0 %v17872_v23  ;;  %v4915_v55 = vadd.f32 %v14887_v35, %v17954_v63 }
 0xa2b   :  { %v5360_v5 = vadd.f32 %v15056_v27, %v5359_v24  ;;  %10028 = vmatmul.mubr.msk.f32.vlgmr.msra.gmra.mxu1 %vm1059_vm1, %v14890_v53  ;;  %6426 = vmatpush2.msra.mxu0 %v5365_v2  ;;  %v5350_v53 = vadd.f32 %v15056_v27, %v5349_v61  ;;  %v4910_v61 = vadd.f32 %v14887_v35, %v17953_v19 }
 0xa2c   :  { %10029 = vmatprep.mubr.msk.f32.mxu1 %vm1059_vm1, %v4765_v47  ;;  %6427 = vmatprep.subr.mxu0 %v17872_v23 }
 0xa2d   :  { %6428 = vmatpush2.msra.mxu0 %v5360_v5  ;;  %10758 = vmatpush3.msra.mxu1 %v11704_v39  ;;  %v11708_v5 = vld [vmem:[#allocation6 + $0x8] sm:$0xff] }
 0xa2e   :  { %6429 = vmatprep.subr.mxu0 %v17872_v23  ;;  %10759 = vmatprep.subr.mxu1 %v11705_v17 }
 0xa2f   :  { %10030 = vmatmul.mubr.msk.f32.gmra.mxu1 %vm1059_vm1, %v4765_v47  ;;  %6430 = vmatpush2.msra.mxu0 %v5355_v11  ;;  %v11707_v47 = vld [vmem:[#allocation6] sm:$0xff] }
 0xa30   :  { %10031 = vmatprep.mubr.msk.f32.mxu1 %vm1059_vm1, %v4770_v14  ;;  %6431 = vmatprep.subr.mxu0 %v17872_v23 }
 0xa31   :  { %6432 = vmatpush2.msra.mxu0 %v5350_v53  ;;  %10760 = vmatpush3.msra.mxu1 %v11705_v17 }
 0xa32   :  { %6433 = vmatprep.subr.mxu0 %v17872_v23  ;;  %10861 = vmatprep.subr.mxu1 %v14567_v54  ;;  %v5330_v54 = vadd.f32 %v15056_v27, %v15132_v52  ;;  %v4810_v27 = vadd.f32 %v14887_v35, %v14934_v56  ;;  %v4825_v56 = vadd.f32 %v14887_v35, %v14938_v18 }
 0xa33   :  { %10032 = vmatmul.mubr.msk.f32.gmra.mxu1 %vm1059_vm1, %v4770_v14  ;;  %6434 = vmatpush2.msra.mxu0 %v5345_v30  ;;  %v4840_v18 = vadd.f32 %v14887_v35, %v14950_v25  ;;  %v4855_v25 = vadd.f32 %v14887_v35, %v14954_v6  ;;  %v4870_v6 = vadd.f32 %v14887_v35, %v17945_v44 }
 0xa34   :  { %10033 = vmatprep.mubr.msk.f32.mxu1 %vm1059_vm1, %v4775_v21  ;;  %6435 = vmatprep.subr.mxu0 %v17872_v23  ;;  %v4880_v52 = vadd.f32 %v14887_v35, %v17947_v32  ;;  %v11709_v35 = vld [vmem:[#allocation6 + $0x10] sm:$0xff] }
 0xa35   :  { %6436 = vmatpush2.msra.mxu0 %v5340_v34 }
 0xa36   :  { %6437 = vmatprep.subr.mxu0 %v17872_v23 }
 0xa37   :  { %10034 = vmatmul.mubr.msk.f32.gmra.mxu1 %vm1059_vm1, %v4775_v21  ;;  %6438 = vmatpush2.msra.mxu0 %v5335_v12  ;;  %v11710_v21 = vld [vmem:[#allocation6 + $0x18] sm:$0xff] }
 0xa38   :  { %10035 = vmatprep.mubr.msk.f32.mxu1 %vm1059_vm1, %v4780_v22  ;;  %6439 = vmatprep.subr.mxu0 %v17872_v23 }
 0xa39   :  { %6440 = vmatpush2.msra.mxu0 %v5330_v54 }
 0xa3a   :  { %6441 = vmatprep.subr.mxu0 %v17872_v23 }
 0xa3b   :  { %10036 = vmatmul.mubr.msk.f32.gmra.mxu1 %vm1059_vm1, %v4780_v22  ;;  %6442 = vmatpush2.msra.mxu0 %v5325_v60  ;;  %v11711_v60 = vld [vmem:[#allocation6 + $0x20] sm:$0xff] }
 0xa3c   :  { %10037 = vmatprep.mubr.msk.f32.mxu1 %vm1059_vm1, %v4785_v10  ;;  %6443 = vmatprep.subr.mxu0 %v17872_v23 }
 0xa3d   :  { %6444 = vmatpush2.msra.mxu0 %v5320_v7  ;;  %v11712_v7 = vld [vmem:[#allocation6 + $0x28] sm:$0xff] }
 0xa3e   :  { %6445 = vmatprep.subr.mxu0 %v17872_v23 }
 0xa3f   :  { %10038 = vmatmul.mubr.msk.f32.gmra.mxu1 %vm1059_vm1, %v4785_v10  ;;  %6446 = vmatpush2.msra.mxu0 %v5315_v0 }
 0xa40   :  { %10039 = vmatprep.mubr.msk.f32.mxu1 %vm1059_vm1, %v4790_v50  ;;  %6447 = vmatprep.subr.mxu0 %v17872_v23 }
 0xa41   :  { %6448 = vmatpush2.msra.mxu0 %v5310_v48 }
 0xa42   :  { %6449 = vmatprep.subr.mxu0 %v17872_v23 }
 0xa43   :  { %10040 = vmatmul.mubr.msk.f32.gmra.mxu1 %vm1059_vm1, %v4790_v50  ;;  %6450 = vmatpush2.msra.mxu0 %v5305_v36 }
 0xa44   :  { %10041 = vmatprep.mubr.msk.f32.mxu1 %vm1059_vm1, %v4795_v62  ;;  %6451 = vmatprep.subr.mxu0 %v17872_v23 }
 0xa45   :  { %6452 = vmatpush2.msra.mxu0 %v5300_v15 }
 0xa46   :  { %6453 = vmatprep.subr.mxu0 %v17872_v23 }
 0xa47   :  { %10042 = vmatmul.mubr.msk.f32.gmra.mxu1 %vm1059_vm1, %v4795_v62  ;;  %6454 = vmatpush2.msra.mxu0 %v5295_v46  ;;  %v11713_v62 = vld [vmem:[#allocation6 + $0x30] sm:$0xff]  ;;  %v11714_v46 = vld [vmem:[#allocation6 + $0x38] sm:$0xff] }
 0xa48   :  { %10043 = vmatprep.mubr.msk.f32.mxu1 %vm1059_vm1, %v4800_v43  ;;  %6455 = vmatprep.subr.mxu0 %v17872_v23 }
 0xa49   :  { %6456 = vmatpush2.msra.mxu0 %v5290_v51 }
 0xa4a   :  { %10809 = vmatprep.subr.mxu0 %v11706_v40 }
 0xa4b   :  { %10044 = vmatmul.mubr.msk.f32.gmra.mxu1 %vm1059_vm1, %v4800_v43 }
 0xa4c   :  { %10045 = vmatprep.mubr.msk.f32.mxu1 %vm1059_vm1, %v4805_v38 }
 0xa4f   :  { %10046 = vmatmul.mubr.msk.f32.gmra.mxu1 %vm1059_vm1, %v4805_v38 }
 0xa50   :  { %10047 = vmatprep.mubr.msk.f32.mxu1 %vm1059_vm1, %v4810_v27 }
 0xa53   :  { %10048 = vmatmul.mubr.msk.f32.gmra.mxu1 %vm1059_vm1, %v4810_v27  ;;  %v11715_v27 = vld [vmem:[#allocation6 + $0x40] sm:$0xff] }
 0xa54   :  { %10049 = vmatprep.mubr.msk.f32.mxu1 %vm1059_vm1, %v4815_v42 }
 0xa57   :  { %10050 = vmatmul.mubr.msk.f32.gmra.mxu1 %vm1059_vm1, %v4815_v42 }
 0xa58   :  { %10051 = vmatprep.mubr.msk.f32.mxu1 %vm1059_vm1, %v4820_v20 }
 0xa5b   :  { %10052 = vmatmul.mubr.msk.f32.gmra.mxu1 %vm1059_vm1, %v4820_v20  ;;  %v11716_v20 = vld [vmem:[#allocation6 + $0x48] sm:$0xff] }
 0xa5c   :  { %10053 = vmatprep.mubr.msk.f32.mxu1 %vm1059_vm1, %v4825_v56 }
 0xa5f   :  { %10054 = vmatmul.mubr.msk.f32.gmra.mxu1 %vm1059_vm1, %v4825_v56 }
 0xa60   :  { %10055 = vmatprep.mubr.msk.f32.mxu1 %vm1059_vm1, %v4830_v29 }
 0xa63   :  { %10056 = vmatmul.mubr.msk.f32.gmra.mxu1 %vm1059_vm1, %v4830_v29 }
 0xa64   :  { %10057 = vmatprep.mubr.msk.f32.mxu1 %vm1059_vm1, %v4835_v59 }
 0xa67   :  { %10058 = vmatmul.mubr.msk.f32.gmra.mxu1 %vm1059_vm1, %v4835_v59 }
 0xa68   :  { %10059 = vmatprep.mubr.msk.f32.mxu1 %vm1059_vm1, %v4840_v18 }
 0xa6b   :  { %10060 = vmatmul.mubr.msk.f32.gmra.mxu1 %vm1059_vm1, %v4840_v18 }
 0xa6c   :  { %10061 = vmatprep.mubr.msk.f32.mxu1 %vm1059_vm1, %v4845_v57 }
 0xa6f   :  { %10062 = vmatmul.mubr.msk.f32.gmra.mxu1 %vm1059_vm1, %v4845_v57  ;;  %v11717_v57 = vld [vmem:[#allocation6 + $0x50] sm:$0xff] }
 0xa70   :  { %10063 = vmatprep.mubr.msk.f32.mxu1 %vm1059_vm1, %v4850_v9 }
 0xa73   :  { %10064 = vmatmul.mubr.msk.f32.gmra.mxu1 %vm1059_vm1, %v4850_v9 }
 0xa74   :  { %10065 = vmatprep.mubr.msk.f32.mxu1 %vm1059_vm1, %v4855_v25 }
 0xa77   :  { %10066 = vmatmul.mubr.msk.f32.gmra.mxu1 %vm1059_vm1, %v4855_v25  ;;  %v11718_v25 = vld [vmem:[#allocation6 + $0x58] sm:$0xff] }
 0xa78   :  { %10067 = vmatprep.mubr.msk.f32.mxu1 %vm1059_vm1, %v4860_v1 }
 0xa7b   :  { %10068 = vmatmul.mubr.msk.f32.gmra.mxu1 %vm1059_vm1, %v4860_v1 }
 0xa7c   :  { %10069 = vmatprep.mubr.msk.f32.mxu1 %vm1059_vm1, %v4865_v8 }
 0xa7f   :  { %10070 = vmatmul.mubr.msk.f32.gmra.mxu1 %vm1059_vm1, %v4865_v8 }
 0xa80   :  { %10071 = vmatprep.mubr.msk.f32.mxu1 %vm1059_vm1, %v4870_v6 }
 0xa83   :  { %10072 = vmatmul.mubr.msk.f32.gmra.mxu1 %vm1059_vm1, %v4870_v6  ;;  %v11719_v6 = vld [vmem:[#allocation6 + $0x60] sm:$0xff] }
 0xa84   :  { %10073 = vmatprep.mubr.msk.f32.mxu1 %vm1059_vm1, %v4875_v16 }
 0xa87   :  { %10074 = vmatmul.mubr.msk.f32.gmra.mxu1 %vm1059_vm1, %v4875_v16  ;;  %v11720_v16 = vld [vmem:[#allocation6 + $0x68] sm:$0xff] }
 0xa88   :  { %10075 = vmatprep.mubr.msk.f32.mxu1 %vm1059_vm1, %v4880_v52 }
 0xa8b   :  { %10076 = vmatmul.mubr.msk.f32.gmra.mxu1 %vm1059_vm1, %v4880_v52 }
 0xa8c   :  { %10077 = vmatprep.mubr.msk.f32.mxu1 %vm1059_vm1, %v4885_v41 }
 0xa8f   :  { %10078 = vmatmul.mubr.msk.f32.gmra.mxu1 %vm1059_vm1, %v4885_v41 }
 0xa90   :  { %10079 = vmatprep.mubr.msk.f32.mxu1 %vm1059_vm1, %v4890_v45 }
 0xa93   :  { %10080 = vmatmul.mubr.msk.f32.gmra.mxu1 %vm1059_vm1, %v4890_v45 }
 0xa94   :  { %10081 = vmatprep.mubr.msk.f32.mxu1 %vm1059_vm1, %v4895_v58 }
 0xa97   :  { %10082 = vmatmul.mubr.msk.f32.gmra.mxu1 %vm1059_vm1, %v4895_v58 }
 0xa98   :  { %10083 = vmatprep.mubr.msk.f32.mxu1 %vm1059_vm1, %v4900_v13 }
 0xa9b   :  { %10084 = vmatmul.mubr.msk.f32.gmra.mxu1 %vm1059_vm1, %v4900_v13 }
 0xa9c   :  { %10085 = vmatprep.mubr.msk.f32.mxu1 %vm1059_vm1, %v4905_v37 }
 0xa9f   :  { %10086 = vmatmul.mubr.msk.f32.gmra.mxu1 %vm1059_vm1, %v4905_v37  ;;  %v11723_v37 = vld [vmem:[#allocation6 + $0x80] sm:$0xff] }
 0xaa0   :  { %10087 = vmatprep.mubr.msk.f32.mxu1 %vm1059_vm1, %v4910_v61 }
 0xaa3   :  { %10088 = vmatmul.mubr.msk.f32.gmra.mxu1 %vm1059_vm1, %v4910_v61  ;;  %v11724_v61 = vld [vmem:[#allocation6 + $0x88] sm:$0xff] }
 0xaa4   :  { %10089 = vmatprep.mubr.msk.f32.mxu1 %vm1059_vm1, %v4915_v55 }
 0xaa7   :  { %10090 = vmatmul.mubr.msk.f32.gmra.mxu1 %vm1059_vm1, %v4915_v55 }
 0xaeb   :  { %v5626_v2 = vpop.f32.mrf.mxu1 }
 0xaec   :  { %v15341_v24 = vadd.f32 %v11707_v47, %v5626_v2  ;;  %v11725_v47 = vld [vmem:[#allocation6 + $0x90] sm:$0xff] }
 0xaed   :  { %v5628_v39 = vpop.f32.mrf.mxu1 }
 0xaee   :  { %v15343_v11 = vadd.f32 %v11708_v5, %v5628_v39 }
 0xaef   :  { %v5632_v14 = vpop.f32.mrf.mxu1 }
 0xaf0   :  { %v5817_v17 = vmax.f32 %v15341_v24, %v15343_v11  ;;  %v15347_v30 = vadd.f32 %v11709_v35, %v5632_v14  ;;  %v11726_v14 = vld [vmem:[#allocation6 + $0x98] sm:$0xff] }
 0xaf1   :  { %v5634_v53 = vpop.f32.mrf.mxu1 }
 0xaf2   :  { %v15349_v34 = vadd.f32 %v11710_v21, %v5634_v53  ;;  %5818 = vmax.xlane.f32.xlu0 %v5817_v17 }
 0xaf3   :  { %v5638_v12 = vpop.f32.mrf.mxu1 }
 0xaf4   :  { %v5820_v22 = vmax.f32 %v15347_v30, %v15349_v34  ;;  %v15353_v10 = vadd.f32 %v11711_v60, %v5638_v12  ;;  %v11727_v12 = vld [vmem:[#allocation6 + $0xa0] sm:$0xff] }
 0xaf5   :  { %v5640_v54 = vpop.f32.mrf.mxu1 }
 0xaf6   :  { %v15355_v0 = vadd.f32 %v11712_v7, %v5640_v54  ;;  %5821 = vmax.xlane.f32.xlu1 %v5820_v22  ;;  %v11728_v54 = vld [vmem:[#allocation6 + $0xa8] sm:$0xff] }
 0xaf7   :  { %v5644_v50 = vpop.f32.mrf.mxu1 }
 0xaf8   :  { %v5823_v48 = vmax.f32 %v15353_v10, %v15355_v0  ;;  %v15359_v15 = vadd.f32 %v11713_v62, %v5644_v50 }
 0xaf9   :  { %v5646_v36 = vpop.f32.mrf.mxu1 }
 0xafa   :  { %v15361_v43 = vadd.f32 %v11714_v46, %v5646_v36  ;;  %5824 = vmax.xlane.f32.xlu0 %v5823_v48  ;;  %v11729_v36 = vld [vmem:[#allocation6 + $0xb0] sm:$0xff]  ;;  %v11730_v46 = vld [vmem:[#allocation6 + $0xb8] sm:$0xff] }
 0xafb   :  { %v5650_v51 = vpop.f32.mrf.mxu1 }
 0xafc   :  { %v5826_v38 = vmax.f32 %v15359_v15, %v15361_v43  ;;  %v15365_v42 = vadd.f32 %v11715_v27, %v5650_v51 }
 0xafd   :  { %v5652_v40 = vpop.f32.mrf.mxu1 }
 0xafe   :  { %v15367_v56 = vadd.f32 %v11716_v20, %v5652_v40  ;;  %5827 = vmax.xlane.f32.xlu1 %v5826_v38  ;;  %v11731_v20 = vld [vmem:[#allocation6 + $0xc0] sm:$0xff] }
 0xaff   :  { %v5656_v29 = vpop.f32.mrf.mxu1 }
 0xb00   :  { %v5829_v59 = vmax.f32 %v15365_v42, %v15367_v56  ;;  %v15371_v9 = vadd.f32 %v11717_v57, %v5656_v29 }
 0xb01   :  { %v5658_v18 = vpop.f32.mrf.mxu1 }
 0xb02   :  { %v15373_v1 = vadd.f32 %v11718_v25, %v5658_v18  ;;  %5830 = vmax.xlane.f32.xlu0 %v5829_v59  ;;  %v11732_v59 = vld [vmem:[#allocation6 + $0xc8] sm:$0xff] }
 0xb03   :  { %v5662_v28 = vpop.f32.mrf.mxu1 }
 0xb04   :  { %v5832_v8 = vmax.f32 %v15371_v9, %v15373_v1  ;;  %v15377_v33 = vadd.f32 %v11719_v6, %v5662_v28  ;;  %v11734_v6 = vld [vmem:[#allocation6 + $0xd8] sm:$0xff] }
 0xb05   :  { %v5664_v44 = vpop.f32.mrf.mxu1 }
 0xb06   :  { %v15379_v32 = vadd.f32 %v11720_v16, %v5664_v44  ;;  %5833 = vmax.xlane.f32.xlu1 %v5832_v8  ;;  %v11733_v8 = vld [vmem:[#allocation6 + $0xd0] sm:$0xff] }
 0xb07   :  { %v5668_v52 = vpop.f32.mrf.mxu1 }
 0xb08   :  { %v5835_v4 = vmax.f32 %v15377_v33, %v15379_v32  ;;  %v15383_v45 = vadd.f32 %v11721_v26, %v5668_v52  ;;  %v11735_v26 = vld [vmem:[#allocation6 + $0xe0] sm:$0xff] }
 0xb09   :  { %v5670_v41 = vpop.f32.mrf.mxu1 }
 0xb0a   :  { %v15385_v58 = vadd.f32 %v11722_v31, %v5670_v41  ;;  %5836 = vmax.xlane.f32.xlu0 %v5835_v4 }
 0xb0b   :  { %v5674_v3 = vpop.f32.mrf.mxu1 }
 0xb0c   :  { %v5838_v13 = vmax.f32 %v15383_v45, %v15385_v58  ;;  %v15389_v19 = vadd.f32 %v11723_v37, %v5674_v3  ;;  %v11736_v3 = vld [vmem:[#allocation6 + $0xe8] sm:$0xff] }
 0xb0d   :  { %v5676_v49 = vpop.f32.mrf.mxu1 }
 0xb0e   :  { %v15391_v63 = vadd.f32 %v11724_v61, %v5676_v49  ;;  %5839 = vmax.xlane.f32.xlu1 %v5838_v13 }
 0xb0f   :  { %v5680_v55 = vpop.f32.mrf.mxu1 }
 0xb10   :  { %v5841_v2 = vmax.f32 %v15389_v19, %v15391_v63  ;;  %v15395_v5 = vadd.f32 %v11725_v47, %v5680_v55  ;;  %v11737_v55 = vld [vmem:[#allocation6 + $0xf0] sm:$0xff] }
 0xb11   :  { %v5682_v39 = vpop.f32.mrf.mxu1 }
 0xb12   :  { %v15397_v17 = vadd.f32 %v11726_v14, %v5682_v39  ;;  %5842 = vmax.xlane.f32.xlu0 %v5841_v2  ;;  %v11738_v39 = vld [vmem:[#allocation6 + $0xf8] sm:$0xff] }
 0xb13   :  { %v5686_v53 = vpop.f32.mrf.mxu1 }
 0xb14   :  { %v5844_v35 = vmax.f32 %v15395_v5, %v15397_v17  ;;  %v15401_v22 = vadd.f32 %v11727_v12, %v5686_v53 }
 0xb15   :  { %v5688_v21 = vpop.f32.mrf.mxu1 }
 0xb16   :  { %v15403_v60 = vadd.f32 %v11728_v54, %v5688_v21  ;;  %5845 = vmax.xlane.f32.xlu1 %v5844_v35  ;;  %v11739_v21 = vld [vmem:[#allocation6 + $0x100] sm:$0xff]  ;;  %v11740_v54 = vld [vmem:[#allocation6 + $0x108] sm:$0xff] }
 0xb17   :  { %v5692_v7 = vpop.f32.mrf.mxu1 }
 0xb18   :  { %v5847_v50 = vmax.f32 %v15401_v22, %v15403_v60  ;;  %v15407_v62 = vadd.f32 %v11729_v36, %v5692_v7 }
 0xb19   :  { %v5694_v48 = vpop.f32.mrf.mxu1 }
 0xb1a   :  { %v15409_v51 = vadd.f32 %v11730_v46, %v5694_v48  ;;  %5848 = vmax.xlane.f32.xlu0 %v5847_v50  ;;  %v11741_v46 = vld [vmem:[#allocation6 + $0x110] sm:$0xff] }
 0xb1b   :  { %v5698_v38 = vpop.f32.mrf.mxu1 }
 0xb1c   :  { %v5850_v40 = vmax.f32 %v15407_v62, %v15409_v51  ;;  %v15413_v29 = vadd.f32 %v11731_v20, %v5698_v38 }
 0xb1d   :  { %v5700_v27 = vpop.f32.mrf.mxu1 }
 0xb1e   :  { %v15415_v18 = vadd.f32 %v11732_v59, %v5700_v27  ;;  %5851 = vmax.xlane.f32.xlu1 %v5850_v40  ;;  %v11742_v40 = vld [vmem:[#allocation6 + $0x118] sm:$0xff] }
 0xb1f   :  { %v5704_v57 = vpop.f32.mrf.mxu1 }
 0xb20   :  { %v5853_v25 = vmax.f32 %v15413_v29, %v15415_v18  ;;  %v15419_v44 = vadd.f32 %v11733_v8, %v5704_v57  ;;  %v11744_v8 = vld [vmem:[#allocation6 + $0x128] sm:$0xff] }
 0xb21   :  { %v5706_v28 = vpop.f32.mrf.mxu1 }
 0xb22   :  { %v15421_v16 = vadd.f32 %v11734_v6, %v5706_v28  ;;  %5854 = vmax.xlane.f32.xlu0 %v5853_v25  ;;  %v11743_v25 = vld [vmem:[#allocation6 + $0x120] sm:$0xff] }
 0xb23   :  { %v5710_v52 = vpop.f32.mrf.mxu1 }
 0xb24   :  { %v5856_v4 = vmax.f32 %v15419_v44, %v15421_v16  ;;  %v15425_v31 = vadd.f32 %v11735_v26, %v5710_v52  ;;  %v11745_v26 = vld [vmem:[#allocation6 + $0x130] sm:$0xff] }
 0xb25   :  { %v5712_v41 = vpop.f32.mrf.mxu1 }
 0xb26   :  { %v15427_v13 = vadd.f32 %v11736_v3, %v5712_v41  ;;  %5857 = vmax.xlane.f32.xlu1 %v5856_v4 }
 0xb27   :  { %v5716_v49 = vpop.f32.mrf.mxu1 }
 0xb28   :  { %v5859_v37 = vmax.f32 %v15425_v31, %v15427_v13  ;;  %v15431_v2 = vadd.f32 %v11737_v55, %v5716_v49  ;;  %v11746_v49 = vld [vmem:[#allocation6 + $0x138] sm:$0xff] }
 0xb29   :  { %v5718_v61 = vpop.f32.mrf.mxu1 }
 0xb2a   :  { %v15433_v47 = vadd.f32 %v11738_v39, %v5718_v61  ;;  %5860 = vmax.xlane.f32.xlu0 %v5859_v37 }
 0xb2b   :  { %v5722_v14 = vpop.f32.mrf.mxu1 }
 0xb2c   :  { %v5862_v53 = vmax.f32 %v15431_v2, %v15433_v47  ;;  %v15437_v12 = vadd.f32 %v11739_v21, %v5722_v14  ;;  %v11747_v14 = vld [vmem:[#allocation6 + $0x140] sm:$0xff] }
 0xb2d   :  { %v5724_v35 = vpop.f32.mrf.mxu1 }
 0xb2e   :  { %v15439_v7 = vadd.f32 %v11740_v54, %v5724_v35  ;;  %5863 = vmax.xlane.f32.xlu1 %v5862_v53  ;;  %v11748_v35 = vld [vmem:[#allocation6 + $0x148] sm:$0xff] }
 0xb2f   :  { %v5728_v50 = vpop.f32.mrf.mxu1 }
 0xb30   :  { %v5865_v48 = vmax.f32 %v15437_v12, %v15439_v7  ;;  %v15443_v38 = vadd.f32 %v11741_v46, %v5728_v50 }
 0xb31   :  { %v5730_v36 = vpop.f32.mrf.mxu1 }
 0xb32   :  { %v15445_v27 = vadd.f32 %v11742_v40, %v5730_v36  ;;  %5866 = vmax.xlane.f32.xlu0 %v5865_v48  ;;  %v11749_v36 = vld [vmem:[#allocation6 + $0x150] sm:$0xff]  ;;  %v11750_v40 = vld [vmem:[#allocation6 + $0x158] sm:$0xff] }
 0xb33   :  { %v5734_v20 = vpop.f32.mrf.mxu1 }
 0xb34   :  { %v5868_v59 = vmax.f32 %v15443_v38, %v15445_v27  ;;  %v15449_v28 = vadd.f32 %v11743_v25, %v5734_v20 }
 0xb35   :  { %v5736_v57 = vpop.f32.mrf.mxu1 }
 0xb36   :  { %v15451_v6 = vadd.f32 %v11744_v8, %v5736_v57  ;;  %5869 = vmax.xlane.f32.xlu1 %v5868_v59  ;;  %v11751_v8 = vld [vmem:[#allocation6 + $0x160] sm:$0xff] }
 0xb37   :  { %v5740_v52 = vpop.f32.mrf.mxu1 }
 0xb38   :  { %v5871_v4 = vmax.f32 %v15449_v28, %v15451_v6  ;;  %v15455_v3 = vadd.f32 %v11745_v26, %v5740_v52 }
 0xb39   :  { %v5742_v41 = vpop.f32.mrf.mxu1 }
 0xb3a   :  { %v15457_v37 = vadd.f32 %v11746_v49, %v5742_v41  ;;  %5872 = vmax.xlane.f32.xlu0 %v5871_v4  ;;  %v11752_v4 = vld [vmem:[#allocation6 + $0x168] sm:$0xff] }
 0xb3b   :  { %v5746_v61 = vpop.f32.mrf.mxu1 }
 0xb3c   :  { %v5874_v55 = vmax.f32 %v15455_v3, %v15457_v37  ;;  %v15461_v53 = vadd.f32 %v11747_v14, %v5746_v61  ;;  %v11754_v14 = vld [vmem:[#allocation6 + $0x178] sm:$0xff] }
 0xb3d   :  { %v5748_v39 = vpop.f32.mrf.mxu1 }
 0xb3e   :  { %v15463_v21 = vadd.f32 %v11748_v35, %v5748_v39  ;;  %5875 = vmax.xlane.f32.xlu1 %v5874_v55  ;;  %v11753_v55 = vld [vmem:[#allocation6 + $0x170] sm:$0xff] }
 0xb3f   :  { %v5752_v54 = vpop.f32.mrf.mxu1 }
 0xb40   :  { %v5877_v50 = vmax.f32 %v15461_v53, %v15463_v21  ;;  %v15467_v46 = vadd.f32 %v11749_v36, %v5752_v54  ;;  %v11755_v36 = vld [vmem:[#allocation6 + $0x180] sm:$0xff] }
 0xb41   :  { %v5754_v48 = vpop.f32.mrf.mxu1 }
 0xb42   :  { %v15469_v20 = vadd.f32 %v11750_v40, %v5754_v48  ;;  %5878 = vmax.xlane.f32.xlu0 %v5877_v50 }
 0xb43   :  { %v5758_v59 = vpop.f32.mrf.mxu1 }
 0xb44   :  { %v5880_v57 = vmax.f32 %v15467_v46, %v15469_v20  ;;  %v15473_v52 = vadd.f32 %v11751_v8, %v5758_v59  ;;  %v11756_v59 = vld [vmem:[#allocation6 + $0x188] sm:$0xff] }
 0xb45   :  { %v5760_v25 = vpop.f32.mrf.mxu1 }
 0xb46   :  { %v15475_v41 = vadd.f32 %v11752_v4, %v5760_v25  ;;  %5881 = vmax.xlane.f32.xlu1 %v5880_v57 }
 0xb47   :  { %v5764_v26 = vpop.f32.mrf.mxu1 }
 0xb48   :  { %v5883_v49 = vmax.f32 %v15473_v52, %v15475_v41  ;;  %v15479_v39 = vadd.f32 %v11753_v55, %v5764_v26  ;;  %v11757_v26 = vld [vmem:[#allocation6 + $0x190] sm:$0xff] }
 0xb49   :  { %v5766_v61 = vpop.f32.mrf.mxu1 }
 0xb4a   :  { %v15481_v35 = vadd.f32 %v11754_v14, %v5766_v61  ;;  %5884 = vmax.xlane.f32.xlu0 %v5883_v49  ;;  %v11758_v49 = vld [vmem:[#allocation6 + $0x198] sm:$0xff] }
 0xb4b   :  { %v5770_v54 = vpop.f32.mrf.mxu1 }
 0xb4c   :  { %v5886_v50 = vmax.f32 %v15479_v39, %v15481_v35  ;;  %v15485_v40 = vadd.f32 %v11755_v36, %v5770_v54 }
 0xb4d   :  { %v5772_v48 = vpop.f32.mrf.mxu1 }
 0xb4e   :  { %17955 = vst [vmem:[#allocation109_spill] sm:$0xff] %v15485_v40  ;;  %v15487_v57 = vadd.f32 %v11756_v59, %v5772_v48  ;;  %5887 = vmax.xlane.f32.xlu0 %v5886_v50  ;;  %v11759_v48 = vld [vmem:[#allocation6 + $0x1a0] sm:$0xff]  ;;  %v11760_v50 = vld [vmem:[#allocation6 + $0x1a8] sm:$0xff] }
 0xb4f   :  { %v5776_v25 = vpop.f32.mrf.mxu1 }
 0xb50   :  { %17956 = vst [vmem:[#allocation111_spill] sm:$0xff] %v15487_v57  ;;  %v5889_v8 = vmax.f32 %v15485_v40, %v15487_v57  ;;  %v15491_v61 = vadd.f32 %v11757_v26, %v5776_v25 }
 0xb51   :  { %v5778_v4 = vpop.f32.mrf.mxu1 }
 0xb52   :  { %17957 = vst [vmem:[#allocation110_spill] sm:$0xff] %v15491_v61  ;;  %v15493_v55 = vadd.f32 %v11758_v49, %v5778_v4  ;;  %5890 = vmax.xlane.f32.xlu0 %v5889_v8  ;;  %v11761_v4 = vld [vmem:[#allocation6 + $0x1b0] sm:$0xff]  ;;  %v11762_v8 = vld [vmem:[#allocation6 + $0x1b8] sm:$0xff] }
 0xb53   :  { %v5782_v14 = vpop.f32.mrf.mxu1 }
 0xb54   :  { %17958 = vst [vmem:[#allocation113_spill] sm:$0xff] %v15493_v55  ;;  %v5892_v54 = vmax.f32 %v15491_v61, %v15493_v55  ;;  %v15497_v59 = vadd.f32 %v11759_v48, %v5782_v14 }
 0xb55   :  { %v5784_v36 = vpop.f32.mrf.mxu1 }
 0xb56   :  { %17959 = vst [vmem:[#allocation112_spill] sm:$0xff] %v15497_v59  ;;  %v15499_v23 = vadd.f32 %v11760_v50, %v5784_v36  ;;  %5893 = vmax.xlane.f32.xlu0 %v5892_v54  ;;  %v11763_v36 = vld [vmem:[#allocation6 + $0x1c0] sm:$0xff]  ;;  %v11764_v54 = vld [vmem:[#allocation6 + $0x1c8] sm:$0xff] }
 0xb57   :  { %v5788_v57 = vpop.f32.mrf.mxu1 }
 0xb58   :  { %17960 = vst [vmem:[#allocation115_spill] sm:$0xff] %v15499_v23  ;;  %v5895_v25 = vmax.f32 %v15497_v59, %v15499_v23  ;;  %v15503_v49 = vadd.f32 %v11761_v4, %v5788_v57 }
 0xb59   :  { %v5790_v26 = vpop.f32.mrf.mxu1 }
 0xb5a   :  { %17961 = vst [vmem:[#allocation114_spill] sm:$0xff] %v15503_v49  ;;  %v15505_v40 = vadd.f32 %v11762_v8, %v5790_v26  ;;  %5896 = vmax.xlane.f32.xlu0 %v5895_v25  ;;  %v11765_v26 = vld [vmem:[#allocation6 + $0x1d0] sm:$0xff]  ;;  %v11766_v25 = vld [vmem:[#allocation6 + $0x1d8] sm:$0xff] }
 0xb5b   :  { %v5794_v55 = vpop.f32.mrf.mxu1 }
 0xb5c   :  { %17962 = vst [vmem:[#allocation117_spill] sm:$0xff] %v15505_v40  ;;  %v5898_v14 = vmax.f32 %v15503_v49, %v15505_v40  ;;  %v15509_v50 = vadd.f32 %v11763_v36, %v5794_v55 }
 0xb5d   :  { %v5796_v48 = vpop.f32.mrf.mxu1 }
 0xb5e   :  { %17963 = vst [vmem:[#allocation116_spill] sm:$0xff] %v15509_v50  ;;  %v15511_v61 = vadd.f32 %v11764_v54, %v5796_v48  ;;  %5899 = vmax.xlane.f32.xlu0 %v5898_v14  ;;  %v11767_v48 = vld [vmem:[#allocation6 + $0x1e0] sm:$0xff]  ;;  %v11768_v14 = vld [vmem:[#allocation6 + $0x1e8] sm:$0xff] }
 0xb5f   :  { %v5800_v23 = vpop.f32.mrf.mxu1 }
 0xb60   :  { %17964 = vst [vmem:[#allocation119_spill] sm:$0xff] %v15511_v61  ;;  %v5901_v57 = vmax.f32 %v15509_v50, %v15511_v61  ;;  %v15515_v8 = vadd.f32 %v11765_v26, %v5800_v23 }
 0xb61   :  { %v5802_v4 = vpop.f32.mrf.mxu1 }
 0xb62   :  { %v15517_v59 = vadd.f32 %v11766_v25, %v5802_v4  ;;  %5902 = vmax.xlane.f32.xlu0 %v5901_v57  ;;  %v11769_v4 = vld [vmem:[#allocation6 + $0x1f0] sm:$0xff]  ;;  %v11770_v57 = vld [vmem:[#allocation6 + $0x1f8] sm:$0xff] }
 0xb63   :  { %v5806_v40 = vpop.f32.mrf.mxu1 }
 0xb64   :  { %17965 = vst [vmem:[#allocation118_spill] sm:$0xff] %v15517_v59  ;;  %v5904_v55 = vmax.f32 %v15515_v8, %v15517_v59  ;;  %v15521_v54 = vadd.f32 %v11767_v48, %v5806_v40 }
 0xb65   :  { %v5808_v36 = vpop.f32.mrf.mxu1 }
 0xb66   :  { %v15523_v49 = vadd.f32 %v11768_v14, %v5808_v36  ;;  %5905 = vmax.xlane.f32.xlu0 %v5904_v55 }
 0xb67   :  { %v5812_v61 = vpop.f32.mrf.mxu1 }
 0xb68   :  { %17966 = vst [vmem:[#allocation120_spill] sm:$0xff] %v15523_v49  ;;  %v5907_v23 = vmax.f32 %v15521_v54, %v15523_v49  ;;  %v15527_v25 = vadd.f32 %v11769_v4, %v5812_v61 }
 0xb69   :  { %v5814_v26 = vpop.f32.mrf.mxu1 }
 0xb6a   :  { %v15529_v50 = vadd.f32 %v11770_v57, %v5814_v26  ;;  %5908 = vmax.xlane.f32.xlu0 %v5907_v23 }
 0xb6c   :  { %17967 = vst [vmem:[#allocation121_spill] sm:$0xff] %v15529_v50  ;;  %v5910_v40 = vmax.f32 %v15527_v25, %v15529_v50 }
 0xb6e   :  { %5911 = vmax.xlane.f32.xlu0 %v5910_v40 }
 0xb7b   :  { %v5819_v48 = vpop.xlane.xlu0 %5818 }
 0xb7c   :  { %v5913_v36 = vsub.f32 %v15341_v24, %v5819_v48  ;;  %v5914_v55 = vsub.f32 %v15343_v11, %v5819_v48 }
 0xb7e   :  { %v5977_v14 = vmul.f32 1.442695, %v5913_v36  ;;  %v5979_v59 = vmul.f32 1.442695, %v5914_v55 }
 0xb7f   :  { %v5822_v49 = vpop.xlane.xlu1 %5821 }
 0xb80   :  { %11303 = vpow2.f32 %v5977_v14  ;;  %v5915_v61 = vsub.f32 %v15347_v30, %v5822_v49  ;;  %v5916_v4 = vsub.f32 %v15349_v34, %v5822_v49 }
 0xb81   :  { %11305 = vpow2.f32 %v5979_v59 }
 0xb82   :  { %v5981_v26 = vmul.f32 1.442695, %v5915_v61  ;;  %v5983_v23 = vmul.f32 1.442695, %v5916_v4 }
 0xb83   :  { %v5825_v57 = vpop.xlane.xlu0 %5824 }
 0xb84   :  { %11307 = vpow2.f32 %v5981_v26  ;;  %v5917_v40 = vsub.f32 %v15353_v10, %v5825_v57  ;;  %v5918_v50 = vsub.f32 %v15355_v0, %v5825_v57 }
 0xb85   :  { %11309 = vpow2.f32 %v5983_v23 }
 0xb86   :  { %v5985_v24 = vmul.f32 1.442695, %v5917_v40  ;;  %v5987_v11 = vmul.f32 1.442695, %v5918_v50 }
 0xb87   :  { %v5828_v48 = vpop.xlane.xlu1 %5827 }
 0xb88   :  { %11311 = vpow2.f32 %v5985_v24  ;;  %v5919_v36 = vsub.f32 %v15359_v15, %v5828_v48  ;;  %v5920_v30 = vsub.f32 %v15361_v43, %v5828_v48 }
 0xb89   :  { %11313 = vpow2.f32 %v5987_v11 }
 0xb8a   :  { %v5989_v34 = vmul.f32 1.442695, %v5919_v36  ;;  %v5991_v59 = vmul.f32 1.442695, %v5920_v30 }
 0xb8b   :  { %v5831_v49 = vpop.xlane.xlu0 %5830 }
 0xb8c   :  { %11315 = vpow2.f32 %v5989_v34  ;;  %v5921_v55 = vsub.f32 %v15365_v42, %v5831_v49  ;;  %v5922_v10 = vsub.f32 %v15367_v56, %v5831_v49 }
 0xb8d   :  { %v15543_v14 = vpop.eup %11303  ;;  %11317 = vpow2.f32 %v5991_v59 }
 0xb8e   :  { %v15545_v0 = vpop.eup %11305  ;;  %v5993_v50 = vmul.f32 1.442695, %v5921_v55  ;;  %v5995_v61 = vmul.f32 1.442695, %v5922_v10 }
 0xb8f   :  { %v5834_v4 = vpop.xlane.xlu1 %5833  ;;  %v6105_v15 = vadd.f32 %v15545_v0, %v15543_v14 }
 0xb90   :  { %11319 = vpow2.f32 %v5993_v50  ;;  %v5923_v43 = vsub.f32 %v15371_v9, %v5834_v4  ;;  %v5924_v26 = vsub.f32 %v15373_v1, %v5834_v4 }
 0xb91   :  { %v15551_v23 = vpop.eup %11307  ;;  %11321 = vpow2.f32 %v5995_v61  ;;  %6106 = vadd.xlane.f32.xlu1 %v6105_v15 }
 0xb92   :  { %v15553_v42 = vpop.eup %11309  ;;  %v5997_v56 = vmul.f32 1.442695, %v5923_v43  ;;  %v5999_v57 = vmul.f32 1.442695, %v5924_v26 }
 0xb93   :  { %v5837_v40 = vpop.xlane.xlu0 %5836  ;;  %v6108_v24 = vadd.f32 %v15553_v42, %v15551_v23 }
 0xb94   :  { %11323 = vpow2.f32 %v5997_v56  ;;  %v5925_v11 = vsub.f32 %v15377_v33, %v5837_v40  ;;  %v5926_v48 = vsub.f32 %v15379_v32, %v5837_v40 }
 0xb95   :  { %v15559_v9 = vpop.eup %11311  ;;  %11325 = vpow2.f32 %v5999_v57  ;;  %6109 = vadd.xlane.f32.xlu1 %v6108_v24 }
 0xb96   :  { %v15561_v1 = vpop.eup %11313  ;;  %v6001_v36 = vmul.f32 1.442695, %v5925_v11  ;;  %v6003_v30 = vmul.f32 1.442695, %v5926_v48 }
 0xb97   :  { %v5840_v34 = vpop.xlane.xlu1 %5839  ;;  %v6111_v59 = vadd.f32 %v15561_v1, %v15559_v9 }
 0xb98   :  { %11327 = vpow2.f32 %v6001_v36  ;;  %v5927_v49 = vsub.f32 %v15383_v45, %v5840_v34  ;;  %v5928_v55 = vsub.f32 %v15385_v58, %v5840_v34 }
 0xb99   :  { %v15567_v33 = vpop.eup %11315  ;;  %11329 = vpow2.f32 %v6003_v30  ;;  %6112 = vadd.xlane.f32.xlu1 %v6111_v59 }
 0xb9a   :  { %v15569_v32 = vpop.eup %11317  ;;  %v6005_v10 = vmul.f32 1.442695, %v5927_v49  ;;  %v6007_v50 = vmul.f32 1.442695, %v5928_v55 }
 0xb9b   :  { %v5843_v61 = vpop.xlane.xlu0 %5842  ;;  %v6114_v4 = vadd.f32 %v15569_v32, %v15567_v33 }
 0xb9c   :  { %11331 = vpow2.f32 %v6005_v10  ;;  %v5929_v15 = vsub.f32 %v15389_v19, %v5843_v61  ;;  %v5930_v43 = vsub.f32 %v15391_v63, %v5843_v61 }
 0xb9d   :  { %v15575_v45 = vpop.eup %11319  ;;  %11333 = vpow2.f32 %v6007_v50  ;;  %6115 = vadd.xlane.f32.xlu1 %v6114_v4 }
 0xb9e   :  { %v15577_v58 = vpop.eup %11321  ;;  %v6009_v26 = vmul.f32 1.442695, %v5929_v15  ;;  %v6011_v56 = vmul.f32 1.442695, %v5930_v43 }
 0xb9f   :  { %v5846_v57 = vpop.xlane.xlu1 %5845  ;;  %v6117_v40 = vadd.f32 %v15577_v58, %v15575_v45 }
 0xba0   :  { %11335 = vpow2.f32 %v6009_v26  ;;  %v5931_v24 = vsub.f32 %v15395_v5, %v5846_v57  ;;  %v5932_v11 = vsub.f32 %v15397_v17, %v5846_v57 }
 0xba1   :  { %v15583_v19 = vpop.eup %11323  ;;  %11337 = vpow2.f32 %v6011_v56  ;;  %6118 = vadd.xlane.f32.xlu1 %v6117_v40 }
 0xba2   :  { %v15585_v63 = vpop.eup %11325  ;;  %v6013_v48 = vmul.f32 1.442695, %v5931_v24  ;;  %v6015_v36 = vmul.f32 1.442695, %v5932_v11 }
 0xba3   :  { %v5849_v30 = vpop.xlane.xlu0 %5848  ;;  %v6120_v34 = vadd.f32 %v15585_v63, %v15583_v19 }
 0xba4   :  { %11339 = vpow2.f32 %v6013_v48  ;;  %v5933_v59 = vsub.f32 %v15401_v22, %v5849_v30  ;;  %v5934_v49 = vsub.f32 %v15403_v60, %v5849_v30 }
 0xba5   :  { %v15591_v5 = vpop.eup %11327  ;;  %11341 = vpow2.f32 %v6015_v36  ;;  %6121 = vadd.xlane.f32.xlu1 %v6120_v34 }
 0xba6   :  { %v15593_v17 = vpop.eup %11329  ;;  %v6017_v55 = vmul.f32 1.442695, %v5933_v59  ;;  %v6019_v10 = vmul.f32 1.442695, %v5934_v49 }
 0xba7   :  { %v5852_v50 = vpop.xlane.xlu1 %5851  ;;  %v6123_v61 = vadd.f32 %v15593_v17, %v15591_v5 }
 0xba8   :  { %11343 = vpow2.f32 %v6017_v55  ;;  %v5935_v4 = vsub.f32 %v15407_v62, %v5852_v50  ;;  %v5936_v15 = vsub.f32 %v15409_v51, %v5852_v50 }
 0xba9   :  { %v15599_v22 = vpop.eup %11331  ;;  %11345 = vpow2.f32 %v6019_v10  ;;  %6124 = vadd.xlane.f32.xlu1 %v6123_v61 }
 0xbaa   :  { %v15601_v60 = vpop.eup %11333  ;;  %v6021_v43 = vmul.f32 1.442695, %v5935_v4  ;;  %v6023_v26 = vmul.f32 1.442695, %v5936_v15 }
 0xbab   :  { %v5855_v56 = vpop.xlane.xlu0 %5854  ;;  %v6126_v57 = vadd.f32 %v15601_v60, %v15599_v22 }
 0xbac   :  { %11347 = vpow2.f32 %v6021_v43  ;;  %v5937_v40 = vsub.f32 %v15413_v29, %v5855_v56  ;;  %v5938_v24 = vsub.f32 %v15415_v18, %v5855_v56 }
 0xbad   :  { %v15607_v62 = vpop.eup %11335  ;;  %11349 = vpow2.f32 %v6023_v26  ;;  %6127 = vadd.xlane.f32.xlu1 %v6126_v57 }
 0xbae   :  { %v15609_v51 = vpop.eup %11337  ;;  %v6025_v11 = vmul.f32 1.442695, %v5937_v40  ;;  %v6027_v48 = vmul.f32 1.442695, %v5938_v24 }
 0xbaf   :  { %v5858_v36 = vpop.xlane.xlu1 %5857  ;;  %v6129_v30 = vadd.f32 %v15609_v51, %v15607_v62 }
 0xbb0   :  { %11351 = vpow2.f32 %v6025_v11  ;;  %v5939_v34 = vsub.f32 %v15419_v44, %v5858_v36  ;;  %v5940_v59 = vsub.f32 %v15421_v16, %v5858_v36 }
 0xbb1   :  { %v15615_v29 = vpop.eup %11339  ;;  %11353 = vpow2.f32 %v6027_v48  ;;  %6130 = vadd.xlane.f32.xlu1 %v6129_v30 }
 0xbb2   :  { %v15617_v18 = vpop.eup %11341  ;;  %v6029_v49 = vmul.f32 1.442695, %v5939_v34  ;;  %v6031_v55 = vmul.f32 1.442695, %v5940_v59 }
 0xbb3   :  { %v5861_v10 = vpop.xlane.xlu0 %5860  ;;  %v6132_v50 = vadd.f32 %v15617_v18, %v15615_v29 }
 0xbb4   :  { %11355 = vpow2.f32 %v6029_v49  ;;  %v5941_v61 = vsub.f32 %v15425_v31, %v5861_v10  ;;  %v5942_v4 = vsub.f32 %v15427_v13, %v5861_v10 }
 0xbb5   :  { %v15623_v44 = vpop.eup %11343  ;;  %11357 = vpow2.f32 %v6031_v55  ;;  %6133 = vadd.xlane.f32.xlu1 %v6132_v50 }
 0xbb6   :  { %v15625_v16 = vpop.eup %11345  ;;  %v6033_v15 = vmul.f32 1.442695, %v5941_v61  ;;  %v6035_v43 = vmul.f32 1.442695, %v5942_v4 }
 0xbb7   :  { %v5864_v26 = vpop.xlane.xlu1 %5863  ;;  %v6135_v56 = vadd.f32 %v15625_v16, %v15623_v44 }
 0xbb8   :  { %11359 = vpow2.f32 %v6033_v15  ;;  %v5943_v57 = vsub.f32 %v15431_v2, %v5864_v26  ;;  %v5944_v40 = vsub.f32 %v15433_v47, %v5864_v26 }
 0xbb9   :  { %v15631_v31 = vpop.eup %11347  ;;  %11361 = vpow2.f32 %v6035_v43  ;;  %6136 = vadd.xlane.f32.xlu0 %v6135_v56 }
 0xbba   :  { %v15633_v13 = vpop.eup %11349  ;;  %v6037_v24 = vmul.f32 1.442695, %v5943_v57  ;;  %v6039_v11 = vmul.f32 1.442695, %v5944_v40 }
 0xbbb   :  { %v5867_v48 = vpop.xlane.xlu0 %5866  ;;  %v6138_v36 = vadd.f32 %v15633_v13, %v15631_v31 }
 0xbbc   :  { %11363 = vpow2.f32 %v6037_v24  ;;  %v5945_v30 = vsub.f32 %v15437_v12, %v5867_v48  ;;  %v5946_v34 = vsub.f32 %v15439_v7, %v5867_v48 }
 0xbbd   :  { %v15639_v2 = vpop.eup %11351  ;;  %11365 = vpow2.f32 %v6039_v11  ;;  %6139 = vadd.xlane.f32.xlu1 %v6138_v36 }
 0xbbe   :  { %v15641_v47 = vpop.eup %11353  ;;  %v6041_v59 = vmul.f32 1.442695, %v5945_v30  ;;  %v6043_v49 = vmul.f32 1.442695, %v5946_v34 }
 0xbbf   :  { %v5870_v55 = vpop.xlane.xlu1 %5869  ;;  %v6141_v10 = vadd.f32 %v15641_v47, %v15639_v2 }
 0xbc0   :  { %11367 = vpow2.f32 %v6041_v59  ;;  %v5947_v50 = vsub.f32 %v15443_v38, %v5870_v55  ;;  %v5948_v61 = vsub.f32 %v15445_v27, %v5870_v55 }
 0xbc1   :  { %v15647_v12 = vpop.eup %11355  ;;  %11369 = vpow2.f32 %v6043_v49  ;;  %6142 = vadd.xlane.f32.xlu0 %v6141_v10 }
 0xbc2   :  { %v15649_v7 = vpop.eup %11357  ;;  %v6045_v4 = vmul.f32 1.442695, %v5947_v50  ;;  %v6047_v15 = vmul.f32 1.442695, %v5948_v61 }
 0xbc3   :  { %v5873_v43 = vpop.xlane.xlu0 %5872  ;;  %v6144_v26 = vadd.f32 %v15649_v7, %v15647_v12 }
 0xbc4   :  { %11371 = vpow2.f32 %v6045_v4  ;;  %v5949_v56 = vsub.f32 %v15449_v28, %v5873_v43  ;;  %v5950_v57 = vsub.f32 %v15451_v6, %v5873_v43 }
 0xbc5   :  { %v15655_v38 = vpop.eup %11359  ;;  %11373 = vpow2.f32 %v6047_v15  ;;  %6145 = vadd.xlane.f32.xlu1 %v6144_v26 }
 0xbc6   :  { %v15657_v27 = vpop.eup %11361  ;;  %v6049_v40 = vmul.f32 1.442695, %v5949_v56  ;;  %v6051_v24 = vmul.f32 1.442695, %v5950_v57 }
 0xbc7   :  { %v5876_v11 = vpop.xlane.xlu1 %5875  ;;  %v6147_v48 = vadd.f32 %v15657_v27, %v15655_v38 }
 0xbc8   :  { %11375 = vpow2.f32 %v6049_v40  ;;  %v5951_v36 = vsub.f32 %v15455_v3, %v5876_v11  ;;  %v5952_v30 = vsub.f32 %v15457_v37, %v5876_v11 }
 0xbc9   :  { %v15663_v28 = vpop.eup %11363  ;;  %11377 = vpow2.f32 %v6051_v24  ;;  %6148 = vadd.xlane.f32.xlu0 %v6147_v48 }
 0xbca   :  { %v15665_v6 = vpop.eup %11365  ;;  %v6053_v34 = vmul.f32 1.442695, %v5951_v36  ;;  %v6055_v59 = vmul.f32 1.442695, %v5952_v30 }
 0xbcb   :  { %v5879_v49 = vpop.xlane.xlu0 %5878  ;;  %v6150_v55 = vadd.f32 %v15665_v6, %v15663_v28 }
 0xbcc   :  { %11379 = vpow2.f32 %v6053_v34  ;;  %v5953_v10 = vsub.f32 %v15461_v53, %v5879_v49  ;;  %v5954_v50 = vsub.f32 %v15463_v21, %v5879_v49 }
 0xbcd   :  { %v15671_v3 = vpop.eup %11367  ;;  %11381 = vpow2.f32 %v6055_v59  ;;  %6151 = vadd.xlane.f32.xlu1 %v6150_v55 }
 0xbce   :  { %v15673_v37 = vpop.eup %11369  ;;  %v6057_v61 = vmul.f32 1.442695, %v5953_v10  ;;  %v6059_v4 = vmul.f32 1.442695, %v5954_v50 }
 0xbcf   :  { %v5882_v15 = vpop.xlane.xlu1 %5881  ;;  %v6153_v43 = vadd.f32 %v15673_v37, %v15671_v3 }
 0xbd0   :  { %11383 = vpow2.f32 %v6057_v61  ;;  %v5955_v26 = vsub.f32 %v15467_v46, %v5882_v15  ;;  %v5956_v56 = vsub.f32 %v15469_v20, %v5882_v15 }
 0xbd1   :  { %v15679_v53 = vpop.eup %11371  ;;  %11385 = vpow2.f32 %v6059_v4  ;;  %6154 = vadd.xlane.f32.xlu0 %v6153_v43  ;;  %v17968_v43 = vld [vmem:[#allocation109_spill] sm:$0xff] }
 0xbd2   :  { %v15681_v21 = vpop.eup %11373  ;;  %v6061_v57 = vmul.f32 1.442695, %v5955_v26  ;;  %v6063_v40 = vmul.f32 1.442695, %v5956_v56  ;;  %v17969_v56 = vld [vmem:[#allocation111_spill] sm:$0xff] }
 0xbd3   :  { %v5885_v24 = vpop.xlane.xlu0 %5884  ;;  %v6156_v11 = vadd.f32 %v15681_v21, %v15679_v53 }
 0xbd4   :  { %11387 = vpow2.f32 %v6061_v57  ;;  %v5957_v48 = vsub.f32 %v15473_v52, %v5885_v24  ;;  %v5958_v36 = vsub.f32 %v15475_v41, %v5885_v24 }
 0xbd5   :  { %v15687_v46 = vpop.eup %11375  ;;  %11389 = vpow2.f32 %v6063_v40  ;;  %6157 = vadd.xlane.f32.xlu1 %v6156_v11 }
 0xbd6   :  { %v15689_v20 = vpop.eup %11377  ;;  %v6065_v30 = vmul.f32 1.442695, %v5957_v48  ;;  %v6067_v34 = vmul.f32 1.442695, %v5958_v36  ;;  %v17970_v36 = vld [vmem:[#allocation110_spill] sm:$0xff] }
 0xbd7   :  { %v5888_v59 = vpop.xlane.xlu0 %5887  ;;  %v6159_v49 = vadd.f32 %v15689_v20, %v15687_v46 }
 0xbd8   :  { %11391 = vpow2.f32 %v6065_v30  ;;  %v5959_v55 = vsub.f32 %v15479_v39, %v5888_v59  ;;  %v5960_v10 = vsub.f32 %v15481_v35, %v5888_v59 }
 0xbd9   :  { %v15695_v52 = vpop.eup %11379  ;;  %11393 = vpow2.f32 %v6067_v34  ;;  %6160 = vadd.xlane.f32.xlu0 %v6159_v49  ;;  %v17971_v34 = vld [vmem:[#allocation113_spill] sm:$0xff] }
 0xbda   :  { %v15697_v41 = vpop.eup %11381  ;;  %v6069_v50 = vmul.f32 1.442695, %v5959_v55  ;;  %v6071_v61 = vmul.f32 1.442695, %v5960_v10 }
 0xbdb   :  { %v5891_v4 = vpop.xlane.xlu0 %5890  ;;  %v6162_v15 = vadd.f32 %v15697_v41, %v15695_v52 }
 0xbdc   :  { %11395 = vpow2.f32 %v6069_v50  ;;  %v5961_v26 = vsub.f32 %v17968_v43, %v5891_v4  ;;  %v5962_v57 = vsub.f32 %v17969_v56, %v5891_v4 }
 0xbdd   :  { %v15703_v39 = vpop.eup %11383  ;;  %11397 = vpow2.f32 %v6071_v61  ;;  %6163 = vadd.xlane.f32.xlu1 %v6162_v15  ;;  %v17972_v15 = vld [vmem:[#allocation112_spill] sm:$0xff] }
 0xbde   :  { %v15705_v35 = vpop.eup %11385  ;;  %v6073_v40 = vmul.f32 1.442695, %v5961_v26  ;;  %v6075_v24 = vmul.f32 1.442695, %v5962_v57  ;;  %v17973_v26 = vld [vmem:[#allocation115_spill] sm:$0xff] }
 0xbdf   :  { %v5894_v11 = vpop.xlane.xlu0 %5893  ;;  %v6165_v48 = vadd.f32 %v15705_v35, %v15703_v39 }
 0xbe0   :  { %11399 = vpow2.f32 %v6073_v40  ;;  %v5963_v30 = vsub.f32 %v17970_v36, %v5894_v11  ;;  %v5964_v59 = vsub.f32 %v17971_v34, %v5894_v11 }
 0xbe1   :  { %v15711_v49 = vpop.eup %11387  ;;  %11401 = vpow2.f32 %v6075_v24  ;;  %6166 = vadd.xlane.f32.xlu0 %v6165_v48 }
 0xbe2   :  { %v15713_v55 = vpop.eup %11389  ;;  %v6077_v10 = vmul.f32 1.442695, %v5963_v30  ;;  %v6079_v50 = vmul.f32 1.442695, %v5964_v59  ;;  %v17976_v30 = vld [vmem:[#allocation114_spill] sm:$0xff]  ;;  %v17977_v59 = vld [vmem:[#allocation117_spill] sm:$0xff] }
 0xbe3   :  { %v5897_v61 = vpop.xlane.xlu0 %5896  ;;  %v6168_v4 = vadd.f32 %v15713_v55, %v15711_v49 }
 0xbe4   :  { %11403 = vpow2.f32 %v6077_v10  ;;  %v5965_v43 = vsub.f32 %v17972_v15, %v5897_v61  ;;  %v5966_v56 = vsub.f32 %v17973_v26, %v5897_v61 }
 0xbe5   :  { %v15719_v57 = vpop.eup %11391  ;;  %11405 = vpow2.f32 %v6079_v50  ;;  %6169 = vadd.xlane.f32.xlu1 %v6168_v4 }
 0xbe6   :  { %17974 = vst [vmem:[#allocation109_spill] sm:$0xff] %v15719_v57  ;;  %v15721_v40 = vpop.eup %11393  ;;  %v6081_v24 = vmul.f32 1.442695, %v5965_v43  ;;  %v6083_v11 = vmul.f32 1.442695, %v5966_v56  ;;  %v17979_v56 = vld [vmem:[#allocation116_spill] sm:$0xff] }
 0xbe7   :  { %17975 = vst [vmem:[#allocation111_spill] sm:$0xff] %v15721_v40  ;;  %v5900_v48 = vpop.xlane.xlu0 %5899  ;;  %v6171_v36 = vadd.f32 %v15721_v40, %v15719_v57 }
 0xbe8   :  { %11407 = vpow2.f32 %v6081_v24  ;;  %v5967_v34 = vsub.f32 %v17976_v30, %v5900_v48  ;;  %v5968_v10 = vsub.f32 %v17977_v59, %v5900_v48  ;;  %v17980_v24 = vld [vmem:[#allocation119_spill] sm:$0xff] }
 0xbe9   :  { %v15727_v15 = vpop.eup %11395  ;;  %11409 = vpow2.f32 %v6083_v11  ;;  %6172 = vadd.xlane.f32.xlu0 %v6171_v36 }
 0xbea   :  { %v15729_v61 = vpop.eup %11397  ;;  %v6085_v50 = vmul.f32 1.442695, %v5967_v34  ;;  %v6087_v4 = vmul.f32 1.442695, %v5968_v10 }
 0xbeb   :  { %17978 = vst [vmem:[#allocation110_spill] sm:$0xff] %v15729_v61  ;;  %v5903_v26 = vpop.xlane.xlu0 %5902  ;;  %v6174_v43 = vadd.f32 %v15729_v61, %v15727_v15 }
 0xbec   :  { %11411 = vpow2.f32 %v6085_v50  ;;  %v5969_v40 = vsub.f32 %v17979_v56, %v5903_v26  ;;  %v5970_v57 = vsub.f32 %v17980_v24, %v5903_v26  ;;  %v17983_v50 = vld [vmem:[#allocation118_spill] sm:$0xff] }
 0xbed   :  { %v15735_v30 = vpop.eup %11399  ;;  %11413 = vpow2.f32 %v6087_v4  ;;  %6175 = vadd.xlane.f32.xlu1 %v6174_v43 }
 0xbee   :  { %17981 = vst [vmem:[#allocation113_spill] sm:$0xff] %v15735_v30  ;;  %v15737_v48 = vpop.eup %11401  ;;  %v6089_v11 = vmul.f32 1.442695, %v5969_v40  ;;  %v6091_v36 = vmul.f32 1.442695, %v5970_v57 }
 0xbef   :  { %17982 = vst [vmem:[#allocation112_spill] sm:$0xff] %v15737_v48  ;;  %v5906_v59 = vpop.xlane.xlu0 %5905  ;;  %v6177_v34 = vadd.f32 %v15737_v48, %v15735_v30 }
 0xbf0   :  { %11415 = vpow2.f32 %v6089_v11  ;;  %v5971_v10 = vsub.f32 %v15515_v8, %v5906_v59  ;;  %v5972_v61 = vsub.f32 %v17983_v50, %v5906_v59  ;;  %v17986_v11 = vld [vmem:[#allocation120_spill] sm:$0xff] }
 0xbf1   :  { %v15743_v56 = vpop.eup %11403  ;;  %11417 = vpow2.f32 %v6091_v36  ;;  %6178 = vadd.xlane.f32.xlu0 %v6177_v34 }
 0xbf2   :  { %17984 = vst [vmem:[#allocation115_spill] sm:$0xff] %v15743_v56  ;;  %v15745_v26 = vpop.eup %11405  ;;  %v6093_v4 = vmul.f32 1.442695, %v5971_v10  ;;  %v6095_v43 = vmul.f32 1.442695, %v5972_v61 }
 0xbf3   :  { %17985 = vst [vmem:[#allocation114_spill] sm:$0xff] %v15745_v26  ;;  %v5909_v24 = vpop.xlane.xlu0 %5908  ;;  %v6180_v57 = vadd.f32 %v15745_v26, %v15743_v56 }
 0xbf4   :  { %11419 = vpow2.f32 %v6093_v4  ;;  %v5973_v40 = vsub.f32 %v15521_v54, %v5909_v24  ;;  %v5974_v48 = vsub.f32 %v17986_v11, %v5909_v24  ;;  %v17989_v4 = vld [vmem:[#allocation121_spill] sm:$0xff] }
 0xbf5   :  { %v15751_v8 = vpop.eup %11407  ;;  %11421 = vpow2.f32 %v6095_v43  ;;  %6181 = vadd.xlane.f32.xlu1 %v6180_v57 }
 0xbf6   :  { %17987 = vst [vmem:[#allocation117_spill] sm:$0xff] %v15751_v8  ;;  %v15753_v59 = vpop.eup %11409  ;;  %v6097_v36 = vmul.f32 1.442695, %v5973_v40  ;;  %v6099_v34 = vmul.f32 1.442695, %v5974_v48 }
 0xbf7   :  { %17988 = vst [vmem:[#allocation116_spill] sm:$0xff] %v15753_v59  ;;  %v5912_v50 = vpop.xlane.xlu0 %5911  ;;  %v6183_v61 = vadd.f32 %v15753_v59, %v15751_v8 }
 0xbf8   :  { %11423 = vpow2.f32 %v6097_v36  ;;  %v5975_v10 = vsub.f32 %v15527_v25, %v5912_v50  ;;  %v5976_v26 = vsub.f32 %v17989_v4, %v5912_v50 }
 0xbf9   :  { %v15759_v54 = vpop.eup %11411  ;;  %11425 = vpow2.f32 %v6099_v34  ;;  %6184 = vadd.xlane.f32.xlu0 %v6183_v61 }
 0xbfa   :  { %17990 = vst [vmem:[#allocation119_spill] sm:$0xff] %v15759_v54  ;;  %v15761_v24 = vpop.eup %11413  ;;  %v6101_v43 = vmul.f32 1.442695, %v5975_v10  ;;  %v6103_v57 = vmul.f32 1.442695, %v5976_v26 }
 0xbfb   :  { %17991 = vst [vmem:[#allocation118_spill] sm:$0xff] %v15761_v24  ;;  %v6186_v48 = vadd.f32 %v15761_v24, %v15759_v54 }
 0xbfc   :  { %11427 = vpow2.f32 %v6101_v43 }
 0xbfd   :  { %v15765_v40 = vpop.eup %11415  ;;  %11429 = vpow2.f32 %v6103_v57  ;;  %6187 = vadd.xlane.f32.xlu1 %v6186_v48 }
 0xbfe   :  { %17992 = vst [vmem:[#allocation120_spill] sm:$0xff] %v15765_v40  ;;  %v15767_v11 = vpop.eup %11417 }
 0xbff   :  { %17993 = vst [vmem:[#allocation121_spill] sm:$0xff] %v15767_v11  ;;  %v6189_v25 = vadd.f32 %v15767_v11, %v15765_v40 }
 0xc01   :  { %v15771_v36 = vpop.eup %11419  ;;  %6190 = vadd.xlane.f32.xlu0 %v6189_v25 }
 0xc02   :  { %17994 = vst [vmem:[#allocation122_spill] sm:$0xff] %v15771_v36  ;;  %v15773_v34 = vpop.eup %11421 }
 0xc03   :  { %17995 = vst [vmem:[#allocation123_spill] sm:$0xff] %v15773_v34  ;;  %v6192_v26 = vadd.f32 %v15773_v34, %v15771_v36 }
 0xc05   :  { %v15777_v50 = vpop.eup %11423  ;;  %6193 = vadd.xlane.f32.xlu1 %v6192_v26 }
 0xc06   :  { %17996 = vst [vmem:[#allocation124_spill] sm:$0xff] %v15777_v50  ;;  %v15779_v61 = vpop.eup %11425 }
 0xc07   :  { %17997 = vst [vmem:[#allocation125_spill] sm:$0xff] %v15779_v61  ;;  %v6195_v10 = vadd.f32 %v15779_v61, %v15777_v50 }
 0xc09   :  { %v15783_v4 = vpop.eup %11427  ;;  %6196 = vadd.xlane.f32.xlu0 %v6195_v10 }
 0xc0a   :  { %17998 = vst [vmem:[#allocation126_spill] sm:$0xff] %v15783_v4  ;;  %v15785_v43 = vpop.eup %11429 }
 0xc0b   :  { %17999 = vst [vmem:[#allocation127_spill] sm:$0xff] %v15785_v43  ;;  %v6198_v57 = vadd.f32 %v15785_v43, %v15783_v4 }
 0xc0d   :  { %6199 = vadd.xlane.f32.xlu1 %v6198_v57 }
 0xc1a   :  { %v6107_v48 = vpop.xlane.xlu1 %6106 }
 0xc1b   :  { %11431 = vrcp.f32 %v6107_v48 }
 0xc1e   :  { %v6110_v25 = vpop.xlane.xlu1 %6109 }
 0xc1f   :  { %11433 = vrcp.f32 %v6110_v25 }
 0xc22   :  { %v6113_v34 = vpop.xlane.xlu1 %6112 }
 0xc23   :  { %11435 = vrcp.f32 %v6113_v34 }
 0xc26   :  { %v6116_v26 = vpop.xlane.xlu1 %6115 }
 0xc27   :  { %11437 = vrcp.f32 %v6116_v26 }
 0xc28   :  { %v11432_v36 = vpop.eup %11431 }
 0xc29   :  { %v6233_v11 = vmul.f32 %v11432_v36, %v6107_v48 }
 0xc2a   :  { %v6119_v61 = vpop.xlane.xlu1 %6118 }
 0xc2b   :  { %v6265_v50 = vsub.f32 2.0, %v6233_v11  ;;  %11439 = vrcp.f32 %v6119_v61 }
 0xc2c   :  { %v11434_v10 = vpop.eup %11433 }
 0xc2d   :  { %v6234_v40 = vmul.f32 %v11434_v10, %v6110_v25  ;;  %v6297_v24 = vmul.f32 %v11432_v36, %v6265_v50 }
 0xc2e   :  { %v6122_v54 = vpop.xlane.xlu1 %6121 }
 0xc2f   :  { %v6266_v59 = vsub.f32 2.0, %v6234_v40  ;;  %11441 = vrcp.f32 %v6122_v54  ;;  %v6329_v57 = vmul.f32 %v15543_v14, %v6297_v24  ;;  %v6330_v43 = vmul.f32 %v15545_v0, %v6297_v24  ;;  %v11771_v40 = vld [vmem:[%s17315_s2 + $0x8] sm:$0xff]  ;;  %v11772_v0 = vld [vmem:[%s17315_s2] sm:$0xff] }
 0xc30   :  { %v11436_v4 = vpop.eup %11435 }
 0xc31   :  { %v6235_v8 = vmul.f32 %v11436_v4, %v6113_v34  ;;  %6457 = vmatprep.mubr.f32.mxu0 %v6330_v43  ;;  %v6298_v56 = vmul.f32 %v11434_v10, %v6266_v59 }
 0xc32   :  { %6458 = vmatmul.mubr.f32.vlgmr.msra.gmra.mxu0 %v6329_v57  ;;  %v6125_v30 = vpop.xlane.xlu1 %6124 }
 0xc33   :  { %v6267_v48 = vsub.f32 2.0, %v6235_v8  ;;  %11443 = vrcp.f32 %v6125_v30  ;;  %v6332_v11 = vmul.f32 %v15553_v42, %v6298_v56  ;;  %v6331_v25 = vmul.f32 %v15551_v23, %v6298_v56  ;;  %10810 = vmatpush3.msra.mxu0 %v11771_v40 }
 0xc34   :  { %v11438_v14 = vpop.eup %11437  ;;  %10811 = vmatprep.subr.mxu0 %v11772_v0 }
 0xc35   :  { %v6236_v59 = vmul.f32 %v11438_v14, %v6116_v26  ;;  %6462 = vmatprep.mubr.f32.mxu0 %v6332_v11  ;;  %v6299_v24 = vmul.f32 %v11436_v4, %v6267_v48  ;;  %10812 = vmatpush3.msra.mxu0 %v11772_v0 }
 0xc36   :  { %6463 = vmatmul.mubr.f32.gmra.mxu0 %v6331_v25  ;;  %v6128_v8 = vpop.xlane.xlu1 %6127 }
 0xc37   :  { %v6268_v42 = vsub.f32 2.0, %v6236_v59  ;;  %11445 = vrcp.f32 %v6128_v8  ;;  %v6334_v23 = vmul.f32 %v15561_v1, %v6299_v24  ;;  %v6333_v56 = vmul.f32 %v15559_v9, %v6299_v24 }
 0xc38   :  { %v11440_v36 = vpop.eup %11439 }
 0xc39   :  { %v6237_v34 = vmul.f32 %v11440_v36, %v6119_v61  ;;  %6467 = vmatprep.mubr.f32.mxu0 %v6334_v23  ;;  %v6300_v50 = vmul.f32 %v11438_v14, %v6268_v42 }
 0xc3a   :  { %6468 = vmatmul.mubr.f32.gmra.mxu0 %v6333_v56  ;;  %v6131_v43 = vpop.xlane.xlu1 %6130 }
 0xc3b   :  { %v6269_v10 = vsub.f32 2.0, %v6237_v34  ;;  %11447 = vrcp.f32 %v6131_v43  ;;  %v6336_v26 = vmul.f32 %v15569_v32, %v6300_v50  ;;  %v6335_v4 = vmul.f32 %v15567_v33, %v6300_v50 }
 0xc3c   :  { %v11442_v57 = vpop.eup %11441 }
 0xc3d   :  { %v6301_v48 = vmul.f32 %v11440_v36, %v6269_v10  ;;  %v6238_v11 = vmul.f32 %v11442_v57, %v6122_v54  ;;  %6472 = vmatprep.mubr.f32.mxu0 %v6336_v26 }
 0xc3e   :  { %6473 = vmatmul.mubr.f32.gmra.mxu0 %v6335_v4  ;;  %v6134_v1 = vpop.xlane.xlu1 %6133 }
 0xc3f   :  { %v6337_v9 = vmul.f32 %v15575_v45, %v6301_v48  ;;  %v6270_v25 = vsub.f32 2.0, %v6238_v11  ;;  %11449 = vrcp.f32 %v6134_v1  ;;  %v6338_v61 = vmul.f32 %v15577_v58, %v6301_v48 }
 0xc40   :  { %v11444_v40 = vpop.eup %11443 }
 0xc41   :  { %v6239_v14 = vmul.f32 %v11444_v40, %v6125_v30  ;;  %6477 = vmatprep.mubr.f32.mxu0 %v6338_v61  ;;  %v6302_v0 = vmul.f32 %v11442_v57, %v6270_v25 }
 0xc42   :  { %6478 = vmatmul.mubr.f32.gmra.mxu0 %v6337_v9  ;;  %v6137_v32 = vpop.xlane.xlu0 %6136 }
 0xc43   :  { %v6271_v59 = vsub.f32 2.0, %v6239_v14  ;;  %11451 = vrcp.f32 %v6137_v32  ;;  %v6340_v33 = vmul.f32 %v15585_v63, %v6302_v0  ;;  %v6339_v54 = vmul.f32 %v15583_v19, %v6302_v0 }
 0xc44   :  { %v11446_v24 = vpop.eup %11445 }
 0xc45   :  { %v6303_v42 = vmul.f32 %v11444_v40, %v6271_v59  ;;  %v6240_v23 = vmul.f32 %v11446_v24, %v6128_v8  ;;  %6482 = vmatprep.mubr.f32.mxu0 %v6340_v33 }
 0xc46   :  { %6483 = vmatmul.mubr.f32.gmra.mxu0 %v6339_v54  ;;  %v6140_v45 = vpop.xlane.xlu1 %6139 }
 0xc47   :  { %v6341_v58 = vmul.f32 %v15591_v5, %v6303_v42  ;;  %v6272_v56 = vsub.f32 2.0, %v6240_v23  ;;  %11453 = vrcp.f32 %v6140_v45  ;;  %v6342_v30 = vmul.f32 %v15593_v17, %v6303_v42 }
 0xc48   :  { %v11448_v36 = vpop.eup %11447 }
 0xc49   :  { %v6241_v34 = vmul.f32 %v11448_v36, %v6131_v43  ;;  %6487 = vmatprep.mubr.f32.mxu0 %v6342_v30  ;;  %v6304_v50 = vmul.f32 %v11446_v24, %v6272_v56 }
 0xc4a   :  { %6488 = vmatmul.mubr.f32.gmra.mxu0 %v6341_v58  ;;  %v6143_v63 = vpop.xlane.xlu0 %6142 }
 0xc4b   :  { %v6273_v10 = vsub.f32 2.0, %v6241_v34  ;;  %11455 = vrcp.f32 %v6143_v63  ;;  %v6344_v19 = vmul.f32 %v15601_v60, %v6304_v50  ;;  %v6343_v8 = vmul.f32 %v15599_v22, %v6304_v50 }
 0xc4c   :  { %v11450_v26 = vpop.eup %11449 }
 0xc4d   :  { %v6305_v4 = vmul.f32 %v11448_v36, %v6273_v10  ;;  %v6242_v57 = vmul.f32 %v11450_v26, %v6134_v1  ;;  %6492 = vmatprep.mubr.f32.mxu0 %v6344_v19 }
 0xc4e   :  { %6493 = vmatmul.mubr.f32.gmra.mxu0 %v6343_v8  ;;  %v6146_v5 = vpop.xlane.xlu1 %6145 }
 0xc4f   :  { %v6345_v17 = vmul.f32 %v15607_v62, %v6305_v4  ;;  %v6274_v48 = vsub.f32 2.0, %v6242_v57  ;;  %11457 = vrcp.f32 %v6146_v5  ;;  %v6346_v43 = vmul.f32 %v15609_v51, %v6305_v4 }
 0xc50   :  { %v11452_v11 = vpop.eup %11451 }
 0xc51   :  { %v6306_v9 = vmul.f32 %v11450_v26, %v6274_v48  ;;  %v6243_v25 = vmul.f32 %v11452_v11, %v6137_v32  ;;  %6497 = vmatprep.mubr.f32.mxu0 %v6346_v43 }
 0xc52   :  { %6498 = vmatmul.mubr.f32.gmra.mxu0 %v6345_v17  ;;  %v6149_v60 = vpop.xlane.xlu0 %6148 }
 0xc53   :  { %v6347_v22 = vmul.f32 %v15615_v29, %v6306_v9  ;;  %v6275_v61 = vsub.f32 2.0, %v6243_v25  ;;  %11459 = vrcp.f32 %v6149_v60  ;;  %v6348_v1 = vmul.f32 %v15617_v18, %v6306_v9 }
 0xc54   :  { %v11454_v40 = vpop.eup %11453 }
 0xc55   :  { %v6307_v14 = vmul.f32 %v11452_v11, %v6275_v61  ;;  %v6244_v0 = vmul.f32 %v11454_v40, %v6140_v45  ;;  %6502 = vmatprep.mubr.f32.mxu0 %v6348_v1 }
 0xc56   :  { %6503 = vmatmul.mubr.f32.gmra.mxu0 %v6347_v22  ;;  %v6152_v62 = vpop.xlane.xlu1 %6151 }
 0xc57   :  { %v6349_v51 = vmul.f32 %v15623_v44, %v6307_v14  ;;  %v6276_v59 = vsub.f32 2.0, %v6244_v0  ;;  %11461 = vrcp.f32 %v6152_v62  ;;  %v6350_v32 = vmul.f32 %v15625_v16, %v6307_v14 }
 0xc58   :  { %v11456_v33 = vpop.eup %11455 }
 0xc59   :  { %v6308_v54 = vmul.f32 %v11454_v40, %v6276_v59  ;;  %v6245_v24 = vmul.f32 %v11456_v33, %v6143_v63  ;;  %6507 = vmatprep.mubr.f32.mxu0 %v6350_v32 }
 0xc5a   :  { %6508 = vmatmul.mubr.f32.gmra.mxu0 %v6349_v51  ;;  %v6155_v29 = vpop.xlane.xlu0 %6154 }
 0xc5b   :  { %v6351_v18 = vmul.f32 %v15631_v31, %v6308_v54  ;;  %v6277_v42 = vsub.f32 2.0, %v6245_v24  ;;  %11463 = vrcp.f32 %v6155_v29  ;;  %v6352_v23 = vmul.f32 %v15633_v13, %v6308_v54 }
 0xc5c   :  { %v11458_v45 = vpop.eup %11457 }
 0xc5d   :  { %v6309_v58 = vmul.f32 %v11456_v33, %v6277_v42  ;;  %v6246_v56 = vmul.f32 %v11458_v45, %v6146_v5  ;;  %6512 = vmatprep.mubr.f32.mxu0 %v6352_v23 }
 0xc5e   :  { %v6158_v44 = vpop.xlane.xlu1 %6157  ;;  %6513 = vmatmul.mubr.f32.gmra.mxu0 %v6351_v18 }
 0xc5f   :  { %v6353_v16 = vmul.f32 %v15639_v2, %v6309_v58  ;;  %v6278_v30 = vsub.f32 2.0, %v6246_v56  ;;  %11465 = vrcp.f32 %v6158_v44  ;;  %v6354_v36 = vmul.f32 %v15641_v47, %v6309_v58 }
 0xc60   :  { %v11460_v34 = vpop.eup %11459 }
 0xc61   :  { %v6310_v50 = vmul.f32 %v11458_v45, %v6278_v30  ;;  %v6247_v63 = vmul.f32 %v11460_v34, %v6149_v60  ;;  %6517 = vmatprep.mubr.f32.mxu0 %v6354_v36 }
 0xc62   :  { %6518 = vmatmul.mubr.f32.gmra.mxu0 %v6353_v16  ;;  %v6161_v31 = vpop.xlane.xlu0 %6160 }
 0xc63   :  { %v6355_v13 = vmul.f32 %v15647_v12, %v6310_v50  ;;  %v6279_v10 = vsub.f32 2.0, %v6247_v63  ;;  %11467 = vrcp.f32 %v6161_v31  ;;  %v6356_v19 = vmul.f32 %v15649_v7, %v6310_v50 }
 0xc64   :  { %v11462_v8 = vpop.eup %11461 }
 0xc65   :  { %v6311_v26 = vmul.f32 %v11460_v34, %v6279_v10  ;;  %v6248_v4 = vmul.f32 %v11462_v8, %v6152_v62  ;;  %6522 = vmatprep.mubr.f32.mxu0 %v6356_v19 }
 0xc66   :  { %v6164_v2 = vpop.xlane.xlu1 %6163  ;;  %6523 = vmatmul.mubr.f32.gmra.mxu0 %v6355_v13 }
 0xc67   :  { %v6357_v47 = vmul.f32 %v15655_v38, %v6311_v26  ;;  %v6280_v57 = vsub.f32 2.0, %v6248_v4  ;;  %11469 = vrcp.f32 %v6164_v2  ;;  %v6358_v5 = vmul.f32 %v15657_v27, %v6311_v26  ;;  %v18001_v4 = vld [vmem:[#allocation111_spill] sm:$0xff] }
 0xc68   :  { %v11464_v17 = vpop.eup %11463 }
 0xc69   :  { %v6312_v48 = vmul.f32 %v11462_v8, %v6280_v57  ;;  %v6249_v43 = vmul.f32 %v11464_v17, %v6155_v29  ;;  %6527 = vmatprep.mubr.f32.mxu0 %v6358_v5  ;;  %v18000_v8 = vld [vmem:[#allocation109_spill] sm:$0xff] }
 0xc6a   :  { %6528 = vmatmul.mubr.f32.gmra.mxu0 %v6357_v47  ;;  %v6167_v12 = vpop.xlane.xlu0 %6166 }
 0xc6b   :  { %v6359_v7 = vmul.f32 %v15663_v28, %v6312_v48  ;;  %v6281_v11 = vsub.f32 2.0, %v6249_v43  ;;  %11471 = vrcp.f32 %v6167_v12  ;;  %v6360_v9 = vmul.f32 %v15665_v6, %v6312_v48  ;;  %v18002_v48 = vld [vmem:[#allocation110_spill] sm:$0xff] }
 0xc6c   :  { %v11466_v25 = vpop.eup %11465 }
 0xc6d   :  { %v6313_v60 = vmul.f32 %v11464_v17, %v6281_v11  ;;  %v6250_v22 = vmul.f32 %v11466_v25, %v6158_v44  ;;  %6532 = vmatprep.mubr.f32.mxu0 %v6360_v9 }
 0xc6e   :  { %v6170_v38 = vpop.xlane.xlu1 %6169  ;;  %6533 = vmatmul.mubr.f32.gmra.mxu0 %v6359_v7 }
 0xc6f   :  { %v6361_v27 = vmul.f32 %v15671_v3, %v6313_v60  ;;  %v6282_v61 = vsub.f32 2.0, %v6250_v22  ;;  %11473 = vrcp.f32 %v6170_v38  ;;  %v6362_v1 = vmul.f32 %v15673_v37, %v6313_v60 }
 0xc70   :  { %v11468_v40 = vpop.eup %11467 }
 0xc71   :  { %v6314_v14 = vmul.f32 %v11466_v25, %v6282_v61  ;;  %v6251_v0 = vmul.f32 %v11468_v40, %v6161_v31  ;;  %6537 = vmatprep.mubr.f32.mxu0 %v6362_v1  ;;  %v18003_v25 = vld [vmem:[#allocation113_spill] sm:$0xff] }
 0xc72   :  { %6538 = vmatmul.mubr.f32.gmra.mxu0 %v6361_v27  ;;  %v6173_v28 = vpop.xlane.xlu0 %6172 }
 0xc73   :  { %v6363_v6 = vmul.f32 %v15679_v53, %v6314_v14  ;;  %v6283_v62 = vsub.f32 2.0, %v6251_v0  ;;  %11475 = vrcp.f32 %v6173_v28  ;;  %v6364_v51 = vmul.f32 %v15681_v21, %v6314_v14  ;;  %v18005_v14 = vld [vmem:[#allocation115_spill] sm:$0xff] }
 0xc74   :  { %v11470_v59 = vpop.eup %11469 }
 0xc75   :  { %v6315_v32 = vmul.f32 %v11468_v40, %v6283_v62  ;;  %v6252_v33 = vmul.f32 %v11470_v59, %v6164_v2  ;;  %6542 = vmatprep.mubr.f32.mxu0 %v6364_v51 }
 0xc76   :  { %v6176_v3 = vpop.xlane.xlu1 %6175  ;;  %6543 = vmatmul.mubr.f32.gmra.mxu0 %v6363_v6  ;;  %v18006_v6 = vld [vmem:[#allocation114_spill] sm:$0xff] }
 0xc77   :  { %v6365_v37 = vmul.f32 %v15687_v46, %v6315_v32  ;;  %v6284_v54 = vsub.f32 2.0, %v6252_v33  ;;  %11477 = vrcp.f32 %v6176_v3  ;;  %v6366_v24 = vmul.f32 %v15689_v20, %v6315_v32 }
 0xc78   :  { %v11472_v29 = vpop.eup %11471 }
 0xc79   :  { %v6316_v18 = vmul.f32 %v11470_v59, %v6284_v54  ;;  %v6253_v42 = vmul.f32 %v11472_v29, %v6167_v12  ;;  %6547 = vmatprep.mubr.f32.mxu0 %v6366_v24  ;;  %v18008_v24 = vld [vmem:[#allocation116_spill] sm:$0xff] }
 0xc7a   :  { %6548 = vmatmul.mubr.f32.gmra.mxu0 %v6365_v37  ;;  %v6179_v53 = vpop.xlane.xlu0 %6178 }
 0xc7b   :  { %v6367_v21 = vmul.f32 %v15695_v52, %v6316_v18  ;;  %v6285_v23 = vsub.f32 2.0, %v6253_v42  ;;  %11479 = vrcp.f32 %v6179_v53  ;;  %v6368_v45 = vmul.f32 %v15697_v41, %v6316_v18 }
 0xc7c   :  { %v11474_v58 = vpop.eup %11473 }
 0xc7d   :  { %v6317_v56 = vmul.f32 %v11472_v29, %v6285_v23  ;;  %v6254_v44 = vmul.f32 %v11474_v58, %v6170_v38  ;;  %6552 = vmatprep.mubr.f32.mxu0 %v6368_v45  ;;  %v18004_v38 = vld [vmem:[#allocation112_spill] sm:$0xff] }
 0xc7e   :  { %v6182_v46 = vpop.xlane.xlu1 %6181  ;;  %6553 = vmatmul.mubr.f32.gmra.mxu0 %v6367_v21  ;;  %v18009_v21 = vld [vmem:[#allocation119_spill] sm:$0xff] }
 0xc7f   :  { %v6369_v20 = vmul.f32 %v15703_v39, %v6317_v56  ;;  %v6286_v16 = vsub.f32 2.0, %v6254_v44  ;;  %11481 = vrcp.f32 %v6182_v46  ;;  %v6370_v30 = vmul.f32 %v15705_v35, %v6317_v56 }
 0xc80   :  { %v11476_v36 = vpop.eup %11475 }
 0xc81   :  { %v6318_v34 = vmul.f32 %v11474_v58, %v6286_v16  ;;  %v6255_v50 = vmul.f32 %v11476_v36, %v6173_v28  ;;  %6557 = vmatprep.mubr.f32.mxu0 %v6370_v30  ;;  %v18010_v58 = vld [vmem:[#allocation118_spill] sm:$0xff]  ;;  %v18011_v16 = vld [vmem:[#allocation120_spill] sm:$0xff] }
 0xc82   :  { %6558 = vmatmul.mubr.f32.gmra.mxu0 %v6369_v20  ;;  %v6185_v52 = vpop.xlane.xlu0 %6184 }
 0xc83   :  { %v6371_v41 = vmul.f32 %v15711_v49, %v6318_v34  ;;  %v6287_v63 = vsub.f32 2.0, %v6255_v50  ;;  %11483 = vrcp.f32 %v6185_v52  ;;  %v6372_v31 = vmul.f32 %v15713_v55, %v6318_v34  ;;  %v18012_v34 = vld [vmem:[#allocation121_spill] sm:$0xff] }
 0xc84   :  { %v11478_v13 = vpop.eup %11477 }
 0xc85   :  { %v6319_v10 = vmul.f32 %v11476_v36, %v6287_v63  ;;  %v6256_v19 = vmul.f32 %v11478_v13, %v6176_v3  ;;  %6562 = vmatprep.mubr.f32.mxu0 %v6372_v31  ;;  %v18007_v3 = vld [vmem:[#allocation117_spill] sm:$0xff]  ;;  %v18013_v31 = vld [vmem:[#allocation122_spill] sm:$0xff] }
 0xc86   :  { %v6188_v39 = vpop.xlane.xlu1 %6187  ;;  %6563 = vmatmul.mubr.f32.gmra.mxu0 %v6371_v41 }
 0xc87   :  { %v6373_v35 = vmul.f32 %v18000_v8, %v6319_v10  ;;  %v6288_v26 = vsub.f32 2.0, %v6256_v19  ;;  %11485 = vrcp.f32 %v6188_v39  ;;  %v6374_v2 = vmul.f32 %v18001_v4, %v6319_v10  ;;  %v18014_v19 = vld [vmem:[#allocation123_spill] sm:$0xff]  ;;  %v18015_v4 = vld [vmem:[#allocation124_spill] sm:$0xff] }
 0xc88   :  { %v11480_v47 = vpop.eup %11479 }
 0xc89   :  { %v6320_v57 = vmul.f32 %v11478_v13, %v6288_v26  ;;  %v6257_v5 = vmul.f32 %v11480_v47, %v6179_v53  ;;  %6567 = vmatprep.mubr.f32.mxu0 %v6374_v2 }
 0xc8a   :  { %6568 = vmatmul.mubr.f32.gmra.mxu0 %v6373_v35  ;;  %v6191_v49 = vpop.xlane.xlu0 %6190 }
 0xc8b   :  { %v6375_v55 = vmul.f32 %v15727_v15, %v6320_v57  ;;  %v6289_v17 = vsub.f32 2.0, %v6257_v5  ;;  %11487 = vrcp.f32 %v6191_v49  ;;  %v6376_v43 = vmul.f32 %v18002_v48, %v6320_v57  ;;  %v18016_v57 = vld [vmem:[#allocation125_spill] sm:$0xff]  ;;  %v18018_v48 = vld [vmem:[#allocation127_spill] sm:$0xff] }
 0xc8c   :  { %v11482_v12 = vpop.eup %11481 }
 0xc8d   :  { %v6321_v7 = vmul.f32 %v11480_v47, %v6289_v17  ;;  %v6258_v11 = vmul.f32 %v11482_v12, %v6182_v46  ;;  %6572 = vmatprep.mubr.f32.mxu0 %v6376_v43 }
 0xc8e   :  { %v6194_v9 = vpop.xlane.xlu1 %6193  ;;  %6573 = vmatmul.mubr.f32.gmra.mxu0 %v6375_v55  ;;  %v18017_v55 = vld [vmem:[#allocation126_spill] sm:$0xff] }
 0xc8f   :  { %v6377_v60 = vmul.f32 %v18003_v25, %v6321_v7  ;;  %v6290_v22 = vsub.f32 2.0, %v6258_v11  ;;  %11489 = vrcp.f32 %v6194_v9  ;;  %v6378_v27 = vmul.f32 %v18004_v38, %v6321_v7  ;;  %v18019_v7 = vld [vmem:[#allocation56_spill] sm:$0xff] }
 0xc90   :  { %v11484_v61 = vpop.eup %11483  ;;  %v18020_v25 = vld [vmem:[#allocation20_spill] sm:$0xff] }
 0xc91   :  { %v6322_v1 = vmul.f32 %v11482_v12, %v6290_v22  ;;  %v6259_v40 = vmul.f32 %v11484_v61, %v6185_v52  ;;  %6577 = vmatprep.mubr.f32.mxu0 %v6378_v27 }
 0xc92   :  { %6578 = vmatmul.mubr.f32.gmra.mxu0 %v6377_v60  ;;  %v6197_v15 = vpop.xlane.xlu0 %6196 }
 0xc93   :  { %v6379_v0 = vmul.f32 %v18005_v14, %v6322_v1  ;;  %v6291_v28 = vsub.f32 2.0, %v6259_v40  ;;  %11491 = vrcp.f32 %v6197_v15  ;;  %v6380_v62 = vmul.f32 %v18006_v6, %v6322_v1 }
 0xc94   :  { %v11486_v51 = vpop.eup %11485 }
 0xc95   :  { %v6323_v59 = vmul.f32 %v11484_v61, %v6291_v28  ;;  %v6260_v32 = vmul.f32 %v11486_v51, %v6188_v39  ;;  %6582 = vmatprep.mubr.f32.mxu0 %v6380_v62  ;;  %v18022_v61 = vld [vmem:[#allocation25_spill] sm:$0xff]  ;;  %v18024_v28 = vld [vmem:[#allocation28_spill] sm:$0xff] }
 0xc96   :  { %v6200_v33 = vpop.xlane.xlu1 %6199  ;;  %6583 = vmatmul.mubr.f32.gmra.mxu0 %v6379_v0  ;;  %v11773_v0 = vld [vmem:[%s17316_s3 + $0x8] sm:$0xff]  ;;  %v11774_v62 = vld [vmem:[%s17316_s3] sm:$0xff] }
 0xc97   :  { %v6381_v37 = vmul.f32 %v18007_v3, %v6323_v59  ;;  %v6292_v54 = vsub.f32 2.0, %v6260_v32  ;;  %11493 = vrcp.f32 %v6200_v33  ;;  %v6382_v29 = vmul.f32 %v18008_v24, %v6323_v59  ;;  %v18027_v3 = vld [vmem:[#allocation30_spill] sm:$0xff] }
 0xc98   :  { %v11488_v18 = vpop.eup %11487 }
 0xc99   :  { %v6324_v42 = vmul.f32 %v11486_v51, %v6292_v54  ;;  %v6261_v53 = vmul.f32 %v11488_v18, %v6191_v49  ;;  %6587 = vmatprep.mubr.f32.mxu0 %v6382_v29 }
 0xc9a   :  { %6588 = vmatmul.mubr.f32.gmra.mxu0 %v6381_v37 }
 0xc9b   :  { %v6383_v23 = vmul.f32 %v18009_v21, %v6324_v42  ;;  %v6293_v45 = vsub.f32 2.0, %v6261_v53  ;;  %v6384_v56 = vmul.f32 %v18010_v58, %v6324_v42 }
 0xc9c   :  { %v11490_v44 = vpop.eup %11489 }
 0xc9d   :  { %v6325_v46 = vmul.f32 %v11488_v18, %v6293_v45  ;;  %v6262_v20 = vmul.f32 %v11490_v44, %v6194_v9  ;;  %6592 = vmatprep.mubr.f32.mxu0 %v6384_v56  ;;  %v18029_v18 = vld [vmem:[#allocation35_spill] sm:$0xff] }
 0xc9e   :  { %6593 = vmatmul.mubr.f32.gmra.mxu0 %v6383_v23  ;;  %v18031_v45 = vld [vmem:[#allocation39_spill] sm:$0xff] }
 0xc9f   :  { %v6385_v30 = vmul.f32 %v18011_v16, %v6325_v46  ;;  %v6294_v36 = vsub.f32 2.0, %v6262_v20  ;;  %v6386_v50 = vmul.f32 %v18012_v34, %v6325_v46  ;;  %v18033_v20 = vld [vmem:[#allocation41_spill] sm:$0xff] }
 0xca0   :  { %v11492_v52 = vpop.eup %11491 }
 0xca1   :  { %v6326_v41 = vmul.f32 %v11490_v44, %v6294_v36  ;;  %v6263_v63 = vmul.f32 %v11492_v52, %v6197_v15  ;;  %6597 = vmatprep.mubr.f32.mxu0 %v6386_v50  ;;  %v18035_v50 = vld [vmem:[#allocation43_spill] sm:$0xff] }
 0xca2   :  { %6598 = vmatmul.mubr.f32.gmra.mxu0 %v6385_v30 }
 0xca3   :  { %v6387_v13 = vmul.f32 %v18013_v31, %v6326_v41  ;;  %v6295_v10 = vsub.f32 2.0, %v6263_v63  ;;  %v6388_v39 = vmul.f32 %v18014_v19, %v6326_v41 }
 0xca4   :  { %v11494_v8 = vpop.eup %11493 }
 0xca5   :  { %v6327_v35 = vmul.f32 %v11492_v52, %v6295_v10  ;;  %v6264_v26 = vmul.f32 %v11494_v8, %v6200_v33  ;;  %6602 = vmatprep.mubr.f32.mxu0 %v6388_v39  ;;  %v18026_v33 = vmov 0.0  }
 0xca6   :  { %6603 = vmatmul.mubr.f32.gmra.mxu0 %v6387_v13  ;;  %v18037_v13 = vld [vmem:[#allocation13_spill] sm:$0xff] }
 0xca7   :  { %v6389_v2 = vmul.f32 %v18015_v4, %v6327_v35  ;;  %v6296_v47 = vsub.f32 2.0, %v6264_v26  ;;  %v6390_v5 = vmul.f32 %v18016_v57, %v6327_v35  ;;  %v18039_v35 = vld [vmem:[#allocation15_spill] sm:$0xff] }
 0xca8   :  { %v18041_v57 = vld [vmem:[#allocation63_spill] sm:$0xff] }
 0xca9   :  { %v6328_v49 = vmul.f32 %v11494_v8, %v6296_v47  ;;  %6607 = vmatprep.mubr.f32.mxu0 %v6390_v5 }
 0xcaa   :  { %6608 = vmatmul.mubr.f32.gmra.mxu0 %v6389_v2 }
 0xcab   :  { %v6391_v17 = vmul.f32 %v18017_v55, %v6328_v49  ;;  %v6392_v43 = vmul.f32 %v18018_v48, %v6328_v49  ;;  %v18043_v48 = vld [vmem:[#allocation64_spill] sm:$0xff] }
 0xcad   :  { %6612 = vmatprep.mubr.f32.mxu0 %v6392_v43 }
 0xcae   :  { %6613 = vmatmul.mubr.f32.gmra.mxu0 %v6391_v17 }
 0xcf2   :  { %v6459_v12 = vpop.f32.mrf.mxu0 }
 0xcf3   :  { %v6618_v11 = vmul.f32 %v6459_v12, %v18019_v7 }
 0xcf4   :  { %v6461_v9 = vpop.f32.mrf.mxu0 }
 0xcf5   :  { %v15861_v60 = vadd.f32 %v6618_v11, %v18020_v25  ;;  %v18045_v25 = vld [vmem:[#allocation65_spill] sm:$0xff] }
 0xcf6   :  { %v6464_v22 = vpop.f32.mrf.mxu0 }
 0xcf7   :  { %18021 = vst [vmem:[#allocation109_spill] sm:$0xff] %v15861_v60  ;;  %v6619_v38 = vmul.f32 %v6464_v22, %v18019_v7  ;;  %10761 = vmatprep.mubr.msk.f32.mxu1 %vm275_vm0, %v15861_v60  ;;  %10813 = vmatprep.mubr.msk.f32.mxu0 %vm275_vm0, %v15861_v60 }
 0xcf8   :  { %v6466_v27 = vpop.f32.mrf.mxu0 }
 0xcf9   :  { %v15869_v1 = vadd.f32 %v6619_v38, %v18022_v61 }
 0xcfa   :  { %v6469_v40 = vpop.f32.mrf.mxu0 }
 0xcfb   :  { %18023 = vst [vmem:[#allocation111_spill] sm:$0xff] %v15869_v1  ;;  %v6620_v15 = vmul.f32 %v6469_v40, %v18019_v7  ;;  %10762 = vmatmul.mubr.msk.f32.vlgmr.msra.gmra.mxu1 %vm275_vm0, %v15869_v1  ;;  %10814 = vmatmul.mubr.msk.f32.vlgmr.msra.gmra.mxu0 %vm275_vm0, %v15869_v1  ;;  %v18047_v40 = vld [vmem:[#allocation67_spill] sm:$0xff] }
 0xcfc   :  { %v6471_v14 = vpop.f32.mrf.mxu0  ;;  %10862 = vmatpush3.msra.mxu1 %v11773_v0 }
 0xcfd   :  { %v15880_v6 = vadd.f32 %v6620_v15, %v18024_v28  ;;  %10863 = vmatprep.subr.mxu1 %v11774_v62 }
 0xcfe   :  { %v6474_v51 = vpop.f32.mrf.mxu0  ;;  %10864 = vmatpush3.msra.mxu1 %v11774_v62  ;;  %v18049_v62 = vld [vmem:[#allocation69_spill] sm:$0xff] }
 0xcff   :  { %18025 = vst [vmem:[#allocation110_spill] sm:$0xff] %v15880_v6  ;;  %v6621_v59 = vmul.f32 %v6474_v51, %v18019_v7  ;;  %10764 = vmatprep.mubr.msk.f32.mxu1 %vm275_vm0, %v15880_v6  ;;  %10816 = vmatprep.mubr.msk.f32.mxu0 %vm275_vm0, %v15880_v6 }
 0xd00   :  { %v6476_v32 = vpop.f32.mrf.mxu0  ;;  %8478 = vmatprep.subr.mxu1 %v18026_v33 }
 0xd01   :  { %v15892_v37 = vadd.f32 %v6621_v59, %v18027_v3 }
 0xd02   :  { %v6479_v54 = vpop.f32.mrf.mxu0 }
 0xd03   :  { %18028 = vst [vmem:[#allocation113_spill] sm:$0xff] %v15892_v37  ;;  %v6622_v24 = vmul.f32 %v6479_v54, %v18019_v7  ;;  %10765 = vmatmul.mubr.msk.f32.gmra.mxu1 %vm275_vm0, %v15892_v37  ;;  %10817 = vmatmul.mubr.msk.f32.gmra.mxu0 %vm275_vm0, %v15892_v37  ;;  %v18051_v54 = vld [vmem:[#allocation70_spill] sm:$0xff] }
 0xd04   :  { %v6481_v29 = vpop.f32.mrf.mxu0 }
 0xd05   :  { %v15900_v42 = vadd.f32 %v6622_v24, %v18029_v18 }
 0xd06   :  { %v6484_v53 = vpop.f32.mrf.mxu0 }
 0xd07   :  { %18030 = vst [vmem:[#allocation112_spill] sm:$0xff] %v15900_v42  ;;  %v6623_v21 = vmul.f32 %v6484_v53, %v18019_v7  ;;  %10767 = vmatprep.mubr.msk.f32.mxu1 %vm275_vm0, %v15900_v42  ;;  %10819 = vmatprep.mubr.msk.f32.mxu0 %vm275_vm0, %v15900_v42 }
 0xd08   :  { %v6486_v23 = vpop.f32.mrf.mxu0 }
 0xd09   :  { %v15908_v58 = vadd.f32 %v6623_v21, %v18031_v45  ;;  %v18053_v21 = vld [vmem:[#allocation33_spill] sm:$0xff] }
 0xd0a   :  { %v6489_v56 = vpop.f32.mrf.mxu0 }
 0xd0b   :  { %18032 = vst [vmem:[#allocation115_spill] sm:$0xff] %v15908_v58  ;;  %v6624_v44 = vmul.f32 %v6489_v56, %v18019_v7  ;;  %10768 = vmatmul.mubr.msk.f32.gmra.mxu1 %vm275_vm0, %v15908_v58  ;;  %10820 = vmatmul.mubr.msk.f32.gmra.mxu0 %vm275_vm0, %v15908_v58 }
 0xd0c   :  { %v6491_v46 = vpop.f32.mrf.mxu0 }
 0xd0d   :  { %v15916_v16 = vadd.f32 %v6624_v44, %v18033_v20  ;;  %v18055_v46 = vld [vmem:[#allocation38_spill] sm:$0xff] }
 0xd0e   :  { %v6494_v30 = vpop.f32.mrf.mxu0 }
 0xd0f   :  { %18034 = vst [vmem:[#allocation114_spill] sm:$0xff] %v15916_v16  ;;  %v6625_v36 = vmul.f32 %v6494_v30, %v18019_v7  ;;  %10770 = vmatprep.mubr.msk.f32.mxu1 %vm275_vm0, %v15916_v16  ;;  %10822 = vmatprep.mubr.msk.f32.mxu0 %vm275_vm0, %v15916_v16 }
 0xd10   :  { %v6496_v34 = vpop.f32.mrf.mxu0 }
 0xd11   :  { %v15924_v52 = vadd.f32 %v6625_v36, %v18035_v50  ;;  %v18057_v50 = vld [vmem:[#allocation40_spill] sm:$0xff] }
 0xd12   :  { %v6499_v41 = vpop.f32.mrf.mxu0 }
 0xd13   :  { %18036 = vst [vmem:[#allocation117_spill] sm:$0xff] %v15924_v52  ;;  %v6626_v63 = vmul.f32 %v6499_v41, %v18019_v7  ;;  %10771 = vmatmul.mubr.msk.f32.gmra.mxu1 %vm275_vm0, %v15924_v52  ;;  %10823 = vmatmul.mubr.msk.f32.gmra.mxu0 %vm275_vm0, %v15924_v52 }
 0xd14   :  { %v6501_v31 = vpop.f32.mrf.mxu0 }
 0xd15   :  { %v15932_v10 = vadd.f32 %v6626_v63, %v18037_v13 }
 0xd16   :  { %v6504_v19 = vpop.f32.mrf.mxu0 }
 0xd17   :  { %18038 = vst [vmem:[#allocation116_spill] sm:$0xff] %v15932_v10  ;;  %v6627_v39 = vmul.f32 %v6504_v19, %v18019_v7  ;;  %10773 = vmatprep.mubr.msk.f32.mxu1 %vm275_vm0, %v15932_v10  ;;  %10825 = vmatprep.mubr.msk.f32.mxu0 %vm275_vm0, %v15932_v10  ;;  %v18059_v19 = vld [vmem:[#allocation42_spill] sm:$0xff] }
 0xd18   :  { %v6506_v8 = vpop.f32.mrf.mxu0 }
 0xd19   :  { %v15940_v26 = vadd.f32 %v6627_v39, %v18039_v35 }
 0xd1a   :  { %v6509_v4 = vpop.f32.mrf.mxu0 }
 0xd1b   :  { %18040 = vst [vmem:[#allocation119_spill] sm:$0xff] %v15940_v26  ;;  %v6628_v2 = vmul.f32 %v6509_v4, %v18019_v7  ;;  %10774 = vmatmul.mubr.msk.f32.gmra.mxu1 %vm275_vm0, %v15940_v26  ;;  %10826 = vmatmul.mubr.msk.f32.gmra.mxu0 %vm275_vm0, %v15940_v26 }
 0xd1c   :  { %v6511_v47 = vpop.f32.mrf.mxu0 }
 0xd1d   :  { %v15948_v5 = vadd.f32 %v6628_v2, %v18041_v57  ;;  %v18061_v2 = vld [vmem:[#allocation36_spill] sm:$0xff] }
 0xd1e   :  { %v6514_v49 = vpop.f32.mrf.mxu0 }
 0xd1f   :  { %18042 = vst [vmem:[#allocation118_spill] sm:$0xff] %v15948_v5  ;;  %v6629_v55 = vmul.f32 %v6514_v49, %v18019_v7  ;;  %10776 = vmatprep.mubr.msk.f32.mxu1 %vm275_vm0, %v15948_v5  ;;  %10828 = vmatprep.mubr.msk.f32.mxu0 %vm275_vm0, %v15948_v5 }
 0xd20   :  { %v6516_v17 = vpop.f32.mrf.mxu0 }
 0xd21   :  { %v15956_v43 = vadd.f32 %v6629_v55, %v18043_v48  ;;  %v18063_v17 = vld [vmem:[#allocation37_spill] sm:$0xff] }
 0xd22   :  { %v6519_v12 = vpop.f32.mrf.mxu0 }
 0xd23   :  { %18044 = vst [vmem:[#allocation120_spill] sm:$0xff] %v15956_v43  ;;  %v6630_v11 = vmul.f32 %v6519_v12, %v18019_v7  ;;  %10777 = vmatmul.mubr.msk.f32.gmra.mxu1 %vm275_vm0, %v15956_v43  ;;  %10829 = vmatmul.mubr.msk.f32.gmra.mxu0 %vm275_vm0, %v15956_v43 }
 0xd24   :  { %v6521_v9 = vpop.f32.mrf.mxu0 }
 0xd25   :  { %v15964_v22 = vadd.f32 %v6630_v11, %v18045_v25  ;;  %v18065_v25 = vld [vmem:[#allocation18_spill] sm:$0xff] }
 0xd26   :  { %v6524_v38 = vpop.f32.mrf.mxu0 }
 0xd27   :  { %18046 = vst [vmem:[#allocation121_spill] sm:$0xff] %v15964_v22  ;;  %v6631_v27 = vmul.f32 %v6524_v38, %v18019_v7  ;;  %10779 = vmatprep.mubr.msk.f32.mxu1 %vm275_vm0, %v15964_v22  ;;  %10831 = vmatprep.mubr.msk.f32.mxu0 %vm275_vm0, %v15964_v22 }
 0xd28   :  { %v6526_v61 = vpop.f32.mrf.mxu0 }
 0xd29   :  { %v15972_v15 = vadd.f32 %v6631_v27, %v18047_v40 }
 0xd2a   :  { %v6529_v14 = vpop.f32.mrf.mxu0 }
 0xd2b   :  { %18048 = vst [vmem:[#allocation122_spill] sm:$0xff] %v15972_v15  ;;  %v6632_v0 = vmul.f32 %v6529_v14, %v18019_v7  ;;  %10780 = vmatmul.mubr.msk.f32.gmra.mxu1 %vm275_vm0, %v15972_v15  ;;  %10832 = vmatmul.mubr.msk.f32.gmra.mxu0 %vm275_vm0, %v15972_v15  ;;  %v18067_v14 = vld [vmem:[#allocation23_spill] sm:$0xff] }
 0xd2c   :  { %v6531_v28 = vpop.f32.mrf.mxu0 }
 0xd2d   :  { %v15980_v51 = vadd.f32 %v6632_v0, %v18049_v62 }
 0xd2e   :  { %v6534_v59 = vpop.f32.mrf.mxu0 }
 0xd2f   :  { %18050 = vst [vmem:[#allocation123_spill] sm:$0xff] %v15980_v51  ;;  %v6633_v32 = vmul.f32 %v6534_v59, %v18019_v7  ;;  %10782 = vmatprep.mubr.msk.f32.mxu1 %vm275_vm0, %v15980_v51  ;;  %10834 = vmatprep.mubr.msk.f32.mxu0 %vm275_vm0, %v15980_v51 }
 0xd30   :  { %v6536_v3 = vpop.f32.mrf.mxu0 }
 0xd31   :  { %v15988_v24 = vadd.f32 %v6633_v32, %v18051_v54  ;;  %v18069_v32 = vld [vmem:[#allocation66_spill] sm:$0xff] }
 0xd32   :  { %v6539_v29 = vpop.f32.mrf.mxu0 }
 0xd33   :  { %18052 = vst [vmem:[#allocation124_spill] sm:$0xff] %v15988_v24  ;;  %v6634_v18 = vmul.f32 %v6539_v29, %v18019_v7  ;;  %10783 = vmatmul.mubr.msk.f32.gmra.mxu1 %vm275_vm0, %v15988_v24  ;;  %10835 = vmatmul.mubr.msk.f32.gmra.mxu0 %vm275_vm0, %v15988_v24 }
 0xd34   :  { %v6541_v53 = vpop.f32.mrf.mxu0 }
 0xd35   :  { %v15996_v23 = vadd.f32 %v6634_v18, %v18053_v21  ;;  %v18071_v53 = vld [vmem:[#allocation68_spill] sm:$0xff] }
 0xd36   :  { %v6544_v45 = vpop.f32.mrf.mxu0 }
 0xd37   :  { %18054 = vst [vmem:[#allocation125_spill] sm:$0xff] %v15996_v23  ;;  %v6635_v56 = vmul.f32 %v6544_v45, %v18019_v7  ;;  %10785 = vmatprep.mubr.msk.f32.mxu1 %vm275_vm0, %v15996_v23  ;;  %10837 = vmatprep.mubr.msk.f32.mxu0 %vm275_vm0, %v15996_v23 }
 0xd38   :  { %v6546_v44 = vpop.f32.mrf.mxu0 }
 0xd39   :  { %v16004_v20 = vadd.f32 %v6635_v56, %v18055_v46  ;;  %v18073_v46 = vld [vmem:[#allocation71_spill] sm:$0xff] }
 0xd3a   :  { %v6549_v30 = vpop.f32.mrf.mxu0 }
 0xd3b   :  { %18056 = vst [vmem:[#allocation126_spill] sm:$0xff] %v16004_v20  ;;  %v6636_v36 = vmul.f32 %v6549_v30, %v18019_v7  ;;  %10786 = vmatmul.mubr.msk.f32.gmra.mxu1 %vm275_vm0, %v16004_v20  ;;  %10838 = vmatmul.mubr.msk.f32.gmra.mxu0 %vm275_vm0, %v16004_v20 }
 0xd3c   :  { %v6551_v34 = vpop.f32.mrf.mxu0 }
 0xd3d   :  { %v16012_v41 = vadd.f32 %v6636_v36, %v18057_v50 }
 0xd3e   :  { %v6554_v63 = vpop.f32.mrf.mxu0 }
 0xd3f   :  { %18058 = vst [vmem:[#allocation127_spill] sm:$0xff] %v16012_v41  ;;  %v6637_v31 = vmul.f32 %v6554_v63, %v18019_v7  ;;  %10788 = vmatprep.mubr.msk.f32.mxu1 %vm275_vm0, %v16012_v41  ;;  %10840 = vmatprep.mubr.msk.f32.mxu0 %vm275_vm0, %v16012_v41  ;;  %v18075_v63 = vld [vmem:[#allocation73_spill] sm:$0xff] }
 0xd40   :  { %v6556_v13 = vpop.f32.mrf.mxu0 }
 0xd41   :  { %v16020_v39 = vadd.f32 %v6637_v31, %v18059_v19 }
 0xd42   :  { %v6559_v8 = vpop.f32.mrf.mxu0 }
 0xd43   :  { %18060 = vst [vmem:[#allocation20_spill] sm:$0xff] %v16020_v39  ;;  %v6638_v35 = vmul.f32 %v6559_v8, %v18019_v7  ;;  %10789 = vmatmul.mubr.msk.f32.gmra.mxu1 %vm275_vm0, %v16020_v39  ;;  %10841 = vmatmul.mubr.msk.f32.gmra.mxu0 %vm275_vm0, %v16020_v39 }
 0xd44   :  { %v6561_v4 = vpop.f32.mrf.mxu0 }
 0xd45   :  { %v16028_v47 = vadd.f32 %v6638_v35, %v18061_v2  ;;  %v18077_v35 = vld [vmem:[#allocation76_spill] sm:$0xff] }
 0xd46   :  { %v6564_v57 = vpop.f32.mrf.mxu0 }
 0xd47   :  { %18062 = vst [vmem:[#allocation25_spill] sm:$0xff] %v16028_v47  ;;  %v6639_v49 = vmul.f32 %v6564_v57, %v18019_v7  ;;  %10791 = vmatprep.mubr.msk.f32.mxu1 %vm275_vm0, %v16028_v47  ;;  %10843 = vmatprep.mubr.msk.f32.mxu0 %vm275_vm0, %v16028_v47 }
 0xd48   :  { %v6566_v55 = vpop.f32.mrf.mxu0 }
 0xd49   :  { %v16036_v48 = vadd.f32 %v6639_v49, %v18063_v17  ;;  %v18079_v55 = vld [vmem:[#allocation78_spill] sm:$0xff] }
 0xd4a   :  { %v6569_v12 = vpop.f32.mrf.mxu0 }
 0xd4b   :  { %18064 = vst [vmem:[#allocation28_spill] sm:$0xff] %v16036_v48  ;;  %v6640_v11 = vmul.f32 %v6569_v12, %v18019_v7  ;;  %10792 = vmatmul.mubr.msk.f32.gmra.mxu1 %vm275_vm0, %v16036_v48  ;;  %10844 = vmatmul.mubr.msk.f32.gmra.mxu0 %vm275_vm0, %v16036_v48 }
 0xd4c   :  { %v6571_v9 = vpop.f32.mrf.mxu0 }
 0xd4d   :  { %v16044_v38 = vadd.f32 %v6640_v11, %v18065_v25  ;;  %v18081_v25 = vld [vmem:[#allocation81_spill] sm:$0xff] }
 0xd4e   :  { %v6574_v27 = vpop.f32.mrf.mxu0 }
 0xd4f   :  { %18066 = vst [vmem:[#allocation30_spill] sm:$0xff] %v16044_v38  ;;  %v6641_v61 = vmul.f32 %v6574_v27, %v18019_v7  ;;  %10794 = vmatprep.mubr.msk.f32.mxu1 %vm275_vm0, %v16044_v38  ;;  %10846 = vmatprep.mubr.msk.f32.mxu0 %vm275_vm0, %v16044_v38 }
 0xd50   :  { %v6576_v40 = vpop.f32.mrf.mxu0 }
 0xd51   :  { %v16052_v0 = vadd.f32 %v6641_v61, %v18067_v14 }
 0xd52   :  { %v6579_v28 = vpop.f32.mrf.mxu0 }
 0xd53   :  { %18068 = vst [vmem:[#allocation35_spill] sm:$0xff] %v16052_v0  ;;  %v6642_v62 = vmul.f32 %v6579_v28, %v18019_v7  ;;  %10795 = vmatmul.mubr.msk.f32.gmra.mxu1 %vm275_vm0, %v16052_v0  ;;  %10847 = vmatmul.mubr.msk.f32.gmra.mxu0 %vm275_vm0, %v16052_v0  ;;  %v18083_v28 = vld [vmem:[#allocation83_spill] sm:$0xff] }
 0xd54   :  { %v6581_v59 = vpop.f32.mrf.mxu0 }
 0xd55   :  { %v16060_v3 = vadd.f32 %v6642_v62, %v18069_v32 }
 0xd56   :  { %v6584_v54 = vpop.f32.mrf.mxu0 }
 0xd57   :  { %18070 = vst [vmem:[#allocation39_spill] sm:$0xff] %v16060_v3  ;;  %v6643_v29 = vmul.f32 %v6584_v54, %v18019_v7  ;;  %10797 = vmatprep.mubr.msk.f32.mxu1 %vm275_vm0, %v16060_v3  ;;  %10849 = vmatprep.mubr.msk.f32.mxu0 %vm275_vm0, %v16060_v3  ;;  %v16191_v54 = vld [vmem:[%s17317_s4] ss:$0 sm:$0xff] }
 0xd58   :  { %v6586_v18 = vpop.f32.mrf.mxu0 }
 0xd59   :  { %v16068_v21 = vadd.f32 %v6643_v29, %v18071_v53 }
 0xd5a   :  { %v6589_v45 = vpop.f32.mrf.mxu0 }
 0xd5b   :  { %18072 = vst [vmem:[#allocation41_spill] sm:$0xff] %v16068_v21  ;;  %v6644_v56 = vmul.f32 %v6589_v45, %v18019_v7  ;;  %10798 = vmatmul.mubr.msk.f32.gmra.mxu1 %vm275_vm0, %v16068_v21  ;;  %10850 = vmatmul.mubr.msk.f32.gmra.mxu0 %vm275_vm0, %v16068_v21 }
 0xd5c   :  { %v6591_v44 = vpop.f32.mrf.mxu0 }
 0xd5d   :  { %v16076_v30 = vadd.f32 %v6644_v56, %v18073_v46 }
 0xd5e   :  { %v6594_v36 = vpop.f32.mrf.mxu0 }
 0xd5f   :  { %18074 = vst [vmem:[#allocation43_spill] sm:$0xff] %v16076_v30  ;;  %v6645_v34 = vmul.f32 %v6594_v36, %v18019_v7  ;;  %10800 = vmatprep.mubr.msk.f32.mxu1 %vm275_vm0, %v16076_v30  ;;  %10852 = vmatprep.mubr.msk.f32.mxu0 %vm275_vm0, %v16076_v30 }
 0xd60   :  { %v6596_v50 = vpop.f32.mrf.mxu0 }
 0xd61   :  { %v16084_v31 = vadd.f32 %v6645_v34, %v18075_v63 }
 0xd62   :  { %v6599_v13 = vpop.f32.mrf.mxu0 }
 0xd63   :  { %18076 = vst [vmem:[#allocation13_spill] sm:$0xff] %v16084_v31  ;;  %v6646_v19 = vmul.f32 %v6599_v13, %v18019_v7  ;;  %10801 = vmatmul.mubr.msk.f32.gmra.mxu1 %vm275_vm0, %v16084_v31  ;;  %10853 = vmatmul.mubr.msk.f32.gmra.mxu0 %vm275_vm0, %v16084_v31 }
 0xd64   :  { %v6601_v8 = vpop.f32.mrf.mxu0 }
 0xd65   :  { %v16092_v4 = vadd.f32 %v6646_v19, %v18077_v35 }
 0xd66   :  { %v6604_v2 = vpop.f32.mrf.mxu0 }
 0xd67   :  { %18078 = vst [vmem:[#allocation15_spill] sm:$0xff] %v16092_v4  ;;  %v6647_v57 = vmul.f32 %v6604_v2, %v18019_v7  ;;  %10803 = vmatprep.mubr.msk.f32.mxu1 %vm275_vm0, %v16092_v4  ;;  %10855 = vmatprep.mubr.msk.f32.mxu0 %vm275_vm0, %v16092_v4 }
 0xd68   :  { %v6606_v49 = vpop.f32.mrf.mxu0 }
 0xd69   :  { %v16100_v17 = vadd.f32 %v6647_v57, %v18079_v55 }
 0xd6a   :  { %v6609_v12 = vpop.f32.mrf.mxu0 }
 0xd6b   :  { %18080 = vst [vmem:[#allocation63_spill] sm:$0xff] %v16100_v17  ;;  %v6648_v11 = vmul.f32 %v6609_v12, %v18019_v7  ;;  %10804 = vmatmul.mubr.msk.f32.gmra.mxu1 %vm275_vm0, %v16100_v17  ;;  %10856 = vmatmul.mubr.msk.f32.gmra.mxu0 %vm275_vm0, %v16100_v17 }
 0xd6c   :  { %v6611_v9 = vpop.f32.mrf.mxu0 }
 0xd6d   :  { %v16108_v27 = vadd.f32 %v6648_v11, %v18081_v25 }
 0xd6e   :  { %v6614_v61 = vpop.f32.mrf.mxu0 }
 0xd6f   :  { %18082 = vst [vmem:[#allocation64_spill] sm:$0xff] %v16108_v27  ;;  %v6649_v40 = vmul.f32 %v6614_v61, %v18019_v7  ;;  %10806 = vmatprep.mubr.msk.f32.mxu1 %vm275_vm0, %v16108_v27  ;;  %10858 = vmatprep.mubr.msk.f32.mxu0 %vm275_vm0, %v16108_v27 }
 0xd70   :  { %v6616_v14 = vpop.f32.mrf.mxu0 }
 0xd71   :  { %v16116_v62 = vadd.f32 %v6649_v40, %v18083_v28 }
 0xd73   :  { %18084 = vst [vmem:[#allocation65_spill] sm:$0xff] %v16116_v62  ;;  %10807 = vmatmul.mubr.msk.f32.gmra.mxu1 %vm275_vm0, %v16116_v62  ;;  %10859 = vmatmul.mubr.msk.f32.gmra.mxu0 %vm275_vm0, %v16116_v62 }
 0xd74   :  { %10865 = vmatprep.mubr.msk.f32.mxu1 %vm275_vm0, %v15861_v60 }
 0xd77   :  { %10866 = vmatmul.mubr.msk.f32.vlgmr.msra.gmra.mxu1 %vm275_vm0, %v15869_v1 }
 0xd78   :  { %10868 = vmatprep.mubr.msk.f32.mxu1 %vm275_vm0, %v15880_v6 }
 0xd7b   :  { %10869 = vmatmul.mubr.msk.f32.gmra.mxu1 %vm275_vm0, %v15892_v37 }
 0xd7c   :  { %10871 = vmatprep.mubr.msk.f32.mxu1 %vm275_vm0, %v15900_v42 }
 0xd7f   :  { %10872 = vmatmul.mubr.msk.f32.gmra.mxu1 %vm275_vm0, %v15908_v58 }
 0xd80   :  { %10874 = vmatprep.mubr.msk.f32.mxu1 %vm275_vm0, %v15916_v16 }
 0xd83   :  { %10875 = vmatmul.mubr.msk.f32.gmra.mxu1 %vm275_vm0, %v15924_v52 }
 0xd84   :  { %10877 = vmatprep.mubr.msk.f32.mxu1 %vm275_vm0, %v15932_v10 }
 0xd87   :  { %10878 = vmatmul.mubr.msk.f32.gmra.mxu1 %vm275_vm0, %v15940_v26 }
 0xd88   :  { %10880 = vmatprep.mubr.msk.f32.mxu1 %vm275_vm0, %v15948_v5 }
 0xd8b   :  { %10881 = vmatmul.mubr.msk.f32.gmra.mxu1 %vm275_vm0, %v15956_v43 }
 0xd8c   :  { %10883 = vmatprep.mubr.msk.f32.mxu1 %vm275_vm0, %v15964_v22 }
 0xd8f   :  { %10884 = vmatmul.mubr.msk.f32.gmra.mxu1 %vm275_vm0, %v15972_v15 }
 0xd90   :  { %10886 = vmatprep.mubr.msk.f32.mxu1 %vm275_vm0, %v15980_v51 }
 0xd93   :  { %10887 = vmatmul.mubr.msk.f32.gmra.mxu1 %vm275_vm0, %v15988_v24 }
 0xd94   :  { %10889 = vmatprep.mubr.msk.f32.mxu1 %vm275_vm0, %v15996_v23 }
 0xd97   :  { %10890 = vmatmul.mubr.msk.f32.gmra.mxu1 %vm275_vm0, %v16004_v20 }
 0xd98   :  { %10892 = vmatprep.mubr.msk.f32.mxu1 %vm275_vm0, %v16012_v41 }
 0xd9b   :  { %10893 = vmatmul.mubr.msk.f32.gmra.mxu1 %vm275_vm0, %v16020_v39 }
 0xd9c   :  { %10895 = vmatprep.mubr.msk.f32.mxu1 %vm275_vm0, %v16028_v47 }
 0xd9f   :  { %10896 = vmatmul.mubr.msk.f32.gmra.mxu1 %vm275_vm0, %v16036_v48 }
 0xda0   :  { %10898 = vmatprep.mubr.msk.f32.mxu1 %vm275_vm0, %v16044_v38 }
 0xda3   :  { %10899 = vmatmul.mubr.msk.f32.gmra.mxu1 %vm275_vm0, %v16052_v0 }
 0xda4   :  { %10901 = vmatprep.mubr.msk.f32.mxu1 %vm275_vm0, %v16060_v3 }
 0xda7   :  { %10902 = vmatmul.mubr.msk.f32.gmra.mxu1 %vm275_vm0, %v16068_v21 }
 0xda8   :  { %10904 = vmatprep.mubr.msk.f32.mxu1 %vm275_vm0, %v16076_v30 }
 0xdab   :  { %10905 = vmatmul.mubr.msk.f32.gmra.mxu1 %vm275_vm0, %v16084_v31 }
 0xdac   :  { %10907 = vmatprep.mubr.msk.f32.mxu1 %vm275_vm0, %v16092_v4 }
 0xdaf   :  { %10908 = vmatmul.mubr.msk.f32.gmra.mxu1 %vm275_vm0, %v16100_v17 }
 0xdb0   :  { %10910 = vmatprep.mubr.msk.f32.mxu1 %vm275_vm0, %v16108_v27 }
 0xdb3   :  { %10911 = vmatmul.mubr.msk.f32.gmra.mxu1 %vm275_vm0, %v16116_v62 }
 0xdbb   :  { %v16186_v59 = vpop.f32.mrf.mxu1  ;;  %v16198_v18 = vpop.f32.mrf.mxu0 }
 0xdbd   :  { %v6844_v32 = vpop.f32.mrf.mxu1  ;;  %v16200_v53 = vpop.f32.mrf.mxu0 }
 0xdbe   :  { %v16194_v29 = vadd.f32 %v16191_v54, %v6844_v32 }
 0xdc0   :  { %10225 = vmatprep.mubr.msk.f32.mxu0 %vm1059_vm1, %v16194_v29 }
 0xdc3   :  { %v16202_v45 = vpop.f32.mrf.mxu1  ;;  %v16204_v56 = vpop.f32.mrf.mxu0 }
 0xdc5   :  { %v16206_v44 = vpop.f32.mrf.mxu1  ;;  %v16208_v46 = vpop.f32.mrf.mxu0 }
 0xdcb   :  { %v16210_v36 = vpop.f32.mrf.mxu1  ;;  %v16212_v34 = vpop.f32.mrf.mxu0 }
 0xdcd   :  { %v16214_v50 = vpop.f32.mrf.mxu1  ;;  %v16216_v63 = vpop.f32.mrf.mxu0 }
 0xdd3   :  { %v16218_v13 = vpop.f32.mrf.mxu1  ;;  %v16220_v19 = vpop.f32.mrf.mxu0 }
 0xdd5   :  { %v16222_v8 = vpop.f32.mrf.mxu1  ;;  %v16224_v35 = vpop.f32.mrf.mxu0 }
 0xddb   :  { %v16226_v2 = vpop.f32.mrf.mxu1  ;;  %v16228_v57 = vpop.f32.mrf.mxu0 }
 0xddd   :  { %v16230_v49 = vpop.f32.mrf.mxu1  ;;  %v16232_v55 = vpop.f32.mrf.mxu0 }
 0xde3   :  { %v16234_v12 = vpop.f32.mrf.mxu1  ;;  %v16236_v11 = vpop.f32.mrf.mxu0 }
 0xde5   :  { %v16238_v9 = vpop.f32.mrf.mxu1  ;;  %v16240_v25 = vpop.f32.mrf.mxu0 }
 0xdeb   :  { %v16242_v61 = vpop.f32.mrf.mxu1  ;;  %v10833_v40 = vpop.f32.mrf.mxu0 }
 0xded   :  { %v16244_v14 = vpop.f32.mrf.mxu1  ;;  %v7129_v28 = vpop.f32.mrf.mxu0 }
 0xdf3   :  { %v16246_v32 = vpop.f32.mrf.mxu1  ;;  %v10836_v62 = vpop.f32.mrf.mxu0 }
 0xdf5   :  { %v16248_v27 = vpop.f32.mrf.mxu1  ;;  %v7139_v17 = vpop.f32.mrf.mxu0 }
 0xdfb   :  { %v16250_v4 = vpop.f32.mrf.mxu1  ;;  %v16252_v31 = vpop.f32.mrf.mxu0 }
 0xdfd   :  { %v16254_v30 = vpop.f32.mrf.mxu1  ;;  %v16256_v21 = vpop.f32.mrf.mxu0 }
 0xe03   :  { %v16258_v3 = vpop.f32.mrf.mxu1  ;;  %v16260_v0 = vpop.f32.mrf.mxu0 }
 0xe05   :  { %v16262_v38 = vpop.f32.mrf.mxu1  ;;  %v16264_v48 = vpop.f32.mrf.mxu0 }
 0xe0b   :  { %v16266_v47 = vpop.f32.mrf.mxu1  ;;  %v16268_v39 = vpop.f32.mrf.mxu0 }
 0xe0d   :  { %v16270_v41 = vpop.f32.mrf.mxu1  ;;  %v16272_v20 = vpop.f32.mrf.mxu0 }
 0xe13   :  { %v16274_v23 = vpop.f32.mrf.mxu1  ;;  %v16276_v24 = vpop.f32.mrf.mxu0 }
 0xe14   :  { %18085 = vst [vmem:[#allocation67_spill] sm:$0xff] %v16274_v23 }
 0xe15   :  { %v16278_v51 = vpop.f32.mrf.mxu1  ;;  %v16280_v15 = vpop.f32.mrf.mxu0 }
 0xe16   :  { %18086 = vst [vmem:[#allocation69_spill] sm:$0xff] %v16278_v51 }
 0xe1b   :  { %v16282_v22 = vpop.f32.mrf.mxu1  ;;  %v10851_v43 = vpop.f32.mrf.mxu0 }
 0xe1c   :  { %18087 = vst [vmem:[#allocation70_spill] sm:$0xff] %v16282_v22  ;;  %v16299_v22 = vld [vmem:[%s17318_s5] ss:$0 sm:$0xff] }
 0xe1d   :  { %v16284_v5 = vpop.f32.mrf.mxu1  ;;  %v7189_v26 = vpop.f32.mrf.mxu0 }
 0xe1e   :  { %18088 = vst [vmem:[#allocation33_spill] sm:$0xff] %v16284_v5  ;;  %v7145_v5 = vadd.f32 %v16299_v22, %v10836_v62 }
 0xe23   :  { %v16286_v10 = vpop.f32.mrf.mxu1  ;;  %v10854_v52 = vpop.f32.mrf.mxu0 }
 0xe24   :  { %18089 = vst [vmem:[#allocation38_spill] sm:$0xff] %v16286_v10 }
 0xe25   :  { %v16288_v16 = vpop.f32.mrf.mxu1  ;;  %v7199_v58 = vpop.f32.mrf.mxu0 }
 0xe26   :  { %18090 = vst [vmem:[#allocation40_spill] sm:$0xff] %v16288_v16 }
 0xe2b   :  { %v16290_v42 = vpop.f32.mrf.mxu1  ;;  %v10857_v37 = vpop.f32.mrf.mxu0 }
 0xe2c   :  { %18091 = vst [vmem:[#allocation42_spill] sm:$0xff] %v16290_v42 }
 0xe2d   :  { %v16292_v6 = vpop.f32.mrf.mxu1  ;;  %v7209_v1 = vpop.f32.mrf.mxu0 }
 0xe2e   :  { %18092 = vst [vmem:[#allocation36_spill] sm:$0xff] %v16292_v6 }
 0xe33   :  { %v16294_v60 = vpop.f32.mrf.mxu1  ;;  %v10860_v7 = vpop.f32.mrf.mxu0 }
 0xe34   :  { %18093 = vst [vmem:[#allocation37_spill] sm:$0xff] %v16294_v60  ;;  %v7225_v10 = vadd.f32 %v16299_v22, %v10860_v7  ;;  %v7140_v60 = vadd.f32 %v16299_v22, %v7139_v17  ;;  %v7215_v7 = vadd.f32 %v16299_v22, %v10857_v37  ;;  %v7130_v37 = vadd.f32 %v16299_v22, %v7129_v28 }
 0xe35   :  { %v16303_v16 = vpop.f32.mrf.mxu1  ;;  %v7219_v23 = vpop.f32.mrf.mxu0 }
 0xe36   :  { %18094 = vst [vmem:[#allocation18_spill] sm:$0xff] %v16303_v16  ;;  %v7220_v42 = vadd.f32 %v16299_v22, %v7219_v23  ;;  %10193 = vmatprep.subr.msk.mxu0 %vm1059_vm1, %v7225_v10  ;;  %v7135_v10 = vadd.f32 %v16299_v22, %v10833_v40 }
 0xe37   :  { %v16307_v6 = vpop.f32.mrf.mxu1  ;;  %10194 = vmatpush3.xpose.msk.msra.mxu0 %vm1059_vm1, %v7145_v5  ;;  %v7210_v5 = vadd.f32 %v16299_v22, %v7209_v1  ;;  %v7125_v1 = vadd.f32 %v16299_v22, %v16236_v11  ;;  %v7115_v11 = vadd.f32 %v16299_v22, %v16228_v57  ;;  %v16360_v57 = vld [vmem:[%s17319_s6] ss:$0 sm:$0xff]  ;;  %s11913_s6 = smov [#allocation8]  }
 0xe38   :  { %10195 = vmatprep.subr.msk.mxu0 %vm1059_vm1, %v7220_v42  ;;  %s8841_s23 = sshll.u32 %s11913_s6, 4  ;;  %s8842_s23 = int_to_ptr.vmem [resolvable:$true] %s8841_s23 }
 0xe39   :  { %v16312_v51 = vpop.f32.mrf.mxu1  ;;  %s11882_s7 = scalar_lea.vmem %s8842_s23, 1024  ;;  %p11887_p11 = scmp.lt.s32.totalorder %s8842_s23, %s8842_s23 }
 0xe3a   :  { %p11883_p10 = scmp.ne.s32.totalorder %s8842_s23, %s11882_s7  ;;  %p11888_p12 = scmp.lt.s32.totalorder %s11882_s7, %s11882_s7 }
 0xe3b   :  { %v16315_v62 = vpop.f32.mrf.mxu1  ;;  %10196 = vmatpush3.xpose.msk.msra.mxu0 %vm1059_vm1, %v7140_v60  ;;  %v7205_v60 = vadd.f32 %v16299_v22, %v10854_v52  ;;  %v7120_v52 = vadd.f32 %v16299_v22, %v16240_v25  ;;  %v7110_v25 = vadd.f32 %v16299_v22, %v16232_v55 }
 0xe3c   :  { %10197 = vmatprep.subr.msk.mxu0 %vm1059_vm1, %v7215_v7  ;;  %v7200_v7 = vadd.f32 %v16299_v22, %v7199_v58  ;;  %p11889_p13 = por %p11888_p12, %p11887_p11 }
 0xe3d   :  { %v16320_v23 = vpop.f32.mrf.mxu1 }
 0xe3e   :  { %p11890_p0 = pnand %p11889_p13, %p11883_p10 }
 0xe3f   :  { %v16323_v16 = vpop.f32.mrf.mxu1  ;;  %10198 = vmatpush3.xpose.msk.msra.mxu0 %vm1059_vm1, %v7135_v10 }
 0xe40   :  { %10199 = vmatprep.subr.msk.mxu0 %vm1059_vm1, %v7210_v5  ;;  %v7195_v5 = vadd.f32 %v16299_v22, %v10851_v43 }
 0xe41   :  { %v16328_v42 = vpop.f32.mrf.mxu1 }
 0xe43   :  { %v16331_v17 = vpop.f32.mrf.mxu1  ;;  %10200 = vmatpush3.xpose.msk.msra.mxu0 %vm1059_vm1, %v7130_v37 }
 0xe44   :  { %10201 = vmatprep.subr.msk.mxu0 %vm1059_vm1, %v7205_v60  ;;  %v7190_v60 = vadd.f32 %v16299_v22, %v7189_v26 }
 0xe45   :  { %v16337_v40 = vpop.f32.mrf.mxu1 }
 0xe47   :  { %v10879_v10 = vpop.f32.mrf.mxu1  ;;  %10202 = vmatpush3.xpose.msk.msra.mxu0 %vm1059_vm1, %v7125_v1 }
 0xe48   :  { %10203 = vmatprep.subr.msk.mxu0 %vm1059_vm1, %v7200_v7  ;;  %v7185_v7 = vadd.f32 %v16299_v22, %v16276_v24 }
 0xe49   :  { %v7334_v28 = vpop.f32.mrf.mxu1 }
 0xe4b   :  { %v10882_v37 = vpop.f32.mrf.mxu1  ;;  %10204 = vmatpush3.xpose.msk.msra.mxu0 %vm1059_vm1, %v7120_v52 }
 0xe4c   :  { %10205 = vmatprep.subr.msk.mxu0 %vm1059_vm1, %v7195_v5  ;;  %v7105_v5 = vadd.f32 %v16299_v22, %v16220_v19  ;;  %v7100_v19 = vadd.f32 %v16299_v22, %v16224_v35  ;;  %v7095_v35 = vadd.f32 %v16299_v22, %v16212_v34  ;;  %v7090_v34 = vadd.f32 %v16299_v22, %v16216_v63 }
 0xe4d   :  { %v7344_v58 = vpop.f32.mrf.mxu1  ;;  %v7085_v63 = vadd.f32 %v16299_v22, %v16204_v56  ;;  %v7320_v56 = vadd.f32 %v16360_v57, %v16323_v16  ;;  %v7310_v16 = vadd.f32 %v16360_v57, %v16315_v62  ;;  %v7300_v62 = vadd.f32 %v16360_v57, %v16307_v6 }
 0xe4f   :  { %v10885_v1 = vpop.f32.mrf.mxu1  ;;  %10206 = vmatpush3.xpose.msk.msra.mxu0 %vm1059_vm1, %v7115_v11  ;;  %v7180_v11 = vadd.f32 %v16299_v22, %v16280_v15  ;;  %v7175_v15 = vadd.f32 %v16299_v22, %v16268_v39  ;;  %v7170_v39 = vadd.f32 %v16299_v22, %v16272_v20  ;;  %v7165_v20 = vadd.f32 %v16299_v22, %v16260_v0 }
 0xe50   :  { %10207 = vmatprep.subr.msk.mxu0 %vm1059_vm1, %v7190_v60  ;;  %v7160_v0 = vadd.f32 %v16299_v22, %v16264_v48 }
 0xe51   :  { %v7354_v43 = vpop.f32.mrf.mxu1 }
 0xe53   :  { %v10888_v52 = vpop.f32.mrf.mxu1  ;;  %10208 = vmatpush3.xpose.msk.msra.mxu0 %vm1059_vm1, %v7110_v25  ;;  %v7360_v25 = vadd.f32 %v16360_v57, %v10885_v1  ;;  %v7350_v1 = vadd.f32 %v16360_v57, %v10882_v37  ;;  %v7340_v37 = vadd.f32 %v16360_v57, %v10879_v10  ;;  %v7330_v10 = vadd.f32 %v16360_v57, %v16331_v17 }
 0xe54   :  { %v7370_v26 = vadd.f32 %v16360_v57, %v10888_v52  ;;  %10209 = vmatprep.subr.msk.mxu0 %vm1059_vm1, %v7185_v7  ;;  %v7355_v52 = vadd.f32 %v16360_v57, %v7354_v43  ;;  %v7345_v43 = vadd.f32 %v16360_v57, %v7344_v58  ;;  %v7335_v58 = vadd.f32 %v16360_v57, %v7334_v28 }
 0xe55   :  { %v7364_v55 = vpop.f32.mrf.mxu1  ;;  %v7325_v28 = vadd.f32 %v16360_v57, %v16337_v40  ;;  %v7080_v17 = vadd.f32 %v16299_v22, %v16208_v46  ;;  %v7155_v40 = vadd.f32 %v16299_v22, %v16252_v31  ;;  %v7075_v46 = vadd.f32 %v16299_v22, %v16198_v18 }
 0xe56   :  { %v7365_v24 = vadd.f32 %v16360_v57, %v7364_v55  ;;  %8479 = vmatpush1.msra.mxu1 %v7370_v26  ;;  %v7150_v31 = vadd.f32 %v16299_v22, %v16256_v21  ;;  %v7070_v18 = vadd.f32 %v16299_v22, %v16200_v53  ;;  %v7295_v21 = vadd.f32 %v16360_v57, %v16312_v51 }
 0xe57   :  { %v16369_v60 = vpop.f32.mrf.mxu1  ;;  %10210 = vmatpush3.xpose.msk.msra.mxu0 %vm1059_vm1, %v7105_v5  ;;  %8480 = vmatprep.subr.mxu1 %v18026_v33  ;;  %v6855_v53 = vadd.f32 %v16191_v54, %v16206_v44 }
 0xe58   :  { %10211 = vmatprep.subr.msk.mxu0 %vm1059_vm1, %v7180_v11  ;;  %8481 = vmatpush1.msra.mxu1 %v7365_v24 }
 0xe59   :  { %v16377_v7 = vpop.f32.mrf.mxu1  ;;  %8482 = vmatprep.subr.mxu1 %v18026_v33 }
 0xe5a   :  { %8483 = vmatpush1.msra.mxu1 %v7360_v25 }
 0xe5b   :  { %v16383_v26 = vpop.f32.mrf.mxu1  ;;  %10212 = vmatpush3.xpose.msk.msra.mxu0 %vm1059_vm1, %v7100_v19  ;;  %8484 = vmatprep.subr.mxu1 %v18026_v33 }
 0xe5c   :  { %10213 = vmatprep.subr.msk.mxu0 %vm1059_vm1, %v7175_v15  ;;  %8485 = vmatpush1.msra.mxu1 %v7355_v52  ;;  %v7315_v15 = vadd.f32 %v16360_v57, %v16328_v42  ;;  %v7305_v42 = vadd.f32 %v16360_v57, %v16320_v23 }
 0xe5d   :  { %v16391_v5 = vpop.f32.mrf.mxu1  ;;  %8486 = vmatprep.subr.mxu1 %v18026_v33 }
 0xe5e   :  { %8487 = vmatpush1.msra.mxu1 %v7350_v1 }
 0xe5f   :  { %v16397_v55 = vpop.f32.mrf.mxu1  ;;  %10214 = vmatpush3.xpose.msk.msra.mxu0 %vm1059_vm1, %v7095_v35  ;;  %8488 = vmatprep.subr.mxu1 %v18026_v33 }
 0xe60   :  { %10215 = vmatprep.subr.msk.mxu0 %vm1059_vm1, %v7170_v39  ;;  %8489 = vmatpush1.msra.mxu1 %v7345_v43  ;;  %v6850_v43 = vadd.f32 %v16191_v54, %v16186_v59 }
 0xe61   :  { %v16405_v11 = vpop.f32.mrf.mxu1  ;;  %8490 = vmatprep.subr.mxu1 %v18026_v33 }
 0xe62   :  { %8491 = vmatpush1.msra.mxu1 %v7340_v37 }
 0xe63   :  { %v16411_v24 = vpop.f32.mrf.mxu1  ;;  %10216 = vmatpush3.xpose.msk.msra.mxu0 %vm1059_vm1, %v7090_v34  ;;  %8492 = vmatprep.subr.mxu1 %v18026_v33  ;;  %v6860_v34 = vadd.f32 %v16191_v54, %v16202_v45 }
 0xe64   :  { %10217 = vmatprep.subr.msk.mxu0 %vm1059_vm1, %v7165_v20  ;;  %8493 = vmatpush1.msra.mxu1 %v7335_v58  ;;  %v6865_v58 = vadd.f32 %v16191_v54, %v16214_v50 }
 0xe65   :  { %v16420_v25 = vpop.f32.mrf.mxu1  ;;  %8494 = vmatprep.subr.mxu1 %v18026_v33 }
 0xe66   :  { %8495 = vmatpush1.msra.mxu1 %v7330_v10  ;;  %v7410_v10 = vadd.f32 %v16360_v57, %v16411_v24  ;;  %v7405_v50 = vadd.f32 %v16360_v57, %v16420_v25  ;;  %v6875_v24 = vadd.f32 %v16191_v54, %v16222_v8  ;;  %v7390_v25 = vadd.f32 %v16360_v57, %v16383_v26 }
 0xe67   :  { %v16427_v19 = vpop.f32.mrf.mxu1  ;;  %10218 = vmatpush3.xpose.msk.msra.mxu0 %vm1059_vm1, %v7085_v63  ;;  %8496 = vmatprep.subr.mxu1 %v18026_v33  ;;  %v6870_v63 = vadd.f32 %v16191_v54, %v16210_v36  ;;  %v7395_v36 = vadd.f32 %v16360_v57, %v16405_v11  ;;  %v7385_v8 = vadd.f32 %v16360_v57, %v16391_v5  ;;  %v18097_v5 = vld [vmem:[#allocation33_spill] sm:$0xff] }
 0xe68   :  { %10219 = vmatprep.subr.msk.mxu0 %vm1059_vm1, %v7160_v0  ;;  %8497 = vmatpush1.msra.mxu1 %v7325_v28  ;;  %v7420_v20 = vadd.f32 %v16360_v57, %v16427_v19  ;;  %v7400_v0 = vadd.f32 %v16360_v57, %v16397_v55  ;;  %v6880_v55 = vadd.f32 %v16191_v54, %v16218_v13  ;;  %v18098_v28 = vld [vmem:[#allocation70_spill] sm:$0xff] }
 0xe69   :  { %v16436_v48 = vpop.f32.mrf.mxu1  ;;  %8498 = vmatprep.subr.mxu1 %v18026_v33  ;;  %v7380_v11 = vadd.f32 %v16360_v57, %v16369_v60  ;;  %v6885_v26 = vadd.f32 %v16191_v54, %v16230_v49  ;;  %v7375_v13 = vadd.f32 %v16360_v57, %v16377_v7  ;;  %v6890_v60 = vadd.f32 %v16191_v54, %v16226_v2  ;;  %v18096_v7 = vld [vmem:[#allocation67_spill] sm:$0xff] }
 0xe6a   :  { %8499 = vmatpush1.msra.mxu1 %v7320_v56  ;;  %v7415_v45 = vadd.f32 %v16360_v57, %v16436_v48  ;;  %v6895_v49 = vadd.f32 %v16191_v54, %v16238_v9  ;;  %v6910_v2 = vadd.f32 %v16191_v54, %v16242_v61  ;;  %v6920_v9 = vadd.f32 %v16191_v54, %v16246_v32  ;;  %v18095_v32 = vld [vmem:[#allocation69_spill] sm:$0xff]  ;;  %v18099_v56 = vld [vmem:[#allocation40_spill] sm:$0xff]  ;;  %v18100_v48 = vld [vmem:[#allocation38_spill] sm:$0xff] }
 0xe6b   :  { %v10906_v52 = vpop.f32.mrf.mxu1  ;;  %10220 = vmatpush3.xpose.msk.msra.mxu0 %vm1059_vm1, %v7080_v17  ;;  %8500 = vmatprep.subr.mxu1 %v18026_v33  ;;  %v6925_v61 = vadd.f32 %v16191_v54, %v16254_v30  ;;  %v6940_v30 = vadd.f32 %v16191_v54, %v16258_v3  ;;  %v6955_v3 = vadd.f32 %v16191_v54, %v18095_v32  ;;  %v11790_v32 = vld [vmem:[#allocation6 + $0x260] sm:$0xff] }
 0xe6c   :  { %10221 = vmatprep.subr.msk.mxu0 %vm1059_vm1, %v7155_v40  ;;  %8501 = vmatpush1.msra.mxu1 %v7315_v15  ;;  %v6970_v19 = vadd.f32 %v16191_v54, %v18098_v28  ;;  %v6975_v17 = vadd.f32 %v16191_v54, %v18099_v56  ;;  %v6980_v40 = vadd.f32 %v16191_v54, %v18100_v48  ;;  %v18101_v15 = vld [vmem:[#allocation36_spill] sm:$0xff] }
 0xe6d   :  { %v7424_v1 = vpop.f32.mrf.mxu1  ;;  %8502 = vmatprep.subr.mxu1 %v18026_v33 }
 0xe6e   :  { %8503 = vmatpush1.msra.mxu1 %v7310_v16  ;;  %v7425_v44 = vadd.f32 %v16360_v57, %v7424_v1  ;;  %v18102_v16 = vld [vmem:[#allocation42_spill] sm:$0xff] }
 0xe6f   :  { %v10909_v35 = vpop.f32.mrf.mxu1  ;;  %10222 = vmatpush3.xpose.msk.msra.mxu0 %vm1059_vm1, %v7075_v46  ;;  %8504 = vmatprep.subr.mxu1 %v18026_v33  ;;  %v6990_v46 = vadd.f32 %v16191_v54, %v18102_v16  ;;  %v18103_v1 = vld [vmem:[#allocation18_spill] sm:$0xff]  ;;  %v11794_v16 = vld [vmem:[#allocation6 + $0x280] sm:$0xff] }
 0xe70   :  { %10223 = vmatprep.subr.msk.mxu0 %vm1059_vm1, %v7150_v31  ;;  %8505 = vmatpush1.msra.mxu1 %v7305_v42  ;;  %v7440_v51 = vadd.f32 %v16360_v57, %v10909_v35  ;;  %v6995_v31 = vadd.f32 %v16191_v54, %v18103_v1  ;;  %v18104_v42 = vld [vmem:[#allocation37_spill] sm:$0xff] }
 0xe71   :  { %v7434_v39 = vpop.f32.mrf.mxu1  ;;  %8506 = vmatprep.subr.mxu1 %v18026_v33  ;;  %v7000_v35 = vadd.f32 %v16191_v54, %v18104_v42  ;;  %v11795_v1 = vld [vmem:[#allocation6 + $0x288] sm:$0xff] }
 0xe72   :  { %8507 = vmatpush1.msra.mxu1 %v7300_v62  ;;  %v7435_v59 = vadd.f32 %v16360_v57, %v7434_v39  ;;  %v11778_v39 = vld [vmem:[#allocation6 + $0x200] sm:$0xff] }
 0xe73   :  { %v10912_v23 = vpop.f32.mrf.mxu1  ;;  %10224 = vmatpush3.xpose.msk.msra.mxu0 %vm1059_vm1, %v7070_v18  ;;  %8508 = vmatprep.subr.mxu1 %v18026_v33 }
 0xe74   :  { %v7450_v6 = vadd.f32 %v16360_v57, %v10912_v23  ;;  %8509 = vmatpush1.msra.mxu1 %v7295_v21  ;;  %v11779_v23 = vld [vmem:[#allocation6 + $0x208] sm:$0xff] }
 0xe75   :  { %v7444_v37 = vpop.f32.mrf.mxu1  ;;  %8510 = vmatprep.subr.mxu1 %v18026_v33 }
 0xe76   :  { %v7445_v22 = vadd.f32 %v16360_v57, %v7444_v37  ;;  %10226 = vmatmul.mubr.msk.f32.vlgmr.msra.gmra.mxu0 %vm1059_vm1, %v16194_v29  ;;  %8511 = vmatpush2.msra.mxu1 %v7450_v6  ;;  %v7430_v29 = vadd.f32 %v16360_v57, %v10906_v52  ;;  %v6900_v57 = vadd.f32 %v16191_v54, %v16234_v12 }
 0xe77   :  { %10227 = vmatprep.mubr.msk.f32.mxu0 %vm1059_vm1, %v6850_v43  ;;  %8512 = vmatprep.subr.mxu1 %v18026_v33  ;;  %v6915_v12 = vadd.f32 %v16191_v54, %v16248_v27  ;;  %v6930_v27 = vadd.f32 %v16191_v54, %v16250_v4  ;;  %v6945_v4 = vadd.f32 %v16191_v54, %v16270_v41 }
 0xe78   :  { %8513 = vmatpush2.msra.mxu1 %v7445_v22  ;;  %v6960_v41 = vadd.f32 %v16191_v54, %v18096_v7  ;;  %v6985_v52 = vadd.f32 %v16191_v54, %v18101_v15  ;;  %v11791_v7 = vld [vmem:[#allocation6 + $0x268] sm:$0xff] }
 0xe79   :  { %8514 = vmatprep.subr.mxu1 %v18026_v33 }
 0xe7a   :  { %10228 = vmatmul.mubr.msk.f32.gmra.mxu0 %vm1059_vm1, %v6850_v43  ;;  %8515 = vmatpush2.msra.mxu1 %v7440_v51 }
 0xe7b   :  { %10229 = vmatprep.mubr.msk.f32.mxu0 %vm1059_vm1, %v6855_v53  ;;  %8516 = vmatprep.subr.mxu1 %v18026_v33 }
 0xe7c   :  { %8517 = vmatpush2.msra.mxu1 %v7435_v59 }
 0xe7d   :  { %8518 = vmatprep.subr.mxu1 %v18026_v33 }
 0xe7e   :  { %10230 = vmatmul.mubr.msk.f32.gmra.mxu0 %vm1059_vm1, %v6855_v53  ;;  %8519 = vmatpush2.msra.mxu1 %v7430_v29  ;;  %v11781_v53 = vld [vmem:[#allocation6 + $0x218] sm:$0xff] }
 0xe7f   :  { %10231 = vmatprep.mubr.msk.f32.mxu0 %vm1059_vm1, %v6860_v34  ;;  %8520 = vmatprep.subr.mxu1 %v18026_v33 }
 0xe80   :  { %8521 = vmatpush2.msra.mxu1 %v7425_v44 }
 0xe81   :  { %8522 = vmatprep.subr.mxu1 %v18026_v33 }
 0xe82   :  { %10232 = vmatmul.mubr.msk.f32.gmra.mxu0 %vm1059_vm1, %v6860_v34  ;;  %8523 = vmatpush2.msra.mxu1 %v7420_v20  ;;  %v11782_v20 = vld [vmem:[#allocation6 + $0x220] sm:$0xff] }
 0xe83   :  { %10233 = vmatprep.mubr.msk.f32.mxu0 %vm1059_vm1, %v6865_v58  ;;  %8524 = vmatprep.subr.mxu1 %v18026_v33 }
 0xe84   :  { %8525 = vmatpush2.msra.mxu1 %v7415_v45  ;;  %v11783_v45 = vld [vmem:[#allocation6 + $0x228] sm:$0xff] }
 0xe85   :  { %8526 = vmatprep.subr.mxu1 %v18026_v33 }
 0xe86   :  { %10234 = vmatmul.mubr.msk.f32.gmra.mxu0 %vm1059_vm1, %v6865_v58  ;;  %8527 = vmatpush2.msra.mxu1 %v7410_v10 }
 0xe87   :  { %10235 = vmatprep.mubr.msk.f32.mxu0 %vm1059_vm1, %v6870_v63  ;;  %8528 = vmatprep.subr.mxu1 %v18026_v33 }
 0xe88   :  { %8529 = vmatpush2.msra.mxu1 %v7405_v50 }
 0xe89   :  { %8530 = vmatprep.subr.mxu1 %v18026_v33 }
 0xe8a   :  { %10236 = vmatmul.mubr.msk.f32.gmra.mxu0 %vm1059_vm1, %v6870_v63  ;;  %8531 = vmatpush2.msra.mxu1 %v7400_v0 }
 0xe8b   :  { %10237 = vmatprep.mubr.msk.f32.mxu0 %vm1059_vm1, %v6875_v24  ;;  %8532 = vmatprep.subr.mxu1 %v18026_v33 }
 0xe8c   :  { %8533 = vmatpush2.msra.mxu1 %v7395_v36 }
 0xe8d   :  { %8534 = vmatprep.subr.mxu1 %v18026_v33 }
 0xe8e   :  { %10238 = vmatmul.mubr.msk.f32.gmra.mxu0 %vm1059_vm1, %v6875_v24  ;;  %8535 = vmatpush2.msra.mxu1 %v7390_v25  ;;  %v11784_v24 = vld [vmem:[#allocation6 + $0x230] sm:$0xff]  ;;  %v11785_v25 = vld [vmem:[#allocation6 + $0x238] sm:$0xff] }
 0xe8f   :  { %10239 = vmatprep.mubr.msk.f32.mxu0 %vm1059_vm1, %v6880_v55  ;;  %8536 = vmatprep.subr.mxu1 %v18026_v33 }
 0xe90   :  { %8537 = vmatpush2.msra.mxu1 %v7385_v8 }
 0xe91   :  { %8538 = vmatprep.subr.mxu1 %v18026_v33 }
 0xe92   :  { %10240 = vmatmul.mubr.msk.f32.gmra.mxu0 %vm1059_vm1, %v6880_v55  ;;  %8539 = vmatpush2.msra.mxu1 %v7380_v11 }
 0xe93   :  { %10241 = vmatprep.mubr.msk.f32.mxu0 %vm1059_vm1, %v6885_v26  ;;  %8540 = vmatprep.subr.mxu1 %v18026_v33  ;;  %v6905_v33 = vadd.f32 %v16191_v54, %v16244_v14  ;;  %v6935_v14 = vadd.f32 %v16191_v54, %v16262_v38  ;;  %v6950_v38 = vadd.f32 %v16191_v54, %v16266_v47 }
 0xe94   :  { %8541 = vmatpush2.msra.mxu1 %v7375_v13  ;;  %v6965_v47 = vadd.f32 %v16191_v54, %v18097_v5  ;;  %v11780_v54 = vld [vmem:[#allocation6 + $0x210] sm:$0xff]  ;;  %v11786_v13 = vld [vmem:[#allocation6 + $0x240] sm:$0xff] }
 0xe96   :  { %10242 = vmatmul.mubr.msk.f32.gmra.mxu0 %vm1059_vm1, %v6885_v26 }
 0xe97   :  { %10243 = vmatprep.mubr.msk.f32.mxu0 %vm1059_vm1, %v6890_v60 }
 0xe9a   :  { %10244 = vmatmul.mubr.msk.f32.gmra.mxu0 %vm1059_vm1, %v6890_v60 }
 0xe9b   :  { %10245 = vmatprep.mubr.msk.f32.mxu0 %vm1059_vm1, %v6895_v49 }
 0xe9e   :  { %10246 = vmatmul.mubr.msk.f32.gmra.mxu0 %vm1059_vm1, %v6895_v49  ;;  %v11787_v49 = vld [vmem:[#allocation6 + $0x248] sm:$0xff] }
 0xe9f   :  { %10247 = vmatprep.mubr.msk.f32.mxu0 %vm1059_vm1, %v6900_v57 }
 0xea2   :  { %10248 = vmatmul.mubr.msk.f32.gmra.mxu0 %vm1059_vm1, %v6900_v57 }
 0xea3   :  { %10249 = vmatprep.mubr.msk.f32.mxu0 %vm1059_vm1, %v6905_v33 }
 0xea6   :  { %10250 = vmatmul.mubr.msk.f32.gmra.mxu0 %vm1059_vm1, %v6905_v33 }
 0xea7   :  { %10251 = vmatprep.mubr.msk.f32.mxu0 %vm1059_vm1, %v6910_v2 }
 0xeaa   :  { %10252 = vmatmul.mubr.msk.f32.gmra.mxu0 %vm1059_vm1, %v6910_v2 }
 0xeab   :  { %10253 = vmatprep.mubr.msk.f32.mxu0 %vm1059_vm1, %v6915_v12 }
 0xeae   :  { %10254 = vmatmul.mubr.msk.f32.gmra.mxu0 %vm1059_vm1, %v6915_v12 }
 0xeaf   :  { %10255 = vmatprep.mubr.msk.f32.mxu0 %vm1059_vm1, %v6920_v9 }
 0xeb2   :  { %10256 = vmatmul.mubr.msk.f32.gmra.mxu0 %vm1059_vm1, %v6920_v9  ;;  %v11788_v9 = vld [vmem:[#allocation6 + $0x250] sm:$0xff] }
 0xeb3   :  { %10257 = vmatprep.mubr.msk.f32.mxu0 %vm1059_vm1, %v6925_v61 }
 0xeb6   :  { %10258 = vmatmul.mubr.msk.f32.gmra.mxu0 %vm1059_vm1, %v6925_v61 }
 0xeb7   :  { %10259 = vmatprep.mubr.msk.f32.mxu0 %vm1059_vm1, %v6930_v27 }
 0xeba   :  { %10260 = vmatmul.mubr.msk.f32.gmra.mxu0 %vm1059_vm1, %v6930_v27  ;;  %v11789_v27 = vld [vmem:[#allocation6 + $0x258] sm:$0xff] }
 0xebb   :  { %10261 = vmatprep.mubr.msk.f32.mxu0 %vm1059_vm1, %v6935_v14 }
 0xebe   :  { %10262 = vmatmul.mubr.msk.f32.gmra.mxu0 %vm1059_vm1, %v6935_v14 }
 0xebf   :  { %10263 = vmatprep.mubr.msk.f32.mxu0 %vm1059_vm1, %v6940_v30 }
 0xec2   :  { %10264 = vmatmul.mubr.msk.f32.gmra.mxu0 %vm1059_vm1, %v6940_v30 }
 0xec3   :  { %10265 = vmatprep.mubr.msk.f32.mxu0 %vm1059_vm1, %v6945_v4 }
 0xec6   :  { %10266 = vmatmul.mubr.msk.f32.gmra.mxu0 %vm1059_vm1, %v6945_v4 }
 0xec7   :  { %10267 = vmatprep.mubr.msk.f32.mxu0 %vm1059_vm1, %v6950_v38 }
 0xeca   :  { %10268 = vmatmul.mubr.msk.f32.gmra.mxu0 %vm1059_vm1, %v6950_v38 }
 0xecb   :  { %10269 = vmatprep.mubr.msk.f32.mxu0 %vm1059_vm1, %v6955_v3 }
 0xece   :  { %10270 = vmatmul.mubr.msk.f32.gmra.mxu0 %vm1059_vm1, %v6955_v3 }
 0xecf   :  { %10271 = vmatprep.mubr.msk.f32.mxu0 %vm1059_vm1, %v6960_v41 }
 0xed2   :  { %10272 = vmatmul.mubr.msk.f32.gmra.mxu0 %vm1059_vm1, %v6960_v41 }
 0xed3   :  { %10273 = vmatprep.mubr.msk.f32.mxu0 %vm1059_vm1, %v6965_v47 }
 0xed6   :  { %10274 = vmatmul.mubr.msk.f32.gmra.mxu0 %vm1059_vm1, %v6965_v47 }
 0xed7   :  { %10275 = vmatprep.mubr.msk.f32.mxu0 %vm1059_vm1, %v6970_v19 }
 0xeda   :  { %10276 = vmatmul.mubr.msk.f32.gmra.mxu0 %vm1059_vm1, %v6970_v19  ;;  %v11792_v19 = vld [vmem:[#allocation6 + $0x270] sm:$0xff] }
 0xedb   :  { %10277 = vmatprep.mubr.msk.f32.mxu0 %vm1059_vm1, %v6975_v17 }
 0xede   :  { %10278 = vmatmul.mubr.msk.f32.gmra.mxu0 %vm1059_vm1, %v6975_v17  ;;  %v11793_v17 = vld [vmem:[#allocation6 + $0x278] sm:$0xff] }
 0xedf   :  { %10279 = vmatprep.mubr.msk.f32.mxu0 %vm1059_vm1, %v6980_v40 }
 0xee2   :  { %10280 = vmatmul.mubr.msk.f32.gmra.mxu0 %vm1059_vm1, %v6980_v40 }
 0xee3   :  { %10281 = vmatprep.mubr.msk.f32.mxu0 %vm1059_vm1, %v6985_v52 }
 0xee6   :  { %10282 = vmatmul.mubr.msk.f32.gmra.mxu0 %vm1059_vm1, %v6985_v52 }
 0xee7   :  { %10283 = vmatprep.mubr.msk.f32.mxu0 %vm1059_vm1, %v6990_v46 }
 0xeea   :  { %10284 = vmatmul.mubr.msk.f32.gmra.mxu0 %vm1059_vm1, %v6990_v46 }
 0xeeb   :  { %10285 = vmatprep.mubr.msk.f32.mxu0 %vm1059_vm1, %v6995_v31 }
 0xeee   :  { %10286 = vmatmul.mubr.msk.f32.gmra.mxu0 %vm1059_vm1, %v6995_v31 }
 0xeef   :  { %10287 = vmatprep.mubr.msk.f32.mxu0 %vm1059_vm1, %v7000_v35 }
 0xef2   :  { %10288 = vmatmul.mubr.msk.f32.gmra.mxu0 %vm1059_vm1, %v7000_v35 }
 0xf36   :  { %v7711_v62 = vpop.f32.mrf.mxu0 }
 0xf37   :  { %v16635_v21 = vadd.f32 %v11778_v39, %v7711_v62 }
 0xf38   :  { %v7713_v18 = vpop.f32.mrf.mxu0 }
 0xf39   :  { %v16637_v6 = vadd.f32 %v11779_v23, %v7713_v18  ;;  %v11796_v18 = vld [vmem:[#allocation6 + $0x290] sm:$0xff]  ;;  %v11797_v23 = vld [vmem:[#allocation6 + $0x298] sm:$0xff] }
 0xf3a   :  { %v7717_v43 = vpop.f32.mrf.mxu0 }
 0xf3b   :  { %v7902_v37 = vmax.f32 %v16635_v21, %v16637_v6  ;;  %v16641_v51 = vadd.f32 %v11780_v54, %v7717_v43 }
 0xf3c   :  { %v7719_v22 = vpop.f32.mrf.mxu0 }
 0xf3d   :  { %v16643_v59 = vadd.f32 %v11781_v53, %v7719_v22  ;;  %7903 = vmax.xlane.f32.xlu0 %v7902_v37  ;;  %v11798_v53 = vld [vmem:[#allocation6 + $0x2a0] sm:$0xff] }
 0xf3e   :  { %v7723_v29 = vpop.f32.mrf.mxu0 }
 0xf3f   :  { %v7905_v34 = vmax.f32 %v16641_v51, %v16643_v59  ;;  %v16647_v58 = vadd.f32 %v11782_v20, %v7723_v29 }
 0xf40   :  { %v7725_v44 = vpop.f32.mrf.mxu0 }
 0xf41   :  { %v16649_v10 = vadd.f32 %v11783_v45, %v7725_v44  ;;  %7906 = vmax.xlane.f32.xlu1 %v7905_v34  ;;  %v11799_v34 = vld [vmem:[#allocation6 + $0x2a8] sm:$0xff] }
 0xf42   :  { %v7729_v63 = vpop.f32.mrf.mxu0 }
 0xf43   :  { %v7908_v50 = vmax.f32 %v16647_v58, %v16649_v10  ;;  %v16653_v36 = vadd.f32 %v11784_v24, %v7729_v63  ;;  %v11801_v24 = vld [vmem:[#allocation6 + $0x2b8] sm:$0xff] }
 0xf44   :  { %v7731_v0 = vpop.f32.mrf.mxu0 }
 0xf45   :  { %v16655_v55 = vadd.f32 %v11785_v25, %v7731_v0  ;;  %7909 = vmax.xlane.f32.xlu0 %v7908_v50  ;;  %v11800_v50 = vld [vmem:[#allocation6 + $0x2b0] sm:$0xff] }
 0xf46   :  { %v7735_v8 = vpop.f32.mrf.mxu0 }
 0xf47   :  { %v7911_v11 = vmax.f32 %v16653_v36, %v16655_v55  ;;  %v16659_v60 = vadd.f32 %v11786_v13, %v7735_v8  ;;  %v11802_v13 = vld [vmem:[#allocation6 + $0x2c0] sm:$0xff] }
 0xf48   :  { %v7737_v26 = vpop.f32.mrf.mxu0 }
 0xf49   :  { %v16661_v57 = vadd.f32 %v11787_v49, %v7737_v26  ;;  %7912 = vmax.xlane.f32.xlu1 %v7911_v11 }
 0xf4a   :  { %v7741_v33 = vpop.f32.mrf.mxu0 }
 0xf4b   :  { %v7914_v2 = vmax.f32 %v16659_v60, %v16661_v57  ;;  %v16665_v61 = vadd.f32 %v11788_v9, %v7741_v33  ;;  %v11803_v33 = vld [vmem:[#allocation6 + $0x2c8] sm:$0xff] }
 0xf4c   :  { %v7743_v12 = vpop.f32.mrf.mxu0 }
 0xf4d   :  { %v16667_v14 = vadd.f32 %v11789_v27, %v7743_v12  ;;  %7915 = vmax.xlane.f32.xlu0 %v7914_v2 }
 0xf4e   :  { %v7747_v30 = vpop.f32.mrf.mxu0 }
 0xf4f   :  { %v7917_v4 = vmax.f32 %v16665_v61, %v16667_v14  ;;  %v16671_v3 = vadd.f32 %v11790_v32, %v7747_v30  ;;  %v11804_v30 = vld [vmem:[#allocation6 + $0x2d0] sm:$0xff] }
 0xf50   :  { %v7749_v38 = vpop.f32.mrf.mxu0 }
 0xf51   :  { %v16673_v41 = vadd.f32 %v11791_v7, %v7749_v38  ;;  %7918 = vmax.xlane.f32.xlu1 %v7917_v4  ;;  %v11805_v38 = vld [vmem:[#allocation6 + $0x2d8] sm:$0xff] }
 0xf52   :  { %v7753_v5 = vpop.f32.mrf.mxu0 }
 0xf53   :  { %v7920_v47 = vmax.f32 %v16671_v3, %v16673_v41  ;;  %v16677_v56 = vadd.f32 %v11792_v19, %v7753_v5 }
 0xf54   :  { %v7755_v28 = vpop.f32.mrf.mxu0 }
 0xf55   :  { %v16679_v48 = vadd.f32 %v11793_v17, %v7755_v28  ;;  %7921 = vmax.xlane.f32.xlu0 %v7920_v47  ;;  %v11806_v28 = vld [vmem:[#allocation6 + $0x2e0] sm:$0xff]  ;;  %v11807_v17 = vld [vmem:[#allocation6 + $0x2e8] sm:$0xff] }
 0xf56   :  { %v7759_v40 = vpop.f32.mrf.mxu0 }
 0xf57   :  { %v7923_v15 = vmax.f32 %v16677_v56, %v16679_v48  ;;  %v16683_v46 = vadd.f32 %v11794_v16, %v7759_v40 }
 0xf58   :  { %v7761_v52 = vpop.f32.mrf.mxu0 }
 0xf59   :  { %v16685_v31 = vadd.f32 %v11795_v1, %v7761_v52  ;;  %7924 = vmax.xlane.f32.xlu1 %v7923_v15  ;;  %v11808_v1 = vld [vmem:[#allocation6 + $0x2f0] sm:$0xff] }
 0xf5a   :  { %v7765_v42 = vpop.f32.mrf.mxu0 }
 0xf5b   :  { %v7926_v35 = vmax.f32 %v16683_v46, %v16685_v31  ;;  %v16689_v39 = vadd.f32 %v11796_v18, %v7765_v42 }
 0xf5c   :  { %v7767_v62 = vpop.f32.mrf.mxu0 }
 0xf5d   :  { %v16691_v43 = vadd.f32 %v11797_v23, %v7767_v62  ;;  %7927 = vmax.xlane.f32.xlu0 %v7926_v35  ;;  %v11809_v35 = vld [vmem:[#allocation6 + $0x2f8] sm:$0xff] }
 0xf5e   :  { %v7771_v37 = vpop.f32.mrf.mxu0 }
 0xf5f   :  { %v7929_v22 = vmax.f32 %v16689_v39, %v16691_v43  ;;  %v16695_v29 = vadd.f32 %v11798_v53, %v7771_v37  ;;  %v11811_v53 = vld [vmem:[#allocation6 + $0x308] sm:$0xff] }
 0xf60   :  { %v7773_v54 = vpop.f32.mrf.mxu0 }
 0xf61   :  { %v16697_v44 = vadd.f32 %v11799_v34, %v7773_v54  ;;  %7930 = vmax.xlane.f32.xlu1 %v7929_v22  ;;  %v11810_v22 = vld [vmem:[#allocation6 + $0x300] sm:$0xff] }
 0xf62   :  { %v7777_v20 = vpop.f32.mrf.mxu0 }
 0xf63   :  { %v7932_v45 = vmax.f32 %v16695_v29, %v16697_v44  ;;  %v16701_v0 = vadd.f32 %v11800_v50, %v7777_v20  ;;  %v11812_v50 = vld [vmem:[#allocation6 + $0x310] sm:$0xff] }
 0xf64   :  { %v7779_v63 = vpop.f32.mrf.mxu0 }
 0xf65   :  { %v16703_v25 = vadd.f32 %v11801_v24, %v7779_v63  ;;  %7933 = vmax.xlane.f32.xlu0 %v7932_v45 }
 0xf66   :  { %v7783_v8 = vpop.f32.mrf.mxu0 }
 0xf67   :  { %v7935_v11 = vmax.f32 %v16701_v0, %v16703_v25  ;;  %v16707_v49 = vadd.f32 %v11802_v13, %v7783_v8  ;;  %v11813_v8 = vld [vmem:[#allocation6 + $0x318] sm:$0xff] }
 0xf68   :  { %v7785_v26 = vpop.f32.mrf.mxu0 }
 0xf69   :  { %v16709_v2 = vadd.f32 %v11803_v33, %v7785_v26  ;;  %7936 = vmax.xlane.f32.xlu1 %v7935_v11 }
 0xf6a   :  { %v7789_v12 = vpop.f32.mrf.mxu0 }
 0xf6b   :  { %v7938_v9 = vmax.f32 %v16707_v49, %v16709_v2  ;;  %v16713_v4 = vadd.f32 %v11804_v30, %v7789_v12  ;;  %v11814_v12 = vld [vmem:[#allocation6 + $0x320] sm:$0xff] }
 0xf6c   :  { %v7791_v27 = vpop.f32.mrf.mxu0 }
 0xf6d   :  { %v16715_v32 = vadd.f32 %v11805_v38, %v7791_v27  ;;  %7939 = vmax.xlane.f32.xlu0 %v7938_v9  ;;  %v11815_v27 = vld [vmem:[#allocation6 + $0x328] sm:$0xff] }
 0xf6e   :  { %v7795_v7 = vpop.f32.mrf.mxu0 }
 0xf6f   :  { %v7941_v5 = vmax.f32 %v16713_v4, %v16715_v32  ;;  %v16719_v19 = vadd.f32 %v11806_v28, %v7795_v7 }
 0xf70   :  { %v7797_v47 = vpop.f32.mrf.mxu0 }
 0xf71   :  { %v16721_v40 = vadd.f32 %v11807_v17, %v7797_v47  ;;  %7942 = vmax.xlane.f32.xlu1 %v7941_v5  ;;  %v11816_v47 = vld [vmem:[#allocation6 + $0x330] sm:$0xff]  ;;  %v11817_v17 = vld [vmem:[#allocation6 + $0x338] sm:$0xff] }
 0xf72   :  { %v7801_v15 = vpop.f32.mrf.mxu0 }
 0xf73   :  { %v7944_v52 = vmax.f32 %v16719_v19, %v16721_v40  ;;  %v16725_v42 = vadd.f32 %v11808_v1, %v7801_v15 }
 0xf74   :  { %v7803_v16 = vpop.f32.mrf.mxu0 }
 0xf75   :  { %v16727_v62 = vadd.f32 %v11809_v35, %v7803_v16  ;;  %7945 = vmax.xlane.f32.xlu0 %v7944_v52  ;;  %v11818_v35 = vld [vmem:[#allocation6 + $0x340] sm:$0xff] }
 0xf76   :  { %v7807_v18 = vpop.f32.mrf.mxu0 }
 0xf77   :  { %v7947_v23 = vmax.f32 %v16725_v42, %v16727_v62  ;;  %v16731_v54 = vadd.f32 %v11810_v22, %v7807_v18 }
 0xf78   :  { %v7809_v37 = vpop.f32.mrf.mxu0 }
 0xf79   :  { %v16733_v34 = vadd.f32 %v11811_v53, %v7809_v37  ;;  %7948 = vmax.xlane.f32.xlu1 %v7947_v23  ;;  %v11819_v23 = vld [vmem:[#allocation6 + $0x348] sm:$0xff] }
 0xf7a   :  { %v7813_v20 = vpop.f32.mrf.mxu0 }
 0xf7b   :  { %v7950_v45 = vmax.f32 %v16731_v54, %v16733_v34  ;;  %v16737_v24 = vadd.f32 %v11812_v50, %v7813_v20  ;;  %v11821_v50 = vld [vmem:[#allocation6 + $0x358] sm:$0xff] }
 0xf7c   :  { %v7815_v63 = vpop.f32.mrf.mxu0 }
 0xf7d   :  { %v16739_v11 = vadd.f32 %v11813_v8, %v7815_v63  ;;  %7951 = vmax.xlane.f32.xlu0 %v7950_v45  ;;  %v11820_v45 = vld [vmem:[#allocation6 + $0x350] sm:$0xff] }
 0xf7e   :  { %v7819_v26 = vpop.f32.mrf.mxu0 }
 0xf7f   :  { %v7953_v13 = vmax.f32 %v16737_v24, %v16739_v11  ;;  %v16743_v9 = vadd.f32 %v11814_v12, %v7819_v26  ;;  %v11822_v12 = vld [vmem:[#allocation6 + $0x360] sm:$0xff] }
 0xf80   :  { %v7821_v33 = vpop.f32.mrf.mxu0 }
 0xf81   :  { %v16745_v30 = vadd.f32 %v11815_v27, %v7821_v33  ;;  %7954 = vmax.xlane.f32.xlu1 %v7953_v13 }
 0xf82   :  { %v7825_v38 = vpop.f32.mrf.mxu0 }
 0xf83   :  { %v7956_v7 = vmax.f32 %v16743_v9, %v16745_v30  ;;  %v16749_v28 = vadd.f32 %v11816_v47, %v7825_v38  ;;  %v11823_v38 = vld [vmem:[#allocation6 + $0x368] sm:$0xff] }
 0xf84   :  { %v7827_v5 = vpop.f32.mrf.mxu0 }
 0xf85   :  { %v16751_v15 = vadd.f32 %v11817_v17, %v7827_v5  ;;  %7957 = vmax.xlane.f32.xlu0 %v7956_v7 }
 0xf86   :  { %v7831_v52 = vpop.f32.mrf.mxu0 }
 0xf87   :  { %v7959_v16 = vmax.f32 %v16749_v28, %v16751_v15  ;;  %v16755_v18 = vadd.f32 %v11818_v35, %v7831_v52  ;;  %v11824_v52 = vld [vmem:[#allocation6 + $0x370] sm:$0xff] }
 0xf88   :  { %v7833_v1 = vpop.f32.mrf.mxu0 }
 0xf89   :  { %v16757_v37 = vadd.f32 %v11819_v23, %v7833_v1  ;;  %7960 = vmax.xlane.f32.xlu1 %v7959_v16  ;;  %v11825_v1 = vld [vmem:[#allocation6 + $0x378] sm:$0xff] }
 0xf8a   :  { %v7837_v22 = vpop.f32.mrf.mxu0 }
 0xf8b   :  { %v7962_v53 = vmax.f32 %v16755_v18, %v16757_v37  ;;  %v16761_v63 = vadd.f32 %v11820_v45, %v7837_v22 }
 0xf8c   :  { %v7839_v20 = vpop.f32.mrf.mxu0 }
 0xf8d   :  { %v16763_v8 = vadd.f32 %v11821_v50, %v7839_v20  ;;  %7963 = vmax.xlane.f32.xlu0 %v7962_v53  ;;  %v11826_v20 = vld [vmem:[#allocation6 + $0x380] sm:$0xff]  ;;  %v11827_v50 = vld [vmem:[#allocation6 + $0x388] sm:$0xff] }
 0xf8e   :  { %v7843_v26 = vpop.f32.mrf.mxu0 }
 0xf8f   :  { %v7965_v13 = vmax.f32 %v16761_v63, %v16763_v8  ;;  %v16767_v27 = vadd.f32 %v11822_v12, %v7843_v26 }
 0xf90   :  { %v7845_v33 = vpop.f32.mrf.mxu0 }
 0xf91   :  { %v16769_v7 = vadd.f32 %v11823_v38, %v7845_v33  ;;  %7966 = vmax.xlane.f32.xlu1 %v7965_v13  ;;  %v11828_v38 = vld [vmem:[#allocation6 + $0x390] sm:$0xff] }
 0xf92   :  { %v7849_v5 = vpop.f32.mrf.mxu0 }
 0xf93   :  { %v7968_v47 = vmax.f32 %v16767_v27, %v16769_v7  ;;  %v16773_v16 = vadd.f32 %v11824_v52, %v7849_v5 }
 0xf94   :  { %v7851_v17 = vpop.f32.mrf.mxu0 }
 0xf95   :  { %v16775_v35 = vadd.f32 %v11825_v1, %v7851_v17  ;;  %7969 = vmax.xlane.f32.xlu0 %v7968_v47  ;;  %v11829_v47 = vld [vmem:[#allocation6 + $0x398] sm:$0xff] }
 0xf96   :  { %v7855_v23 = vpop.f32.mrf.mxu0 }
 0xf97   :  { %v7971_v22 = vmax.f32 %v16773_v16, %v16775_v35  ;;  %v16779_v45 = vadd.f32 %v11826_v20, %v7855_v23 }
 0xf98   :  { %v7857_v53 = vpop.f32.mrf.mxu0 }
 0xf99   :  { %18105 = vst [vmem:[#allocation23_spill] sm:$0xff] %v16779_v45  ;;  %v16781_v26 = vadd.f32 %v11827_v50, %v7857_v53  ;;  %7972 = vmax.xlane.f32.xlu0 %v7971_v22  ;;  %v11830_v53 = vld [vmem:[#allocation6 + $0x3a0] sm:$0xff]  ;;  %v11831_v22 = vld [vmem:[#allocation6 + $0x3a8] sm:$0xff] }
 0xf9a   :  { %v7861_v13 = vpop.f32.mrf.mxu0 }
 0xf9b   :  { %18106 = vst [vmem:[#allocation66_spill] sm:$0xff] %v16781_v26  ;;  %v7974_v33 = vmax.f32 %v16779_v45, %v16781_v26  ;;  %v16785_v5 = vadd.f32 %v11828_v38, %v7861_v13 }
 0xf9c   :  { %v7863_v12 = vpop.f32.mrf.mxu0 }
 0xf9d   :  { %18107 = vst [vmem:[#allocation68_spill] sm:$0xff] %v16785_v5  ;;  %v16787_v17 = vadd.f32 %v11829_v47, %v7863_v12  ;;  %7975 = vmax.xlane.f32.xlu0 %v7974_v33  ;;  %v11832_v12 = vld [vmem:[#allocation6 + $0x3b0] sm:$0xff]  ;;  %v11833_v33 = vld [vmem:[#allocation6 + $0x3b8] sm:$0xff] }
 0xf9e   :  { %v7867_v52 = vpop.f32.mrf.mxu0 }
 0xf9f   :  { %18108 = vst [vmem:[#allocation71_spill] sm:$0xff] %v16787_v17  ;;  %v7977_v1 = vmax.f32 %v16785_v5, %v16787_v17  ;;  %v16791_v20 = vadd.f32 %v11830_v53, %v7867_v52 }
 0xfa0   :  { %v7869_v23 = vpop.f32.mrf.mxu0 }
 0xfa1   :  { %18109 = vst [vmem:[#allocation73_spill] sm:$0xff] %v16791_v20  ;;  %v16793_v50 = vadd.f32 %v11831_v22, %v7869_v23  ;;  %7978 = vmax.xlane.f32.xlu0 %v7977_v1  ;;  %v11834_v23 = vld [vmem:[#allocation6 + $0x3c0] sm:$0xff]  ;;  %v11835_v1 = vld [vmem:[#allocation6 + $0x3c8] sm:$0xff] }
 0xfa2   :  { %v7873_v26 = vpop.f32.mrf.mxu0 }
 0xfa3   :  { %18110 = vst [vmem:[#allocation76_spill] sm:$0xff] %v16793_v50  ;;  %v7980_v13 = vmax.f32 %v16791_v20, %v16793_v50  ;;  %v16797_v47 = vadd.f32 %v11832_v12, %v7873_v26 }
 0xfa4   :  { %v7875_v38 = vpop.f32.mrf.mxu0 }
 0xfa5   :  { %18111 = vst [vmem:[#allocation78_spill] sm:$0xff] %v16797_v47  ;;  %v16799_v45 = vadd.f32 %v11833_v33, %v7875_v38  ;;  %7981 = vmax.xlane.f32.xlu0 %v7980_v13  ;;  %v11836_v38 = vld [vmem:[#allocation6 + $0x3d0] sm:$0xff]  ;;  %v11837_v13 = vld [vmem:[#allocation6 + $0x3d8] sm:$0xff] }
 0xfa6   :  { %v7879_v17 = vpop.f32.mrf.mxu0 }
 0xfa7   :  { %18112 = vst [vmem:[#allocation81_spill] sm:$0xff] %v16799_v45  ;;  %v7983_v52 = vmax.f32 %v16797_v47, %v16799_v45  ;;  %v16803_v22 = vadd.f32 %v11834_v23, %v7879_v17 }
 0xfa8   :  { %v7881_v53 = vpop.f32.mrf.mxu0 }
 0xfa9   :  { %18113 = vst [vmem:[#allocation83_spill] sm:$0xff] %v16803_v22  ;;  %v16805_v5 = vadd.f32 %v11835_v1, %v7881_v53  ;;  %7984 = vmax.xlane.f32.xlu0 %v7983_v52  ;;  %v11838_v53 = vld [vmem:[#allocation6 + $0x3e0] sm:$0xff]  ;;  %v11839_v52 = vld [vmem:[#allocation6 + $0x3e8] sm:$0xff] }
 0xfaa   :  { %v7885_v50 = vpop.f32.mrf.mxu0 }
 0xfab   :  { %18114 = vst [vmem:[#allocation69_spill] sm:$0xff] %v16805_v5  ;;  %v7986_v26 = vmax.f32 %v16803_v22, %v16805_v5  ;;  %v16809_v33 = vadd.f32 %v11836_v38, %v7885_v50 }
 0xfac   :  { %v7887_v12 = vpop.f32.mrf.mxu0 }
 0xfad   :  { %v16811_v20 = vadd.f32 %v11837_v13, %v7887_v12  ;;  %7987 = vmax.xlane.f32.xlu0 %v7986_v26  ;;  %v11840_v12 = vld [vmem:[#allocation6 + $0x3f0] sm:$0xff]  ;;  %v11841_v26 = vld [vmem:[#allocation6 + $0x3f8] sm:$0xff] }
 0xfae   :  { %v7891_v45 = vpop.f32.mrf.mxu0 }
 0xfaf   :  { %18115 = vst [vmem:[#allocation67_spill] sm:$0xff] %v16811_v20  ;;  %v7989_v17 = vmax.f32 %v16809_v33, %v16811_v20  ;;  %v16815_v1 = vadd.f32 %v11838_v53, %v7891_v45 }
 0xfb0   :  { %v7893_v23 = vpop.f32.mrf.mxu0 }
 0xfb1   :  { %v16817_v47 = vadd.f32 %v11839_v52, %v7893_v23  ;;  %7990 = vmax.xlane.f32.xlu0 %v7989_v17 }
 0xfb2   :  { %v7897_v5 = vpop.f32.mrf.mxu0 }
 0xfb3   :  { %18116 = vst [vmem:[#allocation33_spill] sm:$0xff] %v16817_v47  ;;  %v7992_v50 = vmax.f32 %v16815_v1, %v16817_v47  ;;  %v16821_v13 = vadd.f32 %v11840_v12, %v7897_v5 }
 0xfb4   :  { %v7899_v38 = vpop.f32.mrf.mxu0 }
 0xfb5   :  { %v16823_v22 = vadd.f32 %v11841_v26, %v7899_v38  ;;  %7993 = vmax.xlane.f32.xlu0 %v7992_v50 }
 0xfb7   :  { %18117 = vst [vmem:[#allocation70_spill] sm:$0xff] %v16823_v22  ;;  %v7995_v45 = vmax.f32 %v16821_v13, %v16823_v22 }
 0xfb9   :  { %7996 = vmax.xlane.f32.xlu0 %v7995_v45 }
 0xfc6   :  { %v7904_v53 = vpop.xlane.xlu0 %7903 }
 0xfc7   :  { %v7998_v23 = vsub.f32 %v16635_v21, %v7904_v53  ;;  %v7999_v17 = vsub.f32 %v16637_v6, %v7904_v53 }
 0xfc9   :  { %v8062_v52 = vmul.f32 1.442695, %v7998_v23  ;;  %v8064_v20 = vmul.f32 1.442695, %v7999_v17 }
 0xfca   :  { %v7907_v47 = vpop.xlane.xlu1 %7906 }
 0xfcb   :  { %11495 = vpow2.f32 %v8062_v52  ;;  %v8000_v5 = vsub.f32 %v16641_v51, %v7907_v47  ;;  %v8001_v12 = vsub.f32 %v16643_v59, %v7907_v47 }
 0xfcc   :  { %11497 = vpow2.f32 %v8064_v20 }
 0xfcd   :  { %v8066_v38 = vmul.f32 1.442695, %v8000_v5  ;;  %v8068_v50 = vmul.f32 1.442695, %v8001_v12 }
 0xfce   :  { %v7910_v26 = vpop.xlane.xlu0 %7909 }
 0xfcf   :  { %11499 = vpow2.f32 %v8066_v38  ;;  %v8002_v45 = vsub.f32 %v16647_v58, %v7910_v26  ;;  %v8003_v22 = vsub.f32 %v16649_v10, %v7910_v26 }
 0xfd0   :  { %11501 = vpow2.f32 %v8068_v50 }
 0xfd1   :  { %v8070_v21 = vmul.f32 1.442695, %v8002_v45  ;;  %v8072_v6 = vmul.f32 1.442695, %v8003_v22 }
 0xfd2   :  { %v7913_v53 = vpop.xlane.xlu1 %7912 }
 0xfd3   :  { %11503 = vpow2.f32 %v8070_v21  ;;  %v8004_v23 = vsub.f32 %v16653_v36, %v7913_v53  ;;  %v8005_v51 = vsub.f32 %v16655_v55, %v7913_v53 }
 0xfd4   :  { %11505 = vpow2.f32 %v8072_v6 }
 0xfd5   :  { %v8074_v59 = vmul.f32 1.442695, %v8004_v23  ;;  %v8076_v20 = vmul.f32 1.442695, %v8005_v51 }
 0xfd6   :  { %v7916_v47 = vpop.xlane.xlu0 %7915 }
 0xfd7   :  { %11507 = vpow2.f32 %v8074_v59  ;;  %v8006_v17 = vsub.f32 %v16659_v60, %v7916_v47  ;;  %v8007_v58 = vsub.f32 %v16661_v57, %v7916_v47 }
 0xfd8   :  { %v16837_v52 = vpop.eup %11495  ;;  %11509 = vpow2.f32 %v8076_v20 }
 0xfd9   :  { %v16839_v10 = vpop.eup %11497  ;;  %v8078_v22 = vmul.f32 1.442695, %v8006_v17  ;;  %v8080_v5 = vmul.f32 1.442695, %v8007_v58 }
 0xfda   :  { %v7919_v12 = vpop.xlane.xlu1 %7918  ;;  %v8190_v36 = vadd.f32 %v16839_v10, %v16837_v52 }
 0xfdb   :  { %11511 = vpow2.f32 %v8078_v22  ;;  %v8008_v55 = vsub.f32 %v16665_v61, %v7919_v12  ;;  %v8009_v38 = vsub.f32 %v16667_v14, %v7919_v12 }
 0xfdc   :  { %v16845_v50 = vpop.eup %11499  ;;  %11513 = vpow2.f32 %v8080_v5  ;;  %8191 = vadd.xlane.f32.xlu1 %v8190_v36 }
 0xfdd   :  { %v16847_v60 = vpop.eup %11501  ;;  %v8082_v57 = vmul.f32 1.442695, %v8008_v55  ;;  %v8084_v26 = vmul.f32 1.442695, %v8009_v38 }
 0xfde   :  { %v7922_v45 = vpop.xlane.xlu0 %7921  ;;  %v8193_v21 = vadd.f32 %v16847_v60, %v16845_v50 }
 0xfdf   :  { %11515 = vpow2.f32 %v8082_v57  ;;  %v8010_v6 = vsub.f32 %v16671_v3, %v7922_v45  ;;  %v8011_v53 = vsub.f32 %v16673_v41, %v7922_v45 }
 0xfe0   :  { %v16853_v61 = vpop.eup %11503  ;;  %11517 = vpow2.f32 %v8084_v26  ;;  %8194 = vadd.xlane.f32.xlu1 %v8193_v21 }
 0xfe1   :  { %v16855_v14 = vpop.eup %11505  ;;  %v8086_v23 = vmul.f32 1.442695, %v8010_v6  ;;  %v8088_v51 = vmul.f32 1.442695, %v8011_v53 }
 0xfe2   :  { %v7925_v59 = vpop.xlane.xlu1 %7924  ;;  %v8196_v20 = vadd.f32 %v16855_v14, %v16853_v61 }
 0xfe3   :  { %11519 = vpow2.f32 %v8086_v23  ;;  %v8012_v47 = vsub.f32 %v16677_v56, %v7925_v59  ;;  %v8013_v17 = vsub.f32 %v16679_v48, %v7925_v59 }
 0xfe4   :  { %v16861_v3 = vpop.eup %11507  ;;  %11521 = vpow2.f32 %v8088_v51  ;;  %8197 = vadd.xlane.f32.xlu1 %v8196_v20 }
 0xfe5   :  { %v16863_v41 = vpop.eup %11509  ;;  %v8090_v58 = vmul.f32 1.442695, %v8012_v47  ;;  %v8092_v22 = vmul.f32 1.442695, %v8013_v17 }
 0xfe6   :  { %v7928_v5 = vpop.xlane.xlu0 %7927  ;;  %v8199_v12 = vadd.f32 %v16863_v41, %v16861_v3 }
 0xfe7   :  { %11523 = vpow2.f32 %v8090_v58  ;;  %v8014_v36 = vsub.f32 %v16683_v46, %v7928_v5  ;;  %v8015_v55 = vsub.f32 %v16685_v31, %v7928_v5 }
 0xfe8   :  { %v16869_v56 = vpop.eup %11511  ;;  %11525 = vpow2.f32 %v8092_v22  ;;  %8200 = vadd.xlane.f32.xlu1 %v8199_v12 }
 0xfe9   :  { %v16871_v48 = vpop.eup %11513  ;;  %v8094_v38 = vmul.f32 1.442695, %v8014_v36  ;;  %v8096_v57 = vmul.f32 1.442695, %v8015_v55 }
 0xfea   :  { %v7931_v26 = vpop.xlane.xlu1 %7930  ;;  %v8202_v45 = vadd.f32 %v16871_v48, %v16869_v56 }
 0xfeb   :  { %11527 = vpow2.f32 %v8094_v38  ;;  %v8016_v21 = vsub.f32 %v16689_v39, %v7931_v26  ;;  %v8017_v6 = vsub.f32 %v16691_v43, %v7931_v26 }
 0xfec   :  { %v16877_v46 = vpop.eup %11515  ;;  %11529 = vpow2.f32 %v8096_v57  ;;  %8203 = vadd.xlane.f32.xlu1 %v8202_v45 }
 0xfed   :  { %v16879_v31 = vpop.eup %11517  ;;  %v8098_v53 = vmul.f32 1.442695, %v8016_v21  ;;  %v8100_v23 = vmul.f32 1.442695, %v8017_v6 }
 0xfee   :  { %v7934_v51 = vpop.xlane.xlu0 %7933  ;;  %v8205_v59 = vadd.f32 %v16879_v31, %v16877_v46 }
 0xfef   :  { %11531 = vpow2.f32 %v8098_v53  ;;  %v8018_v20 = vsub.f32 %v16695_v29, %v7934_v51  ;;  %v8019_v47 = vsub.f32 %v16697_v44, %v7934_v51 }
 0xff0   :  { %v16885_v39 = vpop.eup %11519  ;;  %11533 = vpow2.f32 %v8100_v23  ;;  %8206 = vadd.xlane.f32.xlu1 %v8205_v59 }
 0xff1   :  { %v16887_v43 = vpop.eup %11521  ;;  %v8102_v17 = vmul.f32 1.442695, %v8018_v20  ;;  %v8104_v58 = vmul.f32 1.442695, %v8019_v47 }
 0xff2   :  { %v7937_v22 = vpop.xlane.xlu1 %7936  ;;  %v8208_v5 = vadd.f32 %v16887_v43, %v16885_v39 }
 0xff3   :  { %11535 = vpow2.f32 %v8102_v17  ;;  %v8020_v12 = vsub.f32 %v16701_v0, %v7937_v22  ;;  %v8021_v36 = vsub.f32 %v16703_v25, %v7937_v22 }
 0xff4   :  { %v16893_v29 = vpop.eup %11523  ;;  %11537 = vpow2.f32 %v8104_v58  ;;  %8209 = vadd.xlane.f32.xlu1 %v8208_v5 }
 0xff5   :  { %v16895_v44 = vpop.eup %11525  ;;  %v8106_v55 = vmul.f32 1.442695, %v8020_v12  ;;  %v8108_v38 = vmul.f32 1.442695, %v8021_v36 }
 0xff6   :  { %v7940_v57 = vpop.xlane.xlu0 %7939  ;;  %v8211_v26 = vadd.f32 %v16895_v44, %v16893_v29 }
 0xff7   :  { %11539 = vpow2.f32 %v8106_v55  ;;  %v8022_v45 = vsub.f32 %v16707_v49, %v7940_v57  ;;  %v8023_v21 = vsub.f32 %v16709_v2, %v7940_v57 }
 0xff8   :  { %v16901_v0 = vpop.eup %11527  ;;  %11541 = vpow2.f32 %v8108_v38  ;;  %8212 = vadd.xlane.f32.xlu1 %v8211_v26 }
 0xff9   :  { %v16903_v25 = vpop.eup %11529  ;;  %v8110_v6 = vmul.f32 1.442695, %v8022_v45  ;;  %v8112_v53 = vmul.f32 1.442695, %v8023_v21 }
 0xffa   :  { %v7943_v23 = vpop.xlane.xlu1 %7942  ;;  %v8214_v51 = vadd.f32 %v16903_v25, %v16901_v0 }
 0xffb   :  { %11543 = vpow2.f32 %v8110_v6  ;;  %v8024_v59 = vsub.f32 %v16713_v4, %v7943_v23  ;;  %v8025_v20 = vsub.f32 %v16715_v32, %v7943_v23 }
 0xffc   :  { %v16909_v49 = vpop.eup %11531  ;;  %11545 = vpow2.f32 %v8112_v53  ;;  %8215 = vadd.xlane.f32.xlu1 %v8214_v51 }
 0xffd   :  { %v16911_v2 = vpop.eup %11533  ;;  %v8114_v47 = vmul.f32 1.442695, %v8024_v59  ;;  %v8116_v17 = vmul.f32 1.442695, %v8025_v20 }
 0xffe   :  { %v7946_v58 = vpop.xlane.xlu0 %7945  ;;  %v8217_v22 = vadd.f32 %v16911_v2, %v16909_v49 }
 0xfff   :  { %11547 = vpow2.f32 %v8114_v47  ;;  %v8026_v5 = vsub.f32 %v16719_v19, %v7946_v58  ;;  %v8027_v12 = vsub.f32 %v16721_v40, %v7946_v58 }
0x1000   :  { %v16917_v4 = vpop.eup %11535  ;;  %11549 = vpow2.f32 %v8116_v17  ;;  %8218 = vadd.xlane.f32.xlu1 %v8217_v22 }
0x1001   :  { %v16919_v32 = vpop.eup %11537  ;;  %v8118_v36 = vmul.f32 1.442695, %v8026_v5  ;;  %v8120_v55 = vmul.f32 1.442695, %v8027_v12 }
0x1002   :  { %v7949_v38 = vpop.xlane.xlu1 %7948  ;;  %v8220_v57 = vadd.f32 %v16919_v32, %v16917_v4 }
0x1003   :  { %11551 = vpow2.f32 %v8118_v36  ;;  %v8028_v26 = vsub.f32 %v16725_v42, %v7949_v38  ;;  %v8029_v45 = vsub.f32 %v16727_v62, %v7949_v38 }
0x1004   :  { %v16925_v19 = vpop.eup %11539  ;;  %11553 = vpow2.f32 %v8120_v55  ;;  %8221 = vadd.xlane.f32.xlu0 %v8220_v57 }
0x1005   :  { %v16927_v40 = vpop.eup %11541  ;;  %v8122_v21 = vmul.f32 1.442695, %v8028_v26  ;;  %v8124_v6 = vmul.f32 1.442695, %v8029_v45 }
0x1006   :  { %v7952_v53 = vpop.xlane.xlu0 %7951  ;;  %v8223_v23 = vadd.f32 %v16927_v40, %v16925_v19 }
0x1007   :  { %11555 = vpow2.f32 %v8122_v21  ;;  %v8030_v51 = vsub.f32 %v16731_v54, %v7952_v53  ;;  %v8031_v59 = vsub.f32 %v16733_v34, %v7952_v53 }
0x1008   :  { %v16933_v42 = vpop.eup %11543  ;;  %11557 = vpow2.f32 %v8124_v6  ;;  %8224 = vadd.xlane.f32.xlu1 %v8223_v23 }
0x1009   :  { %v16935_v62 = vpop.eup %11545  ;;  %v8126_v20 = vmul.f32 1.442695, %v8030_v51  ;;  %v8128_v47 = vmul.f32 1.442695, %v8031_v59 }
0x100a   :  { %v7955_v17 = vpop.xlane.xlu1 %7954  ;;  %v8226_v58 = vadd.f32 %v16935_v62, %v16933_v42 }
0x100b   :  { %11559 = vpow2.f32 %v8126_v20  ;;  %v8032_v22 = vsub.f32 %v16737_v24, %v7955_v17  ;;  %v8033_v5 = vsub.f32 %v16739_v11, %v7955_v17 }
0x100c   :  { %v16941_v54 = vpop.eup %11547  ;;  %11561 = vpow2.f32 %v8128_v47  ;;  %8227 = vadd.xlane.f32.xlu0 %v8226_v58 }
0x100d   :  { %v16943_v34 = vpop.eup %11549  ;;  %v8130_v12 = vmul.f32 1.442695, %v8032_v22  ;;  %v8132_v36 = vmul.f32 1.442695, %v8033_v5 }
0x100e   :  { %v7958_v55 = vpop.xlane.xlu0 %7957  ;;  %v8229_v38 = vadd.f32 %v16943_v34, %v16941_v54 }
0x100f   :  { %11563 = vpow2.f32 %v8130_v12  ;;  %v8034_v57 = vsub.f32 %v16743_v9, %v7958_v55  ;;  %v8035_v26 = vsub.f32 %v16745_v30, %v7958_v55 }
0x1010   :  { %v16949_v24 = vpop.eup %11551  ;;  %11565 = vpow2.f32 %v8132_v36  ;;  %8230 = vadd.xlane.f32.xlu1 %v8229_v38 }
0x1011   :  { %v16951_v11 = vpop.eup %11553  ;;  %v8134_v45 = vmul.f32 1.442695, %v8034_v57  ;;  %v8136_v21 = vmul.f32 1.442695, %v8035_v26 }
0x1012   :  { %v7961_v6 = vpop.xlane.xlu1 %7960  ;;  %v8232_v53 = vadd.f32 %v16951_v11, %v16949_v24 }
0x1013   :  { %11567 = vpow2.f32 %v8134_v45  ;;  %v8036_v23 = vsub.f32 %v16749_v28, %v7961_v6  ;;  %v8037_v51 = vsub.f32 %v16751_v15, %v7961_v6 }
0x1014   :  { %v16957_v9 = vpop.eup %11555  ;;  %11569 = vpow2.f32 %v8136_v21  ;;  %8233 = vadd.xlane.f32.xlu0 %v8232_v53 }
0x1015   :  { %v16959_v30 = vpop.eup %11557  ;;  %v8138_v59 = vmul.f32 1.442695, %v8036_v23  ;;  %v8140_v20 = vmul.f32 1.442695, %v8037_v51 }
0x1016   :  { %v7964_v47 = vpop.xlane.xlu0 %7963  ;;  %v8235_v17 = vadd.f32 %v16959_v30, %v16957_v9 }
0x1017   :  { %11571 = vpow2.f32 %v8138_v59  ;;  %v8038_v58 = vsub.f32 %v16755_v18, %v7964_v47  ;;  %v8039_v22 = vsub.f32 %v16757_v37, %v7964_v47 }
0x1018   :  { %v16965_v28 = vpop.eup %11559  ;;  %11573 = vpow2.f32 %v8140_v20  ;;  %8236 = vadd.xlane.f32.xlu1 %v8235_v17 }
0x1019   :  { %v16967_v15 = vpop.eup %11561  ;;  %v8142_v5 = vmul.f32 1.442695, %v8038_v58  ;;  %v8144_v12 = vmul.f32 1.442695, %v8039_v22 }
0x101a   :  { %v7967_v36 = vpop.xlane.xlu1 %7966  ;;  %v8238_v55 = vadd.f32 %v16967_v15, %v16965_v28 }
0x101b   :  { %11575 = vpow2.f32 %v8142_v5  ;;  %v8040_v38 = vsub.f32 %v16761_v63, %v7967_v36  ;;  %v8041_v57 = vsub.f32 %v16763_v8, %v7967_v36 }
0x101c   :  { %v16973_v18 = vpop.eup %11563  ;;  %11577 = vpow2.f32 %v8144_v12  ;;  %8239 = vadd.xlane.f32.xlu0 %v8238_v55  ;;  %v18118_v55 = vld [vmem:[#allocation23_spill] sm:$0xff] }
0x101d   :  { %v16975_v37 = vpop.eup %11565  ;;  %v8146_v26 = vmul.f32 1.442695, %v8040_v38  ;;  %v8148_v45 = vmul.f32 1.442695, %v8041_v57  ;;  %v18119_v57 = vld [vmem:[#allocation66_spill] sm:$0xff] }
0x101e   :  { %v7970_v21 = vpop.xlane.xlu0 %7969  ;;  %v8241_v6 = vadd.f32 %v16975_v37, %v16973_v18 }
0x101f   :  { %11579 = vpow2.f32 %v8146_v26  ;;  %v8042_v53 = vsub.f32 %v16767_v27, %v7970_v21  ;;  %v8043_v23 = vsub.f32 %v16769_v7, %v7970_v21 }
0x1020   :  { %v16981_v63 = vpop.eup %11567  ;;  %11581 = vpow2.f32 %v8148_v45  ;;  %8242 = vadd.xlane.f32.xlu1 %v8241_v6 }
0x1021   :  { %v16983_v8 = vpop.eup %11569  ;;  %v8150_v51 = vmul.f32 1.442695, %v8042_v53  ;;  %v8152_v59 = vmul.f32 1.442695, %v8043_v23  ;;  %v18121_v23 = vld [vmem:[#allocation68_spill] sm:$0xff] }
0x1022   :  { %v7973_v20 = vpop.xlane.xlu0 %7972  ;;  %v8244_v47 = vadd.f32 %v16983_v8, %v16981_v63 }
0x1023   :  { %11583 = vpow2.f32 %v8150_v51  ;;  %v8044_v17 = vsub.f32 %v16773_v16, %v7973_v20  ;;  %v8045_v58 = vsub.f32 %v16775_v35, %v7973_v20 }
0x1024   :  { %v16989_v27 = vpop.eup %11571  ;;  %11585 = vpow2.f32 %v8152_v59  ;;  %8245 = vadd.xlane.f32.xlu0 %v8244_v47  ;;  %v18122_v59 = vld [vmem:[#allocation71_spill] sm:$0xff] }
0x1025   :  { %v16991_v7 = vpop.eup %11573  ;;  %v8154_v22 = vmul.f32 1.442695, %v8044_v17  ;;  %v8156_v5 = vmul.f32 1.442695, %v8045_v58 }
0x1026   :  { %v7976_v12 = vpop.xlane.xlu0 %7975  ;;  %v8247_v36 = vadd.f32 %v16991_v7, %v16989_v27 }
0x1027   :  { %11587 = vpow2.f32 %v8154_v22  ;;  %v8046_v38 = vsub.f32 %v18118_v55, %v7976_v12  ;;  %v8047_v26 = vsub.f32 %v18119_v57, %v7976_v12 }
0x1028   :  { %v16997_v16 = vpop.eup %11575  ;;  %11589 = vpow2.f32 %v8156_v5  ;;  %8248 = vadd.xlane.f32.xlu1 %v8247_v36  ;;  %v18125_v36 = vld [vmem:[#allocation73_spill] sm:$0xff] }
0x1029   :  { %v16999_v35 = vpop.eup %11577  ;;  %v8158_v45 = vmul.f32 1.442695, %v8046_v38  ;;  %v8160_v21 = vmul.f32 1.442695, %v8047_v26  ;;  %v18126_v38 = vld [vmem:[#allocation76_spill] sm:$0xff] }
0x102a   :  { %18120 = vst [vmem:[#allocation40_spill] sm:$0xff] %v16999_v35  ;;  %v7979_v6 = vpop.xlane.xlu0 %7978  ;;  %v8250_v53 = vadd.f32 %v16999_v35, %v16997_v16 }
0x102b   :  { %11591 = vpow2.f32 %v8158_v45  ;;  %v8048_v51 = vsub.f32 %v18121_v23, %v7979_v6  ;;  %v8049_v20 = vsub.f32 %v18122_v59, %v7979_v6 }
0x102c   :  { %v17005_v47 = vpop.eup %11579  ;;  %11593 = vpow2.f32 %v8160_v21  ;;  %8251 = vadd.xlane.f32.xlu0 %v8250_v53 }
0x102d   :  { %18123 = vst [vmem:[#allocation38_spill] sm:$0xff] %v17005_v47  ;;  %v17007_v17 = vpop.eup %11581  ;;  %v8162_v58 = vmul.f32 1.442695, %v8048_v51  ;;  %v8164_v22 = vmul.f32 1.442695, %v8049_v20  ;;  %v18129_v51 = vld [vmem:[#allocation78_spill] sm:$0xff] }
0x102e   :  { %18124 = vst [vmem:[#allocation36_spill] sm:$0xff] %v17007_v17  ;;  %v7982_v5 = vpop.xlane.xlu0 %7981  ;;  %v8253_v12 = vadd.f32 %v17007_v17, %v17005_v47  ;;  %v18130_v20 = vld [vmem:[#allocation81_spill] sm:$0xff] }
0x102f   :  { %11595 = vpow2.f32 %v8162_v58  ;;  %v8050_v55 = vsub.f32 %v18125_v36, %v7982_v5  ;;  %v8051_v57 = vsub.f32 %v18126_v38, %v7982_v5 }
0x1030   :  { %v17013_v26 = vpop.eup %11583  ;;  %11597 = vpow2.f32 %v8164_v22  ;;  %8254 = vadd.xlane.f32.xlu1 %v8253_v12 }
0x1031   :  { %18127 = vst [vmem:[#allocation42_spill] sm:$0xff] %v17013_v26  ;;  %v17015_v45 = vpop.eup %11585  ;;  %v8166_v21 = vmul.f32 1.442695, %v8050_v55  ;;  %v8168_v6 = vmul.f32 1.442695, %v8051_v57  ;;  %v18133_v57 = vld [vmem:[#allocation83_spill] sm:$0xff] }
0x1032   :  { %18128 = vst [vmem:[#allocation18_spill] sm:$0xff] %v17015_v45  ;;  %v7985_v53 = vpop.xlane.xlu0 %7984  ;;  %v8256_v23 = vadd.f32 %v17015_v45, %v17013_v26 }
0x1033   :  { %11599 = vpow2.f32 %v8166_v21  ;;  %v8052_v59 = vsub.f32 %v18129_v51, %v7985_v53  ;;  %v8053_v58 = vsub.f32 %v18130_v20, %v7985_v53  ;;  %v18134_v21 = vld [vmem:[#allocation69_spill] sm:$0xff] }
0x1034   :  { %v17021_v36 = vpop.eup %11587  ;;  %11601 = vpow2.f32 %v8168_v6  ;;  %8257 = vadd.xlane.f32.xlu0 %v8256_v23 }
0x1035   :  { %18131 = vst [vmem:[#allocation37_spill] sm:$0xff] %v17021_v36  ;;  %v17023_v5 = vpop.eup %11589  ;;  %v8170_v22 = vmul.f32 1.442695, %v8052_v59  ;;  %v8172_v12 = vmul.f32 1.442695, %v8053_v58 }
0x1036   :  { %18132 = vst [vmem:[#allocation23_spill] sm:$0xff] %v17023_v5  ;;  %v7988_v38 = vpop.xlane.xlu0 %7987  ;;  %v8259_v55 = vadd.f32 %v17023_v5, %v17021_v36 }
0x1037   :  { %11603 = vpow2.f32 %v8170_v22  ;;  %v8054_v45 = vsub.f32 %v18133_v57, %v7988_v38  ;;  %v8055_v26 = vsub.f32 %v18134_v21, %v7988_v38  ;;  %v18137_v22 = vld [vmem:[#allocation67_spill] sm:$0xff] }
0x1038   :  { %v17029_v51 = vpop.eup %11591  ;;  %11605 = vpow2.f32 %v8172_v12  ;;  %8260 = vadd.xlane.f32.xlu1 %v8259_v55 }
0x1039   :  { %18135 = vst [vmem:[#allocation66_spill] sm:$0xff] %v17029_v51  ;;  %v17031_v53 = vpop.eup %11593  ;;  %v8174_v6 = vmul.f32 1.442695, %v8054_v45  ;;  %v8176_v23 = vmul.f32 1.442695, %v8055_v26 }
0x103a   :  { %18136 = vst [vmem:[#allocation68_spill] sm:$0xff] %v17031_v53  ;;  %v7991_v20 = vpop.xlane.xlu0 %7990  ;;  %v8262_v59 = vadd.f32 %v17031_v53, %v17029_v51 }
0x103b   :  { %11607 = vpow2.f32 %v8174_v6  ;;  %v8056_v58 = vsub.f32 %v16809_v33, %v7991_v20  ;;  %v8057_v5 = vsub.f32 %v18137_v22, %v7991_v20  ;;  %v18140_v6 = vld [vmem:[#allocation33_spill] sm:$0xff] }
0x103c   :  { %v17037_v57 = vpop.eup %11595  ;;  %11609 = vpow2.f32 %v8176_v23  ;;  %8263 = vadd.xlane.f32.xlu0 %v8262_v59 }
0x103d   :  { %18138 = vst [vmem:[#allocation71_spill] sm:$0xff] %v17037_v57  ;;  %v17039_v38 = vpop.eup %11597  ;;  %v8178_v12 = vmul.f32 1.442695, %v8056_v58  ;;  %v8180_v55 = vmul.f32 1.442695, %v8057_v5 }
0x103e   :  { %18139 = vst [vmem:[#allocation73_spill] sm:$0xff] %v17039_v38  ;;  %v7994_v21 = vpop.xlane.xlu0 %7993  ;;  %v8265_v26 = vadd.f32 %v17039_v38, %v17037_v57  ;;  %v18155_v57 = vld [vmem:[#allocation72_spill] sm:$0xff] }
0x103f   :  { %11611 = vpow2.f32 %v8178_v12  ;;  %v8058_v45 = vsub.f32 %v16815_v1, %v7994_v21  ;;  %v8059_v53 = vsub.f32 %v18140_v6, %v7994_v21  ;;  %v18143_v12 = vld [vmem:[#allocation70_spill] sm:$0xff] }
0x1040   :  { %v17045_v33 = vpop.eup %11599  ;;  %11613 = vpow2.f32 %v8180_v55  ;;  %8266 = vadd.xlane.f32.xlu1 %v8265_v26 }
0x1041   :  { %18141 = vst [vmem:[#allocation76_spill] sm:$0xff] %v17045_v33  ;;  %v17047_v20 = vpop.eup %11601  ;;  %v8182_v23 = vmul.f32 1.442695, %v8058_v45  ;;  %v8184_v59 = vmul.f32 1.442695, %v8059_v53 }
0x1042   :  { %18142 = vst [vmem:[#allocation78_spill] sm:$0xff] %v17047_v20  ;;  %v7997_v22 = vpop.xlane.xlu0 %7996  ;;  %v8268_v5 = vadd.f32 %v17047_v20, %v17045_v33  ;;  %v18154_v33 = vld [vmem:[#allocation56_spill] sm:$0xff] }
0x1043   :  { %11615 = vpow2.f32 %v8182_v23  ;;  %v8060_v58 = vsub.f32 %v16821_v13, %v7997_v22  ;;  %v8061_v38 = vsub.f32 %v18143_v12, %v7997_v22  ;;  %v4396_v51 = vmul.f32 %v18155_v57, %v18154_v33 }
0x1044   :  { %v17053_v1 = vpop.eup %11603  ;;  %11617 = vpow2.f32 %v8184_v59  ;;  %8269 = vadd.xlane.f32.xlu0 %v8268_v5 }
0x1045   :  { %18144 = vst [vmem:[#allocation81_spill] sm:$0xff] %v17053_v1  ;;  %v17055_v21 = vpop.eup %11605  ;;  %v8186_v55 = vmul.f32 1.442695, %v8060_v58  ;;  %v8188_v26 = vmul.f32 1.442695, %v8061_v38 }
0x1046   :  { %18145 = vst [vmem:[#allocation83_spill] sm:$0xff] %v17055_v21  ;;  %v8271_v53 = vadd.f32 %v17055_v21, %v17053_v1 }
0x1047   :  { %11619 = vpow2.f32 %v8186_v55 }
0x1048   :  { %v17059_v45 = vpop.eup %11607  ;;  %11621 = vpow2.f32 %v8188_v26  ;;  %8272 = vadd.xlane.f32.xlu1 %v8271_v53 }
0x1049   :  { %18146 = vst [vmem:[#allocation69_spill] sm:$0xff] %v17059_v45  ;;  %v17061_v6 = vpop.eup %11609 }
0x104a   :  { %18147 = vst [vmem:[#allocation67_spill] sm:$0xff] %v17061_v6  ;;  %v8274_v13 = vadd.f32 %v17061_v6, %v17059_v45 }
0x104c   :  { %v17065_v23 = vpop.eup %11611  ;;  %8275 = vadd.xlane.f32.xlu0 %v8274_v13 }
0x104d   :  { %18148 = vst [vmem:[#allocation33_spill] sm:$0xff] %v17065_v23  ;;  %v17067_v59 = vpop.eup %11613 }
0x104e   :  { %18149 = vst [vmem:[#allocation70_spill] sm:$0xff] %v17067_v59  ;;  %v8277_v38 = vadd.f32 %v17067_v59, %v17065_v23 }
0x1050   :  { %v17071_v22 = vpop.eup %11615  ;;  %8278 = vadd.xlane.f32.xlu1 %v8277_v38 }
0x1051   :  { %18150 = vst [vmem:[#allocation128_spill] sm:$0xff] %v17071_v22  ;;  %v17073_v5 = vpop.eup %11617 }
0x1052   :  { %18151 = vst [vmem:[#allocation129_spill] sm:$0xff] %v17073_v5  ;;  %v8280_v58 = vadd.f32 %v17073_v5, %v17071_v22 }
0x1054   :  { %v17077_v12 = vpop.eup %11619  ;;  %8281 = vadd.xlane.f32.xlu0 %v8280_v58 }
0x1055   :  { %18152 = vst [vmem:[#allocation130_spill] sm:$0xff] %v17077_v12  ;;  %v17079_v55 = vpop.eup %11621 }
0x1056   :  { %18153 = vst [vmem:[#allocation131_spill] sm:$0xff] %v17079_v55  ;;  %v8283_v26 = vadd.f32 %v17079_v55, %v17077_v12 }
0x1058   :  { %8284 = vadd.xlane.f32.xlu1 %v8283_v26 }
0x1065   :  { %v8192_v53 = vpop.xlane.xlu1 %8191 }
0x1066   :  { %11623 = vrcp.f32 %v8192_v53 }
0x1069   :  { %v8195_v13 = vpop.xlane.xlu1 %8194 }
0x106a   :  { %11625 = vrcp.f32 %v8195_v13 }
0x106d   :  { %v8198_v59 = vpop.xlane.xlu1 %8197 }
0x106e   :  { %11627 = vrcp.f32 %v8198_v59 }
0x1071   :  { %v8201_v38 = vpop.xlane.xlu1 %8200 }
0x1072   :  { %11629 = vrcp.f32 %v8201_v38 }
0x1073   :  { %v11624_v23 = vpop.eup %11623 }
0x1074   :  { %v8318_v6 = vmul.f32 %v11624_v23, %v8192_v53 }
0x1075   :  { %v8204_v5 = vpop.xlane.xlu1 %8203 }
0x1076   :  { %v8350_v22 = vsub.f32 2.0, %v8318_v6  ;;  %11631 = vrcp.f32 %v8204_v5 }
0x1077   :  { %v11626_v58 = vpop.eup %11625 }
0x1078   :  { %v8382_v45 = vmul.f32 %v11624_v23, %v8350_v22  ;;  %v8319_v21 = vmul.f32 %v11626_v58, %v8195_v13 }
0x1079   :  { %v8207_v1 = vpop.xlane.xlu1 %8206 }
0x107a   :  { %v8414_v55 = vmul.f32 %v16837_v52, %v8382_v45  ;;  %v8351_v26 = vsub.f32 2.0, %v8319_v21  ;;  %11633 = vrcp.f32 %v8207_v1  ;;  %v8415_v12 = vmul.f32 %v16839_v10, %v8382_v45  ;;  %v18156_v21 = vld [vmem:[#allocation44_spill] sm:$0xff]  ;;  %v18157_v10 = vld [vmem:[#allocation74_spill] sm:$0xff] }
0x107b   :  { %v11628_v20 = vpop.eup %11627  ;;  %v4428_v13 = vadd.f32 %v4396_v51, %v18156_v21  ;;  %v4397_v45 = vmul.f32 %v18157_v10, %v18154_v33  ;;  %v18159_v51 = vld [vmem:[#allocation75_spill] sm:$0xff]  ;;  %v18162_v21 = vld [vmem:[#allocation77_spill] sm:$0xff]  ;;  %v18163_v10 = vld [vmem:[#allocation62_spill] sm:$0xff] }
0x107c   :  { %v8383_v36 = vmul.f32 %v11626_v58, %v8351_v26  ;;  %v8320_v17 = vmul.f32 %v11628_v20, %v8198_v59  ;;  %8542 = vmatprep.mubr.f32.mxu1 %v8415_v12 }
0x107d   :  { %8543 = vmatmul.mubr.f32.vlgmr.msra.gmra.mxu1 %v8414_v55  ;;  %v8210_v6 = vpop.xlane.xlu1 %8209  ;;  %v4398_v55 = vmul.f32 %v18159_v51, %v18154_v33  ;;  %v18165_v51 = vld [vmem:[#allocation46_spill] sm:$0xff] }
0x107e   :  { %v8416_v53 = vmul.f32 %v16845_v50, %v8383_v36  ;;  %v8352_v23 = vsub.f32 2.0, %v8320_v17  ;;  %11635 = vrcp.f32 %v8210_v6  ;;  %v8417_v22 = vmul.f32 %v16847_v60, %v8383_v36  ;;  %v18158_v60 = vld [vmem:[#allocation45_spill] sm:$0xff] }
0x107f   :  { %v11630_v52 = vpop.eup %11629  ;;  %v4429_v36 = vadd.f32 %v4397_v45, %v18158_v60 }
0x1080   :  { %v8384_v47 = vmul.f32 %v11628_v20, %v8352_v23  ;;  %v8321_v35 = vmul.f32 %v11630_v52, %v8201_v38  ;;  %8547 = vmatprep.mubr.f32.mxu1 %v8417_v22  ;;  %v18160_v20 = vld [vmem:[#allocation93_spill] sm:$0xff]  ;;  %v18161_v23 = vld [vmem:[#allocation47_spill] sm:$0xff] }
0x1081   :  { %8548 = vmatmul.mubr.f32.gmra.mxu1 %v8416_v53  ;;  %v8213_v57 = vpop.xlane.xlu1 %8212  ;;  %4460 = vxpose.xlu0.b32.start [1/16] (narrow) %v4428_v13, 16  ;;  %v4412_v38 = vmul.f32 %v18160_v20, %v18154_v33  ;;  %v4430_v22 = vadd.f32 %v4398_v55, %v18161_v23  ;;  %v18167_v20 = vld [vmem:[#allocation61_spill] sm:$0xff] }
0x1082   :  { %v8418_v59 = vmul.f32 %v16853_v61, %v8384_v47  ;;  %v8353_v12 = vsub.f32 2.0, %v8321_v35  ;;  %11637 = vrcp.f32 %v8213_v57  ;;  %v8419_v50 = vmul.f32 %v16855_v14, %v8384_v47 }
0x1083   :  { %v11632_v17 = vpop.eup %11631  ;;  %v4444_v45 = vadd.f32 %v4412_v38, %v18163_v10  ;;  %v18171_v10 = vld [vmem:[#allocation12_spill] sm:$0xff] }
0x1084   :  { %v8385_v58 = vmul.f32 %v11630_v52, %v8353_v12  ;;  %v8322_v26 = vmul.f32 %v11632_v17, %v8204_v5  ;;  %8552 = vmatprep.mubr.f32.mxu1 %v8419_v50  ;;  %v4399_v52 = vmul.f32 %v18162_v21, %v18154_v33  ;;  %v18169_v21 = vld [vmem:[#allocation49_spill] sm:$0xff] }
0x1085   :  { %8553 = vmatmul.mubr.f32.gmra.mxu1 %v8418_v59  ;;  %v8216_v53 = vpop.xlane.xlu1 %8215  ;;  %4461 = vxpose.xlu0.b32.cont [2/16] (narrow) %v4429_v36, 16  ;;  %v18164_v59 = vld [vmem:[#allocation94_spill] sm:$0xff] }
0x1086   :  { %v8420_v61 = vmul.f32 %v16861_v3, %v8385_v58  ;;  %v8354_v35 = vsub.f32 2.0, %v8322_v26  ;;  %11639 = vrcp.f32 %v8216_v53  ;;  %v8421_v14 = vmul.f32 %v16863_v41, %v8385_v58 }
0x1087   :  { %v11634_v47 = vpop.eup %11633  ;;  %v4413_v12 = vmul.f32 %v18164_v59, %v18154_v33  ;;  %v4431_v55 = vadd.f32 %v4399_v52, %v18165_v51  ;;  %v18172_v59 = vld [vmem:[#allocation96_spill] sm:$0xff] }
0x1088   :  { %v8386_v5 = vmul.f32 %v11632_v17, %v8354_v35  ;;  %v8323_v13 = vmul.f32 %v11634_v47, %v8207_v1  ;;  %8557 = vmatprep.mubr.f32.mxu1 %v8421_v14  ;;  %v18166_v1 = vld [vmem:[#allocation79_spill] sm:$0xff]  ;;  %v18173_v51 = vld [vmem:[#allocation48_spill] sm:$0xff] }
0x1089   :  { %8558 = vmatmul.mubr.f32.gmra.mxu1 %v8420_v61  ;;  %v8219_v3 = vpop.xlane.xlu1 %8218  ;;  %4462 = vxpose.xlu0.b32.cont [3/16] (narrow) %v4430_v22, 16  ;;  %v4400_v17 = vmul.f32 %v18166_v1, %v18154_v33  ;;  %v4445_v38 = vadd.f32 %v4413_v12, %v18167_v20  ;;  %v18168_v61 = vld [vmem:[#allocation95_spill] sm:$0xff]  ;;  %v4415_v12 = vmul.f32 %v18172_v59, %v18154_v33  ;;  %v18176_v20 = vld [vmem:[#allocation97_spill] sm:$0xff] }
0x108a   :  { %v8422_v50 = vmul.f32 %v16869_v56, %v8386_v5  ;;  %v8355_v41 = vsub.f32 2.0, %v8323_v13  ;;  %11641 = vrcp.f32 %v8219_v3  ;;  %v8423_v60 = vmul.f32 %v16871_v48, %v8386_v5 }
0x108b   :  { %v11636_v36 = vpop.eup %11635  ;;  %4492 = vxpose.xlu1.b32.start [1/16] (narrow) %v4444_v45, 16  ;;  %v4414_v35 = vmul.f32 %v18168_v61, %v18154_v33  ;;  %v4432_v52 = vadd.f32 %v4400_v17, %v18169_v21 }
0x108c   :  { %v8387_v58 = vmul.f32 %v11634_v47, %v8355_v41  ;;  %v8324_v26 = vmul.f32 %v11636_v36, %v8210_v6  ;;  %8562 = vmatprep.mubr.f32.mxu1 %v8423_v60  ;;  %v18170_v6 = vld [vmem:[#allocation80_spill] sm:$0xff] }
0x108d   :  { %8563 = vmatmul.mubr.f32.gmra.mxu1 %v8422_v50  ;;  %4463 = vxpose.xlu0.b32.cont [4/16] (narrow) %v4431_v55, 16  ;;  %v8222_v56 = vpop.xlane.xlu0 %8221  ;;  %v4401_v47 = vmul.f32 %v18170_v6, %v18154_v33  ;;  %v4446_v45 = vadd.f32 %v4414_v35, %v18171_v10  ;;  %v18179_v6 = vld [vmem:[#allocation16_spill] sm:$0xff] }
0x108e   :  { %v8424_v48 = vmul.f32 %v16877_v46, %v8387_v58  ;;  %v8356_v14 = vsub.f32 2.0, %v8324_v26  ;;  %11643 = vrcp.f32 %v8222_v56  ;;  %v8425_v23 = vmul.f32 %v16879_v31, %v8387_v58  ;;  %v18175_v58 = vld [vmem:[#allocation14_spill] sm:$0xff] }
0x108f   :  { %v11638_v22 = vpop.eup %11637  ;;  %4493 = vxpose.xlu1.b32.cont [2/16] (narrow) %v4445_v38, 16  ;;  %v4433_v55 = vadd.f32 %v4401_v47, %v18173_v51  ;;  %v4447_v26 = vadd.f32 %v4415_v12, %v18175_v58  ;;  %v4416_v38 = vmul.f32 %v18176_v20, %v18154_v33  ;;  %v18181_v12 = vld [vmem:[#allocation50_spill] sm:$0xff]  ;;  %v18183_v51 = vld [vmem:[#allocation17_spill] sm:$0xff] }
0x1090   :  { %v8388_v5 = vmul.f32 %v11636_v36, %v8356_v14  ;;  %v8325_v13 = vmul.f32 %v11638_v22, %v8213_v57  ;;  %8567 = vmatprep.mubr.f32.mxu1 %v8425_v23  ;;  %v18174_v57 = vld [vmem:[#allocation82_spill] sm:$0xff]  ;;  %v18177_v14 = vld [vmem:[#allocation51_spill] sm:$0xff] }
0x1091   :  { %8568 = vmatmul.mubr.f32.gmra.mxu1 %v8424_v48  ;;  %v8225_v46 = vpop.xlane.xlu1 %8224  ;;  %4464 = vxpose.xlu0.b32.cont [5/16] (narrow) %v4432_v52, 16  ;;  %v4402_v36 = vmul.f32 %v18174_v57, %v18154_v33  ;;  %v4448_v47 = vadd.f32 %v4416_v38, %v18179_v6  ;;  %v18184_v57 = vld [vmem:[#allocation99_spill] sm:$0xff] }
0x1092   :  { %v8426_v31 = vmul.f32 %v16885_v39, %v8388_v5  ;;  %v8357_v50 = vsub.f32 2.0, %v8325_v13  ;;  %11645 = vrcp.f32 %v8225_v46  ;;  %v8427_v41 = vmul.f32 %v16887_v43, %v8388_v5  ;;  %v18180_v5 = vld [vmem:[#allocation98_spill] sm:$0xff] }
0x1093   :  { %v11640_v60 = vpop.eup %11639  ;;  %4494 = vxpose.xlu1.b32.cont [3/16] (narrow) %v4446_v45, 16  ;;  %v4434_v23 = vadd.f32 %v4402_v36, %v18177_v14  ;;  %v4417_v13 = vmul.f32 %v18180_v5, %v18154_v33  ;;  %v4418_v36 = vmul.f32 %v18184_v57, %v18154_v33  ;;  %v18188_v14 = vld [vmem:[#allocation100_spill] sm:$0xff]  ;;  %v18195_v57 = vld [vmem:[#allocation22_spill] sm:$0xff] }
0x1094   :  { %v8389_v1 = vmul.f32 %v11638_v22, %v8357_v50  ;;  %v8326_v17 = vmul.f32 %v11640_v60, %v8216_v53  ;;  %8572 = vmatprep.mubr.f32.mxu1 %v8427_v41  ;;  %v18178_v53 = vld [vmem:[#allocation84_spill] sm:$0xff] }
0x1095   :  { %8573 = vmatmul.mubr.f32.gmra.mxu1 %v8426_v31  ;;  %4465 = vxpose.xlu0.b32.cont [6/16] (narrow) %v4433_v55, 16  ;;  %v8228_v39 = vpop.xlane.xlu0 %8227  ;;  %v4403_v22 = vmul.f32 %v18178_v53, %v18154_v33  ;;  %v4449_v55 = vadd.f32 %v4417_v13, %v18183_v51 }
0x1096   :  { %v8428_v43 = vmul.f32 %v16893_v29, %v8389_v1  ;;  %v8358_v61 = vsub.f32 2.0, %v8326_v17  ;;  %11647 = vrcp.f32 %v8228_v39  ;;  %v8429_v35 = vmul.f32 %v16895_v44, %v8389_v1 }
0x1097   :  { %v11642_v48 = vpop.eup %11641  ;;  %4495 = vxpose.xlu1.b32.cont [4/16] (narrow) %v4447_v26, 16  ;;  %v4435_v31 = vadd.f32 %v4403_v22, %v18181_v12  ;;  %v18185_v26 = vld [vmem:[#allocation53_spill] sm:$0xff] }
0x1098   :  { %v8390_v21 = vmul.f32 %v11640_v60, %v8358_v61  ;;  %v8327_v52 = vmul.f32 %v11642_v48, %v8219_v3  ;;  %8577 = vmatprep.mubr.f32.mxu1 %v8429_v35  ;;  %v18182_v3 = vld [vmem:[#allocation85_spill] sm:$0xff]  ;;  %v18187_v35 = vld [vmem:[#allocation19_spill] sm:$0xff] }
0x1099   :  { %8578 = vmatmul.mubr.f32.gmra.mxu1 %v8428_v43  ;;  %v8231_v29 = vpop.xlane.xlu1 %8230  ;;  %4466 = vxpose.xlu0.b32.cont [7/16] (narrow) %v4434_v23, 16  ;;  %v4404_v50 = vmul.f32 %v18182_v3, %v18154_v33  ;;  %v4419_v23 = vmul.f32 %v18188_v14, %v18154_v33  ;;  %v18200_v14 = vld [vmem:[#allocation103_spill] sm:$0xff] }
0x109a   :  { %v8430_v44 = vmul.f32 %v16901_v0, %v8390_v21  ;;  %v8359_v10 = vsub.f32 2.0, %v8327_v52  ;;  %11649 = vrcp.f32 %v8231_v29  ;;  %v8431_v45 = vmul.f32 %v16903_v25, %v8390_v21  ;;  %v18189_v52 = vld [vmem:[#allocation52_spill] sm:$0xff] }
0x109b   :  { %v11644_v59 = vpop.eup %11643  ;;  %4496 = vxpose.xlu1.b32.cont [5/16] (narrow) %v4448_v47, 16  ;;  %v4436_v20 = vadd.f32 %v4404_v50, %v18185_v26  ;;  %v18193_v50 = vld [vmem:[#allocation54_spill] sm:$0xff] }
0x109c   :  { %v8391_v41 = vmul.f32 %v11642_v48, %v8359_v10  ;;  %v8328_v60 = vmul.f32 %v11644_v59, %v8222_v56  ;;  %8582 = vmatprep.mubr.f32.mxu1 %v8431_v45  ;;  %v18186_v56 = vld [vmem:[#allocation86_spill] sm:$0xff]  ;;  %v4450_v48 = vadd.f32 %v4418_v36, %v18187_v35  ;;  %v18192_v45 = vld [vmem:[#allocation101_spill] sm:$0xff]  ;;  %v18199_v35 = vld [vmem:[#allocation24_spill] sm:$0xff] }
0x109d   :  { %8583 = vmatmul.mubr.f32.gmra.mxu1 %v8430_v44  ;;  %4467 = vxpose.xlu0.b32.cont [8/16] (narrow) %v4435_v31, 16  ;;  %v8234_v0 = vpop.xlane.xlu0 %8233  ;;  %v4405_v38 = vmul.f32 %v18186_v56, %v18154_v33  ;;  %v18191_v44 = vld [vmem:[#allocation21_spill] sm:$0xff] }
0x109e   :  { %v8432_v25 = vmul.f32 %v16909_v49, %v8391_v41  ;;  %v8360_v1 = vsub.f32 2.0, %v8328_v60  ;;  %11651 = vrcp.f32 %v8234_v0  ;;  %v8433_v17 = vmul.f32 %v16911_v2, %v8391_v41 }
0x109f   :  { %v11646_v58 = vpop.eup %11645  ;;  %4497 = vxpose.xlu1.b32.cont [6/16] (narrow) %v4449_v55, 16  ;;  %v4437_v6 = vadd.f32 %v4405_v38, %v18189_v52  ;;  %v4451_v10 = vadd.f32 %v4419_v23, %v18191_v44  ;;  %v4422_v23 = vmul.f32 %v18200_v14, %v18154_v33  ;;  %v18204_v44 = vld [vmem:[#allocation104_spill] sm:$0xff] }
0x10a0   :  { %v8392_v43 = vmul.f32 %v11644_v59, %v8360_v1  ;;  %v8329_v61 = vmul.f32 %v11646_v58, %v8225_v46  ;;  %8587 = vmatprep.mubr.f32.mxu1 %v8433_v17  ;;  %v18190_v46 = vld [vmem:[#allocation87_spill] sm:$0xff]  ;;  %v4420_v59 = vmul.f32 %v18192_v45, %v18154_v33 }
0x10a1   :  { %8588 = vmatmul.mubr.f32.gmra.mxu1 %v8432_v25  ;;  %v8237_v49 = vpop.xlane.xlu1 %8236  ;;  %4468 = vxpose.xlu0.b32.cont [9/16] (narrow) %v4436_v20, 16  ;;  %v4406_v47 = vmul.f32 %v18190_v46, %v18154_v33  ;;  %v18196_v25 = vld [vmem:[#allocation102_spill] sm:$0xff]  ;;  %v18197_v20 = vld [vmem:[#allocation55_spill] sm:$0xff] }
0x10a2   :  { %v8434_v2 = vmul.f32 %v16917_v4, %v8392_v43  ;;  %v8361_v53 = vsub.f32 2.0, %v8329_v61  ;;  %11653 = vrcp.f32 %v8237_v49  ;;  %v8435_v22 = vmul.f32 %v16919_v32, %v8392_v43 }
0x10a3   :  { %v11648_v21 = vpop.eup %11647  ;;  %4498 = vxpose.xlu1.b32.cont [7/16] (narrow) %v4450_v48, 16  ;;  %v4438_v41 = vadd.f32 %v4406_v47, %v18193_v50  ;;  %v4452_v36 = vadd.f32 %v4420_v59, %v18195_v57  ;;  %v4421_v1 = vmul.f32 %v18196_v25, %v18154_v33 }
0x10a4   :  { %v8393_v5 = vmul.f32 %v11646_v58, %v8361_v53  ;;  %v8330_v13 = vmul.f32 %v11648_v21, %v8228_v39  ;;  %8592 = vmatprep.mubr.f32.mxu1 %v8435_v22  ;;  %v18194_v39 = vld [vmem:[#allocation88_spill] sm:$0xff] }
0x10a5   :  { %4469 = vxpose.xlu0.b32.cont [10/16] (narrow) %v4437_v6, 16  ;;  %8593 = vmatmul.mubr.f32.gmra.mxu1 %v8434_v2  ;;  %v8240_v4 = vpop.xlane.xlu0 %8239  ;;  %v4407_v60 = vmul.f32 %v18194_v39, %v18154_v33  ;;  %v4453_v48 = vadd.f32 %v4421_v1, %v18199_v35  ;;  %v18207_v39 = vld [vmem:[#allocation27_spill] sm:$0xff]  ;;  %v18209_v1 = vld [vmem:[#allocation60_spill] sm:$0xff] }
0x10a6   :  { %v8436_v32 = vmul.f32 %v16925_v19, %v8393_v5  ;;  %v8362_v12 = vsub.f32 2.0, %v8330_v13  ;;  %11655 = vrcp.f32 %v8240_v4  ;;  %v8437_v31 = vmul.f32 %v16927_v40, %v8393_v5  ;;  %v18203_v5 = vld [vmem:[#allocation26_spill] sm:$0xff] }
0x10a7   :  { %v11650_v3 = vpop.eup %11649  ;;  %4499 = vxpose.xlu1.b32.cont [8/16] (narrow) %v4451_v10, 16  ;;  %v4439_v56 = vadd.f32 %v4407_v60, %v18197_v20  ;;  %v4454_v13 = vadd.f32 %v4422_v23, %v18203_v5  ;;  %v4423_v10 = vmul.f32 %v18204_v44, %v18154_v33  ;;  %v18211_v20 = vld [vmem:[#allocation29_spill] sm:$0xff]  ;;  %v18217_v5 = vld [vmem:[#allocation108_spill] sm:$0xff] }
0x10a8   :  { %v8394_v51 = vmul.f32 %v11648_v21, %v8362_v12  ;;  %v8331_v55 = vmul.f32 %v11650_v3, %v8231_v29  ;;  %8597 = vmatprep.mubr.f32.mxu1 %v8437_v31  ;;  %v18198_v29 = vld [vmem:[#allocation89_spill] sm:$0xff]  ;;  %v18201_v21 = vld [vmem:[#allocation58_spill] sm:$0xff] }
0x10a9   :  { %v8243_v19 = vpop.xlane.xlu1 %8242  ;;  %4470 = vxpose.xlu0.b32.cont [11/16] (narrow) %v4438_v41, 16  ;;  %8598 = vmatmul.mubr.f32.gmra.mxu1 %v8436_v32  ;;  %v4408_v38 = vmul.f32 %v18198_v29, %v18154_v33  ;;  %v18205_v12 = vld [vmem:[#allocation57_spill] sm:$0xff]  ;;  %v4455_v60 = vadd.f32 %v4423_v10, %v18207_v39  ;;  %v18212_v29 = vld [vmem:[#allocation106_spill] sm:$0xff] }
0x10aa   :  { %v8438_v40 = vmul.f32 %v16933_v42, %v8394_v51  ;;  %v8363_v17 = vsub.f32 2.0, %v8331_v55  ;;  %11657 = vrcp.f32 %v8243_v19  ;;  %v8439_v58 = vmul.f32 %v16935_v62, %v8394_v51  ;;  %v18208_v51 = vld [vmem:[#allocation105_spill] sm:$0xff] }
0x10ab   :  { %v11652_v26 = vpop.eup %11651  ;;  %4500 = vxpose.xlu1.b32.cont [9/16] (narrow) %v4452_v36, 16  ;;  %v4440_v52 = vadd.f32 %v4408_v38, %v18201_v21  ;;  %v4424_v55 = vmul.f32 %v18208_v51, %v18154_v33  ;;  %v4425_v38 = vmul.f32 %v18212_v29, %v18154_v33  ;;  %v18219_v51 = vld [vmem:[#allocation40_spill] sm:$0xff]  ;;  %v18223_v29 = vld [vmem:[#allocation18_spill] sm:$0xff] }
0x10ac   :  { %v8395_v43 = vmul.f32 %v11650_v3, %v8363_v17  ;;  %v8332_v61 = vmul.f32 %v11652_v26, %v8234_v0  ;;  %8602 = vmatprep.mubr.f32.mxu1 %v8439_v58  ;;  %v18202_v0 = vld [vmem:[#allocation90_spill] sm:$0xff] }
0x10ad   :  { %4471 = vxpose.xlu0.b32.cont [12/16] (narrow) %v4439_v56, 16  ;;  %8603 = vmatmul.mubr.f32.gmra.mxu1 %v8438_v40  ;;  %v8246_v42 = vpop.xlane.xlu0 %8245  ;;  %v4409_v6 = vmul.f32 %v18202_v0, %v18154_v33  ;;  %v4456_v56 = vadd.f32 %v4424_v55, %v18211_v20 }
0x10ae   :  { %v8440_v62 = vmul.f32 %v16941_v54, %v8395_v43  ;;  %v8364_v2 = vsub.f32 2.0, %v8332_v61  ;;  %11659 = vrcp.f32 %v8246_v42  ;;  %v8441_v53 = vmul.f32 %v16943_v34, %v8395_v43 }
0x10af   :  { %v11654_v22 = vpop.eup %11653  ;;  %4501 = vxpose.xlu1.b32.cont [10/16] (narrow) %v4453_v48, 16  ;;  %v4441_v31 = vadd.f32 %v4409_v6, %v18205_v12  ;;  %v18213_v48 = vld [vmem:[#allocation59_spill] sm:$0xff] }
0x10b0   :  { %v8396_v46 = vmul.f32 %v11652_v26, %v8364_v2  ;;  %v8333_v47 = vmul.f32 %v11654_v22, %v8237_v49  ;;  %8607 = vmatprep.mubr.f32.mxu1 %v8441_v53  ;;  %v18206_v49 = vld [vmem:[#allocation91_spill] sm:$0xff] }
0x10b1   :  { %v8249_v54 = vpop.xlane.xlu1 %8248  ;;  %4472 = vxpose.xlu0.b32.cont [13/16] (narrow) %v4440_v52, 16  ;;  %8608 = vmatmul.mubr.f32.gmra.mxu1 %v8440_v62  ;;  %v4410_v3 = vmul.f32 %v18206_v49, %v18154_v33  ;;  %v18214_v62 = vld [vmem:[#allocation31_spill] sm:$0xff] }
0x10b2   :  { %v8442_v34 = vmul.f32 %v16949_v24, %v8396_v46  ;;  %v8365_v45 = vsub.f32 2.0, %v8333_v47  ;;  %11661 = vrcp.f32 %v8249_v54  ;;  %v8443_v59 = vmul.f32 %v16951_v11, %v8396_v46  ;;  %v18215_v53 = vld [vmem:[#allocation107_spill] sm:$0xff] }
0x10b3   :  { %v11656_v32 = vpop.eup %11655  ;;  %4502 = vxpose.xlu1.b32.cont [11/16] (narrow) %v4454_v13, 16  ;;  %v4442_v40 = vadd.f32 %v4410_v3, %v18209_v1  ;;  %v4457_v2 = vadd.f32 %v4425_v38, %v18214_v62  ;;  %v4427_v13 = vmul.f32 %v18217_v5, %v18154_v33  ;;  %v18221_v1 = vld [vmem:[#allocation36_spill] sm:$0xff]  ;;  %v18228_v5 = vld [vmem:[#allocation71_spill] sm:$0xff] }
0x10b4   :  { %v8397_v50 = vmul.f32 %v11654_v22, %v8365_v45  ;;  %v8334_v41 = vmul.f32 %v11656_v32, %v8240_v4  ;;  %8612 = vmatprep.mubr.f32.mxu1 %v8443_v59  ;;  %v18210_v4 = vld [vmem:[#allocation92_spill] sm:$0xff]  ;;  %v4426_v22 = vmul.f32 %v18215_v53, %v18154_v33 }
0x10b5   :  { %4473 = vxpose.xlu0.b32.cont [14/16] (narrow) %v4441_v31, 16  ;;  %8613 = vmatmul.mubr.f32.gmra.mxu1 %v8442_v34  ;;  %v8252_v24 = vpop.xlane.xlu0 %8251  ;;  %v4411_v17 = vmul.f32 %v18210_v4, %v18154_v33 }
0x10b6   :  { %v8444_v11 = vmul.f32 %v16957_v9, %v8397_v50  ;;  %v8366_v57 = vsub.f32 2.0, %v8334_v41  ;;  %11663 = vrcp.f32 %v8252_v24  ;;  %v8445_v36 = vmul.f32 %v16959_v30, %v8397_v50 }
0x10b7   :  { %v11658_v25 = vpop.eup %11657  ;;  %4503 = vxpose.xlu1.b32.cont [12/16] (narrow) %v4455_v60, 16  ;;  %v4443_v14 = vadd.f32 %v4411_v17, %v18213_v48 }
0x10b8   :  { %v8398_v58 = vmul.f32 %v11656_v32, %v8366_v57  ;;  %v8335_v26 = vmul.f32 %v11658_v25, %v8243_v19  ;;  %8617 = vmatprep.mubr.f32.mxu1 %v8445_v36 }
0x10b9   :  { %v8255_v9 = vpop.xlane.xlu1 %8254  ;;  %4474 = vxpose.xlu0.b32.cont [15/16] (narrow) %v4442_v40, 16  ;;  %8618 = vmatmul.mubr.f32.gmra.mxu1 %v8444_v11 }
0x10ba   :  { %v8446_v30 = vmul.f32 %v16965_v28, %v8398_v58  ;;  %v8367_v43 = vsub.f32 2.0, %v8335_v26  ;;  %11665 = vrcp.f32 %v8255_v9  ;;  %v8447_v61 = vmul.f32 %v16967_v15, %v8398_v58  ;;  %v18222_v26 = vld [vmem:[#allocation42_spill] sm:$0xff] }
0x10bb   :  { %v11660_v35 = vpop.eup %11659  ;;  %4504 = vxpose.xlu1.b32.cont [13/16] (narrow) %v4456_v56, 16 }
0x10bc   :  { %v8399_v19 = vmul.f32 %v11658_v25, %v8367_v43  ;;  %v8336_v23 = vmul.f32 %v11660_v35, %v8246_v42  ;;  %8622 = vmatprep.mubr.f32.mxu1 %v8447_v61  ;;  %v18216_v42 = vld [vmem:[#allocation32_spill] sm:$0xff] }
0x10bd   :  { %4475 = vxpose.xlu0.b32.end [16/16] (narrow) %v4443_v14, 16  ;;  %8623 = vmatmul.mubr.f32.gmra.mxu1 %v8446_v30  ;;  %v8258_v21 = vpop.xlane.xlu0 %8257  ;;  %v4458_v47 = vadd.f32 %v4426_v22, %v18216_v42 }
0x10be   :  { %v8448_v28 = vmul.f32 %v16973_v18, %v8399_v19  ;;  %v8368_v52 = vsub.f32 2.0, %v8336_v23  ;;  %11667 = vrcp.f32 %v8258_v21  ;;  %v8449_v15 = vmul.f32 %v16975_v37, %v8399_v19  ;;  %v18225_v19 = vld [vmem:[#allocation23_spill] sm:$0xff] }
0x10bf   :  { %v11662_v0 = vpop.eup %11661  ;;  %4505 = vxpose.xlu1.b32.cont [14/16] (narrow) %v4457_v2, 16 }
0x10c0   :  { %v8400_v6 = vmul.f32 %v11660_v35, %v8368_v52  ;;  %v8337_v46 = vmul.f32 %v11662_v0, %v8249_v54  ;;  %8627 = vmatprep.mubr.f32.mxu1 %v8449_v15  ;;  %v18218_v54 = vld [vmem:[#allocation34_spill] sm:$0xff]  ;;  %v18224_v35 = vld [vmem:[#allocation37_spill] sm:$0xff]  ;;  %v18227_v15 = vld [vmem:[#allocation68_spill] sm:$0xff] }
0x10c1   :  { %v8261_v44 = vpop.xlane.xlu1 %8260  ;;  %8628 = vmatmul.mubr.f32.gmra.mxu1 %v8448_v28  ;;  %v4459_v32 = vadd.f32 %v4427_v13, %v18218_v54  ;;  %v18230_v54 = vld [vmem:[#allocation76_spill] sm:$0xff] }
0x10c2   :  { %v8450_v10 = vmul.f32 %v16981_v63, %v8400_v6  ;;  %v8369_v34 = vsub.f32 2.0, %v8337_v46  ;;  %11669 = vrcp.f32 %v8261_v44  ;;  %v8451_v18 = vmul.f32 %v16983_v8, %v8400_v6 }
0x10c3   :  { %v11664_v45 = vpop.eup %11663  ;;  %4506 = vxpose.xlu1.b32.cont [15/16] (narrow) %v4458_v47, 16 }
0x10c4   :  { %v8401_v37 = vmul.f32 %v11662_v0, %v8369_v34  ;;  %v8338_v59 = vmul.f32 %v11664_v45, %v8252_v24  ;;  %8632 = vmatprep.mubr.f32.mxu1 %v8451_v18 }
0x10c5   :  { %8633 = vmatmul.mubr.f32.gmra.mxu1 %v8450_v10  ;;  %v8264_v12 = vpop.xlane.xlu0 %8263  ;;  %v18229_v10 = vld [vmem:[#allocation73_spill] sm:$0xff] }
0x10c6   :  { %v8452_v31 = vmul.f32 %v16989_v27, %v8401_v37  ;;  %v8370_v49 = vsub.f32 2.0, %v8338_v59  ;;  %11671 = vrcp.f32 %v8264_v12  ;;  %v8453_v3 = vmul.f32 %v16991_v7, %v8401_v37  ;;  %v18220_v7 = vld [vmem:[#allocation38_spill] sm:$0xff] }
0x10c7   :  { %v11666_v63 = vpop.eup %11665  ;;  %4507 = vxpose.xlu1.b32.end [16/16] (narrow) %v4459_v32, 16 }
0x10c8   :  { %v8402_v50 = vmul.f32 %v11664_v45, %v8370_v49  ;;  %v8339_v41 = vmul.f32 %v11666_v63, %v8255_v9  ;;  %8637 = vmatprep.mubr.f32.mxu1 %v8453_v3 }
0x10c9   :  { %v8267_v8 = vpop.xlane.xlu1 %8266  ;;  %8638 = vmatmul.mubr.f32.gmra.mxu1 %v8452_v31  ;;  %v18231_v31 = vld [vmem:[#allocation78_spill] sm:$0xff] }
0x10ca   :  { %v8454_v39 = vmul.f32 %v16997_v16, %v8402_v50  ;;  %v8371_v60 = vsub.f32 2.0, %v8339_v41  ;;  %11673 = vrcp.f32 %v8267_v8  ;;  %v8455_v55 = vmul.f32 %v18219_v51, %v8402_v50  ;;  %v18232_v41 = vld [vmem:[#allocation81_spill] sm:$0xff] }
0x10cb   :  { %v11668_v24 = vpop.eup %11667 }
0x10cc   :  { %v8403_v11 = vmul.f32 %v11666_v63, %v8371_v60  ;;  %v8340_v27 = vmul.f32 %v11668_v24, %v8258_v21  ;;  %8642 = vmatprep.mubr.f32.mxu1 %v8455_v55  ;;  %v18226_v21 = vld [vmem:[#allocation66_spill] sm:$0xff]  ;;  %v18233_v60 = vld [vmem:[#allocation83_spill] sm:$0xff] }
0x10cd   :  { %8643 = vmatmul.mubr.f32.gmra.mxu1 %v8454_v39  ;;  %v8270_v57 = vpop.xlane.xlu0 %8269 }
0x10ce   :  { %v8456_v36 = vmul.f32 %v18220_v7, %v8403_v11  ;;  %v8372_v25 = vsub.f32 2.0, %v8340_v27  ;;  %11675 = vrcp.f32 %v8270_v57  ;;  %v8457_v40 = vmul.f32 %v18221_v1, %v8403_v11  ;;  %v18234_v27 = vld [vmem:[#allocation69_spill] sm:$0xff] }
0x10cf   :  { %v11670_v4 = vpop.eup %11669 }
0x10d0   :  { %v8404_v17 = vmul.f32 %v11668_v24, %v8372_v25  ;;  %v8341_v58 = vmul.f32 %v11670_v4, %v8261_v44  ;;  %8647 = vmatprep.mubr.f32.mxu1 %v8457_v40 }
0x10d1   :  { %v8273_v16 = vpop.xlane.xlu1 %8272  ;;  %8648 = vmatmul.mubr.f32.gmra.mxu1 %v8456_v36  ;;  %v18235_v36 = vld [vmem:[#allocation67_spill] sm:$0xff] }
0x10d2   :  { %v8458_v20 = vmul.f32 %v18222_v26, %v8404_v17  ;;  %v8373_v56 = vsub.f32 2.0, %v8341_v58  ;;  %11677 = vrcp.f32 %v8273_v16  ;;  %v8459_v38 = vmul.f32 %v18223_v29, %v8404_v17  ;;  %v18236_v17 = vld [vmem:[#allocation33_spill] sm:$0xff]  ;;  %v18237_v26 = vld [vmem:[#allocation70_spill] sm:$0xff] }
0x10d3   :  { %v11672_v9 = vpop.eup %11671 }
0x10d4   :  { %v8405_v30 = vmul.f32 %v11670_v4, %v8373_v56  ;;  %v8342_v43 = vmul.f32 %v11672_v9, %v8264_v12  ;;  %8652 = vmatprep.mubr.f32.mxu1 %v8459_v38 }
0x10d5   :  { %8653 = vmatmul.mubr.f32.gmra.mxu1 %v8458_v20  ;;  %v8276_v61 = vpop.xlane.xlu0 %8275 }
0x10d6   :  { %v8460_v48 = vmul.f32 %v18224_v35, %v8405_v30  ;;  %v8374_v14 = vsub.f32 2.0, %v8342_v43  ;;  %11679 = vrcp.f32 %v8276_v61  ;;  %v8461_v23 = vmul.f32 %v18225_v19, %v8405_v30 }
0x10d7   :  { %v11674_v62 = vpop.eup %11673 }
0x10d8   :  { %v8406_v2 = vmul.f32 %v11672_v9, %v8374_v14  ;;  %v8343_v53 = vmul.f32 %v11674_v62, %v8267_v8  ;;  %8657 = vmatprep.mubr.f32.mxu1 %v8461_v23  ;;  %v18238_v9 = vld [vmem:[#allocation128_spill] sm:$0xff]  ;;  %v18240_v14 = vld [vmem:[#allocation130_spill] sm:$0xff]  ;;  %v18241_v23 = vld [vmem:[#allocation131_spill] sm:$0xff] }
0x10d9   :  { %v8279_v22 = vpop.xlane.xlu1 %8278  ;;  %8658 = vmatmul.mubr.f32.gmra.mxu1 %v8460_v48 }
0x10da   :  { %v8462_v28 = vmul.f32 %v18226_v21, %v8406_v2  ;;  %v8375_v52 = vsub.f32 2.0, %v8343_v53  ;;  %11681 = vrcp.f32 %v8279_v22  ;;  %v8463_v0 = vmul.f32 %v18227_v15, %v8406_v2 }
0x10db   :  { %v11676_v6 = vpop.eup %11675 }
0x10dc   :  { %v8407_v46 = vmul.f32 %v11674_v62, %v8375_v52  ;;  %v8344_v42 = vmul.f32 %v11676_v6, %v8270_v57  ;;  %8662 = vmatprep.mubr.f32.mxu1 %v8463_v0  ;;  %v18242_v52 = vld [vmem:[#allocation109_spill] sm:$0xff] }
0x10dd   :  { %8663 = vmatmul.mubr.f32.gmra.mxu1 %v8462_v28  ;;  %v8282_v47 = vpop.xlane.xlu0 %8281 }
0x10de   :  { %v8464_v13 = vmul.f32 %v18228_v5, %v8407_v46  ;;  %v8376_v44 = vsub.f32 2.0, %v8344_v42  ;;  %11683 = vrcp.f32 %v8282_v47  ;;  %v8465_v34 = vmul.f32 %v18229_v10, %v8407_v46  ;;  %v18243_v5 = vld [vmem:[#allocation111_spill] sm:$0xff] }
0x10df   :  { %v11678_v18 = vpop.eup %11677 }
0x10e0   :  { %v8408_v45 = vmul.f32 %v11676_v6, %v8376_v44  ;;  %v8345_v37 = vmul.f32 %v11678_v18, %v8273_v16  ;;  %8667 = vmatprep.mubr.f32.mxu1 %v8465_v34 }
0x10e1   :  { %v8285_v59 = vpop.xlane.xlu1 %8284  ;;  %8668 = vmatmul.mubr.f32.gmra.mxu1 %v8464_v13 }
0x10e2   :  { %v8466_v32 = vmul.f32 %v18230_v54, %v8408_v45  ;;  %v8377_v12 = vsub.f32 2.0, %v8345_v37  ;;  %11685 = vrcp.f32 %v8285_v59  ;;  %v8467_v49 = vmul.f32 %v18231_v31, %v8408_v45 }
0x10e3   :  { %v11680_v3 = vpop.eup %11679 }
0x10e4   :  { %v8409_v63 = vmul.f32 %v11678_v18, %v8377_v12  ;;  %v8346_v50 = vmul.f32 %v11680_v3, %v8276_v61  ;;  %8672 = vmatprep.mubr.f32.mxu1 %v8467_v49  ;;  %v18239_v61 = vld [vmem:[#allocation129_spill] sm:$0xff]  ;;  %v18244_v18 = vld [vmem:[#allocation110_spill] sm:$0xff] }
0x10e5   :  { %8673 = vmatmul.mubr.f32.gmra.mxu1 %v8466_v32  ;;  %v18245_v32 = vld [vmem:[#allocation113_spill] sm:$0xff] }
0x10e6   :  { %v8468_v8 = vmul.f32 %v18232_v41, %v8409_v63  ;;  %v8378_v39 = vsub.f32 2.0, %v8346_v50  ;;  %v8469_v51 = vmul.f32 %v18233_v60, %v8409_v63  ;;  %v18246_v63 = vld [vmem:[#allocation112_spill] sm:$0xff]  ;;  %v18247_v60 = vld [vmem:[#allocation115_spill] sm:$0xff] }
0x10e7   :  { %v11682_v55 = vpop.eup %11681 }
0x10e8   :  { %v8410_v24 = vmul.f32 %v11680_v3, %v8378_v39  ;;  %v8347_v11 = vmul.f32 %v11682_v55, %v8279_v22  ;;  %8677 = vmatprep.mubr.f32.mxu1 %v8469_v51 }
0x10e9   :  { %8678 = vmatmul.mubr.f32.gmra.mxu1 %v8468_v8 }
0x10ea   :  { %v8470_v57 = vmul.f32 %v18234_v27, %v8410_v24  ;;  %v8379_v7 = vsub.f32 2.0, %v8347_v11  ;;  %v8471_v25 = vmul.f32 %v18235_v36, %v8410_v24  ;;  %v18248_v27 = vld [vmem:[#allocation114_spill] sm:$0xff] }
0x10eb   :  { %v11684_v1 = vpop.eup %11683 }
0x10ec   :  { %v8411_v40 = vmul.f32 %v11682_v55, %v8379_v7  ;;  %v8348_v4 = vmul.f32 %v11684_v1, %v8282_v47  ;;  %8682 = vmatprep.mubr.f32.mxu1 %v8471_v25 }
0x10ed   :  { %8683 = vmatmul.mubr.f32.gmra.mxu1 %v8470_v57 }
0x10ee   :  { %v8472_v58 = vmul.f32 %v18236_v17, %v8411_v40  ;;  %v8380_v16 = vsub.f32 2.0, %v8348_v4  ;;  %v8473_v20 = vmul.f32 %v18237_v26, %v8411_v40 }
0x10ef   :  { %v11686_v56 = vpop.eup %11685 }
0x10f0   :  { %v8412_v29 = vmul.f32 %v11684_v1, %v8380_v16  ;;  %v8349_v38 = vmul.f32 %v11686_v56, %v8285_v59  ;;  %8687 = vmatprep.mubr.f32.mxu1 %v8473_v20  ;;  %v18249_v1 = vld [vmem:[#allocation117_spill] sm:$0xff]  ;;  %v18250_v16 = vld [vmem:[#allocation116_spill] sm:$0xff] }
0x10f1   :  { %8688 = vmatmul.mubr.f32.gmra.mxu1 %v8472_v58 }
0x10f2   :  { %v8474_v30 = vmul.f32 %v18238_v9, %v8412_v29  ;;  %v8381_v43 = vsub.f32 2.0, %v8349_v38  ;;  %v8475_v35 = vmul.f32 %v18239_v61, %v8412_v29  ;;  %v18251_v38 = vld [vmem:[#allocation119_spill] sm:$0xff] }
0x10f4   :  { %v8413_v48 = vmul.f32 %v11686_v56, %v8381_v43  ;;  %8692 = vmatprep.mubr.f32.mxu1 %v8475_v35  ;;  %v18252_v35 = vld [vmem:[#allocation118_spill] sm:$0xff] }
0x10f5   :  { %8693 = vmatmul.mubr.f32.gmra.mxu1 %v8474_v30 }
0x10f6   :  { %v8476_v19 = vmul.f32 %v18240_v14, %v8413_v48  ;;  %v8477_v62 = vmul.f32 %v18241_v23, %v8413_v48 }
0x10f8   :  { %8697 = vmatprep.mubr.f32.mxu1 %v8477_v62  ;;  %v18253_v62 = vld [vmem:[#allocation120_spill] sm:$0xff] }
0x10f9   :  { %8698 = vmatmul.mubr.f32.gmra.mxu1 %v8476_v19 }
0x10fd   :  { %v4476_v21 = vpop.trf.xlu0 }
0x10fe   :  { %4524 = vst [vmem:[#allocation8] sm:$0xff] %v4476_v21 }
0x1101   :  { %v4477_v42 = vpop.trf.xlu0 }
0x1102   :  { %4526 = vst [vmem:[#allocation8 + $0x10] sm:$0xff] %v4477_v42 }
0x1107   :  { %v4508_v22 = vpop.trf.xlu1 }
0x1108   :  { %4525 = vst [vmem:[#allocation8 + $0x8] sm:$0xff] %v4508_v22 }
0x110b   :  { %v4509_v46 = vpop.trf.xlu1 }
0x110c   :  { %4527 = vst [vmem:[#allocation8 + $0x18] sm:$0xff] %v4509_v46  ;;  %v18255_v46 = vld [vmem:[#allocation122_spill] sm:$0xff] }
0x113d   :  { %v8544_v2 = vpop.f32.mrf.mxu1 }
0x113e   :  { %v8703_v53 = vmul.f32 %v8544_v2, %v18154_v33 }
0x113f   :  { %v8546_v28 = vpop.f32.mrf.mxu1 }
0x1140   :  { %v8735_v15 = vadd.f32 %v8703_v53, %v18242_v52  ;;  %v18254_v28 = vld [vmem:[#allocation121_spill] sm:$0xff] }
0x1141   :  { %v8549_v0 = vpop.f32.mrf.mxu1 }
0x1142   :  { %v8704_v6 = vmul.f32 %v8549_v0, %v18154_v33  ;;  %8767 = vxpose.xlu0.b32.start [1/16] (narrow) %v8735_v15, 16 }
0x1143   :  { %v8551_v47 = vpop.f32.mrf.mxu1 }
0x1144   :  { %v8736_v13 = vadd.f32 %v8704_v6, %v18243_v5 }
0x1145   :  { %v8554_v44 = vpop.f32.mrf.mxu1 }
0x1146   :  { %v8705_v10 = vmul.f32 %v8554_v44, %v18154_v33  ;;  %8768 = vxpose.xlu0.b32.cont [2/16] (narrow) %v8736_v13, 16  ;;  %v18256_v44 = vld [vmem:[#allocation123_spill] sm:$0xff] }
0x1147   :  { %v8556_v34 = vpop.f32.mrf.mxu1 }
0x1148   :  { %v8737_v45 = vadd.f32 %v8705_v10, %v18244_v18 }
0x1149   :  { %v8559_v37 = vpop.f32.mrf.mxu1 }
0x114a   :  { %v8706_v59 = vmul.f32 %v8559_v37, %v18154_v33  ;;  %8769 = vxpose.xlu0.b32.cont [3/16] (narrow) %v8737_v45, 16  ;;  %v18257_v37 = vld [vmem:[#allocation124_spill] sm:$0xff] }
0x114b   :  { %v8561_v54 = vpop.f32.mrf.mxu1 }
0x114c   :  { %v8738_v12 = vadd.f32 %v8706_v59, %v18245_v32 }
0x114d   :  { %v8564_v31 = vpop.f32.mrf.mxu1 }
0x114e   :  { %v8707_v49 = vmul.f32 %v8564_v31, %v18154_v33  ;;  %8770 = vxpose.xlu0.b32.cont [4/16] (narrow) %v8738_v12, 16  ;;  %v18258_v31 = vld [vmem:[#allocation125_spill] sm:$0xff] }
0x114f   :  { %v8566_v3 = vpop.f32.mrf.mxu1 }
0x1150   :  { %v8739_v50 = vadd.f32 %v8707_v49, %v18246_v63 }
0x1151   :  { %v8569_v41 = vpop.f32.mrf.mxu1 }
0x1152   :  { %v8708_v8 = vmul.f32 %v8569_v41, %v18154_v33  ;;  %8771 = vxpose.xlu0.b32.cont [5/16] (narrow) %v8739_v50, 16  ;;  %v18259_v41 = vld [vmem:[#allocation126_spill] sm:$0xff] }
0x1153   :  { %v8571_v39 = vpop.f32.mrf.mxu1 }
0x1154   :  { %v8740_v51 = vadd.f32 %v8708_v8, %v18247_v60 }
0x1155   :  { %v8574_v55 = vpop.f32.mrf.mxu1 }
0x1156   :  { %v8709_v24 = vmul.f32 %v8574_v55, %v18154_v33  ;;  %8772 = vxpose.xlu0.b32.cont [6/16] (narrow) %v8740_v51, 16  ;;  %v18260_v55 = vld [vmem:[#allocation127_spill] sm:$0xff] }
0x1157   :  { %v8576_v11 = vpop.f32.mrf.mxu1 }
0x1158   :  { %v8741_v57 = vadd.f32 %v8709_v24, %v18248_v27 }
0x1159   :  { %v8579_v7 = vpop.f32.mrf.mxu1 }
0x115a   :  { %v8710_v36 = vmul.f32 %v8579_v7, %v18154_v33  ;;  %8773 = vxpose.xlu0.b32.cont [7/16] (narrow) %v8741_v57, 16  ;;  %v18261_v7 = vld [vmem:[#allocation20_spill] sm:$0xff] }
0x115b   :  { %v8581_v25 = vpop.f32.mrf.mxu1 }
0x115c   :  { %v8742_v40 = vadd.f32 %v8710_v36, %v18249_v1 }
0x115d   :  { %v8584_v4 = vpop.f32.mrf.mxu1 }
0x115e   :  { %v8711_v17 = vmul.f32 %v8584_v4, %v18154_v33  ;;  %8774 = vxpose.xlu0.b32.cont [8/16] (narrow) %v8742_v40, 16  ;;  %v18262_v4 = vld [vmem:[#allocation25_spill] sm:$0xff] }
0x115f   :  { %v8586_v58 = vpop.f32.mrf.mxu1 }
0x1160   :  { %v8743_v26 = vadd.f32 %v8711_v17, %v18250_v16 }
0x1161   :  { %v8589_v20 = vpop.f32.mrf.mxu1 }
0x1162   :  { %v8712_v56 = vmul.f32 %v8589_v20, %v18154_v33  ;;  %8775 = vxpose.xlu0.b32.cont [9/16] (narrow) %v8743_v26, 16  ;;  %v18263_v20 = vld [vmem:[#allocation28_spill] sm:$0xff] }
0x1163   :  { %v8591_v29 = vpop.f32.mrf.mxu1 }
0x1164   :  { %v8744_v9 = vadd.f32 %v8712_v56, %v18251_v38 }
0x1165   :  { %v8594_v30 = vpop.f32.mrf.mxu1 }
0x1166   :  { %v8713_v43 = vmul.f32 %v8594_v30, %v18154_v33  ;;  %8776 = vxpose.xlu0.b32.cont [10/16] (narrow) %v8744_v9, 16  ;;  %v18264_v30 = vld [vmem:[#allocation30_spill] sm:$0xff] }
0x1167   :  { %v8596_v61 = vpop.f32.mrf.mxu1 }
0x1168   :  { %v8745_v48 = vadd.f32 %v8713_v43, %v18252_v35 }
0x1169   :  { %v8599_v14 = vpop.f32.mrf.mxu1 }
0x116a   :  { %v8714_v19 = vmul.f32 %v8599_v14, %v18154_v33  ;;  %8777 = vxpose.xlu0.b32.cont [11/16] (narrow) %v8745_v48, 16  ;;  %v18265_v14 = vld [vmem:[#allocation35_spill] sm:$0xff] }
0x116b   :  { %v8601_v23 = vpop.f32.mrf.mxu1 }
0x116c   :  { %v8746_v2 = vadd.f32 %v8714_v19, %v18253_v62 }
0x116d   :  { %v8604_v53 = vpop.f32.mrf.mxu1 }
0x116e   :  { %v8715_v22 = vmul.f32 %v8604_v53, %v18154_v33  ;;  %8778 = vxpose.xlu0.b32.cont [12/16] (narrow) %v8746_v2, 16  ;;  %v18266_v53 = vld [vmem:[#allocation39_spill] sm:$0xff] }
0x116f   :  { %v8606_v21 = vpop.f32.mrf.mxu1 }
0x1170   :  { %v8747_v52 = vadd.f32 %v8715_v22, %v18254_v28 }
0x1171   :  { %v8609_v15 = vpop.f32.mrf.mxu1 }
0x1172   :  { %v8716_v0 = vmul.f32 %v8609_v15, %v18154_v33  ;;  %8779 = vxpose.xlu0.b32.cont [13/16] (narrow) %v8747_v52, 16  ;;  %v18267_v15 = vld [vmem:[#allocation41_spill] sm:$0xff] }
0x1173   :  { %v8611_v6 = vpop.f32.mrf.mxu1 }
0x1174   :  { %v8748_v42 = vadd.f32 %v8716_v0, %v18255_v46 }
0x1175   :  { %v8614_v47 = vpop.f32.mrf.mxu1 }
0x1176   :  { %v8717_v5 = vmul.f32 %v8614_v47, %v18154_v33  ;;  %8780 = vxpose.xlu0.b32.cont [14/16] (narrow) %v8748_v42, 16  ;;  %v18268_v47 = vld [vmem:[#allocation43_spill] sm:$0xff] }
0x1177   :  { %v8616_v13 = vpop.f32.mrf.mxu1 }
0x1178   :  { %v8749_v10 = vadd.f32 %v8717_v5, %v18256_v44 }
0x1179   :  { %v8619_v34 = vpop.f32.mrf.mxu1 }
0x117a   :  { %v8718_v18 = vmul.f32 %v8619_v34, %v18154_v33  ;;  %8781 = vxpose.xlu0.b32.cont [15/16] (narrow) %v8749_v10, 16  ;;  %v18269_v34 = vld [vmem:[#allocation13_spill] sm:$0xff] }
0x117b   :  { %v8621_v45 = vpop.f32.mrf.mxu1 }
0x117c   :  { %v8750_v59 = vadd.f32 %v8718_v18, %v18257_v37 }
0x117d   :  { %v8624_v54 = vpop.f32.mrf.mxu1 }
0x117e   :  { %v8719_v32 = vmul.f32 %v8624_v54, %v18154_v33  ;;  %8782 = vxpose.xlu0.b32.end [16/16] (narrow) %v8750_v59, 16  ;;  %v18270_v54 = vld [vmem:[#allocation15_spill] sm:$0xff] }
0x117f   :  { %v8626_v12 = vpop.f32.mrf.mxu1 }
0x1180   :  { %v8751_v49 = vadd.f32 %v8719_v32, %v18258_v31 }
0x1181   :  { %v8629_v3 = vpop.f32.mrf.mxu1 }
0x1182   :  { %v8720_v63 = vmul.f32 %v8629_v3, %v18154_v33  ;;  %8799 = vxpose.xlu1.b32.start [1/16] (narrow) %v8751_v49, 16  ;;  %v18271_v3 = vld [vmem:[#allocation63_spill] sm:$0xff] }
0x1183   :  { %v8631_v50 = vpop.f32.mrf.mxu1 }
0x1184   :  { %v8752_v8 = vadd.f32 %v8720_v63, %v18259_v41 }
0x1185   :  { %v8634_v39 = vpop.f32.mrf.mxu1 }
0x1186   :  { %v8721_v60 = vmul.f32 %v8634_v39, %v18154_v33  ;;  %8800 = vxpose.xlu1.b32.cont [2/16] (narrow) %v8752_v8, 16  ;;  %v18272_v39 = vld [vmem:[#allocation64_spill] sm:$0xff] }
0x1187   :  { %v8636_v51 = vpop.f32.mrf.mxu1 }
0x1188   :  { %v8753_v24 = vadd.f32 %v8721_v60, %v18260_v55 }
0x1189   :  { %v8639_v11 = vpop.f32.mrf.mxu1 }
0x118a   :  { %v8722_v27 = vmul.f32 %v8639_v11, %v18154_v33  ;;  %8801 = vxpose.xlu1.b32.cont [3/16] (narrow) %v8753_v24, 16  ;;  %v18273_v11 = vld [vmem:[#allocation65_spill] sm:$0xff] }
0x118b   :  { %v8641_v57 = vpop.f32.mrf.mxu1 }
0x118c   :  { %v8754_v36 = vadd.f32 %v8722_v27, %v18261_v7 }
0x118d   :  { %v8644_v25 = vpop.f32.mrf.mxu1 }
0x118e   :  { %v8723_v1 = vmul.f32 %v8644_v25, %v18154_v33  ;;  %8802 = vxpose.xlu1.b32.cont [4/16] (narrow) %v8754_v36, 16 }
0x118f   :  { %v8646_v40 = vpop.f32.mrf.mxu1 }
0x1190   :  { %v8755_v17 = vadd.f32 %v8723_v1, %v18262_v4 }
0x1191   :  { %v8649_v58 = vpop.f32.mrf.mxu1 }
0x1192   :  { %v8724_v16 = vmul.f32 %v8649_v58, %v18154_v33  ;;  %8803 = vxpose.xlu1.b32.cont [5/16] (narrow) %v8755_v17, 16 }
0x1193   :  { %v8651_v26 = vpop.f32.mrf.mxu1 }
0x1194   :  { %v8756_v56 = vadd.f32 %v8724_v16, %v18263_v20 }
0x1195   :  { %v8654_v29 = vpop.f32.mrf.mxu1 }
0x1196   :  { %v8725_v38 = vmul.f32 %v8654_v29, %v18154_v33  ;;  %8804 = vxpose.xlu1.b32.cont [6/16] (narrow) %v8756_v56, 16 }
0x1197   :  { %v8656_v9 = vpop.f32.mrf.mxu1 }
0x1198   :  { %v8757_v43 = vadd.f32 %v8725_v38, %v18264_v30 }
0x1199   :  { %v8659_v61 = vpop.f32.mrf.mxu1 }
0x119a   :  { %v8726_v35 = vmul.f32 %v8659_v61, %v18154_v33  ;;  %8805 = vxpose.xlu1.b32.cont [7/16] (narrow) %v8757_v43, 16 }
0x119b   :  { %v8661_v48 = vpop.f32.mrf.mxu1 }
0x119c   :  { %v8758_v19 = vadd.f32 %v8726_v35, %v18265_v14 }
0x119d   :  { %v8664_v23 = vpop.f32.mrf.mxu1 }
0x119e   :  { %v8727_v62 = vmul.f32 %v8664_v23, %v18154_v33  ;;  %8806 = vxpose.xlu1.b32.cont [8/16] (narrow) %v8758_v19, 16 }
0x119f   :  { %v8666_v2 = vpop.f32.mrf.mxu1 }
0x11a0   :  { %v8759_v22 = vadd.f32 %v8727_v62, %v18266_v53 }
0x11a1   :  { %v8669_v21 = vpop.f32.mrf.mxu1 }
0x11a2   :  { %v8728_v28 = vmul.f32 %v8669_v21, %v18154_v33  ;;  %8807 = vxpose.xlu1.b32.cont [9/16] (narrow) %v8759_v22, 16 }
0x11a3   :  { %v8671_v52 = vpop.f32.mrf.mxu1 }
0x11a4   :  { %v8760_v0 = vadd.f32 %v8728_v28, %v18267_v15 }
0x11a5   :  { %v8674_v6 = vpop.f32.mrf.mxu1 }
0x11a6   :  { %v8729_v46 = vmul.f32 %v8674_v6, %v18154_v33  ;;  %8808 = vxpose.xlu1.b32.cont [10/16] (narrow) %v8760_v0, 16 }
0x11a7   :  { %v8676_v42 = vpop.f32.mrf.mxu1 }
0x11a8   :  { %v8761_v5 = vadd.f32 %v8729_v46, %v18268_v47 }
0x11a9   :  { %v8679_v13 = vpop.f32.mrf.mxu1 }
0x11aa   :  { %v8730_v44 = vmul.f32 %v8679_v13, %v18154_v33  ;;  %8809 = vxpose.xlu1.b32.cont [11/16] (narrow) %v8761_v5, 16 }
0x11ab   :  { %v8681_v10 = vpop.f32.mrf.mxu1 }
0x11ac   :  { %v8762_v18 = vadd.f32 %v8730_v44, %v18269_v34 }
0x11ad   :  { %v8684_v45 = vpop.f32.mrf.mxu1 }
0x11ae   :  { %v8731_v37 = vmul.f32 %v8684_v45, %v18154_v33  ;;  %8810 = vxpose.xlu1.b32.cont [12/16] (narrow) %v8762_v18, 16 }
0x11af   :  { %v8686_v59 = vpop.f32.mrf.mxu1 }
0x11b0   :  { %v8763_v32 = vadd.f32 %v8731_v37, %v18270_v54 }
0x11b1   :  { %v8689_v12 = vpop.f32.mrf.mxu1 }
0x11b2   :  { %v8732_v31 = vmul.f32 %v8689_v12, %v18154_v33  ;;  %8811 = vxpose.xlu1.b32.cont [13/16] (narrow) %v8763_v32, 16 }
0x11b3   :  { %v8691_v49 = vpop.f32.mrf.mxu1 }
0x11b4   :  { %v8764_v63 = vadd.f32 %v8732_v31, %v18271_v3 }
0x11b5   :  { %v8694_v50 = vpop.f32.mrf.mxu1 }
0x11b6   :  { %v8733_v41 = vmul.f32 %v8694_v50, %v18154_v33  ;;  %8812 = vxpose.xlu1.b32.cont [14/16] (narrow) %v8764_v63, 16 }
0x11b7   :  { %v8696_v8 = vpop.f32.mrf.mxu1 }
0x11b8   :  { %v8765_v60 = vadd.f32 %v8733_v41, %v18272_v39 }
0x11b9   :  { %v8699_v51 = vpop.f32.mrf.mxu1 }
0x11ba   :  { %v8734_v55 = vmul.f32 %v8699_v51, %v18154_v33  ;;  %8813 = vxpose.xlu1.b32.cont [15/16] (narrow) %v8765_v60, 16 }
0x11bb   :  { %v8701_v24 = vpop.f32.mrf.mxu1 }
0x11bc   :  { %v8766_v27 = vadd.f32 %v8734_v55, %v18273_v11 }
0x11be   :  { %8814 = vxpose.xlu1.b32.end [16/16] (narrow) %v8766_v27, 16  ;;  %v8783_v57 = vpop.trf.xlu0 }
0x11bf   :  { %8832 = vst [vmem:[#allocation8 + $0x20] sm:$0xff] %v8783_v57 }
0x11c2   :  { %v8784_v7 = vpop.trf.xlu0 }
0x11c3   :  { %8834 = vst [vmem:[#allocation8 + $0x30] sm:$0xff] %v8784_v7 }
0x11fe   :  { %v8815_v36 = vpop.trf.xlu1 }
0x11ff   :  { %8833 = vst [vmem:[#allocation8 + $0x28] sm:$0xff] %v8815_v36 }
0x1202   :  { %v8816_v25 = vpop.trf.xlu1 }
0x1203   :  { %8835 = vst [vmem:[#allocation8 + $0x38] sm:$0xff] %v8816_v25 }
0x1204   :  { %11893 = shalt.err (!%p11890_p0)
}
0x1205   :  { %8847 = dma.vmem_to_hbm [thread:$0]  %s8842_s23, 1024, %s17322_s9, [#allocation5], %s11909_s12, %s11909_s12, %s11910_s13  }
0x1206   :  { %11906 = dma.done.wait [#allocation5], 1024  }
0x1207   :  { %11907 = vsyncadd [#allocation5], 4294966272 }
0x1208   :  { %8851 = vsyncpa [#allocation4], 1 }
0x1209   :  { %8852 = vsyncpa [#allocation7], 1 }
0x120a   :  { %8853 = vsyncpa [#allocation5], 1 }

</bundles_post_ra>
